<compile_context>
chip_gen: v6e
topology: v6e:2x2x1
jax: 0.10.0
libtpu: 0.0.40
codegen_flags: <defaults>
</compile_context>

<pallas_src>
import functools

import jax
import jax.numpy as jnp
from jax.experimental import pallas as pl
from jax.experimental.pallas import tpu as pltpu

KT, KF = 2, 5            # kernel size of every conv / conv-transpose in AUnet
BN_EPS = 1e-5
MM_DTYPE = jnp.bfloat16  # MXU operand dtype (f32 accumulation)
_MAX_TILE_N = 512        # N-tile (columns); ~85% of HBM roofline per tile sweep
_VMEM_LIMIT = 48 * 1024 * 1024  # > 16/32 MiB scoped defaults, < v7x 64 MiB phys

_EVEN_KF = (0, 2, 4)     # transposed-conv taps feeding the even output-F phase
_ODD_KF = (1, 3)         # taps feeding the odd output-F phase

# (Cout, Cin) for encoder convs; (Cin_total, Cout, per-source split) for decoder
_ENC_SPECS = {"en1": (16, 2), "en2": (32, 16), "en3": (32, 32),
              "en4": (64, 32), "en5": (64, 64)}
_DEC_SPECS = {"de1": (64, 64, (64,)),
              "de2": (128, 32, (64, 64)),
              "de3": (64, 32, (32, 32)),
              "de4": (64, 16, (32, 32)),
              "de5": (32, 16, (16, 16))}


def _round_up(x, m):
    return (x + m - 1) // m * m


def _pick_tiles(n):
    """Column tiling for the N (lane) axis: tile multiple of 128, minimal pad."""
    n128 = _round_up(max(n, 1), 128)
    num_tiles = -(-n128 // _MAX_TILE_N)
    tn = _round_up(-(-n128 // num_tiles), 128)
    return tn, tn * num_tiles, num_tiles


def _elu(y):
    # ELU(alpha=1); exp argument clamped so the discarded branch never overflows.
    return jnp.where(y > 0.0, y, jnp.exp(jnp.minimum(y, 0.0)) - 1.0)


# ----------------------------------------------------------------------------
# Pallas kernels (channel-major, N-gridded, single-pass BN stats)
# ----------------------------------------------------------------------------
def _enc_kernel(p_ref, w_ref, g_ref, b_ref, o_ref, sum_scr, sq_scr,
                *, tn, num_tiles, inv_n):
    # p: (K*Cin, TN) bf16   w: (Cout, K*Cin) bf16   g/b: (Cout, 1) f32
    # o: (Cout, Npad) f32 -- resident accumulator across the N grid axis.
    i = pl.program_id(0)

    @pl.when(i == 0)
    def _():
        sum_scr[...] = jnp.zeros_like(sum_scr)
        sq_scr[...] = jnp.zeros_like(sq_scr)

    acc = jnp.dot(w_ref[...], p_ref[...], preferred_element_type=jnp.float32)
    sum_scr[...] += jnp.sum(acc, axis=1, keepdims=True)
    sq_scr[...] += jnp.sum(acc * acc, axis=1, keepdims=True)
    start = pl.multiple_of(i * tn, 128)
    o_ref[:, pl.ds(start, tn)] = acc

    @pl.when(i == num_tiles - 1)
    def _():
        # BatchNorm2d training-mode batch statistics (biased variance), one
        # folded scale/shift, then ELU, applied to the resident output.
        mean = sum_scr[...] * inv_n
        var = jnp.maximum(sq_scr[...] * inv_n - mean * mean, 0.0)
        scale = jax.lax.rsqrt(var + BN_EPS) * g_ref[...]
        shift = b_ref[...] - mean * scale
        o_ref[...] = _elu(o_ref[...] * scale + shift)


def _dec_kernel(pe_ref, po_ref, we_ref, wo_ref, g_ref, b_ref,
                oe_ref, oo_ref, sum_scr, sq_scr,
                *, tn, num_tiles, inv_n):
    # Two subpixel phases of the same transposed conv; BN stats are joint.
    i = pl.program_id(0)

    @pl.when(i == 0)
    def _():
        sum_scr[...] = jnp.zeros_like(sum_scr)
        sq_scr[...] = jnp.zeros_like(sq_scr)

    acc_e = jnp.dot(we_ref[...], pe_ref[...], preferred_element_type=jnp.float32)
    acc_o = jnp.dot(wo_ref[...], po_ref[...], preferred_element_type=jnp.float32)
    sum_scr[...] += (jnp.sum(acc_e, axis=1, keepdims=True)
                     + jnp.sum(acc_o, axis=1, keepdims=True))
    sq_scr[...] += (jnp.sum(acc_e * acc_e, axis=1, keepdims=True)
                    + jnp.sum(acc_o * acc_o, axis=1, keepdims=True))
    start = pl.multiple_of(i * tn, 128)
    oe_ref[:, pl.ds(start, tn)] = acc_e
    oo_ref[:, pl.ds(start, tn)] = acc_o

    @pl.when(i == num_tiles - 1)
    def _():
        mean = sum_scr[...] * inv_n
        var = jnp.maximum(sq_scr[...] * inv_n - mean * mean, 0.0)
        scale = jax.lax.rsqrt(var + BN_EPS) * g_ref[...]
        shift = b_ref[...] - mean * scale
        oe_ref[...] = _elu(oe_ref[...] * scale + shift)
        oo_ref[...] = _elu(oo_ref[...] * scale + shift)


_COMPILER_PARAMS = pltpu.CompilerParams(
    dimension_semantics=("arbitrary",),      # resident output + joint stats
    vmem_limit_bytes=_VMEM_LIMIT)


def _conv_bn_elu(patches, wmat, gamma, beta):
    """patches: (K*Cin, N) bf16; wmat: (Cout, K*Cin) bf16 -> (Cout, N) f32."""
    kcin, n = patches.shape
    cout = wmat.shape[0]
    tn, n_pad, num_tiles = _pick_tiles(n)
    if n_pad != n:
        patches = jnp.pad(patches, ((0, 0), (0, n_pad - n)))
    kernel = functools.partial(_enc_kernel, tn=tn, num_tiles=num_tiles,
                               inv_n=1.0 / n)
    out = pl.pallas_call(
        kernel,
        out_shape=jax.ShapeDtypeStruct((cout, n_pad), jnp.float32),
        grid_spec=pltpu.PrefetchScalarGridSpec(
            num_scalar_prefetch=0,
            grid=(num_tiles,),
            in_specs=[
                pl.BlockSpec((kcin, tn), lambda i: (0, i)),     # streamed
                pl.BlockSpec((cout, kcin), lambda i: (0, 0)),   # resident
                pl.BlockSpec((cout, 1), lambda i: (0, 0)),
                pl.BlockSpec((cout, 1), lambda i: (0, 0)),
            ],
            out_specs=pl.BlockSpec((cout, n_pad), lambda i: (0, 0)),
            scratch_shapes=[pltpu.VMEM((cout, 1), jnp.float32),
                            pltpu.VMEM((cout, 1), jnp.float32)]),
        compiler_params=_COMPILER_PARAMS,
    )(patches, wmat, gamma, beta)
    return out[:, :n]


def _convT_bn_elu(pe, po, we, wo, gamma, beta):
    """Two subpixel phases of one ConvTranspose2d + joint BN + ELU."""
    kce, ne = pe.shape
    kco, no = po.shape
    cout = we.shape[0]
    tn, n_pad, num_tiles = _pick_tiles(max(ne, no))
    pe = jnp.pad(pe, ((0, 0), (0, n_pad - ne)))
    po = jnp.pad(po, ((0, 0), (0, n_pad - no)))
    kernel = functools.partial(_dec_kernel, tn=tn, num_tiles=num_tiles,
                               inv_n=1.0 / (ne + no))
    oe, oo = pl.pallas_call(
        kernel,
        out_shape=(jax.ShapeDtypeStruct((cout, n_pad), jnp.float32),
                   jax.ShapeDtypeStruct((cout, n_pad), jnp.float32)),
        grid_spec=pltpu.PrefetchScalarGridSpec(
            num_scalar_prefetch=0,
            grid=(num_tiles,),
            in_specs=[
                pl.BlockSpec((kce, tn), lambda i: (0, i)),
                pl.BlockSpec((kco, tn), lambda i: (0, i)),
                pl.BlockSpec((cout, kce), lambda i: (0, 0)),
                pl.BlockSpec((cout, kco), lambda i: (0, 0)),
                pl.BlockSpec((cout, 1), lambda i: (0, 0)),
                pl.BlockSpec((cout, 1), lambda i: (0, 0)),
            ],
            out_specs=(pl.BlockSpec((cout, n_pad), lambda i: (0, 0)),
                       pl.BlockSpec((cout, n_pad), lambda i: (0, 0))),
            scratch_shapes=[pltpu.VMEM((cout, 1), jnp.float32),
                            pltpu.VMEM((cout, 1), jnp.float32)]),
        compiler_params=_COMPILER_PARAMS,
    )(pe, po, we, wo, gamma, beta)
    return oe[:, :ne], oo[:, :no]


# ----------------------------------------------------------------------------
# Glue: padding, tap extraction (im2col), phase interleave (channel-major)
# ----------------------------------------------------------------------------
def enc_layer(x, wmat, gamma, beta, pad_f):
    """x: (Cin, B, T, F) channel-major.  wmat: (Cout, KT*KF*Cin) bf16.

    pad1 = (0,0,1,0) -> pad_f = 0 ;  pad2 = (1,1,1,0) -> pad_f = 1.
    Conv bias dropped: exact no-op under batch-statistic BatchNorm.
    """
    cin, B, T, F = x.shape
    cout = wmat.shape[0]
    xp = jnp.pad(x, ((0, 0), (0, 0), (1, 0), (pad_f, pad_f)))
    f_out = (F + 2 * pad_f - KF) // 2 + 1
    n = B * T * f_out

    taps = []
    for kt in range(KT):
        for kf in range(KF):
            sl = xp[:, :, kt:kt + T, kf:kf + 2 * (f_out - 1) + 1:2]
            taps.append(sl.reshape(cin, n))
    patches = jnp.concatenate(taps, axis=0).astype(MM_DTYPE)    # (10*Cin, N)

    out = _conv_bn_elu(patches, wmat, gamma, beta)               # (Cout, N)
    return out.reshape(cout, B, T, f_out)


def _interleave_f(first, second, out_len):
    # out[..., 2j] = first[..., j]; out[..., 2j+1] = second[..., j]
    L = first.shape[-1]
    pad = L - second.shape[-1]
    if pad:
        second = jnp.pad(second, ((0, 0), (0, 0), (0, 0), (0, pad)))
    inter = jnp.stack([first, second], axis=-1)
    inter = inter.reshape(first.shape[:-1] + (2 * L,))
    return inter[..., :out_len]


def dec_layer(xs, we, wo, gamma, beta, full):
    """xs: channel-major (Ci, B, T, F) tensors (PyTorch's torch.cat is fused
    into the GEMM contraction).  we/wo: (Cout, 6*Cin_tot) / (Cout, 4*Cin_tot).

    full=False -> de1..de4 (up_Chomp_F(1) + down_Chomp_F(1) + Chomp_T(1))
    full=True  -> de5 (Chomp_T(1) only).
    Subpixel decomposition: even/odd output-F columns only receive taps
    kf in {0,2,4} / {1,3}; the chomps are folded into the per-phase offsets.
    """
    B, T, F = xs[0].shape[1:]
    cout = we.shape[0]
    pf = 2 if full else 1
    if full:
        len_e, len_o = F + 2, F + 1
        f0_e = {0: 2, 2: 1, 4: 0}
        f0_o = {1: 2, 3: 1}
    else:
        len_e, len_o = F, F + 1
        f0_e = {0: 2, 2: 1, 4: 0}
        f0_o = {1: 1, 3: 0}
    ne, no = B * T * len_e, B * T * len_o

    taps_e, taps_o = [], []
    for x in xs:                      # order must match prepare_params packing
        ci = x.shape[0]
        xp = jnp.pad(x, ((0, 0), (0, 0), (1, 0), (pf, pf)))
        for kt in range(KT):
            t0 = 1 - kt
            for kf in _EVEN_KF:
                f0 = f0_e[kf]
                taps_e.append(xp[:, :, t0:t0 + T, f0:f0 + len_e].reshape(ci, ne))
            for kf in _ODD_KF:
                f0 = f0_o[kf]
                taps_o.append(xp[:, :, t0:t0 + T, f0:f0 + len_o].reshape(ci, no))
    pe = jnp.concatenate(taps_e, axis=0).astype(MM_DTYPE)   # (6*Cin_tot, Ne)
    po = jnp.concatenate(taps_o, axis=0).astype(MM_DTYPE)   # (4*Cin_tot, No)

    oe, oo = _convT_bn_elu(pe, po, we, wo, gamma, beta)
    even = oe.reshape(cout, B, T, len_e)
    odd = oo.reshape(cout, B, T, len_o)

    # TODO(synk): fuse this even/odd interleave + trailing slice into the
    # kernel's store path (stride-2 lane stores) to save one pass over the
    # decoder activations.
    if full:   # de5: even[0], odd[0], even[1], ...  -> length 2F+3
        return _interleave_f(even, odd, 2 * F + 3)
    else:      # de1..de4: odd[0], even[0], odd[1], ... -> length 2F+1
        return _interleave_f(odd, even, 2 * F + 1)


# ----------------------------------------------------------------------------
# AUnet forward (channel-major internally, NCHW at the boundary)
# ----------------------------------------------------------------------------
def aunet_forward(x_nchw, prep):
    x = jnp.transpose(x_nchw, (1, 0, 2, 3)).astype(jnp.float32)  # -> (C,B,T,F)

    # ---------------- encoder ----------------
    en_list = []
    x = enc_layer(x, *prep["en1"], pad_f=0); en_list.append(x)
    x = enc_layer(x, *prep["en2"], pad_f=1); en_list.append(x)
    x = enc_layer(x, *prep["en3"], pad_f=1); en_list.append(x)
    x = enc_layer(x, *prep["en4"], pad_f=1); en_list.append(x)
    x = enc_layer(x, *prep["en5"], pad_f=1)

    # ---------------- decoder ----------------
    de_list = []
    x = dec_layer([x], *prep["de1"], full=False); de_list.append(x)
    x = dec_layer([x, en_list[-1]], *prep["de2"], full=False); de_list.append(x)
    x = dec_layer([x, en_list[-2]], *prep["de3"], full=False); de_list.append(x)
    x = dec_layer([x, en_list[-3]], *prep["de4"], full=False); de_list.append(x)
    x = dec_layer([x, en_list[-4]], *prep["de5"], full=True); de_list.append(x)

    # channel-major (C,B,T,F) -> NCHW, matching the PyTorch module's return
    return [jnp.transpose(d, (1, 0, 2, 3)) for d in de_list]


# ----------------------------------------------------------------------------
# Parameters: PyTorch-layout init + one-time kernel-ready re-layout
# ----------------------------------------------------------------------------
def init_params():
    key = jax.random.PRNGKey(42)
    params = {}
    for name, (cout, cin) in _ENC_SPECS.items():
        key, kw, kb = jax.random.split(key, 3)
        params[name] = (
            0.05 * jax.random.normal(kw, (cout, cin, KT, KF), jnp.float32),
            0.05 * jax.random.normal(kb, (cout,), jnp.float32),  # bias (no-op under BN)
            jnp.ones((cout,), jnp.float32),    # BN gamma (PyTorch default)
            jnp.zeros((cout,), jnp.float32),   # BN beta
        )
    for name, (cin, cout, _) in _DEC_SPECS.items():
        key, kw, kb = jax.random.split(key, 3)
        params[name] = (
            0.05 * jax.random.normal(kw, (cin, cout, KT, KF), jnp.float32),
            0.05 * jax.random.normal(kb, (cout,), jnp.float32),
            jnp.ones((cout,), jnp.float32),
            jnp.zeros((cout,), jnp.float32),
        )
    return params


def prepare_params(params):
    """One-time weight re-layout / bf16 cast, hoisted out of the traced fwd."""
    prep = {}
    for name, (cout, cin) in _ENC_SPECS.items():
        W, _b, gamma, beta = params[name]                # (Cout, Cin, 2, 5)
        wmat = jnp.transpose(W, (0, 2, 3, 1)).reshape(cout, KT * KF * cin)
        prep[name] = (wmat.astype(MM_DTYPE),
                      gamma.reshape(cout, 1), beta.reshape(cout, 1))
    for name, (_cin_tot, cout, split) in _DEC_SPECS.items():
        W, _b, gamma, beta = params[name]                # (Cin_tot, Cout, 2, 5)
        w_e, w_o = [], []
        c_off = 0
        for ci in split:                                 # fused skip concat
            Wt = W[c_off:c_off + ci]
            c_off += ci
            for kt in range(KT):
                for kf in _EVEN_KF:
                    w_e.append(Wt[:, :, kt, kf].T)       # (Cout, ci)
                for kf in _ODD_KF:
                    w_o.append(Wt[:, :, kt, kf].T)
        we = jnp.concatenate(w_e, axis=1).astype(MM_DTYPE)   # (Cout, 6*Cin_tot)
        wo = jnp.concatenate(w_o, axis=1).astype(MM_DTYPE)   # (Cout, 4*Cin_tot)
        prep[name] = (we, wo, gamma.reshape(cout, 1), beta.reshape(cout, 1))
    return prep


# ----------------------------------------------------------------------------
if __name__ == "__main__":
    # Small shapes consistent with the module: NCHW = (B=2, C=2, T=8, F=65).
    # F must satisfy the U-net chain (65 -> 31 -> 15 -> 7 -> 3 -> 1 and back).
    B, C, T, F = 2, 2, 8, 65
    x = jax.random.normal(jax.random.PRNGKey(0), (B, C, T, F), jnp.float32)
    prep = prepare_params(init_params())   # one-time weight prep (outside jit)

    fwd = jax.jit(aunet_forward)
    de_list = jax.block_until_ready(fwd(x, prep))

    expected = [(B, 64, T, 3), (B, 32, T, 7), (B, 32, T, 15),
                (B, 16, T, 31), (B, 16, T, 65)]
    assert [tuple(d.shape) for d in de_list] == expected, \
        [tuple(d.shape) for d in de_list]
    assert all(bool(jnp.isfinite(d).all()) for d in de_list)

    print("KERNEL_OK")
</pallas_src>

<mosaic_0001>
module attributes {stable_mosaic.version = 11 : i64} {
  func.func @_enc_kernel(%arg0: i32, %arg1: memref<20x512xbf16, #tpu.memory_space<vmem>>, %arg2: memref<16x20xbf16, #tpu.memory_space<vmem>>, %arg3: memref<16x1xf32, #tpu.memory_space<vmem>>, %arg4: memref<16x1xf32, #tpu.memory_space<vmem>>, %arg5: memref<16x512xf32, #tpu.memory_space<vmem>>, %arg6: memref<16x1xf32, #tpu.memory_space<vmem>>, %arg7: memref<16x1xf32, #tpu.memory_space<vmem>>) attributes {dimension_semantics = [#tpu.dimension_semantics<arbitrary>], iteration_bounds = array<i64: 1>, scalar_prefetch = 0 : i64, scratch_operands = 2 : i64, tpu.core_type = #tpu.core_type<tc>, window_params = [{transform_indices = @transform_0, window_bounds = array<i64: 20, 512>}, {pipeline_mode = #tpu.pipeline_mode<synchronous>, transform_indices = @transform_1, window_bounds = array<i64: 16, 20>}, {pipeline_mode = #tpu.pipeline_mode<synchronous>, transform_indices = @transform_2, window_bounds = array<i64: 16, 1>}, {pipeline_mode = #tpu.pipeline_mode<synchronous>, transform_indices = @transform_3, window_bounds = array<i64: 16, 1>}, {pipeline_mode = #tpu.pipeline_mode<synchronous>, transform_indices = @transform_4, window_bounds = array<i64: 16, 512>}]} {
    %c0_i32 = arith.constant 0 : i32
    %0 = arith.cmpi eq, %arg0, %c0_i32 : i32
    %1 = arith.extui %0 : i1 to i32
    %c0_i32_0 = arith.constant 0 : i32
    %2 = arith.cmpi ne, %1, %c0_i32_0 : i32
    scf.if %2 {
      %cst_17 = arith.constant 0.000000e+00 : f32
      %24 = vector.broadcast %cst_17 : f32 to vector<16x1xf32>
      %c0_18 = arith.constant 0 : index
      %c0_19 = arith.constant 0 : index
      %25 = vector.load %arg6[%c0_18, %c0_19] : memref<16x1xf32, #tpu.memory_space<vmem>>, vector<16x1xf32>
      tpu.vector_store %arg6[%c0_18, %c0_19], %24 {strides = array<i32>} : memref<16x1xf32, #tpu.memory_space<vmem>>, vector<16x1xf32>,
      %cst_20 = arith.constant 0.000000e+00 : f32
      %26 = vector.broadcast %cst_20 : f32 to vector<16x1xf32>
      %c0_21 = arith.constant 0 : index
      %c0_22 = arith.constant 0 : index
      %27 = vector.load %arg7[%c0_21, %c0_22] : memref<16x1xf32, #tpu.memory_space<vmem>>, vector<16x1xf32>
      tpu.vector_store %arg7[%c0_21, %c0_22], %26 {strides = array<i32>} : memref<16x1xf32, #tpu.memory_space<vmem>>, vector<16x1xf32>,
    } else {
    }
    %c0 = arith.constant 0 : index
    %c0_1 = arith.constant 0 : index
    %3 = vector.load %arg2[%c0, %c0_1] : memref<16x20xbf16, #tpu.memory_space<vmem>>, vector<16x20xbf16>
    %c0_2 = arith.constant 0 : index
    %c0_3 = arith.constant 0 : index
    %4 = vector.load %arg1[%c0_2, %c0_3] : memref<20x512xbf16, #tpu.memory_space<vmem>>, vector<20x512xbf16>
    %cst = arith.constant dense<0.000000e+00> : vector<16x512xf32>
    %5 = tpu.matmul %3, %4, %cst {dimension_numbers = #tpu.dot_dimension_numbers<[1], [0], [0], [1], [0, 0, 1, 1], [], []>} : vector<16x20xbf16>, vector<20x512xbf16>, vector<16x512xf32> -> vector<16x512xf32>
    %c0_4 = arith.constant 0 : index
    %c0_5 = arith.constant 0 : index
    %6 = vector.load %arg6[%c0_4, %c0_5] : memref<16x1xf32, #tpu.memory_space<vmem>>, vector<16x1xf32>
    %cst_6 = arith.constant dense<0.000000e+00> : vector<16xf32>
    %7 = vector.multi_reduction <add>, %5, %cst_6 [1] : vector<16x512xf32> to vector<16xf32>
    %8 = vector.shape_cast %7 : vector<16xf32> to vector<16x1xf32>
    %9 = arith.addf %6, %8 : vector<16x1xf32>
    %c0_7 = arith.constant 0 : index
    %c0_8 = arith.constant 0 : index
    %10 = vector.load %arg6[%c0_7, %c0_8] : memref<16x1xf32, #tpu.memory_space<vmem>>, vector<16x1xf32>
    tpu.vector_store %arg6[%c0_7, %c0_8], %9 {strides = array<i32>} : memref<16x1xf32, #tpu.memory_space<vmem>>, vector<16x1xf32>,
    %c0_9 = arith.constant 0 : index
    %c0_10 = arith.constant 0 : index
    %11 = vector.load %arg7[%c0_9, %c0_10] : memref<16x1xf32, #tpu.memory_space<vmem>>, vector<16x1xf32>
    %12 = arith.mulf %5, %5 : vector<16x512xf32>
    %cst_11 = arith.constant dense<0.000000e+00> : vector<16xf32>
    %13 = vector.multi_reduction <add>, %12, %cst_11 [1] : vector<16x512xf32> to vector<16xf32>
    %14 = vector.shape_cast %13 : vector<16xf32> to vector<16x1xf32>
    %15 = arith.addf %11, %14 : vector<16x1xf32>
    %c0_12 = arith.constant 0 : index
    %c0_13 = arith.constant 0 : index
    %16 = vector.load %arg7[%c0_12, %c0_13] : memref<16x1xf32, #tpu.memory_space<vmem>>, vector<16x1xf32>
    tpu.vector_store %arg7[%c0_12, %c0_13], %15 {strides = array<i32>} : memref<16x1xf32, #tpu.memory_space<vmem>>, vector<16x1xf32>,
    %c512_i32 = arith.constant 512 : i32
    %17 = arith.muli %arg0, %c512_i32 : i32
    %18 = tpu.assume_multiple %17, 128 : i32
    %c0_14 = arith.constant 0 : index
    %19 = arith.index_cast %18 : i32 to index
    %20 = vector.load %arg5[%c0_14, %19] : memref<16x512xf32, #tpu.memory_space<vmem>>, vector<16x512xf32>
    tpu.vector_store %arg5[%c0_14, %19], %5 {strides = array<i32>} : memref<16x512xf32, #tpu.memory_space<vmem>>, vector<16x512xf32>,
    %c0_i32_15 = arith.constant 0 : i32
    %21 = arith.cmpi eq, %arg0, %c0_i32_15 : i32
    %22 = arith.extui %21 : i1 to i32
    %c0_i32_16 = arith.constant 0 : i32
    %23 = arith.cmpi ne, %22, %c0_i32_16 : i32
    scf.if %23 {
      %c0_17 = arith.constant 0 : index
      %c0_18 = arith.constant 0 : index
      %24 = vector.load %arg6[%c0_17, %c0_18] : memref<16x1xf32, #tpu.memory_space<vmem>>, vector<16x1xf32>
      %cst_19 = arith.constant 0.00201612897 : f32
      %25 = vector.broadcast %cst_19 : f32 to vector<16x1xf32>
      %26 = arith.mulf %24, %25 : vector<16x1xf32>
      %c0_20 = arith.constant 0 : index
      %c0_21 = arith.constant 0 : index
      %27 = vector.load %arg7[%c0_20, %c0_21] : memref<16x1xf32, #tpu.memory_space<vmem>>, vector<16x1xf32>
      %cst_22 = arith.constant 0.00201612897 : f32
      %28 = vector.broadcast %cst_22 : f32 to vector<16x1xf32>
      %29 = arith.mulf %27, %28 : vector<16x1xf32>
      %30 = arith.mulf %26, %26 : vector<16x1xf32>
      %31 = arith.subf %29, %30 : vector<16x1xf32>
      %cst_23 = arith.constant 0.000000e+00 : f32
      %32 = vector.broadcast %cst_23 : f32 to vector<16x1xf32>
      %33 = arith.maximumf %31, %32 : vector<16x1xf32>
      %cst_24 = arith.constant 9.99999974E-6 : f32
      %34 = vector.broadcast %cst_24 : f32 to vector<16x1xf32>
      %35 = arith.addf %33, %34 : vector<16x1xf32>
      %36 = math.rsqrt %35 : vector<16x1xf32>
      %c0_25 = arith.constant 0 : index
      %c0_26 = arith.constant 0 : index
      %37 = vector.load %arg3[%c0_25, %c0_26] : memref<16x1xf32, #tpu.memory_space<vmem>>, vector<16x1xf32>
      %38 = arith.mulf %36, %37 : vector<16x1xf32>
      %c0_27 = arith.constant 0 : index
      %c0_28 = arith.constant 0 : index
      %39 = vector.load %arg4[%c0_27, %c0_28] : memref<16x1xf32, #tpu.memory_space<vmem>>, vector<16x1xf32>
      %40 = arith.mulf %26, %38 : vector<16x1xf32>
      %41 = arith.subf %39, %40 : vector<16x1xf32>
      %c0_29 = arith.constant 0 : index
      %c0_30 = arith.constant 0 : index
      %42 = vector.load %arg5[%c0_29, %c0_30] : memref<16x512xf32, #tpu.memory_space<vmem>>, vector<16x512xf32>
      %43 = vector.broadcast %38 : vector<16x1xf32> to vector<16x512xf32>
      %44 = arith.mulf %42, %43 : vector<16x512xf32>
      %45 = vector.broadcast %41 : vector<16x1xf32> to vector<16x512xf32>
      %46 = arith.addf %44, %45 : vector<16x512xf32>
      %cst_31 = arith.constant 0.000000e+00 : f32
      %47 = vector.broadcast %cst_31 : f32 to vector<16x512xf32>
      %48 = arith.cmpf ogt, %46, %47 : vector<16x512xf32>
      %cst_32 = arith.constant 0.000000e+00 : f32
      %49 = vector.broadcast %cst_32 : f32 to vector<16x512xf32>
      %50 = arith.minimumf %46, %49 : vector<16x512xf32>
      %51 = math.exp %50 : vector<16x512xf32>
      %cst_33 = arith.constant 1.000000e+00 : f32
      %52 = vector.broadcast %cst_33 : f32 to vector<16x512xf32>
      %53 = arith.subf %51, %52 : vector<16x512xf32>
      %54 = arith.select %48, %46, %53 : vector<16x512xi1>, vector<16x512xf32>
      %c0_34 = arith.constant 0 : index
      %c0_35 = arith.constant 0 : index
      %55 = vector.load %arg5[%c0_34, %c0_35] : memref<16x512xf32, #tpu.memory_space<vmem>>, vector<16x512xf32>
      tpu.vector_store %arg5[%c0_34, %c0_35], %54 {strides = array<i32>} : memref<16x512xf32, #tpu.memory_space<vmem>>, vector<16x512xf32>,
    } else {
    }
    return
  }
  func.func @transform_0(%arg0: i32) -> (i32, i32) {
    %c0_i32 = arith.constant 0 : i32
    %c0_i32_0 = arith.constant 0 : i32
    return %c0_i32, %arg0 : i32, i32
  }
  func.func @transform_1(%arg0: i32) -> (i32, i32) {
    %c0_i32 = arith.constant 0 : i32
    %c0_i32_0 = arith.constant 0 : i32
    %c0_i32_1 = arith.constant 0 : i32
    return %c0_i32, %c0_i32_0 : i32, i32
  }
  func.func @transform_2(%arg0: i32) -> (i32, i32) {
    %c0_i32 = arith.constant 0 : i32
    %c0_i32_0 = arith.constant 0 : i32
    %c0_i32_1 = arith.constant 0 : i32
    return %c0_i32, %c0_i32_0 : i32, i32
  }
  func.func @transform_3(%arg0: i32) -> (i32, i32) {
    %c0_i32 = arith.constant 0 : i32
    %c0_i32_0 = arith.constant 0 : i32
    %c0_i32_1 = arith.constant 0 : i32
    return %c0_i32, %c0_i32_0 : i32, i32
  }
  func.func @transform_4(%arg0: i32) -> (i32, i32) {
    %c0_i32 = arith.constant 0 : i32
    %c0_i32_0 = arith.constant 0 : i32
    %c0_i32_1 = arith.constant 0 : i32
    return %c0_i32, %c0_i32_0 : i32, i32
  }
}

module attributes {stable_mosaic.version = 11 : i64} {
  func.func @_enc_kernel(%arg0: i32, %arg1: memref<160x256xbf16, #tpu.memory_space<vmem>>, %arg2: memref<32x160xbf16, #tpu.memory_space<vmem>>, %arg3: memref<32x1xf32, #tpu.memory_space<vmem>>, %arg4: memref<32x1xf32, #tpu.memory_space<vmem>>, %arg5: memref<32x256xf32, #tpu.memory_space<vmem>>, %arg6: memref<32x1xf32, #tpu.memory_space<vmem>>, %arg7: memref<32x1xf32, #tpu.memory_space<vmem>>) attributes {dimension_semantics = [#tpu.dimension_semantics<arbitrary>], iteration_bounds = array<i64: 1>, scalar_prefetch = 0 : i64, scratch_operands = 2 : i64, tpu.core_type = #tpu.core_type<tc>, window_params = [{transform_indices = @transform_0, window_bounds = array<i64: 160, 256>}, {pipeline_mode = #tpu.pipeline_mode<synchronous>, transform_indices = @transform_1, window_bounds = array<i64: 32, 160>}, {pipeline_mode = #tpu.pipeline_mode<synchronous>, transform_indices = @transform_2, window_bounds = array<i64: 32, 1>}, {pipeline_mode = #tpu.pipeline_mode<synchronous>, transform_indices = @transform_3, window_bounds = array<i64: 32, 1>}, {pipeline_mode = #tpu.pipeline_mode<synchronous>, transform_indices = @transform_4, window_bounds = array<i64: 32, 256>}]} {
    %c0_i32 = arith.constant 0 : i32
    %0 = arith.cmpi eq, %arg0, %c0_i32 : i32
    %1 = arith.extui %0 : i1 to i32
    %c0_i32_0 = arith.constant 0 : i32
    %2 = arith.cmpi ne, %1, %c0_i32_0 : i32
    scf.if %2 {
      %cst_17 = arith.constant 0.000000e+00 : f32
      %24 = vector.broadcast %cst_17 : f32 to vector<32x1xf32>
      %c0_18 = arith.constant 0 : index
      %c0_19 = arith.constant 0 : index
      %25 = vector.load %arg6[%c0_18, %c0_19] : memref<32x1xf32, #tpu.memory_space<vmem>>, vector<32x1xf32>
      tpu.vector_store %arg6[%c0_18, %c0_19], %24 {strides = array<i32>} : memref<32x1xf32, #tpu.memory_space<vmem>>, vector<32x1xf32>,
      %cst_20 = arith.constant 0.000000e+00 : f32
      %26 = vector.broadcast %cst_20 : f32 to vector<32x1xf32>
      %c0_21 = arith.constant 0 : index
      %c0_22 = arith.constant 0 : index
      %27 = vector.load %arg7[%c0_21, %c0_22] : memref<32x1xf32, #tpu.memory_space<vmem>>, vector<32x1xf32>
      tpu.vector_store %arg7[%c0_21, %c0_22], %26 {strides = array<i32>} : memref<32x1xf32, #tpu.memory_space<vmem>>, vector<32x1xf32>,
    } else {
    }
    %c0 = arith.constant 0 : index
    %c0_1 = arith.constant 0 : index
    %3 = vector.load %arg2[%c0, %c0_1] : memref<32x160xbf16, #tpu.memory_space<vmem>>, vector<32x160xbf16>
    %c0_2 = arith.constant 0 : index
    %c0_3 = arith.constant 0 : index
    %4 = vector.load %arg1[%c0_2, %c0_3] : memref<160x256xbf16, #tpu.memory_space<vmem>>, vector<160x256xbf16>
    %cst = arith.constant dense<0.000000e+00> : vector<32x256xf32>
    %5 = tpu.matmul %3, %4, %cst {dimension_numbers = #tpu.dot_dimension_numbers<[1], [0], [0], [1], [0, 0, 1, 1], [], []>} : vector<32x160xbf16>, vector<160x256xbf16>, vector<32x256xf32> -> vector<32x256xf32>
    %c0_4 = arith.constant 0 : index
    %c0_5 = arith.constant 0 : index
    %6 = vector.load %arg6[%c0_4, %c0_5] : memref<32x1xf32, #tpu.memory_space<vmem>>, vector<32x1xf32>
    %cst_6 = arith.constant dense<0.000000e+00> : vector<32xf32>
    %7 = vector.multi_reduction <add>, %5, %cst_6 [1] : vector<32x256xf32> to vector<32xf32>
    %8 = vector.shape_cast %7 : vector<32xf32> to vector<32x1xf32>
    %9 = arith.addf %6, %8 : vector<32x1xf32>
    %c0_7 = arith.constant 0 : index
    %c0_8 = arith.constant 0 : index
    %10 = vector.load %arg6[%c0_7, %c0_8] : memref<32x1xf32, #tpu.memory_space<vmem>>, vector<32x1xf32>
    tpu.vector_store %arg6[%c0_7, %c0_8], %9 {strides = array<i32>} : memref<32x1xf32, #tpu.memory_space<vmem>>, vector<32x1xf32>,
    %c0_9 = arith.constant 0 : index
    %c0_10 = arith.constant 0 : index
    %11 = vector.load %arg7[%c0_9, %c0_10] : memref<32x1xf32, #tpu.memory_space<vmem>>, vector<32x1xf32>
    %12 = arith.mulf %5, %5 : vector<32x256xf32>
    %cst_11 = arith.constant dense<0.000000e+00> : vector<32xf32>
    %13 = vector.multi_reduction <add>, %12, %cst_11 [1] : vector<32x256xf32> to vector<32xf32>
    %14 = vector.shape_cast %13 : vector<32xf32> to vector<32x1xf32>
    %15 = arith.addf %11, %14 : vector<32x1xf32>
    %c0_12 = arith.constant 0 : index
    %c0_13 = arith.constant 0 : index
    %16 = vector.load %arg7[%c0_12, %c0_13] : memref<32x1xf32, #tpu.memory_space<vmem>>, vector<32x1xf32>
    tpu.vector_store %arg7[%c0_12, %c0_13], %15 {strides = array<i32>} : memref<32x1xf32, #tpu.memory_space<vmem>>, vector<32x1xf32>,
    %c256_i32 = arith.constant 256 : i32
    %17 = arith.muli %arg0, %c256_i32 : i32
    %18 = tpu.assume_multiple %17, 128 : i32
    %c0_14 = arith.constant 0 : index
    %19 = arith.index_cast %18 : i32 to index
    %20 = vector.load %arg5[%c0_14, %19] : memref<32x256xf32, #tpu.memory_space<vmem>>, vector<32x256xf32>
    tpu.vector_store %arg5[%c0_14, %19], %5 {strides = array<i32>} : memref<32x256xf32, #tpu.memory_space<vmem>>, vector<32x256xf32>,
    %c0_i32_15 = arith.constant 0 : i32
    %21 = arith.cmpi eq, %arg0, %c0_i32_15 : i32
    %22 = arith.extui %21 : i1 to i32
    %c0_i32_16 = arith.constant 0 : i32
    %23 = arith.cmpi ne, %22, %c0_i32_16 : i32
    scf.if %23 {
      %c0_17 = arith.constant 0 : index
      %c0_18 = arith.constant 0 : index
      %24 = vector.load %arg6[%c0_17, %c0_18] : memref<32x1xf32, #tpu.memory_space<vmem>>, vector<32x1xf32>
      %cst_19 = arith.constant 0.00416666688 : f32
      %25 = vector.broadcast %cst_19 : f32 to vector<32x1xf32>
      %26 = arith.mulf %24, %25 : vector<32x1xf32>
      %c0_20 = arith.constant 0 : index
      %c0_21 = arith.constant 0 : index
      %27 = vector.load %arg7[%c0_20, %c0_21] : memref<32x1xf32, #tpu.memory_space<vmem>>, vector<32x1xf32>
      %cst_22 = arith.constant 0.00416666688 : f32
      %28 = vector.broadcast %cst_22 : f32 to vector<32x1xf32>
      %29 = arith.mulf %27, %28 : vector<32x1xf32>
      %30 = arith.mulf %26, %26 : vector<32x1xf32>
      %31 = arith.subf %29, %30 : vector<32x1xf32>
      %cst_23 = arith.constant 0.000000e+00 : f32
      %32 = vector.broadcast %cst_23 : f32 to vector<32x1xf32>
      %33 = arith.maximumf %31, %32 : vector<32x1xf32>
      %cst_24 = arith.constant 9.99999974E-6 : f32
      %34 = vector.broadcast %cst_24 : f32 to vector<32x1xf32>
      %35 = arith.addf %33, %34 : vector<32x1xf32>
      %36 = math.rsqrt %35 : vector<32x1xf32>
      %c0_25 = arith.constant 0 : index
      %c0_26 = arith.constant 0 : index
      %37 = vector.load %arg3[%c0_25, %c0_26] : memref<32x1xf32, #tpu.memory_space<vmem>>, vector<32x1xf32>
      %38 = arith.mulf %36, %37 : vector<32x1xf32>
      %c0_27 = arith.constant 0 : index
      %c0_28 = arith.constant 0 : index
      %39 = vector.load %arg4[%c0_27, %c0_28] : memref<32x1xf32, #tpu.memory_space<vmem>>, vector<32x1xf32>
      %40 = arith.mulf %26, %38 : vector<32x1xf32>
      %41 = arith.subf %39, %40 : vector<32x1xf32>
      %c0_29 = arith.constant 0 : index
      %c0_30 = arith.constant 0 : index
      %42 = vector.load %arg5[%c0_29, %c0_30] : memref<32x256xf32, #tpu.memory_space<vmem>>, vector<32x256xf32>
      %43 = vector.broadcast %38 : vector<32x1xf32> to vector<32x256xf32>
      %44 = arith.mulf %42, %43 : vector<32x256xf32>
      %45 = vector.broadcast %41 : vector<32x1xf32> to vector<32x256xf32>
      %46 = arith.addf %44, %45 : vector<32x256xf32>
      %cst_31 = arith.constant 0.000000e+00 : f32
      %47 = vector.broadcast %cst_31 : f32 to vector<32x256xf32>
      %48 = arith.cmpf ogt, %46, %47 : vector<32x256xf32>
      %cst_32 = arith.constant 0.000000e+00 : f32
      %49 = vector.broadcast %cst_32 : f32 to vector<32x256xf32>
      %50 = arith.minimumf %46, %49 : vector<32x256xf32>
      %51 = math.exp %50 : vector<32x256xf32>
      %cst_33 = arith.constant 1.000000e+00 : f32
      %52 = vector.broadcast %cst_33 : f32 to vector<32x256xf32>
      %53 = arith.subf %51, %52 : vector<32x256xf32>
      %54 = arith.select %48, %46, %53 : vector<32x256xi1>, vector<32x256xf32>
      %c0_34 = arith.constant 0 : index
      %c0_35 = arith.constant 0 : index
      %55 = vector.load %arg5[%c0_34, %c0_35] : memref<32x256xf32, #tpu.memory_space<vmem>>, vector<32x256xf32>
      tpu.vector_store %arg5[%c0_34, %c0_35], %54 {strides = array<i32>} : memref<32x256xf32, #tpu.memory_space<vmem>>, vector<32x256xf32>,
    } else {
    }
    return
  }
  func.func @transform_0(%arg0: i32) -> (i32, i32) {
    %c0_i32 = arith.constant 0 : i32
    %c0_i32_0 = arith.constant 0 : i32
    return %c0_i32, %arg0 : i32, i32
  }
  func.func @transform_1(%arg0: i32) -> (i32, i32) {
    %c0_i32 = arith.constant 0 : i32
    %c0_i32_0 = arith.constant 0 : i32
    %c0_i32_1 = arith.constant 0 : i32
    return %c0_i32, %c0_i32_0 : i32, i32
  }
  func.func @transform_2(%arg0: i32) -> (i32, i32) {
    %c0_i32 = arith.constant 0 : i32
    %c0_i32_0 = arith.constant 0 : i32
    %c0_i32_1 = arith.constant 0 : i32
    return %c0_i32, %c0_i32_0 : i32, i32
  }
  func.func @transform_3(%arg0: i32) -> (i32, i32) {
    %c0_i32 = arith.constant 0 : i32
    %c0_i32_0 = arith.constant 0 : i32
    %c0_i32_1 = arith.constant 0 : i32
    return %c0_i32, %c0_i32_0 : i32, i32
  }
  func.func @transform_4(%arg0: i32) -> (i32, i32) {
    %c0_i32 = arith.constant 0 : i32
    %c0_i32_0 = arith.constant 0 : i32
    %c0_i32_1 = arith.constant 0 : i32
    return %c0_i32, %c0_i32_0 : i32, i32
  }
}

module attributes {stable_mosaic.version = 11 : i64} {
  func.func @_enc_kernel(%arg0: i32, %arg1: memref<320x128xbf16, #tpu.memory_space<vmem>>, %arg2: memref<32x320xbf16, #tpu.memory_space<vmem>>, %arg3: memref<32x1xf32, #tpu.memory_space<vmem>>, %arg4: memref<32x1xf32, #tpu.memory_space<vmem>>, %arg5: memref<32x128xf32, #tpu.memory_space<vmem>>, %arg6: memref<32x1xf32, #tpu.memory_space<vmem>>, %arg7: memref<32x1xf32, #tpu.memory_space<vmem>>) attributes {dimension_semantics = [#tpu.dimension_semantics<arbitrary>], iteration_bounds = array<i64: 1>, scalar_prefetch = 0 : i64, scratch_operands = 2 : i64, tpu.core_type = #tpu.core_type<tc>, window_params = [{transform_indices = @transform_0, window_bounds = array<i64: 320, 128>}, {pipeline_mode = #tpu.pipeline_mode<synchronous>, transform_indices = @transform_1, window_bounds = array<i64: 32, 320>}, {pipeline_mode = #tpu.pipeline_mode<synchronous>, transform_indices = @transform_2, window_bounds = array<i64: 32, 1>}, {pipeline_mode = #tpu.pipeline_mode<synchronous>, transform_indices = @transform_3, window_bounds = array<i64: 32, 1>}, {pipeline_mode = #tpu.pipeline_mode<synchronous>, transform_indices = @transform_4, window_bounds = array<i64: 32, 128>}]} {
    %c0_i32 = arith.constant 0 : i32
    %0 = arith.cmpi eq, %arg0, %c0_i32 : i32
    %1 = arith.extui %0 : i1 to i32
    %c0_i32_0 = arith.constant 0 : i32
    %2 = arith.cmpi ne, %1, %c0_i32_0 : i32
    scf.if %2 {
      %cst_17 = arith.constant 0.000000e+00 : f32
      %24 = vector.broadcast %cst_17 : f32 to vector<32x1xf32>
      %c0_18 = arith.constant 0 : index
      %c0_19 = arith.constant 0 : index
      %25 = vector.load %arg6[%c0_18, %c0_19] : memref<32x1xf32, #tpu.memory_space<vmem>>, vector<32x1xf32>
      tpu.vector_store %arg6[%c0_18, %c0_19], %24 {strides = array<i32>} : memref<32x1xf32, #tpu.memory_space<vmem>>, vector<32x1xf32>,
      %cst_20 = arith.constant 0.000000e+00 : f32
      %26 = vector.broadcast %cst_20 : f32 to vector<32x1xf32>
      %c0_21 = arith.constant 0 : index
      %c0_22 = arith.constant 0 : index
      %27 = vector.load %arg7[%c0_21, %c0_22] : memref<32x1xf32, #tpu.memory_space<vmem>>, vector<32x1xf32>
      tpu.vector_store %arg7[%c0_21, %c0_22], %26 {strides = array<i32>} : memref<32x1xf32, #tpu.memory_space<vmem>>, vector<32x1xf32>,
    } else {
    }
    %c0 = arith.constant 0 : index
    %c0_1 = arith.constant 0 : index
    %3 = vector.load %arg2[%c0, %c0_1] : memref<32x320xbf16, #tpu.memory_space<vmem>>, vector<32x320xbf16>
    %c0_2 = arith.constant 0 : index
    %c0_3 = arith.constant 0 : index
    %4 = vector.load %arg1[%c0_2, %c0_3] : memref<320x128xbf16, #tpu.memory_space<vmem>>, vector<320x128xbf16>
    %cst = arith.constant dense<0.000000e+00> : vector<32x128xf32>
    %5 = tpu.matmul %3, %4, %cst {dimension_numbers = #tpu.dot_dimension_numbers<[1], [0], [0], [1], [0, 0, 1, 1], [], []>} : vector<32x320xbf16>, vector<320x128xbf16>, vector<32x128xf32> -> vector<32x128xf32>
    %c0_4 = arith.constant 0 : index
    %c0_5 = arith.constant 0 : index
    %6 = vector.load %arg6[%c0_4, %c0_5] : memref<32x1xf32, #tpu.memory_space<vmem>>, vector<32x1xf32>
    %cst_6 = arith.constant dense<0.000000e+00> : vector<32xf32>
    %7 = vector.multi_reduction <add>, %5, %cst_6 [1] : vector<32x128xf32> to vector<32xf32>
    %8 = vector.shape_cast %7 : vector<32xf32> to vector<32x1xf32>
    %9 = arith.addf %6, %8 : vector<32x1xf32>
    %c0_7 = arith.constant 0 : index
    %c0_8 = arith.constant 0 : index
    %10 = vector.load %arg6[%c0_7, %c0_8] : memref<32x1xf32, #tpu.memory_space<vmem>>, vector<32x1xf32>
    tpu.vector_store %arg6[%c0_7, %c0_8], %9 {strides = array<i32>} : memref<32x1xf32, #tpu.memory_space<vmem>>, vector<32x1xf32>,
    %c0_9 = arith.constant 0 : index
    %c0_10 = arith.constant 0 : index
    %11 = vector.load %arg7[%c0_9, %c0_10] : memref<32x1xf32, #tpu.memory_space<vmem>>, vector<32x1xf32>
    %12 = arith.mulf %5, %5 : vector<32x128xf32>
    %cst_11 = arith.constant dense<0.000000e+00> : vector<32xf32>
    %13 = vector.multi_reduction <add>, %12, %cst_11 [1] : vector<32x128xf32> to vector<32xf32>
    %14 = vector.shape_cast %13 : vector<32xf32> to vector<32x1xf32>
    %15 = arith.addf %11, %14 : vector<32x1xf32>
    %c0_12 = arith.constant 0 : index
    %c0_13 = arith.constant 0 : index
    %16 = vector.load %arg7[%c0_12, %c0_13] : memref<32x1xf32, #tpu.memory_space<vmem>>, vector<32x1xf32>
    tpu.vector_store %arg7[%c0_12, %c0_13], %15 {strides = array<i32>} : memref<32x1xf32, #tpu.memory_space<vmem>>, vector<32x1xf32>,
    %c128_i32 = arith.constant 128 : i32
    %17 = arith.muli %arg0, %c128_i32 : i32
    %18 = tpu.assume_multiple %17, 128 : i32
    %c0_14 = arith.constant 0 : index
    %19 = arith.index_cast %18 : i32 to index
    %20 = vector.load %arg5[%c0_14, %19] : memref<32x128xf32, #tpu.memory_space<vmem>>, vector<32x128xf32>
    tpu.vector_store %arg5[%c0_14, %19], %5 {strides = array<i32>} : memref<32x128xf32, #tpu.memory_space<vmem>>, vector<32x128xf32>,
    %c0_i32_15 = arith.constant 0 : i32
    %21 = arith.cmpi eq, %arg0, %c0_i32_15 : i32
    %22 = arith.extui %21 : i1 to i32
    %c0_i32_16 = arith.constant 0 : i32
    %23 = arith.cmpi ne, %22, %c0_i32_16 : i32
    scf.if %23 {
      %c0_17 = arith.constant 0 : index
      %c0_18 = arith.constant 0 : index
      %24 = vector.load %arg6[%c0_17, %c0_18] : memref<32x1xf32, #tpu.memory_space<vmem>>, vector<32x1xf32>
      %cst_19 = arith.constant 0.00892857183 : f32
      %25 = vector.broadcast %cst_19 : f32 to vector<32x1xf32>
      %26 = arith.mulf %24, %25 : vector<32x1xf32>
      %c0_20 = arith.constant 0 : index
      %c0_21 = arith.constant 0 : index
      %27 = vector.load %arg7[%c0_20, %c0_21] : memref<32x1xf32, #tpu.memory_space<vmem>>, vector<32x1xf32>
      %cst_22 = arith.constant 0.00892857183 : f32
      %28 = vector.broadcast %cst_22 : f32 to vector<32x1xf32>
      %29 = arith.mulf %27, %28 : vector<32x1xf32>
      %30 = arith.mulf %26, %26 : vector<32x1xf32>
      %31 = arith.subf %29, %30 : vector<32x1xf32>
      %cst_23 = arith.constant 0.000000e+00 : f32
      %32 = vector.broadcast %cst_23 : f32 to vector<32x1xf32>
      %33 = arith.maximumf %31, %32 : vector<32x1xf32>
      %cst_24 = arith.constant 9.99999974E-6 : f32
      %34 = vector.broadcast %cst_24 : f32 to vector<32x1xf32>
      %35 = arith.addf %33, %34 : vector<32x1xf32>
      %36 = math.rsqrt %35 : vector<32x1xf32>
      %c0_25 = arith.constant 0 : index
      %c0_26 = arith.constant 0 : index
      %37 = vector.load %arg3[%c0_25, %c0_26] : memref<32x1xf32, #tpu.memory_space<vmem>>, vector<32x1xf32>
      %38 = arith.mulf %36, %37 : vector<32x1xf32>
      %c0_27 = arith.constant 0 : index
      %c0_28 = arith.constant 0 : index
      %39 = vector.load %arg4[%c0_27, %c0_28] : memref<32x1xf32, #tpu.memory_space<vmem>>, vector<32x1xf32>
      %40 = arith.mulf %26, %38 : vector<32x1xf32>
      %41 = arith.subf %39, %40 : vector<32x1xf32>
      %c0_29 = arith.constant 0 : index
      %c0_30 = arith.constant 0 : index
      %42 = vector.load %arg5[%c0_29, %c0_30] : memref<32x128xf32, #tpu.memory_space<vmem>>, vector<32x128xf32>
      %43 = vector.broadcast %38 : vector<32x1xf32> to vector<32x128xf32>
      %44 = arith.mulf %42, %43 : vector<32x128xf32>
      %45 = vector.broadcast %41 : vector<32x1xf32> to vector<32x128xf32>
      %46 = arith.addf %44, %45 : vector<32x128xf32>
      %cst_31 = arith.constant 0.000000e+00 : f32
      %47 = vector.broadcast %cst_31 : f32 to vector<32x128xf32>
      %48 = arith.cmpf ogt, %46, %47 : vector<32x128xf32>
      %cst_32 = arith.constant 0.000000e+00 : f32
      %49 = vector.broadcast %cst_32 : f32 to vector<32x128xf32>
      %50 = arith.minimumf %46, %49 : vector<32x128xf32>
      %51 = math.exp %50 : vector<32x128xf32>
      %cst_33 = arith.constant 1.000000e+00 : f32
      %52 = vector.broadcast %cst_33 : f32 to vector<32x128xf32>
      %53 = arith.subf %51, %52 : vector<32x128xf32>
      %54 = arith.select %48, %46, %53 : vector<32x128xi1>, vector<32x128xf32>
      %c0_34 = arith.constant 0 : index
      %c0_35 = arith.constant 0 : index
      %55 = vector.load %arg5[%c0_34, %c0_35] : memref<32x128xf32, #tpu.memory_space<vmem>>, vector<32x128xf32>
      tpu.vector_store %arg5[%c0_34, %c0_35], %54 {strides = array<i32>} : memref<32x128xf32, #tpu.memory_space<vmem>>, vector<32x128xf32>,
    } else {
    }
    return
  }
  func.func @transform_0(%arg0: i32) -> (i32, i32) {
    %c0_i32 = arith.constant 0 : i32
    %c0_i32_0 = arith.constant 0 : i32
    return %c0_i32, %arg0 : i32, i32
  }
  func.func @transform_1(%arg0: i32) -> (i32, i32) {
    %c0_i32 = arith.constant 0 : i32
    %c0_i32_0 = arith.constant 0 : i32
    %c0_i32_1 = arith.constant 0 : i32
    return %c0_i32, %c0_i32_0 : i32, i32
  }
  func.func @transform_2(%arg0: i32) -> (i32, i32) {
    %c0_i32 = arith.constant 0 : i32
    %c0_i32_0 = arith.constant 0 : i32
    %c0_i32_1 = arith.constant 0 : i32
    return %c0_i32, %c0_i32_0 : i32, i32
  }
  func.func @transform_3(%arg0: i32) -> (i32, i32) {
    %c0_i32 = arith.constant 0 : i32
    %c0_i32_0 = arith.constant 0 : i32
    %c0_i32_1 = arith.constant 0 : i32
    return %c0_i32, %c0_i32_0 : i32, i32
  }
  func.func @transform_4(%arg0: i32) -> (i32, i32) {
    %c0_i32 = arith.constant 0 : i32
    %c0_i32_0 = arith.constant 0 : i32
    %c0_i32_1 = arith.constant 0 : i32
    return %c0_i32, %c0_i32_0 : i32, i32
  }
}

module attributes {stable_mosaic.version = 11 : i64} {
  func.func @_enc_kernel(%arg0: i32, %arg1: memref<320x128xbf16, #tpu.memory_space<vmem>>, %arg2: memref<64x320xbf16, #tpu.memory_space<vmem>>, %arg3: memref<64x1xf32, #tpu.memory_space<vmem>>, %arg4: memref<64x1xf32, #tpu.memory_space<vmem>>, %arg5: memref<64x128xf32, #tpu.memory_space<vmem>>, %arg6: memref<64x1xf32, #tpu.memory_space<vmem>>, %arg7: memref<64x1xf32, #tpu.memory_space<vmem>>) attributes {dimension_semantics = [#tpu.dimension_semantics<arbitrary>], iteration_bounds = array<i64: 1>, scalar_prefetch = 0 : i64, scratch_operands = 2 : i64, tpu.core_type = #tpu.core_type<tc>, window_params = [{transform_indices = @transform_0, window_bounds = array<i64: 320, 128>}, {pipeline_mode = #tpu.pipeline_mode<synchronous>, transform_indices = @transform_1, window_bounds = array<i64: 64, 320>}, {pipeline_mode = #tpu.pipeline_mode<synchronous>, transform_indices = @transform_2, window_bounds = array<i64: 64, 1>}, {pipeline_mode = #tpu.pipeline_mode<synchronous>, transform_indices = @transform_3, window_bounds = array<i64: 64, 1>}, {pipeline_mode = #tpu.pipeline_mode<synchronous>, transform_indices = @transform_4, window_bounds = array<i64: 64, 128>}]} {
    %c0_i32 = arith.constant 0 : i32
    %0 = arith.cmpi eq, %arg0, %c0_i32 : i32
    %1 = arith.extui %0 : i1 to i32
    %c0_i32_0 = arith.constant 0 : i32
    %2 = arith.cmpi ne, %1, %c0_i32_0 : i32
    scf.if %2 {
      %cst_17 = arith.constant 0.000000e+00 : f32
      %24 = vector.broadcast %cst_17 : f32 to vector<64x1xf32>
      %c0_18 = arith.constant 0 : index
      %c0_19 = arith.constant 0 : index
      %25 = vector.load %arg6[%c0_18, %c0_19] : memref<64x1xf32, #tpu.memory_space<vmem>>, vector<64x1xf32>
      tpu.vector_store %arg6[%c0_18, %c0_19], %24 {strides = array<i32>} : memref<64x1xf32, #tpu.memory_space<vmem>>, vector<64x1xf32>,
      %cst_20 = arith.constant 0.000000e+00 : f32
      %26 = vector.broadcast %cst_20 : f32 to vector<64x1xf32>
      %c0_21 = arith.constant 0 : index
      %c0_22 = arith.constant 0 : index
      %27 = vector.load %arg7[%c0_21, %c0_22] : memref<64x1xf32, #tpu.memory_space<vmem>>, vector<64x1xf32>
      tpu.vector_store %arg7[%c0_21, %c0_22], %26 {strides = array<i32>} : memref<64x1xf32, #tpu.memory_space<vmem>>, vector<64x1xf32>,
    } else {
    }
    %c0 = arith.constant 0 : index
    %c0_1 = arith.constant 0 : index
    %3 = vector.load %arg2[%c0, %c0_1] : memref<64x320xbf16, #tpu.memory_space<vmem>>, vector<64x320xbf16>
    %c0_2 = arith.constant 0 : index
    %c0_3 = arith.constant 0 : index
    %4 = vector.load %arg1[%c0_2, %c0_3] : memref<320x128xbf16, #tpu.memory_space<vmem>>, vector<320x128xbf16>
    %cst = arith.constant dense<0.000000e+00> : vector<64x128xf32>
    %5 = tpu.matmul %3, %4, %cst {dimension_numbers = #tpu.dot_dimension_numbers<[1], [0], [0], [1], [0, 0, 1, 1], [], []>} : vector<64x320xbf16>, vector<320x128xbf16>, vector<64x128xf32> -> vector<64x128xf32>
    %c0_4 = arith.constant 0 : index
    %c0_5 = arith.constant 0 : index
    %6 = vector.load %arg6[%c0_4, %c0_5] : memref<64x1xf32, #tpu.memory_space<vmem>>, vector<64x1xf32>
    %cst_6 = arith.constant dense<0.000000e+00> : vector<64xf32>
    %7 = vector.multi_reduction <add>, %5, %cst_6 [1] : vector<64x128xf32> to vector<64xf32>
    %8 = vector.shape_cast %7 : vector<64xf32> to vector<64x1xf32>
    %9 = arith.addf %6, %8 : vector<64x1xf32>
    %c0_7 = arith.constant 0 : index
    %c0_8 = arith.constant 0 : index
    %10 = vector.load %arg6[%c0_7, %c0_8] : memref<64x1xf32, #tpu.memory_space<vmem>>, vector<64x1xf32>
    tpu.vector_store %arg6[%c0_7, %c0_8], %9 {strides = array<i32>} : memref<64x1xf32, #tpu.memory_space<vmem>>, vector<64x1xf32>,
    %c0_9 = arith.constant 0 : index
    %c0_10 = arith.constant 0 : index
    %11 = vector.load %arg7[%c0_9, %c0_10] : memref<64x1xf32, #tpu.memory_space<vmem>>, vector<64x1xf32>
    %12 = arith.mulf %5, %5 : vector<64x128xf32>
    %cst_11 = arith.constant dense<0.000000e+00> : vector<64xf32>
    %13 = vector.multi_reduction <add>, %12, %cst_11 [1] : vector<64x128xf32> to vector<64xf32>
    %14 = vector.shape_cast %13 : vector<64xf32> to vector<64x1xf32>
    %15 = arith.addf %11, %14 : vector<64x1xf32>
    %c0_12 = arith.constant 0 : index
    %c0_13 = arith.constant 0 : index
    %16 = vector.load %arg7[%c0_12, %c0_13] : memref<64x1xf32, #tpu.memory_space<vmem>>, vector<64x1xf32>
    tpu.vector_store %arg7[%c0_12, %c0_13], %15 {strides = array<i32>} : memref<64x1xf32, #tpu.memory_space<vmem>>, vector<64x1xf32>,
    %c128_i32 = arith.constant 128 : i32
    %17 = arith.muli %arg0, %c128_i32 : i32
    %18 = tpu.assume_multiple %17, 128 : i32
    %c0_14 = arith.constant 0 : index
    %19 = arith.index_cast %18 : i32 to index
    %20 = vector.load %arg5[%c0_14, %19] : memref<64x128xf32, #tpu.memory_space<vmem>>, vector<64x128xf32>
    tpu.vector_store %arg5[%c0_14, %19], %5 {strides = array<i32>} : memref<64x128xf32, #tpu.memory_space<vmem>>, vector<64x128xf32>,
    %c0_i32_15 = arith.constant 0 : i32
    %21 = arith.cmpi eq, %arg0, %c0_i32_15 : i32
    %22 = arith.extui %21 : i1 to i32
    %c0_i32_16 = arith.constant 0 : i32
    %23 = arith.cmpi ne, %22, %c0_i32_16 : i32
    scf.if %23 {
      %c0_17 = arith.constant 0 : index
      %c0_18 = arith.constant 0 : index
      %24 = vector.load %arg6[%c0_17, %c0_18] : memref<64x1xf32, #tpu.memory_space<vmem>>, vector<64x1xf32>
      %cst_19 = arith.constant 0.020833334 : f32
      %25 = vector.broadcast %cst_19 : f32 to vector<64x1xf32>
      %26 = arith.mulf %24, %25 : vector<64x1xf32>
      %c0_20 = arith.constant 0 : index
      %c0_21 = arith.constant 0 : index
      %27 = vector.load %arg7[%c0_20, %c0_21] : memref<64x1xf32, #tpu.memory_space<vmem>>, vector<64x1xf32>
      %cst_22 = arith.constant 0.020833334 : f32
      %28 = vector.broadcast %cst_22 : f32 to vector<64x1xf32>
      %29 = arith.mulf %27, %28 : vector<64x1xf32>
      %30 = arith.mulf %26, %26 : vector<64x1xf32>
      %31 = arith.subf %29, %30 : vector<64x1xf32>
      %cst_23 = arith.constant 0.000000e+00 : f32
      %32 = vector.broadcast %cst_23 : f32 to vector<64x1xf32>
      %33 = arith.maximumf %31, %32 : vector<64x1xf32>
      %cst_24 = arith.constant 9.99999974E-6 : f32
      %34 = vector.broadcast %cst_24 : f32 to vector<64x1xf32>
      %35 = arith.addf %33, %34 : vector<64x1xf32>
      %36 = math.rsqrt %35 : vector<64x1xf32>
      %c0_25 = arith.constant 0 : index
      %c0_26 = arith.constant 0 : index
      %37 = vector.load %arg3[%c0_25, %c0_26] : memref<64x1xf32, #tpu.memory_space<vmem>>, vector<64x1xf32>
      %38 = arith.mulf %36, %37 : vector<64x1xf32>
      %c0_27 = arith.constant 0 : index
      %c0_28 = arith.constant 0 : index
      %39 = vector.load %arg4[%c0_27, %c0_28] : memref<64x1xf32, #tpu.memory_space<vmem>>, vector<64x1xf32>
      %40 = arith.mulf %26, %38 : vector<64x1xf32>
      %41 = arith.subf %39, %40 : vector<64x1xf32>
      %c0_29 = arith.constant 0 : index
      %c0_30 = arith.constant 0 : index
      %42 = vector.load %arg5[%c0_29, %c0_30] : memref<64x128xf32, #tpu.memory_space<vmem>>, vector<64x128xf32>
      %43 = vector.broadcast %38 : vector<64x1xf32> to vector<64x128xf32>
      %44 = arith.mulf %42, %43 : vector<64x128xf32>
      %45 = vector.broadcast %41 : vector<64x1xf32> to vector<64x128xf32>
      %46 = arith.addf %44, %45 : vector<64x128xf32>
      %cst_31 = arith.constant 0.000000e+00 : f32
      %47 = vector.broadcast %cst_31 : f32 to vector<64x128xf32>
      %48 = arith.cmpf ogt, %46, %47 : vector<64x128xf32>
      %cst_32 = arith.constant 0.000000e+00 : f32
      %49 = vector.broadcast %cst_32 : f32 to vector<64x128xf32>
      %50 = arith.minimumf %46, %49 : vector<64x128xf32>
      %51 = math.exp %50 : vector<64x128xf32>
      %cst_33 = arith.constant 1.000000e+00 : f32
      %52 = vector.broadcast %cst_33 : f32 to vector<64x128xf32>
      %53 = arith.subf %51, %52 : vector<64x128xf32>
      %54 = arith.select %48, %46, %53 : vector<64x128xi1>, vector<64x128xf32>
      %c0_34 = arith.constant 0 : index
      %c0_35 = arith.constant 0 : index
      %55 = vector.load %arg5[%c0_34, %c0_35] : memref<64x128xf32, #tpu.memory_space<vmem>>, vector<64x128xf32>
      tpu.vector_store %arg5[%c0_34, %c0_35], %54 {strides = array<i32>} : memref<64x128xf32, #tpu.memory_space<vmem>>, vector<64x128xf32>,
    } else {
    }
    return
  }
  func.func @transform_0(%arg0: i32) -> (i32, i32) {
    %c0_i32 = arith.constant 0 : i32
    %c0_i32_0 = arith.constant 0 : i32
    return %c0_i32, %arg0 : i32, i32
  }
  func.func @transform_1(%arg0: i32) -> (i32, i32) {
    %c0_i32 = arith.constant 0 : i32
    %c0_i32_0 = arith.constant 0 : i32
    %c0_i32_1 = arith.constant 0 : i32
    return %c0_i32, %c0_i32_0 : i32, i32
  }
  func.func @transform_2(%arg0: i32) -> (i32, i32) {
    %c0_i32 = arith.constant 0 : i32
    %c0_i32_0 = arith.constant 0 : i32
    %c0_i32_1 = arith.constant 0 : i32
    return %c0_i32, %c0_i32_0 : i32, i32
  }
  func.func @transform_3(%arg0: i32) -> (i32, i32) {
    %c0_i32 = arith.constant 0 : i32
    %c0_i32_0 = arith.constant 0 : i32
    %c0_i32_1 = arith.constant 0 : i32
    return %c0_i32, %c0_i32_0 : i32, i32
  }
  func.func @transform_4(%arg0: i32) -> (i32, i32) {
    %c0_i32 = arith.constant 0 : i32
    %c0_i32_0 = arith.constant 0 : i32
    %c0_i32_1 = arith.constant 0 : i32
    return %c0_i32, %c0_i32_0 : i32, i32
  }
}

module attributes {stable_mosaic.version = 11 : i64} {
  func.func @_enc_kernel(%arg0: i32, %arg1: memref<640x128xbf16, #tpu.memory_space<vmem>>, %arg2: memref<64x640xbf16, #tpu.memory_space<vmem>>, %arg3: memref<64x1xf32, #tpu.memory_space<vmem>>, %arg4: memref<64x1xf32, #tpu.memory_space<vmem>>, %arg5: memref<64x128xf32, #tpu.memory_space<vmem>>, %arg6: memref<64x1xf32, #tpu.memory_space<vmem>>, %arg7: memref<64x1xf32, #tpu.memory_space<vmem>>) attributes {dimension_semantics = [#tpu.dimension_semantics<arbitrary>], iteration_bounds = array<i64: 1>, scalar_prefetch = 0 : i64, scratch_operands = 2 : i64, tpu.core_type = #tpu.core_type<tc>, window_params = [{transform_indices = @transform_0, window_bounds = array<i64: 640, 128>}, {pipeline_mode = #tpu.pipeline_mode<synchronous>, transform_indices = @transform_1, window_bounds = array<i64: 64, 640>}, {pipeline_mode = #tpu.pipeline_mode<synchronous>, transform_indices = @transform_2, window_bounds = array<i64: 64, 1>}, {pipeline_mode = #tpu.pipeline_mode<synchronous>, transform_indices = @transform_3, window_bounds = array<i64: 64, 1>}, {pipeline_mode = #tpu.pipeline_mode<synchronous>, transform_indices = @transform_4, window_bounds = array<i64: 64, 128>}]} {
    %c0_i32 = arith.constant 0 : i32
    %0 = arith.cmpi eq, %arg0, %c0_i32 : i32
    %1 = arith.extui %0 : i1 to i32
    %c0_i32_0 = arith.constant 0 : i32
    %2 = arith.cmpi ne, %1, %c0_i32_0 : i32
    scf.if %2 {
      %cst_17 = arith.constant 0.000000e+00 : f32
      %24 = vector.broadcast %cst_17 : f32 to vector<64x1xf32>
      %c0_18 = arith.constant 0 : index
      %c0_19 = arith.constant 0 : index
      %25 = vector.load %arg6[%c0_18, %c0_19] : memref<64x1xf32, #tpu.memory_space<vmem>>, vector<64x1xf32>
      tpu.vector_store %arg6[%c0_18, %c0_19], %24 {strides = array<i32>} : memref<64x1xf32, #tpu.memory_space<vmem>>, vector<64x1xf32>,
      %cst_20 = arith.constant 0.000000e+00 : f32
      %26 = vector.broadcast %cst_20 : f32 to vector<64x1xf32>
      %c0_21 = arith.constant 0 : index
      %c0_22 = arith.constant 0 : index
      %27 = vector.load %arg7[%c0_21, %c0_22] : memref<64x1xf32, #tpu.memory_space<vmem>>, vector<64x1xf32>
      tpu.vector_store %arg7[%c0_21, %c0_22], %26 {strides = array<i32>} : memref<64x1xf32, #tpu.memory_space<vmem>>, vector<64x1xf32>,
    } else {
    }
    %c0 = arith.constant 0 : index
    %c0_1 = arith.constant 0 : index
    %3 = vector.load %arg2[%c0, %c0_1] : memref<64x640xbf16, #tpu.memory_space<vmem>>, vector<64x640xbf16>
    %c0_2 = arith.constant 0 : index
    %c0_3 = arith.constant 0 : index
    %4 = vector.load %arg1[%c0_2, %c0_3] : memref<640x128xbf16, #tpu.memory_space<vmem>>, vector<640x128xbf16>
    %cst = arith.constant dense<0.000000e+00> : vector<64x128xf32>
    %5 = tpu.matmul %3, %4, %cst {dimension_numbers = #tpu.dot_dimension_numbers<[1], [0], [0], [1], [0, 0, 1, 1], [], []>} : vector<64x640xbf16>, vector<640x128xbf16>, vector<64x128xf32> -> vector<64x128xf32>
    %c0_4 = arith.constant 0 : index
    %c0_5 = arith.constant 0 : index
    %6 = vector.load %arg6[%c0_4, %c0_5] : memref<64x1xf32, #tpu.memory_space<vmem>>, vector<64x1xf32>
    %cst_6 = arith.constant dense<0.000000e+00> : vector<64xf32>
    %7 = vector.multi_reduction <add>, %5, %cst_6 [1] : vector<64x128xf32> to vector<64xf32>
    %8 = vector.shape_cast %7 : vector<64xf32> to vector<64x1xf32>
    %9 = arith.addf %6, %8 : vector<64x1xf32>
    %c0_7 = arith.constant 0 : index
    %c0_8 = arith.constant 0 : index
    %10 = vector.load %arg6[%c0_7, %c0_8] : memref<64x1xf32, #tpu.memory_space<vmem>>, vector<64x1xf32>
    tpu.vector_store %arg6[%c0_7, %c0_8], %9 {strides = array<i32>} : memref<64x1xf32, #tpu.memory_space<vmem>>, vector<64x1xf32>,
    %c0_9 = arith.constant 0 : index
    %c0_10 = arith.constant 0 : index
    %11 = vector.load %arg7[%c0_9, %c0_10] : memref<64x1xf32, #tpu.memory_space<vmem>>, vector<64x1xf32>
    %12 = arith.mulf %5, %5 : vector<64x128xf32>
    %cst_11 = arith.constant dense<0.000000e+00> : vector<64xf32>
    %13 = vector.multi_reduction <add>, %12, %cst_11 [1] : vector<64x128xf32> to vector<64xf32>
    %14 = vector.shape_cast %13 : vector<64xf32> to vector<64x1xf32>
    %15 = arith.addf %11, %14 : vector<64x1xf32>
    %c0_12 = arith.constant 0 : index
    %c0_13 = arith.constant 0 : index
    %16 = vector.load %arg7[%c0_12, %c0_13] : memref<64x1xf32, #tpu.memory_space<vmem>>, vector<64x1xf32>
    tpu.vector_store %arg7[%c0_12, %c0_13], %15 {strides = array<i32>} : memref<64x1xf32, #tpu.memory_space<vmem>>, vector<64x1xf32>,
    %c128_i32 = arith.constant 128 : i32
    %17 = arith.muli %arg0, %c128_i32 : i32
    %18 = tpu.assume_multiple %17, 128 : i32
    %c0_14 = arith.constant 0 : index
    %19 = arith.index_cast %18 : i32 to index
    %20 = vector.load %arg5[%c0_14, %19] : memref<64x128xf32, #tpu.memory_space<vmem>>, vector<64x128xf32>
    tpu.vector_store %arg5[%c0_14, %19], %5 {strides = array<i32>} : memref<64x128xf32, #tpu.memory_space<vmem>>, vector<64x128xf32>,
    %c0_i32_15 = arith.constant 0 : i32
    %21 = arith.cmpi eq, %arg0, %c0_i32_15 : i32
    %22 = arith.extui %21 : i1 to i32
    %c0_i32_16 = arith.constant 0 : i32
    %23 = arith.cmpi ne, %22, %c0_i32_16 : i32
    scf.if %23 {
      %c0_17 = arith.constant 0 : index
      %c0_18 = arith.constant 0 : index
      %24 = vector.load %arg6[%c0_17, %c0_18] : memref<64x1xf32, #tpu.memory_space<vmem>>, vector<64x1xf32>
      %cst_19 = arith.constant 6.250000e-02 : f32
      %25 = vector.broadcast %cst_19 : f32 to vector<64x1xf32>
      %26 = arith.mulf %24, %25 : vector<64x1xf32>
      %c0_20 = arith.constant 0 : index
      %c0_21 = arith.constant 0 : index
      %27 = vector.load %arg7[%c0_20, %c0_21] : memref<64x1xf32, #tpu.memory_space<vmem>>, vector<64x1xf32>
      %cst_22 = arith.constant 6.250000e-02 : f32
      %28 = vector.broadcast %cst_22 : f32 to vector<64x1xf32>
      %29 = arith.mulf %27, %28 : vector<64x1xf32>
      %30 = arith.mulf %26, %26 : vector<64x1xf32>
      %31 = arith.subf %29, %30 : vector<64x1xf32>
      %cst_23 = arith.constant 0.000000e+00 : f32
      %32 = vector.broadcast %cst_23 : f32 to vector<64x1xf32>
      %33 = arith.maximumf %31, %32 : vector<64x1xf32>
      %cst_24 = arith.constant 9.99999974E-6 : f32
      %34 = vector.broadcast %cst_24 : f32 to vector<64x1xf32>
      %35 = arith.addf %33, %34 : vector<64x1xf32>
      %36 = math.rsqrt %35 : vector<64x1xf32>
      %c0_25 = arith.constant 0 : index
      %c0_26 = arith.constant 0 : index
      %37 = vector.load %arg3[%c0_25, %c0_26] : memref<64x1xf32, #tpu.memory_space<vmem>>, vector<64x1xf32>
      %38 = arith.mulf %36, %37 : vector<64x1xf32>
      %c0_27 = arith.constant 0 : index
      %c0_28 = arith.constant 0 : index
      %39 = vector.load %arg4[%c0_27, %c0_28] : memref<64x1xf32, #tpu.memory_space<vmem>>, vector<64x1xf32>
      %40 = arith.mulf %26, %38 : vector<64x1xf32>
      %41 = arith.subf %39, %40 : vector<64x1xf32>
      %c0_29 = arith.constant 0 : index
      %c0_30 = arith.constant 0 : index
      %42 = vector.load %arg5[%c0_29, %c0_30] : memref<64x128xf32, #tpu.memory_space<vmem>>, vector<64x128xf32>
      %43 = vector.broadcast %38 : vector<64x1xf32> to vector<64x128xf32>
      %44 = arith.mulf %42, %43 : vector<64x128xf32>
      %45 = vector.broadcast %41 : vector<64x1xf32> to vector<64x128xf32>
      %46 = arith.addf %44, %45 : vector<64x128xf32>
      %cst_31 = arith.constant 0.000000e+00 : f32
      %47 = vector.broadcast %cst_31 : f32 to vector<64x128xf32>
      %48 = arith.cmpf ogt, %46, %47 : vector<64x128xf32>
      %cst_32 = arith.constant 0.000000e+00 : f32
      %49 = vector.broadcast %cst_32 : f32 to vector<64x128xf32>
      %50 = arith.minimumf %46, %49 : vector<64x128xf32>
      %51 = math.exp %50 : vector<64x128xf32>
      %cst_33 = arith.constant 1.000000e+00 : f32
      %52 = vector.broadcast %cst_33 : f32 to vector<64x128xf32>
      %53 = arith.subf %51, %52 : vector<64x128xf32>
      %54 = arith.select %48, %46, %53 : vector<64x128xi1>, vector<64x128xf32>
      %c0_34 = arith.constant 0 : index
      %c0_35 = arith.constant 0 : index
      %55 = vector.load %arg5[%c0_34, %c0_35] : memref<64x128xf32, #tpu.memory_space<vmem>>, vector<64x128xf32>
      tpu.vector_store %arg5[%c0_34, %c0_35], %54 {strides = array<i32>} : memref<64x128xf32, #tpu.memory_space<vmem>>, vector<64x128xf32>,
    } else {
    }
    return
  }
  func.func @transform_0(%arg0: i32) -> (i32, i32) {
    %c0_i32 = arith.constant 0 : i32
    %c0_i32_0 = arith.constant 0 : i32
    return %c0_i32, %arg0 : i32, i32
  }
  func.func @transform_1(%arg0: i32) -> (i32, i32) {
    %c0_i32 = arith.constant 0 : i32
    %c0_i32_0 = arith.constant 0 : i32
    %c0_i32_1 = arith.constant 0 : i32
    return %c0_i32, %c0_i32_0 : i32, i32
  }
  func.func @transform_2(%arg0: i32) -> (i32, i32) {
    %c0_i32 = arith.constant 0 : i32
    %c0_i32_0 = arith.constant 0 : i32
    %c0_i32_1 = arith.constant 0 : i32
    return %c0_i32, %c0_i32_0 : i32, i32
  }
  func.func @transform_3(%arg0: i32) -> (i32, i32) {
    %c0_i32 = arith.constant 0 : i32
    %c0_i32_0 = arith.constant 0 : i32
    %c0_i32_1 = arith.constant 0 : i32
    return %c0_i32, %c0_i32_0 : i32, i32
  }
  func.func @transform_4(%arg0: i32) -> (i32, i32) {
    %c0_i32 = arith.constant 0 : i32
    %c0_i32_0 = arith.constant 0 : i32
    %c0_i32_1 = arith.constant 0 : i32
    return %c0_i32, %c0_i32_0 : i32, i32
  }
}

module attributes {stable_mosaic.version = 11 : i64} {
  func.func @_dec_kernel(%arg0: i32, %arg1: memref<384x128xbf16, #tpu.memory_space<vmem>>, %arg2: memref<256x128xbf16, #tpu.memory_space<vmem>>, %arg3: memref<64x384xbf16, #tpu.memory_space<vmem>>, %arg4: memref<64x256xbf16, #tpu.memory_space<vmem>>, %arg5: memref<64x1xf32, #tpu.memory_space<vmem>>, %arg6: memref<64x1xf32, #tpu.memory_space<vmem>>, %arg7: memref<64x128xf32, #tpu.memory_space<vmem>>, %arg8: memref<64x128xf32, #tpu.memory_space<vmem>>, %arg9: memref<64x1xf32, #tpu.memory_space<vmem>>, %arg10: memref<64x1xf32, #tpu.memory_space<vmem>>) attributes {dimension_semantics = [#tpu.dimension_semantics<arbitrary>], iteration_bounds = array<i64: 1>, scalar_prefetch = 0 : i64, scratch_operands = 2 : i64, tpu.core_type = #tpu.core_type<tc>, window_params = [{transform_indices = @transform_0, window_bounds = array<i64: 384, 128>}, {transform_indices = @transform_1, window_bounds = array<i64: 256, 128>}, {pipeline_mode = #tpu.pipeline_mode<synchronous>, transform_indices = @transform_2, window_bounds = array<i64: 64, 384>}, {pipeline_mode = #tpu.pipeline_mode<synchronous>, transform_indices = @transform_3, window_bounds = array<i64: 64, 256>}, {pipeline_mode = #tpu.pipeline_mode<synchronous>, transform_indices = @transform_4, window_bounds = array<i64: 64, 1>}, {pipeline_mode = #tpu.pipeline_mode<synchronous>, transform_indices = @transform_5, window_bounds = array<i64: 64, 1>}, {pipeline_mode = #tpu.pipeline_mode<synchronous>, transform_indices = @transform_6, window_bounds = array<i64: 64, 128>}, {pipeline_mode = #tpu.pipeline_mode<synchronous>, transform_indices = @transform_7, window_bounds = array<i64: 64, 128>}]} {
    %c0_i32 = arith.constant 0 : i32
    %0 = arith.cmpi eq, %arg0, %c0_i32 : i32
    %1 = arith.extui %0 : i1 to i32
    %c0_i32_0 = arith.constant 0 : i32
    %2 = arith.cmpi ne, %1, %c0_i32_0 : i32
    scf.if %2 {
      %cst_25 = arith.constant 0.000000e+00 : f32
      %36 = vector.broadcast %cst_25 : f32 to vector<64x1xf32>
      %c0_26 = arith.constant 0 : index
      %c0_27 = arith.constant 0 : index
      %37 = vector.load %arg9[%c0_26, %c0_27] : memref<64x1xf32, #tpu.memory_space<vmem>>, vector<64x1xf32>
      tpu.vector_store %arg9[%c0_26, %c0_27], %36 {strides = array<i32>} : memref<64x1xf32, #tpu.memory_space<vmem>>, vector<64x1xf32>,
      %cst_28 = arith.constant 0.000000e+00 : f32
      %38 = vector.broadcast %cst_28 : f32 to vector<64x1xf32>
      %c0_29 = arith.constant 0 : index
      %c0_30 = arith.constant 0 : index
      %39 = vector.load %arg10[%c0_29, %c0_30] : memref<64x1xf32, #tpu.memory_space<vmem>>, vector<64x1xf32>
      tpu.vector_store %arg10[%c0_29, %c0_30], %38 {strides = array<i32>} : memref<64x1xf32, #tpu.memory_space<vmem>>, vector<64x1xf32>,
    } else {
    }
    %c0 = arith.constant 0 : index
    %c0_1 = arith.constant 0 : index
    %3 = vector.load %arg3[%c0, %c0_1] : memref<64x384xbf16, #tpu.memory_space<vmem>>, vector<64x384xbf16>
    %c0_2 = arith.constant 0 : index
    %c0_3 = arith.constant 0 : index
    %4 = vector.load %arg1[%c0_2, %c0_3] : memref<384x128xbf16, #tpu.memory_space<vmem>>, vector<384x128xbf16>
    %cst = arith.constant dense<0.000000e+00> : vector<64x128xf32>
    %5 = tpu.matmul %3, %4, %cst {dimension_numbers = #tpu.dot_dimension_numbers<[1], [0], [0], [1], [0, 0, 1, 1], [], []>} : vector<64x384xbf16>, vector<384x128xbf16>, vector<64x128xf32> -> vector<64x128xf32>
    %c0_4 = arith.constant 0 : index
    %c0_5 = arith.constant 0 : index
    %6 = vector.load %arg4[%c0_4, %c0_5] : memref<64x256xbf16, #tpu.memory_space<vmem>>, vector<64x256xbf16>
    %c0_6 = arith.constant 0 : index
    %c0_7 = arith.constant 0 : index
    %7 = vector.load %arg2[%c0_6, %c0_7] : memref<256x128xbf16, #tpu.memory_space<vmem>>, vector<256x128xbf16>
    %cst_8 = arith.constant dense<0.000000e+00> : vector<64x128xf32>
    %8 = tpu.matmul %6, %7, %cst_8 {dimension_numbers = #tpu.dot_dimension_numbers<[1], [0], [0], [1], [0, 0, 1, 1], [], []>} : vector<64x256xbf16>, vector<256x128xbf16>, vector<64x128xf32> -> vector<64x128xf32>
    %c0_9 = arith.constant 0 : index
    %c0_10 = arith.constant 0 : index
    %9 = vector.load %arg9[%c0_9, %c0_10] : memref<64x1xf32, #tpu.memory_space<vmem>>, vector<64x1xf32>
    %cst_11 = arith.constant dense<0.000000e+00> : vector<64xf32>
    %10 = vector.multi_reduction <add>, %5, %cst_11 [1] : vector<64x128xf32> to vector<64xf32>
    %11 = vector.shape_cast %10 : vector<64xf32> to vector<64x1xf32>
    %cst_12 = arith.constant dense<0.000000e+00> : vector<64xf32>
    %12 = vector.multi_reduction <add>, %8, %cst_12 [1] : vector<64x128xf32> to vector<64xf32>
    %13 = vector.shape_cast %12 : vector<64xf32> to vector<64x1xf32>
    %14 = arith.addf %11, %13 : vector<64x1xf32>
    %15 = arith.addf %9, %14 : vector<64x1xf32>
    %c0_13 = arith.constant 0 : index
    %c0_14 = arith.constant 0 : index
    %16 = vector.load %arg9[%c0_13, %c0_14] : memref<64x1xf32, #tpu.memory_space<vmem>>, vector<64x1xf32>
    tpu.vector_store %arg9[%c0_13, %c0_14], %15 {strides = array<i32>} : memref<64x1xf32, #tpu.memory_space<vmem>>, vector<64x1xf32>,
    %c0_15 = arith.constant 0 : index
    %c0_16 = arith.constant 0 : index
    %17 = vector.load %arg10[%c0_15, %c0_16] : memref<64x1xf32, #tpu.memory_space<vmem>>, vector<64x1xf32>
    %18 = arith.mulf %5, %5 : vector<64x128xf32>
    %cst_17 = arith.constant dense<0.000000e+00> : vector<64xf32>
    %19 = vector.multi_reduction <add>, %18, %cst_17 [1] : vector<64x128xf32> to vector<64xf32>
    %20 = vector.shape_cast %19 : vector<64xf32> to vector<64x1xf32>
    %21 = arith.mulf %8, %8 : vector<64x128xf32>
    %cst_18 = arith.constant dense<0.000000e+00> : vector<64xf32>
    %22 = vector.multi_reduction <add>, %21, %cst_18 [1] : vector<64x128xf32> to vector<64xf32>
    %23 = vector.shape_cast %22 : vector<64xf32> to vector<64x1xf32>
    %24 = arith.addf %20, %23 : vector<64x1xf32>
    %25 = arith.addf %17, %24 : vector<64x1xf32>
    %c0_19 = arith.constant 0 : index
    %c0_20 = arith.constant 0 : index
    %26 = vector.load %arg10[%c0_19, %c0_20] : memref<64x1xf32, #tpu.memory_space<vmem>>, vector<64x1xf32>
    tpu.vector_store %arg10[%c0_19, %c0_20], %25 {strides = array<i32>} : memref<64x1xf32, #tpu.memory_space<vmem>>, vector<64x1xf32>,
    %c128_i32 = arith.constant 128 : i32
    %27 = arith.muli %arg0, %c128_i32 : i32
    %28 = tpu.assume_multiple %27, 128 : i32
    %c0_21 = arith.constant 0 : index
    %29 = arith.index_cast %28 : i32 to index
    %30 = vector.load %arg7[%c0_21, %29] : memref<64x128xf32, #tpu.memory_space<vmem>>, vector<64x128xf32>
    tpu.vector_store %arg7[%c0_21, %29], %5 {strides = array<i32>} : memref<64x128xf32, #tpu.memory_space<vmem>>, vector<64x128xf32>,
    %c0_22 = arith.constant 0 : index
    %31 = arith.index_cast %28 : i32 to index
    %32 = vector.load %arg8[%c0_22, %31] : memref<64x128xf32, #tpu.memory_space<vmem>>, vector<64x128xf32>
    tpu.vector_store %arg8[%c0_22, %31], %8 {strides = array<i32>} : memref<64x128xf32, #tpu.memory_space<vmem>>, vector<64x128xf32>,
    %c0_i32_23 = arith.constant 0 : i32
    %33 = arith.cmpi eq, %arg0, %c0_i32_23 : i32
    %34 = arith.extui %33 : i1 to i32
    %c0_i32_24 = arith.constant 0 : i32
    %35 = arith.cmpi ne, %34, %c0_i32_24 : i32
    scf.if %35 {
      %c0_25 = arith.constant 0 : index
      %c0_26 = arith.constant 0 : index
      %36 = vector.load %arg9[%c0_25, %c0_26] : memref<64x1xf32, #tpu.memory_space<vmem>>, vector<64x1xf32>
      %cst_27 = arith.constant 0.020833334 : f32
      %37 = vector.broadcast %cst_27 : f32 to vector<64x1xf32>
      %38 = arith.mulf %36, %37 : vector<64x1xf32>
      %c0_28 = arith.constant 0 : index
      %c0_29 = arith.constant 0 : index
      %39 = vector.load %arg10[%c0_28, %c0_29] : memref<64x1xf32, #tpu.memory_space<vmem>>, vector<64x1xf32>
      %cst_30 = arith.constant 0.020833334 : f32
      %40 = vector.broadcast %cst_30 : f32 to vector<64x1xf32>
      %41 = arith.mulf %39, %40 : vector<64x1xf32>
      %42 = arith.mulf %38, %38 : vector<64x1xf32>
      %43 = arith.subf %41, %42 : vector<64x1xf32>
      %cst_31 = arith.constant 0.000000e+00 : f32
      %44 = vector.broadcast %cst_31 : f32 to vector<64x1xf32>
      %45 = arith.maximumf %43, %44 : vector<64x1xf32>
      %cst_32 = arith.constant 9.99999974E-6 : f32
      %46 = vector.broadcast %cst_32 : f32 to vector<64x1xf32>
      %47 = arith.addf %45, %46 : vector<64x1xf32>
      %48 = math.rsqrt %47 : vector<64x1xf32>
      %c0_33 = arith.constant 0 : index
      %c0_34 = arith.constant 0 : index
      %49 = vector.load %arg5[%c0_33, %c0_34] : memref<64x1xf32, #tpu.memory_space<vmem>>, vector<64x1xf32>
      %50 = arith.mulf %48, %49 : vector<64x1xf32>
      %c0_35 = arith.constant 0 : index
      %c0_36 = arith.constant 0 : index
      %51 = vector.load %arg6[%c0_35, %c0_36] : memref<64x1xf32, #tpu.memory_space<vmem>>, vector<64x1xf32>
      %52 = arith.mulf %38, %50 : vector<64x1xf32>
      %53 = arith.subf %51, %52 : vector<64x1xf32>
      %c0_37 = arith.constant 0 : index
      %c0_38 = arith.constant 0 : index
      %54 = vector.load %arg7[%c0_37, %c0_38] : memref<64x128xf32, #tpu.memory_space<vmem>>, vector<64x128xf32>
      %55 = vector.broadcast %50 : vector<64x1xf32> to vector<64x128xf32>
      %56 = arith.mulf %54, %55 : vector<64x128xf32>
      %57 = vector.broadcast %53 : vector<64x1xf32> to vector<64x128xf32>
      %58 = arith.addf %56, %57 : vector<64x128xf32>
      %cst_39 = arith.constant 0.000000e+00 : f32
      %59 = vector.broadcast %cst_39 : f32 to vector<64x128xf32>
      %60 = arith.cmpf ogt, %58, %59 : vector<64x128xf32>
      %cst_40 = arith.constant 0.000000e+00 : f32
      %61 = vector.broadcast %cst_40 : f32 to vector<64x128xf32>
      %62 = arith.minimumf %58, %61 : vector<64x128xf32>
      %63 = math.exp %62 : vector<64x128xf32>
      %cst_41 = arith.constant 1.000000e+00 : f32
      %64 = vector.broadcast %cst_41 : f32 to vector<64x128xf32>
      %65 = arith.subf %63, %64 : vector<64x128xf32>
      %66 = arith.select %60, %58, %65 : vector<64x128xi1>, vector<64x128xf32>
      %c0_42 = arith.constant 0 : index
      %c0_43 = arith.constant 0 : index
      %67 = vector.load %arg7[%c0_42, %c0_43] : memref<64x128xf32, #tpu.memory_space<vmem>>, vector<64x128xf32>
      tpu.vector_store %arg7[%c0_42, %c0_43], %66 {strides = array<i32>} : memref<64x128xf32, #tpu.memory_space<vmem>>, vector<64x128xf32>,
      %c0_44 = arith.constant 0 : index
      %c0_45 = arith.constant 0 : index
      %68 = vector.load %arg8[%c0_44, %c0_45] : memref<64x128xf32, #tpu.memory_space<vmem>>, vector<64x128xf32>
      %69 = vector.broadcast %50 : vector<64x1xf32> to vector<64x128xf32>
      %70 = arith.mulf %68, %69 : vector<64x128xf32>
      %71 = vector.broadcast %53 : vector<64x1xf32> to vector<64x128xf32>
      %72 = arith.addf %70, %71 : vector<64x128xf32>
      %cst_46 = arith.constant 0.000000e+00 : f32
      %73 = vector.broadcast %cst_46 : f32 to vector<64x128xf32>
      %74 = arith.cmpf ogt, %72, %73 : vector<64x128xf32>
      %cst_47 = arith.constant 0.000000e+00 : f32
      %75 = vector.broadcast %cst_47 : f32 to vector<64x128xf32>
      %76 = arith.minimumf %72, %75 : vector<64x128xf32>
      %77 = math.exp %76 : vector<64x128xf32>
      %cst_48 = arith.constant 1.000000e+00 : f32
      %78 = vector.broadcast %cst_48 : f32 to vector<64x128xf32>
      %79 = arith.subf %77, %78 : vector<64x128xf32>
      %80 = arith.select %74, %72, %79 : vector<64x128xi1>, vector<64x128xf32>
      %c0_49 = arith.constant 0 : index
      %c0_50 = arith.constant 0 : index
      %81 = vector.load %arg8[%c0_49, %c0_50] : memref<64x128xf32, #tpu.memory_space<vmem>>, vector<64x128xf32>
      tpu.vector_store %arg8[%c0_49, %c0_50], %80 {strides = array<i32>} : memref<64x128xf32, #tpu.memory_space<vmem>>, vector<64x128xf32>,
    } else {
    }
    return
  }
  func.func @transform_0(%arg0: i32) -> (i32, i32) {
    %c0_i32 = arith.constant 0 : i32
    %c0_i32_0 = arith.constant 0 : i32
    return %c0_i32, %arg0 : i32, i32
  }
  func.func @transform_1(%arg0: i32) -> (i32, i32) {
    %c0_i32 = arith.constant 0 : i32
    %c0_i32_0 = arith.constant 0 : i32
    return %c0_i32, %arg0 : i32, i32
  }
  func.func @transform_2(%arg0: i32) -> (i32, i32) {
    %c0_i32 = arith.constant 0 : i32
    %c0_i32_0 = arith.constant 0 : i32
    %c0_i32_1 = arith.constant 0 : i32
    return %c0_i32, %c0_i32_0 : i32, i32
  }
  func.func @transform_3(%arg0: i32) -> (i32, i32) {
    %c0_i32 = arith.constant 0 : i32
    %c0_i32_0 = arith.constant 0 : i32
    %c0_i32_1 = arith.constant 0 : i32
    return %c0_i32, %c0_i32_0 : i32, i32
  }
  func.func @transform_4(%arg0: i32) -> (i32, i32) {
    %c0_i32 = arith.constant 0 : i32
    %c0_i32_0 = arith.constant 0 : i32
    %c0_i32_1 = arith.constant 0 : i32
    return %c0_i32, %c0_i32_0 : i32, i32
  }
  func.func @transform_5(%arg0: i32) -> (i32, i32) {
    %c0_i32 = arith.constant 0 : i32
    %c0_i32_0 = arith.constant 0 : i32
    %c0_i32_1 = arith.constant 0 : i32
    return %c0_i32, %c0_i32_0 : i32, i32
  }
  func.func @transform_6(%arg0: i32) -> (i32, i32) {
    %c0_i32 = arith.constant 0 : i32
    %c0_i32_0 = arith.constant 0 : i32
    %c0_i32_1 = arith.constant 0 : i32
    return %c0_i32, %c0_i32_0 : i32, i32
  }
  func.func @transform_7(%arg0: i32) -> (i32, i32) {
    %c0_i32 = arith.constant 0 : i32
    %c0_i32_0 = arith.constant 0 : i32
    %c0_i32_1 = arith.constant 0 : i32
    return %c0_i32, %c0_i32_0 : i32, i32
  }
}

module attributes {stable_mosaic.version = 11 : i64} {
  func.func @_dec_kernel(%arg0: i32, %arg1: memref<768x128xbf16, #tpu.memory_space<vmem>>, %arg2: memref<512x128xbf16, #tpu.memory_space<vmem>>, %arg3: memref<32x768xbf16, #tpu.memory_space<vmem>>, %arg4: memref<32x512xbf16, #tpu.memory_space<vmem>>, %arg5: memref<32x1xf32, #tpu.memory_space<vmem>>, %arg6: memref<32x1xf32, #tpu.memory_space<vmem>>, %arg7: memref<32x128xf32, #tpu.memory_space<vmem>>, %arg8: memref<32x128xf32, #tpu.memory_space<vmem>>, %arg9: memref<32x1xf32, #tpu.memory_space<vmem>>, %arg10: memref<32x1xf32, #tpu.memory_space<vmem>>) attributes {dimension_semantics = [#tpu.dimension_semantics<arbitrary>], iteration_bounds = array<i64: 1>, scalar_prefetch = 0 : i64, scratch_operands = 2 : i64, tpu.core_type = #tpu.core_type<tc>, window_params = [{transform_indices = @transform_0, window_bounds = array<i64: 768, 128>}, {transform_indices = @transform_1, window_bounds = array<i64: 512, 128>}, {pipeline_mode = #tpu.pipeline_mode<synchronous>, transform_indices = @transform_2, window_bounds = array<i64: 32, 768>}, {pipeline_mode = #tpu.pipeline_mode<synchronous>, transform_indices = @transform_3, window_bounds = array<i64: 32, 512>}, {pipeline_mode = #tpu.pipeline_mode<synchronous>, transform_indices = @transform_4, window_bounds = array<i64: 32, 1>}, {pipeline_mode = #tpu.pipeline_mode<synchronous>, transform_indices = @transform_5, window_bounds = array<i64: 32, 1>}, {pipeline_mode = #tpu.pipeline_mode<synchronous>, transform_indices = @transform_6, window_bounds = array<i64: 32, 128>}, {pipeline_mode = #tpu.pipeline_mode<synchronous>, transform_indices = @transform_7, window_bounds = array<i64: 32, 128>}]} {
    %c0_i32 = arith.constant 0 : i32
    %0 = arith.cmpi eq, %arg0, %c0_i32 : i32
    %1 = arith.extui %0 : i1 to i32
    %c0_i32_0 = arith.constant 0 : i32
    %2 = arith.cmpi ne, %1, %c0_i32_0 : i32
    scf.if %2 {
      %cst_25 = arith.constant 0.000000e+00 : f32
      %36 = vector.broadcast %cst_25 : f32 to vector<32x1xf32>
      %c0_26 = arith.constant 0 : index
      %c0_27 = arith.constant 0 : index
      %37 = vector.load %arg9[%c0_26, %c0_27] : memref<32x1xf32, #tpu.memory_space<vmem>>, vector<32x1xf32>
      tpu.vector_store %arg9[%c0_26, %c0_27], %36 {strides = array<i32>} : memref<32x1xf32, #tpu.memory_space<vmem>>, vector<32x1xf32>,
      %cst_28 = arith.constant 0.000000e+00 : f32
      %38 = vector.broadcast %cst_28 : f32 to vector<32x1xf32>
      %c0_29 = arith.constant 0 : index
      %c0_30 = arith.constant 0 : index
      %39 = vector.load %arg10[%c0_29, %c0_30] : memref<32x1xf32, #tpu.memory_space<vmem>>, vector<32x1xf32>
      tpu.vector_store %arg10[%c0_29, %c0_30], %38 {strides = array<i32>} : memref<32x1xf32, #tpu.memory_space<vmem>>, vector<32x1xf32>,
    } else {
    }
    %c0 = arith.constant 0 : index
    %c0_1 = arith.constant 0 : index
    %3 = vector.load %arg3[%c0, %c0_1] : memref<32x768xbf16, #tpu.memory_space<vmem>>, vector<32x768xbf16>
    %c0_2 = arith.constant 0 : index
    %c0_3 = arith.constant 0 : index
    %4 = vector.load %arg1[%c0_2, %c0_3] : memref<768x128xbf16, #tpu.memory_space<vmem>>, vector<768x128xbf16>
    %cst = arith.constant dense<0.000000e+00> : vector<32x128xf32>
    %5 = tpu.matmul %3, %4, %cst {dimension_numbers = #tpu.dot_dimension_numbers<[1], [0], [0], [1], [0, 0, 1, 1], [], []>} : vector<32x768xbf16>, vector<768x128xbf16>, vector<32x128xf32> -> vector<32x128xf32>
    %c0_4 = arith.constant 0 : index
    %c0_5 = arith.constant 0 : index
    %6 = vector.load %arg4[%c0_4, %c0_5] : memref<32x512xbf16, #tpu.memory_space<vmem>>, vector<32x512xbf16>
    %c0_6 = arith.constant 0 : index
    %c0_7 = arith.constant 0 : index
    %7 = vector.load %arg2[%c0_6, %c0_7] : memref<512x128xbf16, #tpu.memory_space<vmem>>, vector<512x128xbf16>
    %cst_8 = arith.constant dense<0.000000e+00> : vector<32x128xf32>
    %8 = tpu.matmul %6, %7, %cst_8 {dimension_numbers = #tpu.dot_dimension_numbers<[1], [0], [0], [1], [0, 0, 1, 1], [], []>} : vector<32x512xbf16>, vector<512x128xbf16>, vector<32x128xf32> -> vector<32x128xf32>
    %c0_9 = arith.constant 0 : index
    %c0_10 = arith.constant 0 : index
    %9 = vector.load %arg9[%c0_9, %c0_10] : memref<32x1xf32, #tpu.memory_space<vmem>>, vector<32x1xf32>
    %cst_11 = arith.constant dense<0.000000e+00> : vector<32xf32>
    %10 = vector.multi_reduction <add>, %5, %cst_11 [1] : vector<32x128xf32> to vector<32xf32>
    %11 = vector.shape_cast %10 : vector<32xf32> to vector<32x1xf32>
    %cst_12 = arith.constant dense<0.000000e+00> : vector<32xf32>
    %12 = vector.multi_reduction <add>, %8, %cst_12 [1] : vector<32x128xf32> to vector<32xf32>
    %13 = vector.shape_cast %12 : vector<32xf32> to vector<32x1xf32>
    %14 = arith.addf %11, %13 : vector<32x1xf32>
    %15 = arith.addf %9, %14 : vector<32x1xf32>
    %c0_13 = arith.constant 0 : index
    %c0_14 = arith.constant 0 : index
    %16 = vector.load %arg9[%c0_13, %c0_14] : memref<32x1xf32, #tpu.memory_space<vmem>>, vector<32x1xf32>
    tpu.vector_store %arg9[%c0_13, %c0_14], %15 {strides = array<i32>} : memref<32x1xf32, #tpu.memory_space<vmem>>, vector<32x1xf32>,
    %c0_15 = arith.constant 0 : index
    %c0_16 = arith.constant 0 : index
    %17 = vector.load %arg10[%c0_15, %c0_16] : memref<32x1xf32, #tpu.memory_space<vmem>>, vector<32x1xf32>
    %18 = arith.mulf %5, %5 : vector<32x128xf32>
    %cst_17 = arith.constant dense<0.000000e+00> : vector<32xf32>
    %19 = vector.multi_reduction <add>, %18, %cst_17 [1] : vector<32x128xf32> to vector<32xf32>
    %20 = vector.shape_cast %19 : vector<32xf32> to vector<32x1xf32>
    %21 = arith.mulf %8, %8 : vector<32x128xf32>
    %cst_18 = arith.constant dense<0.000000e+00> : vector<32xf32>
    %22 = vector.multi_reduction <add>, %21, %cst_18 [1] : vector<32x128xf32> to vector<32xf32>
    %23 = vector.shape_cast %22 : vector<32xf32> to vector<32x1xf32>
    %24 = arith.addf %20, %23 : vector<32x1xf32>
    %25 = arith.addf %17, %24 : vector<32x1xf32>
    %c0_19 = arith.constant 0 : index
    %c0_20 = arith.constant 0 : index
    %26 = vector.load %arg10[%c0_19, %c0_20] : memref<32x1xf32, #tpu.memory_space<vmem>>, vector<32x1xf32>
    tpu.vector_store %arg10[%c0_19, %c0_20], %25 {strides = array<i32>} : memref<32x1xf32, #tpu.memory_space<vmem>>, vector<32x1xf32>,
    %c128_i32 = arith.constant 128 : i32
    %27 = arith.muli %arg0, %c128_i32 : i32
    %28 = tpu.assume_multiple %27, 128 : i32
    %c0_21 = arith.constant 0 : index
    %29 = arith.index_cast %28 : i32 to index
    %30 = vector.load %arg7[%c0_21, %29] : memref<32x128xf32, #tpu.memory_space<vmem>>, vector<32x128xf32>
    tpu.vector_store %arg7[%c0_21, %29], %5 {strides = array<i32>} : memref<32x128xf32, #tpu.memory_space<vmem>>, vector<32x128xf32>,
    %c0_22 = arith.constant 0 : index
    %31 = arith.index_cast %28 : i32 to index
    %32 = vector.load %arg8[%c0_22, %31] : memref<32x128xf32, #tpu.memory_space<vmem>>, vector<32x128xf32>
    tpu.vector_store %arg8[%c0_22, %31], %8 {strides = array<i32>} : memref<32x128xf32, #tpu.memory_space<vmem>>, vector<32x128xf32>,
    %c0_i32_23 = arith.constant 0 : i32
    %33 = arith.cmpi eq, %arg0, %c0_i32_23 : i32
    %34 = arith.extui %33 : i1 to i32
    %c0_i32_24 = arith.constant 0 : i32
    %35 = arith.cmpi ne, %34, %c0_i32_24 : i32
    scf.if %35 {
      %c0_25 = arith.constant 0 : index
      %c0_26 = arith.constant 0 : index
      %36 = vector.load %arg9[%c0_25, %c0_26] : memref<32x1xf32, #tpu.memory_space<vmem>>, vector<32x1xf32>
      %cst_27 = arith.constant 0.00892857183 : f32
      %37 = vector.broadcast %cst_27 : f32 to vector<32x1xf32>
      %38 = arith.mulf %36, %37 : vector<32x1xf32>
      %c0_28 = arith.constant 0 : index
      %c0_29 = arith.constant 0 : index
      %39 = vector.load %arg10[%c0_28, %c0_29] : memref<32x1xf32, #tpu.memory_space<vmem>>, vector<32x1xf32>
      %cst_30 = arith.constant 0.00892857183 : f32
      %40 = vector.broadcast %cst_30 : f32 to vector<32x1xf32>
      %41 = arith.mulf %39, %40 : vector<32x1xf32>
      %42 = arith.mulf %38, %38 : vector<32x1xf32>
      %43 = arith.subf %41, %42 : vector<32x1xf32>
      %cst_31 = arith.constant 0.000000e+00 : f32
      %44 = vector.broadcast %cst_31 : f32 to vector<32x1xf32>
      %45 = arith.maximumf %43, %44 : vector<32x1xf32>
      %cst_32 = arith.constant 9.99999974E-6 : f32
      %46 = vector.broadcast %cst_32 : f32 to vector<32x1xf32>
      %47 = arith.addf %45, %46 : vector<32x1xf32>
      %48 = math.rsqrt %47 : vector<32x1xf32>
      %c0_33 = arith.constant 0 : index
      %c0_34 = arith.constant 0 : index
      %49 = vector.load %arg5[%c0_33, %c0_34] : memref<32x1xf32, #tpu.memory_space<vmem>>, vector<32x1xf32>
      %50 = arith.mulf %48, %49 : vector<32x1xf32>
      %c0_35 = arith.constant 0 : index
      %c0_36 = arith.constant 0 : index
      %51 = vector.load %arg6[%c0_35, %c0_36] : memref<32x1xf32, #tpu.memory_space<vmem>>, vector<32x1xf32>
      %52 = arith.mulf %38, %50 : vector<32x1xf32>
      %53 = arith.subf %51, %52 : vector<32x1xf32>
      %c0_37 = arith.constant 0 : index
      %c0_38 = arith.constant 0 : index
      %54 = vector.load %arg7[%c0_37, %c0_38] : memref<32x128xf32, #tpu.memory_space<vmem>>, vector<32x128xf32>
      %55 = vector.broadcast %50 : vector<32x1xf32> to vector<32x128xf32>
      %56 = arith.mulf %54, %55 : vector<32x128xf32>
      %57 = vector.broadcast %53 : vector<32x1xf32> to vector<32x128xf32>
      %58 = arith.addf %56, %57 : vector<32x128xf32>
      %cst_39 = arith.constant 0.000000e+00 : f32
      %59 = vector.broadcast %cst_39 : f32 to vector<32x128xf32>
      %60 = arith.cmpf ogt, %58, %59 : vector<32x128xf32>
      %cst_40 = arith.constant 0.000000e+00 : f32
      %61 = vector.broadcast %cst_40 : f32 to vector<32x128xf32>
      %62 = arith.minimumf %58, %61 : vector<32x128xf32>
      %63 = math.exp %62 : vector<32x128xf32>
      %cst_41 = arith.constant 1.000000e+00 : f32
      %64 = vector.broadcast %cst_41 : f32 to vector<32x128xf32>
      %65 = arith.subf %63, %64 : vector<32x128xf32>
      %66 = arith.select %60, %58, %65 : vector<32x128xi1>, vector<32x128xf32>
      %c0_42 = arith.constant 0 : index
      %c0_43 = arith.constant 0 : index
      %67 = vector.load %arg7[%c0_42, %c0_43] : memref<32x128xf32, #tpu.memory_space<vmem>>, vector<32x128xf32>
      tpu.vector_store %arg7[%c0_42, %c0_43], %66 {strides = array<i32>} : memref<32x128xf32, #tpu.memory_space<vmem>>, vector<32x128xf32>,
      %c0_44 = arith.constant 0 : index
      %c0_45 = arith.constant 0 : index
      %68 = vector.load %arg8[%c0_44, %c0_45] : memref<32x128xf32, #tpu.memory_space<vmem>>, vector<32x128xf32>
      %69 = vector.broadcast %50 : vector<32x1xf32> to vector<32x128xf32>
      %70 = arith.mulf %68, %69 : vector<32x128xf32>
      %71 = vector.broadcast %53 : vector<32x1xf32> to vector<32x128xf32>
      %72 = arith.addf %70, %71 : vector<32x128xf32>
      %cst_46 = arith.constant 0.000000e+00 : f32
      %73 = vector.broadcast %cst_46 : f32 to vector<32x128xf32>
      %74 = arith.cmpf ogt, %72, %73 : vector<32x128xf32>
      %cst_47 = arith.constant 0.000000e+00 : f32
      %75 = vector.broadcast %cst_47 : f32 to vector<32x128xf32>
      %76 = arith.minimumf %72, %75 : vector<32x128xf32>
      %77 = math.exp %76 : vector<32x128xf32>
      %cst_48 = arith.constant 1.000000e+00 : f32
      %78 = vector.broadcast %cst_48 : f32 to vector<32x128xf32>
      %79 = arith.subf %77, %78 : vector<32x128xf32>
      %80 = arith.select %74, %72, %79 : vector<32x128xi1>, vector<32x128xf32>
      %c0_49 = arith.constant 0 : index
      %c0_50 = arith.constant 0 : index
      %81 = vector.load %arg8[%c0_49, %c0_50] : memref<32x128xf32, #tpu.memory_space<vmem>>, vector<32x128xf32>
      tpu.vector_store %arg8[%c0_49, %c0_50], %80 {strides = array<i32>} : memref<32x128xf32, #tpu.memory_space<vmem>>, vector<32x128xf32>,
    } else {
    }
    return
  }
  func.func @transform_0(%arg0: i32) -> (i32, i32) {
    %c0_i32 = arith.constant 0 : i32
    %c0_i32_0 = arith.constant 0 : i32
    return %c0_i32, %arg0 : i32, i32
  }
  func.func @transform_1(%arg0: i32) -> (i32, i32) {
    %c0_i32 = arith.constant 0 : i32
    %c0_i32_0 = arith.constant 0 : i32
    return %c0_i32, %arg0 : i32, i32
  }
  func.func @transform_2(%arg0: i32) -> (i32, i32) {
    %c0_i32 = arith.constant 0 : i32
    %c0_i32_0 = arith.constant 0 : i32
    %c0_i32_1 = arith.constant 0 : i32
    return %c0_i32, %c0_i32_0 : i32, i32
  }
  func.func @transform_3(%arg0: i32) -> (i32, i32) {
    %c0_i32 = arith.constant 0 : i32
    %c0_i32_0 = arith.constant 0 : i32
    %c0_i32_1 = arith.constant 0 : i32
    return %c0_i32, %c0_i32_0 : i32, i32
  }
  func.func @transform_4(%arg0: i32) -> (i32, i32) {
    %c0_i32 = arith.constant 0 : i32
    %c0_i32_0 = arith.constant 0 : i32
    %c0_i32_1 = arith.constant 0 : i32
    return %c0_i32, %c0_i32_0 : i32, i32
  }
  func.func @transform_5(%arg0: i32) -> (i32, i32) {
    %c0_i32 = arith.constant 0 : i32
    %c0_i32_0 = arith.constant 0 : i32
    %c0_i32_1 = arith.constant 0 : i32
    return %c0_i32, %c0_i32_0 : i32, i32
  }
  func.func @transform_6(%arg0: i32) -> (i32, i32) {
    %c0_i32 = arith.constant 0 : i32
    %c0_i32_0 = arith.constant 0 : i32
    %c0_i32_1 = arith.constant 0 : i32
    return %c0_i32, %c0_i32_0 : i32, i32
  }
  func.func @transform_7(%arg0: i32) -> (i32, i32) {
    %c0_i32 = arith.constant 0 : i32
    %c0_i32_0 = arith.constant 0 : i32
    %c0_i32_1 = arith.constant 0 : i32
    return %c0_i32, %c0_i32_0 : i32, i32
  }
}

module attributes {stable_mosaic.version = 11 : i64} {
  func.func @_dec_kernel(%arg0: i32, %arg1: memref<384x128xbf16, #tpu.memory_space<vmem>>, %arg2: memref<256x128xbf16, #tpu.memory_space<vmem>>, %arg3: memref<32x384xbf16, #tpu.memory_space<vmem>>, %arg4: memref<32x256xbf16, #tpu.memory_space<vmem>>, %arg5: memref<32x1xf32, #tpu.memory_space<vmem>>, %arg6: memref<32x1xf32, #tpu.memory_space<vmem>>, %arg7: memref<32x128xf32, #tpu.memory_space<vmem>>, %arg8: memref<32x128xf32, #tpu.memory_space<vmem>>, %arg9: memref<32x1xf32, #tpu.memory_space<vmem>>, %arg10: memref<32x1xf32, #tpu.memory_space<vmem>>) attributes {dimension_semantics = [#tpu.dimension_semantics<arbitrary>], iteration_bounds = array<i64: 1>, scalar_prefetch = 0 : i64, scratch_operands = 2 : i64, tpu.core_type = #tpu.core_type<tc>, window_params = [{transform_indices = @transform_0, window_bounds = array<i64: 384, 128>}, {transform_indices = @transform_1, window_bounds = array<i64: 256, 128>}, {pipeline_mode = #tpu.pipeline_mode<synchronous>, transform_indices = @transform_2, window_bounds = array<i64: 32, 384>}, {pipeline_mode = #tpu.pipeline_mode<synchronous>, transform_indices = @transform_3, window_bounds = array<i64: 32, 256>}, {pipeline_mode = #tpu.pipeline_mode<synchronous>, transform_indices = @transform_4, window_bounds = array<i64: 32, 1>}, {pipeline_mode = #tpu.pipeline_mode<synchronous>, transform_indices = @transform_5, window_bounds = array<i64: 32, 1>}, {pipeline_mode = #tpu.pipeline_mode<synchronous>, transform_indices = @transform_6, window_bounds = array<i64: 32, 128>}, {pipeline_mode = #tpu.pipeline_mode<synchronous>, transform_indices = @transform_7, window_bounds = array<i64: 32, 128>}]} {
    %c0_i32 = arith.constant 0 : i32
    %0 = arith.cmpi eq, %arg0, %c0_i32 : i32
    %1 = arith.extui %0 : i1 to i32
    %c0_i32_0 = arith.constant 0 : i32
    %2 = arith.cmpi ne, %1, %c0_i32_0 : i32
    scf.if %2 {
      %cst_25 = arith.constant 0.000000e+00 : f32
      %36 = vector.broadcast %cst_25 : f32 to vector<32x1xf32>
      %c0_26 = arith.constant 0 : index
      %c0_27 = arith.constant 0 : index
      %37 = vector.load %arg9[%c0_26, %c0_27] : memref<32x1xf32, #tpu.memory_space<vmem>>, vector<32x1xf32>
      tpu.vector_store %arg9[%c0_26, %c0_27], %36 {strides = array<i32>} : memref<32x1xf32, #tpu.memory_space<vmem>>, vector<32x1xf32>,
      %cst_28 = arith.constant 0.000000e+00 : f32
      %38 = vector.broadcast %cst_28 : f32 to vector<32x1xf32>
      %c0_29 = arith.constant 0 : index
      %c0_30 = arith.constant 0 : index
      %39 = vector.load %arg10[%c0_29, %c0_30] : memref<32x1xf32, #tpu.memory_space<vmem>>, vector<32x1xf32>
      tpu.vector_store %arg10[%c0_29, %c0_30], %38 {strides = array<i32>} : memref<32x1xf32, #tpu.memory_space<vmem>>, vector<32x1xf32>,
    } else {
    }
    %c0 = arith.constant 0 : index
    %c0_1 = arith.constant 0 : index
    %3 = vector.load %arg3[%c0, %c0_1] : memref<32x384xbf16, #tpu.memory_space<vmem>>, vector<32x384xbf16>
    %c0_2 = arith.constant 0 : index
    %c0_3 = arith.constant 0 : index
    %4 = vector.load %arg1[%c0_2, %c0_3] : memref<384x128xbf16, #tpu.memory_space<vmem>>, vector<384x128xbf16>
    %cst = arith.constant dense<0.000000e+00> : vector<32x128xf32>
    %5 = tpu.matmul %3, %4, %cst {dimension_numbers = #tpu.dot_dimension_numbers<[1], [0], [0], [1], [0, 0, 1, 1], [], []>} : vector<32x384xbf16>, vector<384x128xbf16>, vector<32x128xf32> -> vector<32x128xf32>
    %c0_4 = arith.constant 0 : index
    %c0_5 = arith.constant 0 : index
    %6 = vector.load %arg4[%c0_4, %c0_5] : memref<32x256xbf16, #tpu.memory_space<vmem>>, vector<32x256xbf16>
    %c0_6 = arith.constant 0 : index
    %c0_7 = arith.constant 0 : index
    %7 = vector.load %arg2[%c0_6, %c0_7] : memref<256x128xbf16, #tpu.memory_space<vmem>>, vector<256x128xbf16>
    %cst_8 = arith.constant dense<0.000000e+00> : vector<32x128xf32>
    %8 = tpu.matmul %6, %7, %cst_8 {dimension_numbers = #tpu.dot_dimension_numbers<[1], [0], [0], [1], [0, 0, 1, 1], [], []>} : vector<32x256xbf16>, vector<256x128xbf16>, vector<32x128xf32> -> vector<32x128xf32>
    %c0_9 = arith.constant 0 : index
    %c0_10 = arith.constant 0 : index
    %9 = vector.load %arg9[%c0_9, %c0_10] : memref<32x1xf32, #tpu.memory_space<vmem>>, vector<32x1xf32>
    %cst_11 = arith.constant dense<0.000000e+00> : vector<32xf32>
    %10 = vector.multi_reduction <add>, %5, %cst_11 [1] : vector<32x128xf32> to vector<32xf32>
    %11 = vector.shape_cast %10 : vector<32xf32> to vector<32x1xf32>
    %cst_12 = arith.constant dense<0.000000e+00> : vector<32xf32>
    %12 = vector.multi_reduction <add>, %8, %cst_12 [1] : vector<32x128xf32> to vector<32xf32>
    %13 = vector.shape_cast %12 : vector<32xf32> to vector<32x1xf32>
    %14 = arith.addf %11, %13 : vector<32x1xf32>
    %15 = arith.addf %9, %14 : vector<32x1xf32>
    %c0_13 = arith.constant 0 : index
    %c0_14 = arith.constant 0 : index
    %16 = vector.load %arg9[%c0_13, %c0_14] : memref<32x1xf32, #tpu.memory_space<vmem>>, vector<32x1xf32>
    tpu.vector_store %arg9[%c0_13, %c0_14], %15 {strides = array<i32>} : memref<32x1xf32, #tpu.memory_space<vmem>>, vector<32x1xf32>,
    %c0_15 = arith.constant 0 : index
    %c0_16 = arith.constant 0 : index
    %17 = vector.load %arg10[%c0_15, %c0_16] : memref<32x1xf32, #tpu.memory_space<vmem>>, vector<32x1xf32>
    %18 = arith.mulf %5, %5 : vector<32x128xf32>
    %cst_17 = arith.constant dense<0.000000e+00> : vector<32xf32>
    %19 = vector.multi_reduction <add>, %18, %cst_17 [1] : vector<32x128xf32> to vector<32xf32>
    %20 = vector.shape_cast %19 : vector<32xf32> to vector<32x1xf32>
    %21 = arith.mulf %8, %8 : vector<32x128xf32>
    %cst_18 = arith.constant dense<0.000000e+00> : vector<32xf32>
    %22 = vector.multi_reduction <add>, %21, %cst_18 [1] : vector<32x128xf32> to vector<32xf32>
    %23 = vector.shape_cast %22 : vector<32xf32> to vector<32x1xf32>
    %24 = arith.addf %20, %23 : vector<32x1xf32>
    %25 = arith.addf %17, %24 : vector<32x1xf32>
    %c0_19 = arith.constant 0 : index
    %c0_20 = arith.constant 0 : index
    %26 = vector.load %arg10[%c0_19, %c0_20] : memref<32x1xf32, #tpu.memory_space<vmem>>, vector<32x1xf32>
    tpu.vector_store %arg10[%c0_19, %c0_20], %25 {strides = array<i32>} : memref<32x1xf32, #tpu.memory_space<vmem>>, vector<32x1xf32>,
    %c128_i32 = arith.constant 128 : i32
    %27 = arith.muli %arg0, %c128_i32 : i32
    %28 = tpu.assume_multiple %27, 128 : i32
    %c0_21 = arith.constant 0 : index
    %29 = arith.index_cast %28 : i32 to index
    %30 = vector.load %arg7[%c0_21, %29] : memref<32x128xf32, #tpu.memory_space<vmem>>, vector<32x128xf32>
    tpu.vector_store %arg7[%c0_21, %29], %5 {strides = array<i32>} : memref<32x128xf32, #tpu.memory_space<vmem>>, vector<32x128xf32>,
    %c0_22 = arith.constant 0 : index
    %31 = arith.index_cast %28 : i32 to index
    %32 = vector.load %arg8[%c0_22, %31] : memref<32x128xf32, #tpu.memory_space<vmem>>, vector<32x128xf32>
    tpu.vector_store %arg8[%c0_22, %31], %8 {strides = array<i32>} : memref<32x128xf32, #tpu.memory_space<vmem>>, vector<32x128xf32>,
    %c0_i32_23 = arith.constant 0 : i32
    %33 = arith.cmpi eq, %arg0, %c0_i32_23 : i32
    %34 = arith.extui %33 : i1 to i32
    %c0_i32_24 = arith.constant 0 : i32
    %35 = arith.cmpi ne, %34, %c0_i32_24 : i32
    scf.if %35 {
      %c0_25 = arith.constant 0 : index
      %c0_26 = arith.constant 0 : index
      %36 = vector.load %arg9[%c0_25, %c0_26] : memref<32x1xf32, #tpu.memory_space<vmem>>, vector<32x1xf32>
      %cst_27 = arith.constant 0.00416666688 : f32
      %37 = vector.broadcast %cst_27 : f32 to vector<32x1xf32>
      %38 = arith.mulf %36, %37 : vector<32x1xf32>
      %c0_28 = arith.constant 0 : index
      %c0_29 = arith.constant 0 : index
      %39 = vector.load %arg10[%c0_28, %c0_29] : memref<32x1xf32, #tpu.memory_space<vmem>>, vector<32x1xf32>
      %cst_30 = arith.constant 0.00416666688 : f32
      %40 = vector.broadcast %cst_30 : f32 to vector<32x1xf32>
      %41 = arith.mulf %39, %40 : vector<32x1xf32>
      %42 = arith.mulf %38, %38 : vector<32x1xf32>
      %43 = arith.subf %41, %42 : vector<32x1xf32>
      %cst_31 = arith.constant 0.000000e+00 : f32
      %44 = vector.broadcast %cst_31 : f32 to vector<32x1xf32>
      %45 = arith.maximumf %43, %44 : vector<32x1xf32>
      %cst_32 = arith.constant 9.99999974E-6 : f32
      %46 = vector.broadcast %cst_32 : f32 to vector<32x1xf32>
      %47 = arith.addf %45, %46 : vector<32x1xf32>
      %48 = math.rsqrt %47 : vector<32x1xf32>
      %c0_33 = arith.constant 0 : index
      %c0_34 = arith.constant 0 : index
      %49 = vector.load %arg5[%c0_33, %c0_34] : memref<32x1xf32, #tpu.memory_space<vmem>>, vector<32x1xf32>
      %50 = arith.mulf %48, %49 : vector<32x1xf32>
      %c0_35 = arith.constant 0 : index
      %c0_36 = arith.constant 0 : index
      %51 = vector.load %arg6[%c0_35, %c0_36] : memref<32x1xf32, #tpu.memory_space<vmem>>, vector<32x1xf32>
      %52 = arith.mulf %38, %50 : vector<32x1xf32>
      %53 = arith.subf %51, %52 : vector<32x1xf32>
      %c0_37 = arith.constant 0 : index
      %c0_38 = arith.constant 0 : index
      %54 = vector.load %arg7[%c0_37, %c0_38] : memref<32x128xf32, #tpu.memory_space<vmem>>, vector<32x128xf32>
      %55 = vector.broadcast %50 : vector<32x1xf32> to vector<32x128xf32>
      %56 = arith.mulf %54, %55 : vector<32x128xf32>
      %57 = vector.broadcast %53 : vector<32x1xf32> to vector<32x128xf32>
      %58 = arith.addf %56, %57 : vector<32x128xf32>
      %cst_39 = arith.constant 0.000000e+00 : f32
      %59 = vector.broadcast %cst_39 : f32 to vector<32x128xf32>
      %60 = arith.cmpf ogt, %58, %59 : vector<32x128xf32>
      %cst_40 = arith.constant 0.000000e+00 : f32
      %61 = vector.broadcast %cst_40 : f32 to vector<32x128xf32>
      %62 = arith.minimumf %58, %61 : vector<32x128xf32>
      %63 = math.exp %62 : vector<32x128xf32>
      %cst_41 = arith.constant 1.000000e+00 : f32
      %64 = vector.broadcast %cst_41 : f32 to vector<32x128xf32>
      %65 = arith.subf %63, %64 : vector<32x128xf32>
      %66 = arith.select %60, %58, %65 : vector<32x128xi1>, vector<32x128xf32>
      %c0_42 = arith.constant 0 : index
      %c0_43 = arith.constant 0 : index
      %67 = vector.load %arg7[%c0_42, %c0_43] : memref<32x128xf32, #tpu.memory_space<vmem>>, vector<32x128xf32>
      tpu.vector_store %arg7[%c0_42, %c0_43], %66 {strides = array<i32>} : memref<32x128xf32, #tpu.memory_space<vmem>>, vector<32x128xf32>,
      %c0_44 = arith.constant 0 : index
      %c0_45 = arith.constant 0 : index
      %68 = vector.load %arg8[%c0_44, %c0_45] : memref<32x128xf32, #tpu.memory_space<vmem>>, vector<32x128xf32>
      %69 = vector.broadcast %50 : vector<32x1xf32> to vector<32x128xf32>
      %70 = arith.mulf %68, %69 : vector<32x128xf32>
      %71 = vector.broadcast %53 : vector<32x1xf32> to vector<32x128xf32>
      %72 = arith.addf %70, %71 : vector<32x128xf32>
      %cst_46 = arith.constant 0.000000e+00 : f32
      %73 = vector.broadcast %cst_46 : f32 to vector<32x128xf32>
      %74 = arith.cmpf ogt, %72, %73 : vector<32x128xf32>
      %cst_47 = arith.constant 0.000000e+00 : f32
      %75 = vector.broadcast %cst_47 : f32 to vector<32x128xf32>
      %76 = arith.minimumf %72, %75 : vector<32x128xf32>
      %77 = math.exp %76 : vector<32x128xf32>
      %cst_48 = arith.constant 1.000000e+00 : f32
      %78 = vector.broadcast %cst_48 : f32 to vector<32x128xf32>
      %79 = arith.subf %77, %78 : vector<32x128xf32>
      %80 = arith.select %74, %72, %79 : vector<32x128xi1>, vector<32x128xf32>
      %c0_49 = arith.constant 0 : index
      %c0_50 = arith.constant 0 : index
      %81 = vector.load %arg8[%c0_49, %c0_50] : memref<32x128xf32, #tpu.memory_space<vmem>>, vector<32x128xf32>
      tpu.vector_store %arg8[%c0_49, %c0_50], %80 {strides = array<i32>} : memref<32x128xf32, #tpu.memory_space<vmem>>, vector<32x128xf32>,
    } else {
    }
    return
  }
  func.func @transform_0(%arg0: i32) -> (i32, i32) {
    %c0_i32 = arith.constant 0 : i32
    %c0_i32_0 = arith.constant 0 : i32
    return %c0_i32, %arg0 : i32, i32
  }
  func.func @transform_1(%arg0: i32) -> (i32, i32) {
    %c0_i32 = arith.constant 0 : i32
    %c0_i32_0 = arith.constant 0 : i32
    return %c0_i32, %arg0 : i32, i32
  }
  func.func @transform_2(%arg0: i32) -> (i32, i32) {
    %c0_i32 = arith.constant 0 : i32
    %c0_i32_0 = arith.constant 0 : i32
    %c0_i32_1 = arith.constant 0 : i32
    return %c0_i32, %c0_i32_0 : i32, i32
  }
  func.func @transform_3(%arg0: i32) -> (i32, i32) {
    %c0_i32 = arith.constant 0 : i32
    %c0_i32_0 = arith.constant 0 : i32
    %c0_i32_1 = arith.constant 0 : i32
    return %c0_i32, %c0_i32_0 : i32, i32
  }
  func.func @transform_4(%arg0: i32) -> (i32, i32) {
    %c0_i32 = arith.constant 0 : i32
    %c0_i32_0 = arith.constant 0 : i32
    %c0_i32_1 = arith.constant 0 : i32
    return %c0_i32, %c0_i32_0 : i32, i32
  }
  func.func @transform_5(%arg0: i32) -> (i32, i32) {
    %c0_i32 = arith.constant 0 : i32
    %c0_i32_0 = arith.constant 0 : i32
    %c0_i32_1 = arith.constant 0 : i32
    return %c0_i32, %c0_i32_0 : i32, i32
  }
  func.func @transform_6(%arg0: i32) -> (i32, i32) {
    %c0_i32 = arith.constant 0 : i32
    %c0_i32_0 = arith.constant 0 : i32
    %c0_i32_1 = arith.constant 0 : i32
    return %c0_i32, %c0_i32_0 : i32, i32
  }
  func.func @transform_7(%arg0: i32) -> (i32, i32) {
    %c0_i32 = arith.constant 0 : i32
    %c0_i32_0 = arith.constant 0 : i32
    %c0_i32_1 = arith.constant 0 : i32
    return %c0_i32, %c0_i32_0 : i32, i32
  }
}

module attributes {stable_mosaic.version = 11 : i64} {
  func.func @_dec_kernel(%arg0: i32, %arg1: memref<384x256xbf16, #tpu.memory_space<vmem>>, %arg2: memref<256x256xbf16, #tpu.memory_space<vmem>>, %arg3: memref<16x384xbf16, #tpu.memory_space<vmem>>, %arg4: memref<16x256xbf16, #tpu.memory_space<vmem>>, %arg5: memref<16x1xf32, #tpu.memory_space<vmem>>, %arg6: memref<16x1xf32, #tpu.memory_space<vmem>>, %arg7: memref<16x256xf32, #tpu.memory_space<vmem>>, %arg8: memref<16x256xf32, #tpu.memory_space<vmem>>, %arg9: memref<16x1xf32, #tpu.memory_space<vmem>>, %arg10: memref<16x1xf32, #tpu.memory_space<vmem>>) attributes {dimension_semantics = [#tpu.dimension_semantics<arbitrary>], iteration_bounds = array<i64: 1>, scalar_prefetch = 0 : i64, scratch_operands = 2 : i64, tpu.core_type = #tpu.core_type<tc>, window_params = [{transform_indices = @transform_0, window_bounds = array<i64: 384, 256>}, {transform_indices = @transform_1, window_bounds = array<i64: 256, 256>}, {pipeline_mode = #tpu.pipeline_mode<synchronous>, transform_indices = @transform_2, window_bounds = array<i64: 16, 384>}, {pipeline_mode = #tpu.pipeline_mode<synchronous>, transform_indices = @transform_3, window_bounds = array<i64: 16, 256>}, {pipeline_mode = #tpu.pipeline_mode<synchronous>, transform_indices = @transform_4, window_bounds = array<i64: 16, 1>}, {pipeline_mode = #tpu.pipeline_mode<synchronous>, transform_indices = @transform_5, window_bounds = array<i64: 16, 1>}, {pipeline_mode = #tpu.pipeline_mode<synchronous>, transform_indices = @transform_6, window_bounds = array<i64: 16, 256>}, {pipeline_mode = #tpu.pipeline_mode<synchronous>, transform_indices = @transform_7, window_bounds = array<i64: 16, 256>}]} {
    %c0_i32 = arith.constant 0 : i32
    %0 = arith.cmpi eq, %arg0, %c0_i32 : i32
    %1 = arith.extui %0 : i1 to i32
    %c0_i32_0 = arith.constant 0 : i32
    %2 = arith.cmpi ne, %1, %c0_i32_0 : i32
    scf.if %2 {
      %cst_25 = arith.constant 0.000000e+00 : f32
      %36 = vector.broadcast %cst_25 : f32 to vector<16x1xf32>
      %c0_26 = arith.constant 0 : index
      %c0_27 = arith.constant 0 : index
      %37 = vector.load %arg9[%c0_26, %c0_27] : memref<16x1xf32, #tpu.memory_space<vmem>>, vector<16x1xf32>
      tpu.vector_store %arg9[%c0_26, %c0_27], %36 {strides = array<i32>} : memref<16x1xf32, #tpu.memory_space<vmem>>, vector<16x1xf32>,
      %cst_28 = arith.constant 0.000000e+00 : f32
      %38 = vector.broadcast %cst_28 : f32 to vector<16x1xf32>
      %c0_29 = arith.constant 0 : index
      %c0_30 = arith.constant 0 : index
      %39 = vector.load %arg10[%c0_29, %c0_30] : memref<16x1xf32, #tpu.memory_space<vmem>>, vector<16x1xf32>
      tpu.vector_store %arg10[%c0_29, %c0_30], %38 {strides = array<i32>} : memref<16x1xf32, #tpu.memory_space<vmem>>, vector<16x1xf32>,
    } else {
    }
    %c0 = arith.constant 0 : index
    %c0_1 = arith.constant 0 : index
    %3 = vector.load %arg3[%c0, %c0_1] : memref<16x384xbf16, #tpu.memory_space<vmem>>, vector<16x384xbf16>
    %c0_2 = arith.constant 0 : index
    %c0_3 = arith.constant 0 : index
    %4 = vector.load %arg1[%c0_2, %c0_3] : memref<384x256xbf16, #tpu.memory_space<vmem>>, vector<384x256xbf16>
    %cst = arith.constant dense<0.000000e+00> : vector<16x256xf32>
    %5 = tpu.matmul %3, %4, %cst {dimension_numbers = #tpu.dot_dimension_numbers<[1], [0], [0], [1], [0, 0, 1, 1], [], []>} : vector<16x384xbf16>, vector<384x256xbf16>, vector<16x256xf32> -> vector<16x256xf32>
    %c0_4 = arith.constant 0 : index
    %c0_5 = arith.constant 0 : index
    %6 = vector.load %arg4[%c0_4, %c0_5] : memref<16x256xbf16, #tpu.memory_space<vmem>>, vector<16x256xbf16>
    %c0_6 = arith.constant 0 : index
    %c0_7 = arith.constant 0 : index
    %7 = vector.load %arg2[%c0_6, %c0_7] : memref<256x256xbf16, #tpu.memory_space<vmem>>, vector<256x256xbf16>
    %cst_8 = arith.constant dense<0.000000e+00> : vector<16x256xf32>
    %8 = tpu.matmul %6, %7, %cst_8 {dimension_numbers = #tpu.dot_dimension_numbers<[1], [0], [0], [1], [0, 0, 1, 1], [], []>} : vector<16x256xbf16>, vector<256x256xbf16>, vector<16x256xf32> -> vector<16x256xf32>
    %c0_9 = arith.constant 0 : index
    %c0_10 = arith.constant 0 : index
    %9 = vector.load %arg9[%c0_9, %c0_10] : memref<16x1xf32, #tpu.memory_space<vmem>>, vector<16x1xf32>
    %cst_11 = arith.constant dense<0.000000e+00> : vector<16xf32>
    %10 = vector.multi_reduction <add>, %5, %cst_11 [1] : vector<16x256xf32> to vector<16xf32>
    %11 = vector.shape_cast %10 : vector<16xf32> to vector<16x1xf32>
    %cst_12 = arith.constant dense<0.000000e+00> : vector<16xf32>
    %12 = vector.multi_reduction <add>, %8, %cst_12 [1] : vector<16x256xf32> to vector<16xf32>
    %13 = vector.shape_cast %12 : vector<16xf32> to vector<16x1xf32>
    %14 = arith.addf %11, %13 : vector<16x1xf32>
    %15 = arith.addf %9, %14 : vector<16x1xf32>
    %c0_13 = arith.constant 0 : index
    %c0_14 = arith.constant 0 : index
    %16 = vector.load %arg9[%c0_13, %c0_14] : memref<16x1xf32, #tpu.memory_space<vmem>>, vector<16x1xf32>
    tpu.vector_store %arg9[%c0_13, %c0_14], %15 {strides = array<i32>} : memref<16x1xf32, #tpu.memory_space<vmem>>, vector<16x1xf32>,
    %c0_15 = arith.constant 0 : index
    %c0_16 = arith.constant 0 : index
    %17 = vector.load %arg10[%c0_15, %c0_16] : memref<16x1xf32, #tpu.memory_space<vmem>>, vector<16x1xf32>
    %18 = arith.mulf %5, %5 : vector<16x256xf32>
    %cst_17 = arith.constant dense<0.000000e+00> : vector<16xf32>
    %19 = vector.multi_reduction <add>, %18, %cst_17 [1] : vector<16x256xf32> to vector<16xf32>
    %20 = vector.shape_cast %19 : vector<16xf32> to vector<16x1xf32>
    %21 = arith.mulf %8, %8 : vector<16x256xf32>
    %cst_18 = arith.constant dense<0.000000e+00> : vector<16xf32>
    %22 = vector.multi_reduction <add>, %21, %cst_18 [1] : vector<16x256xf32> to vector<16xf32>
    %23 = vector.shape_cast %22 : vector<16xf32> to vector<16x1xf32>
    %24 = arith.addf %20, %23 : vector<16x1xf32>
    %25 = arith.addf %17, %24 : vector<16x1xf32>
    %c0_19 = arith.constant 0 : index
    %c0_20 = arith.constant 0 : index
    %26 = vector.load %arg10[%c0_19, %c0_20] : memref<16x1xf32, #tpu.memory_space<vmem>>, vector<16x1xf32>
    tpu.vector_store %arg10[%c0_19, %c0_20], %25 {strides = array<i32>} : memref<16x1xf32, #tpu.memory_space<vmem>>, vector<16x1xf32>,
    %c256_i32 = arith.constant 256 : i32
    %27 = arith.muli %arg0, %c256_i32 : i32
    %28 = tpu.assume_multiple %27, 128 : i32
    %c0_21 = arith.constant 0 : index
    %29 = arith.index_cast %28 : i32 to index
    %30 = vector.load %arg7[%c0_21, %29] : memref<16x256xf32, #tpu.memory_space<vmem>>, vector<16x256xf32>
    tpu.vector_store %arg7[%c0_21, %29], %5 {strides = array<i32>} : memref<16x256xf32, #tpu.memory_space<vmem>>, vector<16x256xf32>,
    %c0_22 = arith.constant 0 : index
    %31 = arith.index_cast %28 : i32 to index
    %32 = vector.load %arg8[%c0_22, %31] : memref<16x256xf32, #tpu.memory_space<vmem>>, vector<16x256xf32>
    tpu.vector_store %arg8[%c0_22, %31], %8 {strides = array<i32>} : memref<16x256xf32, #tpu.memory_space<vmem>>, vector<16x256xf32>,
    %c0_i32_23 = arith.constant 0 : i32
    %33 = arith.cmpi eq, %arg0, %c0_i32_23 : i32
    %34 = arith.extui %33 : i1 to i32
    %c0_i32_24 = arith.constant 0 : i32
    %35 = arith.cmpi ne, %34, %c0_i32_24 : i32
    scf.if %35 {
      %c0_25 = arith.constant 0 : index
      %c0_26 = arith.constant 0 : index
      %36 = vector.load %arg9[%c0_25, %c0_26] : memref<16x1xf32, #tpu.memory_space<vmem>>, vector<16x1xf32>
      %cst_27 = arith.constant 0.00201612897 : f32
      %37 = vector.broadcast %cst_27 : f32 to vector<16x1xf32>
      %38 = arith.mulf %36, %37 : vector<16x1xf32>
      %c0_28 = arith.constant 0 : index
      %c0_29 = arith.constant 0 : index
      %39 = vector.load %arg10[%c0_28, %c0_29] : memref<16x1xf32, #tpu.memory_space<vmem>>, vector<16x1xf32>
      %cst_30 = arith.constant 0.00201612897 : f32
      %40 = vector.broadcast %cst_30 : f32 to vector<16x1xf32>
      %41 = arith.mulf %39, %40 : vector<16x1xf32>
      %42 = arith.mulf %38, %38 : vector<16x1xf32>
      %43 = arith.subf %41, %42 : vector<16x1xf32>
      %cst_31 = arith.constant 0.000000e+00 : f32
      %44 = vector.broadcast %cst_31 : f32 to vector<16x1xf32>
      %45 = arith.maximumf %43, %44 : vector<16x1xf32>
      %cst_32 = arith.constant 9.99999974E-6 : f32
      %46 = vector.broadcast %cst_32 : f32 to vector<16x1xf32>
      %47 = arith.addf %45, %46 : vector<16x1xf32>
      %48 = math.rsqrt %47 : vector<16x1xf32>
      %c0_33 = arith.constant 0 : index
      %c0_34 = arith.constant 0 : index
      %49 = vector.load %arg5[%c0_33, %c0_34] : memref<16x1xf32, #tpu.memory_space<vmem>>, vector<16x1xf32>
      %50 = arith.mulf %48, %49 : vector<16x1xf32>
      %c0_35 = arith.constant 0 : index
      %c0_36 = arith.constant 0 : index
      %51 = vector.load %arg6[%c0_35, %c0_36] : memref<16x1xf32, #tpu.memory_space<vmem>>, vector<16x1xf32>
      %52 = arith.mulf %38, %50 : vector<16x1xf32>
      %53 = arith.subf %51, %52 : vector<16x1xf32>
      %c0_37 = arith.constant 0 : index
      %c0_38 = arith.constant 0 : index
      %54 = vector.load %arg7[%c0_37, %c0_38] : memref<16x256xf32, #tpu.memory_space<vmem>>, vector<16x256xf32>
      %55 = vector.broadcast %50 : vector<16x1xf32> to vector<16x256xf32>
      %56 = arith.mulf %54, %55 : vector<16x256xf32>
      %57 = vector.broadcast %53 : vector<16x1xf32> to vector<16x256xf32>
      %58 = arith.addf %56, %57 : vector<16x256xf32>
      %cst_39 = arith.constant 0.000000e+00 : f32
      %59 = vector.broadcast %cst_39 : f32 to vector<16x256xf32>
      %60 = arith.cmpf ogt, %58, %59 : vector<16x256xf32>
      %cst_40 = arith.constant 0.000000e+00 : f32
      %61 = vector.broadcast %cst_40 : f32 to vector<16x256xf32>
      %62 = arith.minimumf %58, %61 : vector<16x256xf32>
      %63 = math.exp %62 : vector<16x256xf32>
      %cst_41 = arith.constant 1.000000e+00 : f32
      %64 = vector.broadcast %cst_41 : f32 to vector<16x256xf32>
      %65 = arith.subf %63, %64 : vector<16x256xf32>
      %66 = arith.select %60, %58, %65 : vector<16x256xi1>, vector<16x256xf32>
      %c0_42 = arith.constant 0 : index
      %c0_43 = arith.constant 0 : index
      %67 = vector.load %arg7[%c0_42, %c0_43] : memref<16x256xf32, #tpu.memory_space<vmem>>, vector<16x256xf32>
      tpu.vector_store %arg7[%c0_42, %c0_43], %66 {strides = array<i32>} : memref<16x256xf32, #tpu.memory_space<vmem>>, vector<16x256xf32>,
      %c0_44 = arith.constant 0 : index
      %c0_45 = arith.constant 0 : index
      %68 = vector.load %arg8[%c0_44, %c0_45] : memref<16x256xf32, #tpu.memory_space<vmem>>, vector<16x256xf32>
      %69 = vector.broadcast %50 : vector<16x1xf32> to vector<16x256xf32>
      %70 = arith.mulf %68, %69 : vector<16x256xf32>
      %71 = vector.broadcast %53 : vector<16x1xf32> to vector<16x256xf32>
      %72 = arith.addf %70, %71 : vector<16x256xf32>
      %cst_46 = arith.constant 0.000000e+00 : f32
      %73 = vector.broadcast %cst_46 : f32 to vector<16x256xf32>
      %74 = arith.cmpf ogt, %72, %73 : vector<16x256xf32>
      %cst_47 = arith.constant 0.000000e+00 : f32
      %75 = vector.broadcast %cst_47 : f32 to vector<16x256xf32>
      %76 = arith.minimumf %72, %75 : vector<16x256xf32>
      %77 = math.exp %76 : vector<16x256xf32>
      %cst_48 = arith.constant 1.000000e+00 : f32
      %78 = vector.broadcast %cst_48 : f32 to vector<16x256xf32>
      %79 = arith.subf %77, %78 : vector<16x256xf32>
      %80 = arith.select %74, %72, %79 : vector<16x256xi1>, vector<16x256xf32>
      %c0_49 = arith.constant 0 : index
      %c0_50 = arith.constant 0 : index
      %81 = vector.load %arg8[%c0_49, %c0_50] : memref<16x256xf32, #tpu.memory_space<vmem>>, vector<16x256xf32>
      tpu.vector_store %arg8[%c0_49, %c0_50], %80 {strides = array<i32>} : memref<16x256xf32, #tpu.memory_space<vmem>>, vector<16x256xf32>,
    } else {
    }
    return
  }
  func.func @transform_0(%arg0: i32) -> (i32, i32) {
    %c0_i32 = arith.constant 0 : i32
    %c0_i32_0 = arith.constant 0 : i32
    return %c0_i32, %arg0 : i32, i32
  }
  func.func @transform_1(%arg0: i32) -> (i32, i32) {
    %c0_i32 = arith.constant 0 : i32
    %c0_i32_0 = arith.constant 0 : i32
    return %c0_i32, %arg0 : i32, i32
  }
  func.func @transform_2(%arg0: i32) -> (i32, i32) {
    %c0_i32 = arith.constant 0 : i32
    %c0_i32_0 = arith.constant 0 : i32
    %c0_i32_1 = arith.constant 0 : i32
    return %c0_i32, %c0_i32_0 : i32, i32
  }
  func.func @transform_3(%arg0: i32) -> (i32, i32) {
    %c0_i32 = arith.constant 0 : i32
    %c0_i32_0 = arith.constant 0 : i32
    %c0_i32_1 = arith.constant 0 : i32
    return %c0_i32, %c0_i32_0 : i32, i32
  }
  func.func @transform_4(%arg0: i32) -> (i32, i32) {
    %c0_i32 = arith.constant 0 : i32
    %c0_i32_0 = arith.constant 0 : i32
    %c0_i32_1 = arith.constant 0 : i32
    return %c0_i32, %c0_i32_0 : i32, i32
  }
  func.func @transform_5(%arg0: i32) -> (i32, i32) {
    %c0_i32 = arith.constant 0 : i32
    %c0_i32_0 = arith.constant 0 : i32
    %c0_i32_1 = arith.constant 0 : i32
    return %c0_i32, %c0_i32_0 : i32, i32
  }
  func.func @transform_6(%arg0: i32) -> (i32, i32) {
    %c0_i32 = arith.constant 0 : i32
    %c0_i32_0 = arith.constant 0 : i32
    %c0_i32_1 = arith.constant 0 : i32
    return %c0_i32, %c0_i32_0 : i32, i32
  }
  func.func @transform_7(%arg0: i32) -> (i32, i32) {
    %c0_i32 = arith.constant 0 : i32
    %c0_i32_0 = arith.constant 0 : i32
    %c0_i32_1 = arith.constant 0 : i32
    return %c0_i32, %c0_i32_0 : i32, i32
  }
}

module attributes {stable_mosaic.version = 11 : i64} {
  func.func @_dec_kernel(%arg0: i32, %arg1: memref<192x384xbf16, #tpu.memory_space<vmem>>, %arg2: memref<128x384xbf16, #tpu.memory_space<vmem>>, %arg3: memref<16x192xbf16, #tpu.memory_space<vmem>>, %arg4: memref<16x128xbf16, #tpu.memory_space<vmem>>, %arg5: memref<16x1xf32, #tpu.memory_space<vmem>>, %arg6: memref<16x1xf32, #tpu.memory_space<vmem>>, %arg7: memref<16x768xf32, #tpu.memory_space<vmem>>, %arg8: memref<16x768xf32, #tpu.memory_space<vmem>>, %arg9: memref<16x1xf32, #tpu.memory_space<vmem>>, %arg10: memref<16x1xf32, #tpu.memory_space<vmem>>) attributes {dimension_semantics = [#tpu.dimension_semantics<arbitrary>], iteration_bounds = array<i64: 2>, scalar_prefetch = 0 : i64, scratch_operands = 2 : i64, tpu.core_type = #tpu.core_type<tc>, window_params = [{transform_indices = @transform_0, window_bounds = array<i64: 192, 384>}, {transform_indices = @transform_1, window_bounds = array<i64: 128, 384>}, {pipeline_mode = #tpu.pipeline_mode<synchronous>, transform_indices = @transform_2, window_bounds = array<i64: 16, 192>}, {pipeline_mode = #tpu.pipeline_mode<synchronous>, transform_indices = @transform_3, window_bounds = array<i64: 16, 128>}, {pipeline_mode = #tpu.pipeline_mode<synchronous>, transform_indices = @transform_4, window_bounds = array<i64: 16, 1>}, {pipeline_mode = #tpu.pipeline_mode<synchronous>, transform_indices = @transform_5, window_bounds = array<i64: 16, 1>}, {pipeline_mode = #tpu.pipeline_mode<synchronous>, transform_indices = @transform_6, window_bounds = array<i64: 16, 768>}, {pipeline_mode = #tpu.pipeline_mode<synchronous>, transform_indices = @transform_7, window_bounds = array<i64: 16, 768>}]} {
    %c0_i32 = arith.constant 0 : i32
    %0 = arith.cmpi eq, %arg0, %c0_i32 : i32
    %1 = arith.extui %0 : i1 to i32
    %c0_i32_0 = arith.constant 0 : i32
    %2 = arith.cmpi ne, %1, %c0_i32_0 : i32
    scf.if %2 {
      %cst_24 = arith.constant 0.000000e+00 : f32
      %36 = vector.broadcast %cst_24 : f32 to vector<16x1xf32>
      %c0_25 = arith.constant 0 : index
      %c0_26 = arith.constant 0 : index
      %37 = vector.load %arg9[%c0_25, %c0_26] : memref<16x1xf32, #tpu.memory_space<vmem>>, vector<16x1xf32>
      tpu.vector_store %arg9[%c0_25, %c0_26], %36 {strides = array<i32>} : memref<16x1xf32, #tpu.memory_space<vmem>>, vector<16x1xf32>,
      %cst_27 = arith.constant 0.000000e+00 : f32
      %38 = vector.broadcast %cst_27 : f32 to vector<16x1xf32>
      %c0_28 = arith.constant 0 : index
      %c0_29 = arith.constant 0 : index
      %39 = vector.load %arg10[%c0_28, %c0_29] : memref<16x1xf32, #tpu.memory_space<vmem>>, vector<16x1xf32>
      tpu.vector_store %arg10[%c0_28, %c0_29], %38 {strides = array<i32>} : memref<16x1xf32, #tpu.memory_space<vmem>>, vector<16x1xf32>,
    } else {
    }
    %c0 = arith.constant 0 : index
    %c0_1 = arith.constant 0 : index
    %3 = vector.load %arg3[%c0, %c0_1] : memref<16x192xbf16, #tpu.memory_space<vmem>>, vector<16x192xbf16>
    %c0_2 = arith.constant 0 : index
    %c0_3 = arith.constant 0 : index
    %4 = vector.load %arg1[%c0_2, %c0_3] : memref<192x384xbf16, #tpu.memory_space<vmem>>, vector<192x384xbf16>
    %cst = arith.constant dense<0.000000e+00> : vector<16x384xf32>
    %5 = tpu.matmul %3, %4, %cst {dimension_numbers = #tpu.dot_dimension_numbers<[1], [0], [0], [1], [0, 0, 1, 1], [], []>} : vector<16x192xbf16>, vector<192x384xbf16>, vector<16x384xf32> -> vector<16x384xf32>
    %c0_4 = arith.constant 0 : index
    %c0_5 = arith.constant 0 : index
    %6 = vector.load %arg4[%c0_4, %c0_5] : memref<16x128xbf16, #tpu.memory_space<vmem>>, vector<16x128xbf16>
    %c0_6 = arith.constant 0 : index
    %c0_7 = arith.constant 0 : index
    %7 = vector.load %arg2[%c0_6, %c0_7] : memref<128x384xbf16, #tpu.memory_space<vmem>>, vector<128x384xbf16>
    %cst_8 = arith.constant dense<0.000000e+00> : vector<16x384xf32>
    %8 = tpu.matmul %6, %7, %cst_8 {dimension_numbers = #tpu.dot_dimension_numbers<[1], [0], [0], [1], [0, 0, 1, 1], [], []>} : vector<16x128xbf16>, vector<128x384xbf16>, vector<16x384xf32> -> vector<16x384xf32>
    %c0_9 = arith.constant 0 : index
    %c0_10 = arith.constant 0 : index
    %9 = vector.load %arg9[%c0_9, %c0_10] : memref<16x1xf32, #tpu.memory_space<vmem>>, vector<16x1xf32>
    %cst_11 = arith.constant dense<0.000000e+00> : vector<16xf32>
    %10 = vector.multi_reduction <add>, %5, %cst_11 [1] : vector<16x384xf32> to vector<16xf32>
    %11 = vector.shape_cast %10 : vector<16xf32> to vector<16x1xf32>
    %cst_12 = arith.constant dense<0.000000e+00> : vector<16xf32>
    %12 = vector.multi_reduction <add>, %8, %cst_12 [1] : vector<16x384xf32> to vector<16xf32>
    %13 = vector.shape_cast %12 : vector<16xf32> to vector<16x1xf32>
    %14 = arith.addf %11, %13 : vector<16x1xf32>
    %15 = arith.addf %9, %14 : vector<16x1xf32>
    %c0_13 = arith.constant 0 : index
    %c0_14 = arith.constant 0 : index
    %16 = vector.load %arg9[%c0_13, %c0_14] : memref<16x1xf32, #tpu.memory_space<vmem>>, vector<16x1xf32>
    tpu.vector_store %arg9[%c0_13, %c0_14], %15 {strides = array<i32>} : memref<16x1xf32, #tpu.memory_space<vmem>>, vector<16x1xf32>,
    %c0_15 = arith.constant 0 : index
    %c0_16 = arith.constant 0 : index
    %17 = vector.load %arg10[%c0_15, %c0_16] : memref<16x1xf32, #tpu.memory_space<vmem>>, vector<16x1xf32>
    %18 = arith.mulf %5, %5 : vector<16x384xf32>
    %cst_17 = arith.constant dense<0.000000e+00> : vector<16xf32>
    %19 = vector.multi_reduction <add>, %18, %cst_17 [1] : vector<16x384xf32> to vector<16xf32>
    %20 = vector.shape_cast %19 : vector<16xf32> to vector<16x1xf32>
    %21 = arith.mulf %8, %8 : vector<16x384xf32>
    %cst_18 = arith.constant dense<0.000000e+00> : vector<16xf32>
    %22 = vector.multi_reduction <add>, %21, %cst_18 [1] : vector<16x384xf32> to vector<16xf32>
    %23 = vector.shape_cast %22 : vector<16xf32> to vector<16x1xf32>
    %24 = arith.addf %20, %23 : vector<16x1xf32>
    %25 = arith.addf %17, %24 : vector<16x1xf32>
    %c0_19 = arith.constant 0 : index
    %c0_20 = arith.constant 0 : index
    %26 = vector.load %arg10[%c0_19, %c0_20] : memref<16x1xf32, #tpu.memory_space<vmem>>, vector<16x1xf32>
    tpu.vector_store %arg10[%c0_19, %c0_20], %25 {strides = array<i32>} : memref<16x1xf32, #tpu.memory_space<vmem>>, vector<16x1xf32>,
    %c384_i32 = arith.constant 384 : i32
    %27 = arith.muli %arg0, %c384_i32 : i32
    %28 = tpu.assume_multiple %27, 128 : i32
    %c0_21 = arith.constant 0 : index
    %29 = arith.index_cast %28 : i32 to index
    %30 = vector.load %arg7[%c0_21, %29] : memref<16x768xf32, #tpu.memory_space<vmem>>, vector<16x384xf32>
    tpu.vector_store %arg7[%c0_21, %29], %5 {strides = array<i32>} : memref<16x768xf32, #tpu.memory_space<vmem>>, vector<16x384xf32>,
    %c0_22 = arith.constant 0 : index
    %31 = arith.index_cast %28 : i32 to index
    %32 = vector.load %arg8[%c0_22, %31] : memref<16x768xf32, #tpu.memory_space<vmem>>, vector<16x384xf32>
    tpu.vector_store %arg8[%c0_22, %31], %8 {strides = array<i32>} : memref<16x768xf32, #tpu.memory_space<vmem>>, vector<16x384xf32>,
    %c1_i32 = arith.constant 1 : i32
    %33 = arith.cmpi eq, %arg0, %c1_i32 : i32
    %34 = arith.extui %33 : i1 to i32
    %c0_i32_23 = arith.constant 0 : i32
    %35 = arith.cmpi ne, %34, %c0_i32_23 : i32
    scf.if %35 {
      %c0_24 = arith.constant 0 : index
      %c0_25 = arith.constant 0 : index
      %36 = vector.load %arg9[%c0_24, %c0_25] : memref<16x1xf32, #tpu.memory_space<vmem>>, vector<16x1xf32>
      %cst_26 = arith.constant 9.61538462E-4 : f32
      %37 = vector.broadcast %cst_26 : f32 to vector<16x1xf32>
      %38 = arith.mulf %36, %37 : vector<16x1xf32>
      %c0_27 = arith.constant 0 : index
      %c0_28 = arith.constant 0 : index
      %39 = vector.load %arg10[%c0_27, %c0_28] : memref<16x1xf32, #tpu.memory_space<vmem>>, vector<16x1xf32>
      %cst_29 = arith.constant 9.61538462E-4 : f32
      %40 = vector.broadcast %cst_29 : f32 to vector<16x1xf32>
      %41 = arith.mulf %39, %40 : vector<16x1xf32>
      %42 = arith.mulf %38, %38 : vector<16x1xf32>
      %43 = arith.subf %41, %42 : vector<16x1xf32>
      %cst_30 = arith.constant 0.000000e+00 : f32
      %44 = vector.broadcast %cst_30 : f32 to vector<16x1xf32>
      %45 = arith.maximumf %43, %44 : vector<16x1xf32>
      %cst_31 = arith.constant 9.99999974E-6 : f32
      %46 = vector.broadcast %cst_31 : f32 to vector<16x1xf32>
      %47 = arith.addf %45, %46 : vector<16x1xf32>
      %48 = math.rsqrt %47 : vector<16x1xf32>
      %c0_32 = arith.constant 0 : index
      %c0_33 = arith.constant 0 : index
      %49 = vector.load %arg5[%c0_32, %c0_33] : memref<16x1xf32, #tpu.memory_space<vmem>>, vector<16x1xf32>
      %50 = arith.mulf %48, %49 : vector<16x1xf32>
      %c0_34 = arith.constant 0 : index
      %c0_35 = arith.constant 0 : index
      %51 = vector.load %arg6[%c0_34, %c0_35] : memref<16x1xf32, #tpu.memory_space<vmem>>, vector<16x1xf32>
      %52 = arith.mulf %38, %50 : vector<16x1xf32>
      %53 = arith.subf %51, %52 : vector<16x1xf32>
      %c0_36 = arith.constant 0 : index
      %c0_37 = arith.constant 0 : index
      %54 = vector.load %arg7[%c0_36, %c0_37] : memref<16x768xf32, #tpu.memory_space<vmem>>, vector<16x768xf32>
      %55 = vector.broadcast %50 : vector<16x1xf32> to vector<16x768xf32>
      %56 = arith.mulf %54, %55 : vector<16x768xf32>
      %57 = vector.broadcast %53 : vector<16x1xf32> to vector<16x768xf32>
      %58 = arith.addf %56, %57 : vector<16x768xf32>
      %cst_38 = arith.constant 0.000000e+00 : f32
      %59 = vector.broadcast %cst_38 : f32 to vector<16x768xf32>
      %60 = arith.cmpf ogt, %58, %59 : vector<16x768xf32>
      %cst_39 = arith.constant 0.000000e+00 : f32
      %61 = vector.broadcast %cst_39 : f32 to vector<16x768xf32>
      %62 = arith.minimumf %58, %61 : vector<16x768xf32>
      %63 = math.exp %62 : vector<16x768xf32>
      %cst_40 = arith.constant 1.000000e+00 : f32
      %64 = vector.broadcast %cst_40 : f32 to vector<16x768xf32>
      %65 = arith.subf %63, %64 : vector<16x768xf32>
      %66 = arith.select %60, %58, %65 : vector<16x768xi1>, vector<16x768xf32>
      %c0_41 = arith.constant 0 : index
      %c0_42 = arith.constant 0 : index
      %67 = vector.load %arg7[%c0_41, %c0_42] : memref<16x768xf32, #tpu.memory_space<vmem>>, vector<16x768xf32>
      tpu.vector_store %arg7[%c0_41, %c0_42], %66 {strides = array<i32>} : memref<16x768xf32, #tpu.memory_space<vmem>>, vector<16x768xf32>,
      %c0_43 = arith.constant 0 : index
      %c0_44 = arith.constant 0 : index
      %68 = vector.load %arg8[%c0_43, %c0_44] : memref<16x768xf32, #tpu.memory_space<vmem>>, vector<16x768xf32>
      %69 = vector.broadcast %50 : vector<16x1xf32> to vector<16x768xf32>
      %70 = arith.mulf %68, %69 : vector<16x768xf32>
      %71 = vector.broadcast %53 : vector<16x1xf32> to vector<16x768xf32>
      %72 = arith.addf %70, %71 : vector<16x768xf32>
      %cst_45 = arith.constant 0.000000e+00 : f32
      %73 = vector.broadcast %cst_45 : f32 to vector<16x768xf32>
      %74 = arith.cmpf ogt, %72, %73 : vector<16x768xf32>
      %cst_46 = arith.constant 0.000000e+00 : f32
      %75 = vector.broadcast %cst_46 : f32 to vector<16x768xf32>
      %76 = arith.minimumf %72, %75 : vector<16x768xf32>
      %77 = math.exp %76 : vector<16x768xf32>
      %cst_47 = arith.constant 1.000000e+00 : f32
      %78 = vector.broadcast %cst_47 : f32 to vector<16x768xf32>
      %79 = arith.subf %77, %78 : vector<16x768xf32>
      %80 = arith.select %74, %72, %79 : vector<16x768xi1>, vector<16x768xf32>
      %c0_48 = arith.constant 0 : index
      %c0_49 = arith.constant 0 : index
      %81 = vector.load %arg8[%c0_48, %c0_49] : memref<16x768xf32, #tpu.memory_space<vmem>>, vector<16x768xf32>
      tpu.vector_store %arg8[%c0_48, %c0_49], %80 {strides = array<i32>} : memref<16x768xf32, #tpu.memory_space<vmem>>, vector<16x768xf32>,
    } else {
    }
    return
  }
  func.func @transform_0(%arg0: i32) -> (i32, i32) {
    %c0_i32 = arith.constant 0 : i32
    %c0_i32_0 = arith.constant 0 : i32
    return %c0_i32, %arg0 : i32, i32
  }
  func.func @transform_1(%arg0: i32) -> (i32, i32) {
    %c0_i32 = arith.constant 0 : i32
    %c0_i32_0 = arith.constant 0 : i32
    return %c0_i32, %arg0 : i32, i32
  }
  func.func @transform_2(%arg0: i32) -> (i32, i32) {
    %c0_i32 = arith.constant 0 : i32
    %c0_i32_0 = arith.constant 0 : i32
    %c0_i32_1 = arith.constant 0 : i32
    return %c0_i32, %c0_i32_0 : i32, i32
  }
  func.func @transform_3(%arg0: i32) -> (i32, i32) {
    %c0_i32 = arith.constant 0 : i32
    %c0_i32_0 = arith.constant 0 : i32
    %c0_i32_1 = arith.constant 0 : i32
    return %c0_i32, %c0_i32_0 : i32, i32
  }
  func.func @transform_4(%arg0: i32) -> (i32, i32) {
    %c0_i32 = arith.constant 0 : i32
    %c0_i32_0 = arith.constant 0 : i32
    %c0_i32_1 = arith.constant 0 : i32
    return %c0_i32, %c0_i32_0 : i32, i32
  }
  func.func @transform_5(%arg0: i32) -> (i32, i32) {
    %c0_i32 = arith.constant 0 : i32
    %c0_i32_0 = arith.constant 0 : i32
    %c0_i32_1 = arith.constant 0 : i32
    return %c0_i32, %c0_i32_0 : i32, i32
  }
  func.func @transform_6(%arg0: i32) -> (i32, i32) {
    %c0_i32 = arith.constant 0 : i32
    %c0_i32_0 = arith.constant 0 : i32
    %c0_i32_1 = arith.constant 0 : i32
    return %c0_i32, %c0_i32_0 : i32, i32
  }
  func.func @transform_7(%arg0: i32) -> (i32, i32) {
    %c0_i32 = arith.constant 0 : i32
    %c0_i32_0 = arith.constant 0 : i32
    %c0_i32_1 = arith.constant 0 : i32
    return %c0_i32, %c0_i32_0 : i32, i32
  }
}

</mosaic_0001>

<bundles_post_ra>
// kernel: aunet_forward.10
= control target key start
LH: loop header
LB: loop body
LE: loop exit
PB: predicated region body
PF: predicated region fallthrough
CT: control target
= control target key end

     0   :  { %vm74_vm0 = vcmask 1041408   ;;  %v420_v2 = vmov 0   ;;  %vm70_vm1 = vcmask 162816   ;;  %vm22_vm2 = vcmask 7168   ;;  %s564_s0 = inlined_call_operand.vmem [shape: bf16[20,512], index: 0, kind: input, shape index: {}]   ;;  %s565_s1 = inlined_call_operand.vmem [shape: bf16[16,20], index: 1, kind: input, shape index: {}]   ;;  %s566_s2 = inlined_call_operand.vmem [shape: f32[16,1], index: 2, kind: input, shape index: {}]   ;;  %s567_s3 = inlined_call_operand.vmem [shape: f32[16,1], index: 3, kind: input, shape index: {}]   ;;  %s568_s4 = inlined_call_operand.vmem [shape: f32[16,512], index: 4, kind: output, shape index: {}]  }
   0x1   :  { %v33_v0 = vld [vmem:[%s564_s0 + $0x20] sm:$0x33]  ;;  %v34_v1 = vld [vmem:[%s564_s0 + $0x28] sm:$0x33]  ;;  %119 = vmatprep.mubr.bf16.mxu0 %v420_v2  ;;  %162 = vmatprep.mubr.bf16.mxu1 %v420_v2  ;;  %v421_v14 = vmov 0.0  }
   0x2   :  { %v370_v3 = vcombine.high %v33_v0, %v33_v0  ;;  %v372_v4 = vcombine.high %v34_v1, %v34_v1  ;;  %v369_v5 = vcombine.low %v33_v0, %v33_v0  ;;  %v371_v6 = vcombine.low %v34_v1, %v34_v1  ;;  %v393_v7 = vld [vmem:[%s564_s0 + $0x4] ss:$16 sps:$4 sm:$0xff]   ;;  %387 = vset.pattern.permute.xlu0 %v420_v2  ;;  %v395_v8 = vld [vmem:[%s564_s0 + $0xc] ss:$16 sps:$4 sm:$0xff]   ;;  %v397_v11 = vld [vmem:[%s564_s0] ss:$16 sps:$4 sm:$0xff]  }
   0x3   :  { %388 = vset.pattern.permute.xlu1 %v420_v2  ;;  %v398_v12 = vld [vmem:[%s564_s0 + $0x8] ss:$16 sps:$4 sm:$0xff]   ;;  %v399_v13 = vld [vmem:[%s565_s1] sm:$0xff]   ;;  %23 = vst.msk [vmem:[#allocation2] sm:$0xff] %vm22_vm2, %v421_v14  ;;  %24 = vst.msk [vmem:[#allocation2 + $0x8] sm:$0xff] %vm22_vm2, %v421_v14 }
   0x4   :  { %373 = vmatprep.subr.msk.bf16.mxu0 %vm74_vm0, %v370_v3  ;;  %375 = vmatprep.subr.msk.bf16.mxu1 %vm74_vm0, %v372_v4  ;;  %v76_v9 = vsel %vm74_vm0, %v369_v5, 0  ;;  %v82_v10 = vsel %vm74_vm0, %v371_v6, 0  ;;  %25 = vst.msk [vmem:[#allocation3] sm:$0xff] %vm22_vm2, %v421_v14  ;;  %26 = vst.msk [vmem:[#allocation3 + $0x8] sm:$0xff] %vm22_vm2, %v421_v14  ;;  %v252_v14 = vld [vmem:[%s567_s3] sm:$0xff] }
   0x5   :  { %100 = vmatpush1.bf16.msra.mxu0 %v76_v9  ;;  %143 = vmatpush1.bf16.msra.mxu1 %v82_v10  ;;  %v249_v10 = vld [vmem:[%s566_s2 + $0x8] sm:$0xff] }
   0x6   :  { %101 = vmatprep.subr.bf16.mxu0 %v393_v7  ;;  %144 = vmatprep.subr.bf16.mxu1 %v395_v8  ;;  %v248_v7 = vld [vmem:[%s566_s2] sm:$0xff] }
   0x9   :  { %102 = vmatpush1.bf16.msra.mxu0 %v397_v11  ;;  %145 = vmatpush1.bf16.msra.mxu1 %v398_v12 }
   0xa   :  { %v173_v43 = vld [vmem:[#allocation2] sm:$0xff]  ;;  %v174_v47 = vld [vmem:[#allocation2 + $0x8] sm:$0xff] }
   0xb   :  { %v190_v46 = vld [vmem:[#allocation3] sm:$0xff]  ;;  %v191_v52 = vld [vmem:[#allocation3 + $0x8] sm:$0xff] }
   0xc   :  { %374 = vmatmul.mubr.msk.bf16.vlgmr.msra.gmra.mxu0 %vm70_vm1, %v399_v13  ;;  %376 = vmatmul.mubr.msk.bf16.vlgmr.msra.gmra.mxu1 %vm70_vm1, %v399_v13 }
  0xcc   :  { %v476_v15 = vpop.f32.mrf.mxu0  ;;  %v478_v16 = vpop.f32.mrf.mxu1 }
  0xcd   :  { %v192_v19 = vmul.f32 %v476_v15, %v476_v15  ;;  %v194_v22 = vmul.f32 %v478_v16, %v478_v16 }
  0xce   :  { %v480_v17 = vpop.f32.mrf.mxu0  ;;  %v482_v18 = vpop.f32.mrf.mxu1 }
  0xcf   :  { %v175_v20 = vadd.f32 %v480_v17, %v476_v15  ;;  %v193_v21 = vmul.f32 %v480_v17, %v480_v17  ;;  %v195_v33 = vmul.f32 %v482_v18, %v482_v18 }
  0xd0   :  { %v492_v23 = vpop.f32.mrf.mxu0  ;;  %v494_v24 = vpop.f32.mrf.mxu1 }
  0xd1   :  { %v176_v25 = vadd.f32 %v175_v20, %v478_v16  ;;  %v200_v26 = vadd.f32 %v193_v21, %v192_v19  ;;  %v196_v28 = vmul.f32 %v492_v23, %v492_v23  ;;  %v198_v35 = vmul.f32 %v494_v24, %v494_v24  ;;  %v253_v21 = vld [vmem:[%s567_s3 + $0x8] sm:$0xff] }
  0xd2   :  { %v497_v27 = vpop.f32.mrf.mxu0  ;;  %v506_v32 = vpop.f32.mrf.mxu1 }
  0xd3   :  { %v180_v29 = vadd.f32 %v497_v27, %v492_v23  ;;  %v197_v30 = vmul.f32 %v497_v27, %v497_v27  ;;  %v177_v31 = vadd.f32 %v176_v25, %v482_v18  ;;  %v201_v34 = vadd.f32 %v200_v26, %v194_v22 }
  0xd4   :  { %v199_v39 = vmul.f32 %v506_v32, %v506_v32 }
  0xd5   :  { %v205_v36 = vadd.f32 %v197_v30, %v196_v28  ;;  %178 = vadd.xlane.f32.xlu0 %v177_v31  ;;  %v181_v37 = vadd.f32 %v180_v29, %v494_v24  ;;  %v202_v38 = vadd.f32 %v201_v34, %v195_v33 }
  0xd7   :  { %v182_v40 = vadd.f32 %v181_v37, %v506_v32  ;;  %v206_v41 = vadd.f32 %v205_v36, %v198_v35  ;;  %203 = vadd.xlane.f32.xlu1 %v202_v38 }
  0xd9   :  { %183 = vadd.xlane.f32.xlu0 %v182_v40  ;;  %v207_v42 = vadd.f32 %v206_v41, %v199_v39 }
  0xdb   :  { %208 = vadd.xlane.f32.xlu1 %v207_v42 }
 0x15e   :  { %v179_v44 = vpop.xlane.xlu0 %178 }
 0x15f   :  { %v185_v45 = vadd.f32 %v179_v44, %v173_v43 }
 0x160   :  { %v204_v48 = vpop.xlane.xlu1 %203 }
 0x161   :  { %188 = vst.msk [vmem:[#allocation2] sm:$0xff] %vm22_vm2, %v185_v45  ;;  %v210_v49 = vadd.f32 %v204_v48, %v190_v46 }
 0x162   :  { %v184_v50 = vpop.xlane.xlu0 %183 }
 0x163   :  { %v186_v51 = vadd.f32 %v184_v50, %v174_v47  ;;  %212 = vst.msk [vmem:[#allocation3] sm:$0xff] %vm22_vm2, %v210_v49 }
 0x164   :  { %v209_v53 = vpop.xlane.xlu1 %208 }
 0x165   :  { %189 = vst.msk [vmem:[#allocation2 + $0x8] sm:$0xff] %vm22_vm2, %v186_v51  ;;  %v211_v54 = vadd.f32 %v209_v53, %v191_v52 }
 0x167   :  { %213 = vst.msk [vmem:[#allocation3 + $0x8] sm:$0xff] %vm22_vm2, %v211_v54 }
 0x168   :  { %v230_v55 = vld [vmem:[#allocation2] sm:$0xff] }
 0x169   :  { %v232_v56 = vmul.f32 0.002016129, %v230_v55 }
 0x16a   :  { %v234_v57 = vld [vmem:[#allocation3] sm:$0xff] }
 0x16b   :  { %v238_v58 = vmul.f32 %v232_v56, %v232_v56  ;;  %v236_v59 = vmul.f32 0.002016129, %v234_v57 }
 0x16c   :  { %v231_v60 = vld [vmem:[#allocation2 + $0x8] sm:$0xff] }
 0x16d   :  { %v233_v61 = vmul.f32 0.002016129, %v231_v60  ;;  %v240_v62 = vsub.f32 %v236_v59, %v238_v58 }
 0x16e   :  { %v235_v63 = vld [vmem:[#allocation3 + $0x8] sm:$0xff] }
 0x16f   :  { %v239_v0 = vmul.f32 %v233_v61, %v233_v61  ;;  %v242_v1 = vmax.f32 %v240_v62, 0.0  ;;  %v237_v2 = vmul.f32 0.002016129, %v235_v63 }
 0x171   :  { %v244_v3 = vadd.f32 1e-05, %v242_v1  ;;  %v241_v4 = vsub.f32 %v237_v2, %v239_v0 }
 0x173   :  { %400 = vrsqrt.f32 %v244_v3  ;;  %v243_v5 = vmax.f32 %v241_v4, 0.0 }
 0x175   :  { %v245_v6 = vadd.f32 1e-05, %v243_v5 }
 0x177   :  { %402 = vrsqrt.f32 %v245_v6 }
 0x180   :  { %v401_v8 = vpop.eup %400 }
 0x181   :  { %v250_v9 = vmul.f32 %v401_v8, %v248_v7 }
 0x183   :  { %268 = vperm.xlu0 %387, %v250_v9   ;;  %v254_v13 = vmul.f32 %v250_v9, %v232_v56 }
 0x184   :  { %v403_v11 = vpop.eup %402 }
 0x185   :  { %v251_v12 = vmul.f32 %v403_v11, %v249_v10  ;;  %v256_v19 = vsub.f32 %v252_v14, %v254_v13 }
 0x187   :  { %273 = vperm.xlu1 %388, %v251_v12   ;;  %v255_v20 = vmul.f32 %v251_v12, %v233_v61 }
 0x189   :  { %v257_v22 = vsub.f32 %v253_v21, %v255_v20 }
 0x18b   :  { %286 = vperm.xlu1 %388, %v256_v19  }
 0x18f   :  { %291 = vperm.xlu1 %388, %v257_v22  }
 0x1fe   :  { %v269_v25 = vpop.permute.xlu0 %268 }
 0x1ff   :  { %v276_v28 = vmul.f32 %v269_v25, %v476_v15  ;;  %v277_v29 = vmul.f32 %v269_v25, %v480_v17  ;;  %v278_v30 = vmul.f32 %v269_v25, %v478_v16  ;;  %v279_v31 = vmul.f32 %v269_v25, %v482_v18 }
 0x202   :  { %v274_v26 = vpop.permute.xlu1 %273 }
 0x203   :  { %v280_v38 = vmul.f32 %v274_v26, %v492_v23  ;;  %v281_v39 = vmul.f32 %v274_v26, %v497_v27  ;;  %v282_v40 = vmul.f32 %v274_v26, %v494_v24  ;;  %v283_v41 = vmul.f32 %v274_v26, %v506_v32 }
 0x206   :  { %v287_v33 = vpop.permute.xlu1 %286 }
 0x207   :  { %v294_v34 = vadd.f32 %v287_v33, %v276_v28  ;;  %v295_v35 = vadd.f32 %v287_v33, %v277_v29  ;;  %v296_v36 = vadd.f32 %v287_v33, %v278_v30  ;;  %v297_v37 = vadd.f32 %v287_v33, %v279_v31 }
 0x209   :  { %v310_v15 = vmin.f32 %v294_v34, 0.0  ;;  %v311_v42 = vmin.f32 %v295_v35, 0.0  ;;  %v312_v17 = vmin.f32 %v296_v36, 0.0  ;;  %v313_v43 = vmin.f32 %v297_v37, 0.0 }
 0x20a   :  { %v292_v16 = vpop.permute.xlu1 %291  ;;  %vm302_vm3 = vcmp.gt.f32.partialorder %v294_v34, 0.0  ;;  %vm303_vm4 = vcmp.gt.f32.partialorder %v295_v35, 0.0  ;;  %vm304_vm5 = vcmp.gt.f32.partialorder %v296_v36, 0.0  ;;  %vm305_vm6 = vcmp.gt.f32.partialorder %v297_v37, 0.0 }
 0x20b   :  { %v298_v44 = vadd.f32 %v292_v16, %v280_v38  ;;  %v299_v18 = vadd.f32 %v292_v16, %v281_v39  ;;  %v300_v45 = vadd.f32 %v292_v16, %v282_v40  ;;  %v301_v46 = vadd.f32 %v292_v16, %v283_v41 }
 0x20c   :  { %v318_v47 = vmul.f32 1.442695, %v310_v15  ;;  %v320_v48 = vmul.f32 1.442695, %v311_v42  ;;  %v322_v49 = vmul.f32 1.442695, %v312_v17 }
 0x20d   :  { %v324_v50 = vmul.f32 1.442695, %v313_v43  ;;  %v314_v23 = vmin.f32 %v298_v44, 0.0  ;;  %v315_v27 = vmin.f32 %v299_v18, 0.0  ;;  %v316_v24 = vmin.f32 %v300_v45, 0.0 }
 0x20e   :  { %404 = vpow2.f32 %v318_v47  ;;  %v317_v51 = vmin.f32 %v301_v46, 0.0  ;;  %vm306_vm7 = vcmp.gt.f32.partialorder %v298_v44, 0.0  ;;  %vm307_vm8 = vcmp.gt.f32.partialorder %v299_v18, 0.0 }
 0x20f   :  { %406 = vpow2.f32 %v320_v48  ;;  %v326_v32 = vmul.f32 1.442695, %v314_v23  ;;  %v328_v52 = vmul.f32 1.442695, %v315_v27  ;;  %v330_v53 = vmul.f32 1.442695, %v316_v24 }
 0x210   :  { %408 = vpow2.f32 %v322_v49  ;;  %v332_v54 = vmul.f32 1.442695, %v317_v51  ;;  %vm308_vm9 = vcmp.gt.f32.partialorder %v300_v45, 0.0  ;;  %vm309_vm10 = vcmp.gt.f32.partialorder %v301_v46, 0.0 }
 0x211   :  { %410 = vpow2.f32 %v324_v50 }
 0x212   :  { %412 = vpow2.f32 %v326_v32 }
 0x213   :  { %414 = vpow2.f32 %v328_v52 }
 0x214   :  { %416 = vpow2.f32 %v330_v53 }
 0x215   :  { %418 = vpow2.f32 %v332_v54 }
 0x21b   :  { %v405_v55 = vpop.eup %404 }
 0x21c   :  { %v407_v56 = vpop.eup %406  ;;  %v377_v57 = vadd.f32 -1.0, %v405_v55 }
 0x21d   :  { %v409_v58 = vpop.eup %408  ;;  %v378_v59 = vadd.f32 -1.0, %v407_v56 }
 0x21e   :  { %v411_v60 = vpop.eup %410  ;;  %v379_v61 = vadd.f32 -1.0, %v409_v58  ;;  %v342_v62 = vsel %vm302_vm3, %v294_v34, %v377_v57 }
 0x21f   :  { %v413_v63 = vpop.eup %412  ;;  %v380_v0 = vadd.f32 -1.0, %v411_v60  ;;  %v343_v1 = vsel %vm303_vm4, %v295_v35, %v378_v59  ;;  %350 = vst [vmem:[%s568_s4] sm:$0xff] %v342_v62 }
 0x220   :  { %v415_v2 = vpop.eup %414  ;;  %v344_v3 = vsel %vm304_vm5, %v296_v36, %v379_v61  ;;  %351 = vst [vmem:[%s568_s4 + $0x8] sm:$0xff] %v343_v1  ;;  %v381_v4 = vadd.f32 -1.0, %v413_v63 }
 0x221   :  { %v417_v5 = vpop.eup %416  ;;  %v345_v6 = vsel %vm305_vm6, %v297_v37, %v380_v0  ;;  %352 = vst [vmem:[%s568_s4 + $0x10] sm:$0xff] %v344_v3  ;;  %v382_v7 = vadd.f32 -1.0, %v415_v2 }
 0x222   :  { %v419_v8 = vpop.eup %418  ;;  %353 = vst [vmem:[%s568_s4 + $0x18] sm:$0xff] %v345_v6  ;;  %v383_v9 = vadd.f32 -1.0, %v417_v5  ;;  %v346_v10 = vsel %vm306_vm7, %v298_v44, %v381_v4 }
 0x223   :  { %v384_v11 = vadd.f32 -1.0, %v419_v8  ;;  %v347_v12 = vsel %vm307_vm8, %v299_v18, %v382_v7  ;;  %354 = vst [vmem:[%s568_s4 + $0x20] sm:$0xff] %v346_v10 }
 0x224   :  { %v348_v13 = vsel %vm308_vm9, %v300_v45, %v383_v9  ;;  %355 = vst [vmem:[%s568_s4 + $0x28] sm:$0xff] %v347_v12 }
 0x225   :  { %v349_v14 = vsel %vm309_vm10, %v301_v46, %v384_v11  ;;  %356 = vst [vmem:[%s568_s4 + $0x30] sm:$0xff] %v348_v13 }
 0x226   :  { %357 = vst [vmem:[%s568_s4 + $0x38] sm:$0xff] %v349_v14 }

// kernel: aunet_forward.11
= control target key start
LH: loop header
LB: loop body
LE: loop exit
PB: predicated region body
PF: predicated region fallthrough
CT: control target
= control target key end

     0   :  { %vm173_vm0 = vcmask 261120   ;;  %vm22_vm1 = vcmask 7168   ;;  %v606_v24 = vmov 0.0   ;;  %v607_v49 = vmov 0   ;;  %s817_s0 = inlined_call_operand.vmem [shape: bf16[160,256], index: 0, kind: input, shape index: {}]   ;;  %s818_s1 = inlined_call_operand.vmem [shape: bf16[32,160], index: 1, kind: input, shape index: {}]   ;;  %s819_s2 = inlined_call_operand.vmem [shape: f32[32,1], index: 2, kind: input, shape index: {}]   ;;  %s820_s3 = inlined_call_operand.vmem [shape: f32[32,1], index: 3, kind: input, shape index: {}]   ;;  %s821_s4 = inlined_call_operand.vmem [shape: f32[32,256], index: 4, kind: output, shape index: {}]  }
   0x1   :  { %v546_v0 = vld [vmem:[%s817_s0 + $0x74] ss:$8 sps:$4 sm:$0xff]   ;;  %v548_v1 = vld [vmem:[%s817_s0 + $0x70] ss:$8 sps:$4 sm:$0xff]   ;;  %v549_v2 = vld [vmem:[%s817_s0 + $0x64] ss:$8 sps:$4 sm:$0xff]   ;;  %544 = vset.pattern.permute.xlu0 %v607_v49  ;;  %545 = vset.pattern.permute.xlu1 %v607_v49 }
   0x2   :  { %180 = vmatprep.subr.bf16.mxu0 %v546_v0  ;;  %522 = vmatprep.subr.bf16.mxu1 %v546_v0  ;;  %v551_v3 = vld [vmem:[%s817_s0 + $0x60] ss:$8 sps:$4 sm:$0xff]   ;;  %v552_v4 = vld [vmem:[%s817_s0 + $0x54] ss:$8 sps:$4 sm:$0xff]   ;;  %v554_v5 = vld [vmem:[%s817_s0 + $0x50] ss:$8 sps:$4 sm:$0xff]  }
   0x3   :  { %181 = vmatpush1.bf16.msra.mxu0 %v548_v1  ;;  %532 = vmatpush1.bf16.msra.mxu1 %v548_v1  ;;  %v555_v6 = vld [vmem:[%s817_s0 + $0x44] ss:$8 sps:$4 sm:$0xff]   ;;  %v557_v7 = vld [vmem:[%s817_s0 + $0x40] ss:$8 sps:$4 sm:$0xff]   ;;  %v558_v8 = vld [vmem:[%s817_s0 + $0x34] ss:$8 sps:$4 sm:$0xff]  }
   0x4   :  { %182 = vmatprep.subr.bf16.mxu0 %v549_v2  ;;  %523 = vmatprep.subr.bf16.mxu1 %v549_v2  ;;  %v578_v9 = vld [vmem:[%s818_s1 + $0x4] ss:$8 sps:$4 sm:$0xff]   ;;  %v560_v10 = vld [vmem:[%s817_s0 + $0x30] ss:$8 sps:$4 sm:$0xff]   ;;  %v581_v11 = vld [vmem:[%s818_s1 + $0x14] ss:$8 sps:$4 sm:$0xff]  }
   0x5   :  { %v561_v12 = vld [vmem:[%s817_s0 + $0x24] ss:$8 sps:$4 sm:$0xff]   ;;  %512 = vmatprep.mubr.msk.bf16.mxu0 %vm173_vm0, %v578_v9  ;;  %513 = vmatprep.mubr.msk.bf16.mxu1 %vm173_vm0, %v581_v11  ;;  %v563_v13 = vld [vmem:[%s817_s0 + $0x20] ss:$8 sps:$4 sm:$0xff]   ;;  %v564_v14 = vld [vmem:[%s817_s0 + $0x14] ss:$8 sps:$4 sm:$0xff]  }
   0x6   :  { %v566_v15 = vld [vmem:[%s817_s0 + $0x10] ss:$8 sps:$4 sm:$0xff]   ;;  %v567_v16 = vld [vmem:[%s817_s0 + $0x4] ss:$8 sps:$4 sm:$0xff]   ;;  %v569_v17 = vld [vmem:[%s817_s0] ss:$8 sps:$4 sm:$0xff]  }
   0x7   :  { %183 = vmatpush1.bf16.msra.mxu0 %v551_v3  ;;  %533 = vmatpush1.bf16.msra.mxu1 %v551_v3  ;;  %v570_v18 = vld [vmem:[%s817_s0 + $0x94] ss:$8 sps:$4 sm:$0xff]   ;;  %v572_v19 = vld [vmem:[%s817_s0 + $0x90] ss:$8 sps:$4 sm:$0xff]   ;;  %v573_v20 = vld [vmem:[%s817_s0 + $0x84] ss:$8 sps:$4 sm:$0xff]  }
   0x8   :  { %184 = vmatprep.subr.bf16.mxu0 %v552_v4  ;;  %524 = vmatprep.subr.bf16.mxu1 %v552_v4  ;;  %v575_v21 = vld [vmem:[%s817_s0 + $0x80] ss:$8 sps:$4 sm:$0xff]   ;;  %v579_v23 = vld [vmem:[%s818_s1 + $0x10] ss:$8 sps:$4 sm:$0xff]   ;;  %25 = vst.msk [vmem:[#allocation2 + $0x10] sm:$0xff] %vm22_vm1, %v606_v24  ;;  %23 = vst.msk [vmem:[#allocation2] sm:$0xff] %vm22_vm1, %v606_v24 }
   0x9   :  { %v576_v22 = vld [vmem:[%s818_s1] ss:$8 sps:$4 sm:$0xff]   ;;  %24 = vst.msk [vmem:[#allocation2 + $0x8] sm:$0xff] %vm22_vm1, %v606_v24  ;;  %26 = vst.msk [vmem:[#allocation2 + $0x18] sm:$0xff] %vm22_vm1, %v606_v24 }
   0xa   :  { %27 = vst.msk [vmem:[#allocation3] sm:$0xff] %vm22_vm1, %v606_v24  ;;  %28 = vst.msk [vmem:[#allocation3 + $0x8] sm:$0xff] %vm22_vm1, %v606_v24 }
   0xb   :  { %185 = vmatpush1.bf16.msra.mxu0 %v554_v5  ;;  %534 = vmatpush1.bf16.msra.mxu1 %v554_v5  ;;  %29 = vst.msk [vmem:[#allocation3 + $0x10] sm:$0xff] %vm22_vm1, %v606_v24  ;;  %30 = vst.msk [vmem:[#allocation3 + $0x18] sm:$0xff] %vm22_vm1, %v606_v24 }
   0xc   :  { %186 = vmatprep.subr.bf16.mxu0 %v555_v6  ;;  %525 = vmatprep.subr.bf16.mxu1 %v555_v6 }
   0xf   :  { %187 = vmatpush1.bf16.msra.mxu0 %v557_v7  ;;  %535 = vmatpush1.bf16.msra.mxu1 %v557_v7  ;;  %v235_v50 = vld [vmem:[#allocation2 + $0x10] sm:$0xff]  ;;  %v233_v51 = vld [vmem:[#allocation2] sm:$0xff] }
  0x10   :  { %188 = vmatprep.subr.bf16.mxu0 %v558_v8  ;;  %526 = vmatprep.subr.bf16.mxu1 %v558_v8  ;;  %v236_v56 = vld [vmem:[#allocation2 + $0x18] sm:$0xff]  ;;  %v234_v63 = vld [vmem:[#allocation2 + $0x8] sm:$0xff] }
  0x11   :  { %v258_v57 = vld [vmem:[#allocation3] sm:$0xff]  ;;  %v259_v62 = vld [vmem:[#allocation3 + $0x8] sm:$0xff] }
  0x12   :  { %v261_v4 = vld [vmem:[#allocation3 + $0x18] sm:$0xff]  ;;  %v260_v5 = vld [vmem:[#allocation3 + $0x10] sm:$0xff] }
  0x13   :  { %189 = vmatpush1.bf16.msra.mxu0 %v560_v10  ;;  %536 = vmatpush1.bf16.msra.mxu1 %v560_v10 }
  0x14   :  { %190 = vmatprep.subr.bf16.mxu0 %v561_v12  ;;  %527 = vmatprep.subr.bf16.mxu1 %v561_v12 }
  0x17   :  { %191 = vmatpush1.bf16.msra.mxu0 %v563_v13  ;;  %537 = vmatpush1.bf16.msra.mxu1 %v563_v13 }
  0x18   :  { %192 = vmatprep.subr.bf16.mxu0 %v564_v14  ;;  %528 = vmatprep.subr.bf16.mxu1 %v564_v14 }
  0x1b   :  { %193 = vmatpush1.bf16.msra.mxu0 %v566_v15  ;;  %538 = vmatpush1.bf16.msra.mxu1 %v566_v15 }
  0x1c   :  { %194 = vmatprep.subr.bf16.mxu0 %v567_v16  ;;  %529 = vmatprep.subr.bf16.mxu1 %v567_v16 }
  0x1f   :  { %195 = vmatpush1.bf16.msra.mxu0 %v569_v17  ;;  %539 = vmatpush1.bf16.msra.mxu1 %v569_v17 }
  0x20   :  { %208 = vmatprep.subr.bf16.mxu0 %v570_v18  ;;  %530 = vmatprep.subr.bf16.mxu1 %v570_v18 }
  0x23   :  { %209 = vmatpush2.bf16.msra.mxu0 %v572_v19  ;;  %540 = vmatpush2.bf16.msra.mxu1 %v572_v19 }
  0x24   :  { %210 = vmatprep.subr.bf16.mxu0 %v573_v20  ;;  %531 = vmatprep.subr.bf16.mxu1 %v573_v20 }
  0x27   :  { %211 = vmatpush2.bf16.msra.mxu0 %v575_v21  ;;  %541 = vmatpush2.bf16.msra.mxu1 %v575_v21 }
  0x2a   :  { %213 = vmatmul.mubr.bf16.vlgmr.msra.gmra.mxu0 %v576_v22  ;;  %223 = vmatmul.mubr.bf16.vlgmr.msra.gmra.mxu1 %v579_v23 }
  0xea   :  { %v713_v25 = vpop.f32.mrf.mxu0  ;;  %v715_v26 = vpop.f32.mrf.mxu1 }
  0xeb   :  { %v262_v34 = vmul.f32 %v713_v25, %v713_v25  ;;  %v266_v41 = vmul.f32 %v715_v26, %v715_v26 }
  0xec   :  { %v717_v27 = vpop.f32.mrf.mxu0  ;;  %v719_v28 = vpop.f32.mrf.mxu1 }
  0xed   :  { %v243_v29 = vadd.f32 %v719_v28, %v715_v26  ;;  %v237_v30 = vadd.f32 %v717_v27, %v713_v25  ;;  %v263_v31 = vmul.f32 %v717_v27, %v717_v27  ;;  %v267_v42 = vmul.f32 %v719_v28, %v719_v28 }
  0xee   :  { %v727_v32 = vpop.f32.mrf.mxu0  ;;  %v729_v33 = vpop.f32.mrf.mxu1 }
  0xef   :  { %244 = vadd.xlane.f32.xlu1 %v243_v29  ;;  %238 = vadd.xlane.f32.xlu0 %v237_v30  ;;  %v270_v39 = vadd.f32 %v263_v31, %v262_v34  ;;  %v264_v40 = vmul.f32 %v727_v32, %v727_v32  ;;  %v268_v46 = vmul.f32 %v729_v33, %v729_v33 }
  0xf0   :  { %v733_v35 = vpop.f32.mrf.mxu0  ;;  %v735_v36 = vpop.f32.mrf.mxu1  ;;  %v276_v48 = vadd.f32 %v267_v42, %v266_v41 }
  0xf1   :  { %v265_v37 = vmul.f32 %v733_v35, %v733_v35  ;;  %v246_v38 = vadd.f32 %v735_v36, %v729_v33  ;;  %v269_v43 = vmul.f32 %v735_v36, %v735_v36  ;;  %v240_v45 = vadd.f32 %v733_v35, %v727_v32 }
  0xf3   :  { %247 = vadd.xlane.f32.xlu1 %v246_v38  ;;  %271 = vadd.xlane.f32.xlu0 %v270_v39  ;;  %v273_v44 = vadd.f32 %v265_v37, %v264_v40  ;;  %v279_v47 = vadd.f32 %v269_v43, %v268_v46 }
  0xf7   :  { %274 = vadd.xlane.f32.xlu1 %v273_v44  ;;  %241 = vadd.xlane.f32.xlu0 %v240_v45 }
  0xfb   :  { %280 = vadd.xlane.f32.xlu1 %v279_v47  ;;  %277 = vadd.xlane.f32.xlu0 %v276_v48 }
 0x178   :  { %v245_v52 = vpop.xlane.xlu1 %244  ;;  %v239_v53 = vpop.xlane.xlu0 %238 }
 0x179   :  { %v251_v54 = vadd.f32 %v245_v52, %v235_v50  ;;  %v249_v55 = vadd.f32 %v239_v53, %v233_v51  ;;  %v342_v50 = vld [vmem:[%s819_s2] sm:$0xff]  ;;  %v344_v53 = vld [vmem:[%s819_s2 + $0x10] sm:$0xff] }
 0x17b   :  { %256 = vst.msk [vmem:[#allocation2 + $0x10] sm:$0xff] %vm22_vm1, %v251_v54  ;;  %254 = vst.msk [vmem:[#allocation2] sm:$0xff] %vm22_vm1, %v249_v55 }
 0x17c   :  { %v248_v58 = vpop.xlane.xlu1 %247  ;;  %v272_v59 = vpop.xlane.xlu0 %271 }
 0x17d   :  { %v252_v60 = vadd.f32 %v248_v58, %v236_v56  ;;  %v282_v61 = vadd.f32 %v272_v59, %v258_v57  ;;  %v343_v57 = vld [vmem:[%s819_s2 + $0x8] sm:$0xff] }
 0x17f   :  { %257 = vst.msk [vmem:[#allocation2 + $0x18] sm:$0xff] %vm22_vm1, %v252_v60  ;;  %286 = vst.msk [vmem:[#allocation3] sm:$0xff] %vm22_vm1, %v282_v61  ;;  %v345_v60 = vld [vmem:[%s819_s2 + $0x18] sm:$0xff] }
 0x180   :  { %v275_v0 = vpop.xlane.xlu1 %274  ;;  %v242_v1 = vpop.xlane.xlu0 %241 }
 0x181   :  { %v283_v2 = vadd.f32 %v275_v0, %v259_v62  ;;  %v250_v3 = vadd.f32 %v242_v1, %v234_v63  ;;  %v350_v63 = vld [vmem:[%s820_s3] sm:$0xff] }
 0x182   :  { %v306_v6 = vld [vmem:[#allocation2] sm:$0xff]  ;;  %v308_v15 = vld [vmem:[#allocation2 + $0x10] sm:$0xff] }
 0x183   :  { %287 = vst.msk [vmem:[#allocation3 + $0x8] sm:$0xff] %vm22_vm1, %v283_v2  ;;  %255 = vst.msk [vmem:[#allocation2 + $0x8] sm:$0xff] %vm22_vm1, %v250_v3  ;;  %v310_v7 = vmul.f32 0.004166667, %v306_v6  ;;  %v312_v18 = vmul.f32 0.004166667, %v308_v15 }
 0x184   :  { %v281_v8 = vpop.xlane.xlu1 %280  ;;  %v278_v9 = vpop.xlane.xlu0 %277  ;;  %v352_v2 = vld [vmem:[%s820_s3 + $0x10] sm:$0xff] }
 0x185   :  { %v285_v10 = vadd.f32 %v281_v8, %v261_v4  ;;  %v284_v11 = vadd.f32 %v278_v9, %v260_v5  ;;  %v322_v14 = vmul.f32 %v310_v7, %v310_v7  ;;  %v324_v34 = vmul.f32 %v312_v18, %v312_v18  ;;  %v351_v5 = vld [vmem:[%s820_s3 + $0x8] sm:$0xff]  ;;  %v353_v8 = vld [vmem:[%s820_s3 + $0x18] sm:$0xff] }
 0x186   :  { %v314_v12 = vld [vmem:[#allocation3] sm:$0xff]  ;;  %v309_v16 = vld [vmem:[#allocation2 + $0x18] sm:$0xff] }
 0x187   :  { %289 = vst.msk [vmem:[#allocation3 + $0x18] sm:$0xff] %vm22_vm1, %v285_v10  ;;  %288 = vst.msk [vmem:[#allocation3 + $0x10] sm:$0xff] %vm22_vm1, %v284_v11  ;;  %v318_v13 = vmul.f32 0.004166667, %v314_v12  ;;  %v313_v21 = vmul.f32 0.004166667, %v309_v16 }
 0x189   :  { %v326_v17 = vsub.f32 %v318_v13, %v322_v14  ;;  %v325_v38 = vmul.f32 %v313_v21, %v313_v21 }
 0x18a   :  { %v307_v19 = vld [vmem:[#allocation2 + $0x8] sm:$0xff] }
 0x18b   :  { %v315_v20 = vld [vmem:[#allocation3 + $0x8] sm:$0xff]  ;;  %v330_v22 = vmax.f32 %v326_v17, 0.0  ;;  %v311_v23 = vmul.f32 0.004166667, %v307_v19 }
 0x18c   :  { %v319_v29 = vmul.f32 0.004166667, %v315_v20 }
 0x18d   :  { %v334_v24 = vadd.f32 1e-05, %v330_v22  ;;  %v323_v30 = vmul.f32 %v311_v23, %v311_v23 }
 0x18e   :  { %v316_v31 = vld [vmem:[#allocation3 + $0x10] sm:$0xff]  ;;  %v317_v37 = vld [vmem:[#allocation3 + $0x18] sm:$0xff] }
 0x18f   :  { %582 = vrsqrt.f32 %v334_v24  ;;  %v320_v39 = vmul.f32 0.004166667, %v316_v31  ;;  %v327_v40 = vsub.f32 %v319_v29, %v323_v30  ;;  %v321_v41 = vmul.f32 0.004166667, %v317_v37 }
 0x191   :  { %v328_v42 = vsub.f32 %v320_v39, %v324_v34  ;;  %v331_v43 = vmax.f32 %v327_v40, 0.0  ;;  %v329_v44 = vsub.f32 %v321_v41, %v325_v38 }
 0x193   :  { %v332_v45 = vmax.f32 %v328_v42, 0.0  ;;  %v335_v47 = vadd.f32 1e-05, %v331_v43  ;;  %v333_v48 = vmax.f32 %v329_v44, 0.0 }
 0x195   :  { %v336_v46 = vadd.f32 1e-05, %v332_v45  ;;  %v337_v49 = vadd.f32 1e-05, %v333_v48 }
 0x197   :  { %584 = vrsqrt.f32 %v336_v46 }
 0x198   :  { %586 = vrsqrt.f32 %v335_v47 }
 0x199   :  { %588 = vrsqrt.f32 %v337_v49 }
 0x19c   :  { %v583_v51 = vpop.eup %582 }
 0x19d   :  { %v346_v52 = vmul.f32 %v583_v51, %v342_v50 }
 0x19f   :  { %372 = vperm.xlu0 %544, %v346_v52   ;;  %v354_v62 = vmul.f32 %v346_v52, %v310_v7 }
 0x1a1   :  { %v358_v0 = vsub.f32 %v350_v63, %v354_v62 }
 0x1a4   :  { %v585_v54 = vpop.eup %584 }
 0x1a5   :  { %v348_v55 = vmul.f32 %v585_v54, %v344_v53  ;;  %v587_v56 = vpop.eup %586 }
 0x1a6   :  { %v347_v58 = vmul.f32 %v587_v56, %v343_v57  ;;  %v589_v59 = vpop.eup %588 }
 0x1a7   :  { %382 = vperm.xlu1 %545, %v348_v55   ;;  %v349_v61 = vmul.f32 %v589_v59, %v345_v60  ;;  %v356_v1 = vmul.f32 %v348_v55, %v312_v18 }
 0x1a8   :  { %v355_v4 = vmul.f32 %v347_v58, %v311_v23 }
 0x1a9   :  { %v360_v3 = vsub.f32 %v352_v2, %v356_v1  ;;  %v357_v7 = vmul.f32 %v349_v61, %v313_v21 }
 0x1aa   :  { %v359_v6 = vsub.f32 %v351_v5, %v355_v4 }
 0x1ab   :  { %377 = vperm.xlu1 %545, %v347_v58   ;;  %v361_v9 = vsub.f32 %v353_v8, %v357_v7 }
 0x1af   :  { %387 = vperm.xlu1 %545, %v349_v61  }
 0x1b3   :  { %400 = vperm.xlu1 %545, %v358_v0  }
 0x1b7   :  { %410 = vperm.xlu1 %545, %v360_v3  }
 0x1bb   :  { %405 = vperm.xlu1 %545, %v359_v6  }
 0x1bf   :  { %415 = vperm.xlu1 %545, %v361_v9  }
 0x21a   :  { %v373_v12 = vpop.permute.xlu0 %372 }
 0x21b   :  { %v390_v14 = vmul.f32 %v373_v12, %v713_v25  ;;  %v391_v15 = vmul.f32 %v373_v12, %v717_v27 }
 0x222   :  { %v383_v10 = vpop.permute.xlu1 %382 }
 0x223   :  { %v394_v19 = vmul.f32 %v383_v10, %v715_v26  ;;  %v395_v20 = vmul.f32 %v383_v10, %v719_v28 }
 0x226   :  { %v378_v11 = vpop.permute.xlu1 %377 }
 0x227   :  { %v392_v34 = vmul.f32 %v378_v11, %v727_v32  ;;  %v393_v25 = vmul.f32 %v378_v11, %v733_v35 }
 0x22a   :  { %v388_v13 = vpop.permute.xlu1 %387 }
 0x22b   :  { %v396_v41 = vmul.f32 %v388_v13, %v729_v33  ;;  %v397_v42 = vmul.f32 %v388_v13, %v735_v36 }
 0x22e   :  { %v401_v16 = vpop.permute.xlu1 %400 }
 0x22f   :  { %v418_v17 = vadd.f32 %v401_v16, %v390_v14  ;;  %v419_v18 = vadd.f32 %v401_v16, %v391_v15 }
 0x231   :  { %v434_v21 = vmin.f32 %v418_v17, 0.0  ;;  %v435_v22 = vmin.f32 %v419_v18, 0.0  ;;  %vm426_vm2 = vcmp.gt.f32.partialorder %v418_v17, 0.0  ;;  %vm427_vm3 = vcmp.gt.f32.partialorder %v419_v18, 0.0 }
 0x232   :  { %v411_v23 = vpop.permute.xlu1 %410 }
 0x233   :  { %v442_v24 = vmul.f32 1.442695, %v434_v21  ;;  %v444_v29 = vmul.f32 1.442695, %v435_v22  ;;  %v422_v30 = vadd.f32 %v411_v23, %v394_v19  ;;  %v423_v31 = vadd.f32 %v411_v23, %v395_v20 }
 0x235   :  { %590 = vpow2.f32 %v442_v24  ;;  %v438_v27 = vmin.f32 %v422_v30, 0.0  ;;  %v439_v37 = vmin.f32 %v423_v31, 0.0  ;;  %vm430_vm4 = vcmp.gt.f32.partialorder %v422_v30, 0.0 }
 0x236   :  { %592 = vpow2.f32 %v444_v29  ;;  %v406_v38 = vpop.permute.xlu1 %405  ;;  %vm431_vm5 = vcmp.gt.f32.partialorder %v423_v31, 0.0 }
 0x237   :  { %v450_v39 = vmul.f32 1.442695, %v438_v27  ;;  %v420_v26 = vadd.f32 %v406_v38, %v392_v34  ;;  %v421_v40 = vadd.f32 %v406_v38, %v393_v25  ;;  %v452_v28 = vmul.f32 1.442695, %v439_v37 }
 0x239   :  { %594 = vpow2.f32 %v450_v39  ;;  %v436_v43 = vmin.f32 %v420_v26, 0.0  ;;  %v437_v44 = vmin.f32 %v421_v40, 0.0  ;;  %vm428_vm6 = vcmp.gt.f32.partialorder %v420_v26, 0.0 }
 0x23a   :  { %596 = vpow2.f32 %v452_v28  ;;  %v416_v32 = vpop.permute.xlu1 %415  ;;  %vm429_vm7 = vcmp.gt.f32.partialorder %v421_v40, 0.0 }
 0x23b   :  { %v446_v45 = vmul.f32 1.442695, %v436_v43  ;;  %v424_v35 = vadd.f32 %v416_v32, %v396_v41  ;;  %v425_v46 = vadd.f32 %v416_v32, %v397_v42  ;;  %v448_v47 = vmul.f32 1.442695, %v437_v44 }
 0x23d   :  { %598 = vpow2.f32 %v446_v45  ;;  %v440_v48 = vmin.f32 %v424_v35, 0.0  ;;  %v441_v49 = vmin.f32 %v425_v46, 0.0  ;;  %vm432_vm8 = vcmp.gt.f32.partialorder %v424_v35, 0.0 }
 0x23e   :  { %600 = vpow2.f32 %v448_v47  ;;  %vm433_vm9 = vcmp.gt.f32.partialorder %v425_v46, 0.0 }
 0x23f   :  { %v454_v50 = vmul.f32 1.442695, %v440_v48  ;;  %v456_v51 = vmul.f32 1.442695, %v441_v49 }
 0x241   :  { %602 = vpow2.f32 %v454_v50 }
 0x242   :  { %v591_v52 = vpop.eup %590  ;;  %604 = vpow2.f32 %v456_v51 }
 0x243   :  { %v593_v33 = vpop.eup %592  ;;  %v514_v36 = vadd.f32 -1.0, %v591_v52 }
 0x244   :  { %v515_v53 = vadd.f32 -1.0, %v593_v33 }
 0x245   :  { %v466_v54 = vsel %vm426_vm2, %v418_v17, %v514_v36 }
 0x246   :  { %v595_v55 = vpop.eup %594  ;;  %v467_v56 = vsel %vm427_vm3, %v419_v18, %v515_v53  ;;  %474 = vst [vmem:[%s821_s4] sm:$0xff] %v466_v54 }
 0x247   :  { %v597_v57 = vpop.eup %596  ;;  %475 = vst [vmem:[%s821_s4 + $0x8] sm:$0xff] %v467_v56  ;;  %v518_v58 = vadd.f32 -1.0, %v595_v55 }
 0x248   :  { %v519_v59 = vadd.f32 -1.0, %v597_v57 }
 0x249   :  { %v470_v60 = vsel %vm430_vm4, %v422_v30, %v518_v58 }
 0x24a   :  { %v599_v61 = vpop.eup %598  ;;  %v471_v62 = vsel %vm431_vm5, %v423_v31, %v519_v59  ;;  %478 = vst [vmem:[%s821_s4 + $0x20] sm:$0xff] %v470_v60 }
 0x24b   :  { %v601_v63 = vpop.eup %600  ;;  %479 = vst [vmem:[%s821_s4 + $0x28] sm:$0xff] %v471_v62  ;;  %v516_v0 = vadd.f32 -1.0, %v599_v61 }
 0x24c   :  { %v517_v1 = vadd.f32 -1.0, %v601_v63 }
 0x24d   :  { %v468_v2 = vsel %vm428_vm6, %v420_v26, %v516_v0 }
 0x24e   :  { %v603_v3 = vpop.eup %602  ;;  %v469_v4 = vsel %vm429_vm7, %v421_v40, %v517_v1  ;;  %476 = vst [vmem:[%s821_s4 + $0x10] sm:$0xff] %v468_v2 }
 0x24f   :  { %v605_v5 = vpop.eup %604  ;;  %477 = vst [vmem:[%s821_s4 + $0x18] sm:$0xff] %v469_v4  ;;  %v520_v6 = vadd.f32 -1.0, %v603_v3 }
 0x250   :  { %v521_v7 = vadd.f32 -1.0, %v605_v5 }
 0x251   :  { %v472_v8 = vsel %vm432_vm8, %v424_v35, %v520_v6 }
 0x252   :  { %v473_v9 = vsel %vm433_vm9, %v425_v46, %v521_v7  ;;  %480 = vst [vmem:[%s821_s4 + $0x30] sm:$0xff] %v472_v8 }
 0x253   :  { %481 = vst [vmem:[%s821_s4 + $0x38] sm:$0xff] %v473_v9 }

// kernel: aunet_forward.12
= control target key start
LH: loop header
LB: loop body
LE: loop exit
PB: predicated region body
PF: predicated region fallthrough
CT: control target
= control target key end

     0   :  { %vm229_vm0 = vcmask 523264   ;;  %vm22_vm1 = vcmask 7168   ;;  %v657_v26 = vmov 0.0   ;;  %v658_v51 = vmov 0   ;;  %s840_s0 = inlined_call_operand.vmem [shape: bf16[320,128], index: 0, kind: input, shape index: {}]   ;;  %s841_s1 = inlined_call_operand.vmem [shape: bf16[32,320], index: 1, kind: input, shape index: {}]   ;;  %s842_s2 = inlined_call_operand.vmem [shape: f32[32,1], index: 2, kind: input, shape index: {}]   ;;  %s843_s3 = inlined_call_operand.vmem [shape: f32[32,1], index: 3, kind: input, shape index: {}]   ;;  %s844_s4 = inlined_call_operand.vmem [shape: f32[32,128], index: 4, kind: output, shape index: {}]  }
   0x1   :  { %v613_v0 = vld [vmem:[%s840_s0 + $0x78] sm:$0xff]   ;;  %v615_v2 = vld [vmem:[%s840_s0 + $0x70] sm:$0xff]   ;;  %v617_v4 = vld [vmem:[%s840_s0 + $0x68] sm:$0xff]   ;;  %23 = vst.msk [vmem:[#allocation2] sm:$0xff] %vm22_vm1, %v657_v26  ;;  %611 = vset.pattern.permute.xlu0 %v658_v51  ;;  %612 = vset.pattern.permute.xlu1 %v658_v51 }
   0x2   :  { %v614_v1 = vld [vmem:[%s840_s0 + $0x38] sm:$0xff]   ;;  %563 = vmatprep.subr.bf16.mxu0 %v613_v0  ;;  %v616_v3 = vld [vmem:[%s840_s0 + $0x30] sm:$0xff]   ;;  %v618_v5 = vld [vmem:[%s840_s0 + $0x28] sm:$0xff]   ;;  %24 = vst.msk [vmem:[#allocation2 + $0x8] sm:$0xff] %vm22_vm1, %v657_v26 }
   0x3   :  { %564 = vmatpush3.bf16.msra.mxu0 %v614_v1  ;;  %v620_v6 = vld [vmem:[%s840_s0 + $0x98] sm:$0xff]   ;;  %v619_v7 = vld [vmem:[%s840_s0 + $0x60] sm:$0xff]   ;;  %v623_v8 = vld [vmem:[%s840_s0 + $0x90] sm:$0xff]   ;;  %25 = vst.msk [vmem:[#allocation2 + $0x10] sm:$0xff] %vm22_vm1, %v657_v26 }
   0x4   :  { %565 = vmatprep.subr.bf16.mxu0 %v615_v2  ;;  %597 = vmatprep.subr.bf16.mxu1 %v620_v6  ;;  %v621_v9 = vld [vmem:[%s840_s0 + $0x20] sm:$0xff]   ;;  %v622_v10 = vld [vmem:[%s840_s0 + $0x58] sm:$0xff]   ;;  %v626_v11 = vld [vmem:[%s840_s0 + $0x88] sm:$0xff]   ;;  %26 = vst.msk [vmem:[#allocation2 + $0x18] sm:$0xff] %vm22_vm1, %v657_v26 }
   0x5   :  { %598 = vmatpush3.bf16.msra.mxu1 %v620_v6  ;;  %v624_v12 = vld [vmem:[%s840_s0 + $0x18] sm:$0xff]   ;;  %v625_v13 = vld [vmem:[%s840_s0 + $0x50] sm:$0xff]   ;;  %v629_v14 = vld [vmem:[%s840_s0 + $0x80] sm:$0xff]   ;;  %27 = vst.msk [vmem:[#allocation3] sm:$0xff] %vm22_vm1, %v657_v26 }
   0x6   :  { %599 = vmatprep.subr.bf16.mxu1 %v623_v8  ;;  %v631_v15 = vld [vmem:[%s841_s1 + $0x8] ss:$12 sps:$4 sm:$0xff]   ;;  %v633_v18 = vld [vmem:[%s841_s1 + $0x20] ss:$12 sps:$4 sm:$0xff]   ;;  %v637_v20 = vld [vmem:[%s841_s1 + $0x4] ss:$12 sps:$4 sm:$0xff]  }
   0x7   :  { %566 = vmatpush3.bf16.msra.mxu0 %v616_v3  ;;  %v627_v16 = vld [vmem:[%s840_s0 + $0x10] sm:$0xff]   ;;  %v628_v17 = vld [vmem:[%s840_s0 + $0x48] sm:$0xff]   ;;  %605 = vmatprep.mubr.msk.bf16.mxu1 %vm229_vm0, %v631_v15  ;;  %v632_v21 = vld [vmem:[%s840_s0 + $0x40] sm:$0xff]   ;;  %28 = vst.msk [vmem:[#allocation3 + $0x8] sm:$0xff] %vm22_vm1, %v657_v26 }
   0x8   :  { %567 = vmatprep.subr.bf16.mxu0 %v617_v4  ;;  %v630_v19 = vld [vmem:[%s840_s0 + $0x8] sm:$0xff]   ;;  %268 = vmatprep.mubr.bf16.mxu0 %v637_v20  ;;  %v634_v22 = vld [vmem:[%s840_s0] sm:$0xff]   ;;  %29 = vst.msk [vmem:[#allocation3 + $0x10] sm:$0xff] %vm22_vm1, %v657_v26  ;;  %30 = vst.msk [vmem:[#allocation3 + $0x18] sm:$0xff] %vm22_vm1, %v657_v26 }
   0x9   :  { %600 = vmatpush3.bf16.msra.mxu1 %v623_v8  ;;  %v635_v23 = vld [vmem:[%s841_s1] ss:$12 sps:$4 sm:$0xff]   ;;  %v638_v24 = vld [vmem:[%s841_s1 + $0x1c] ss:$12 sps:$4 sm:$0xff]   ;;  %v640_v25 = vld [vmem:[%s841_s1 + $0x18] ss:$12 sps:$4 sm:$0xff]  }
   0xa   :  { %601 = vmatprep.subr.bf16.mxu1 %v626_v11  ;;  %v334_v52 = vld [vmem:[#allocation2] sm:$0xff]  ;;  %v335_v60 = vld [vmem:[#allocation2 + $0x8] sm:$0xff]  ;;  %v336_v63 = vld [vmem:[#allocation2 + $0x10] sm:$0xff] }
   0xb   :  { %568 = vmatpush3.bf16.msra.mxu0 %v618_v5  ;;  %v427_v51 = vld [vmem:[%s842_s2 + $0x8] sm:$0xff] }
   0xc   :  { %569 = vmatprep.subr.bf16.mxu0 %v619_v7  ;;  %v355_v55 = vld [vmem:[#allocation3] sm:$0xff]  ;;  %v337_v7 = vld [vmem:[#allocation2 + $0x18] sm:$0xff] }
   0xd   :  { %602 = vmatpush3.bf16.msra.mxu1 %v626_v11 }
   0xe   :  { %603 = vmatprep.subr.bf16.mxu1 %v629_v14  ;;  %v356_v57 = vld [vmem:[#allocation3 + $0x8] sm:$0xff] }
   0xf   :  { %570 = vmatpush3.bf16.msra.mxu0 %v621_v9  ;;  %v357_v2 = vld [vmem:[#allocation3 + $0x10] sm:$0xff] }
  0x10   :  { %571 = vmatprep.subr.bf16.mxu0 %v622_v10 }
  0x11   :  { %604 = vmatpush3.bf16.msra.mxu1 %v629_v14  ;;  %v358_v14 = vld [vmem:[#allocation3 + $0x18] sm:$0xff] }
  0x13   :  { %572 = vmatpush3.bf16.msra.mxu0 %v624_v12 }
  0x14   :  { %573 = vmatprep.subr.bf16.mxu0 %v625_v13  ;;  %606 = vmatmul.mubr.msk.bf16.vlgmr.msra.gmra.mxu1 %vm229_vm0, %v633_v18 }
  0x17   :  { %574 = vmatpush3.bf16.msra.mxu0 %v627_v16 }
  0x18   :  { %575 = vmatprep.subr.bf16.mxu0 %v628_v17 }
  0x1b   :  { %576 = vmatpush3.bf16.msra.mxu0 %v630_v19 }
  0x1c   :  { %577 = vmatprep.subr.bf16.mxu0 %v632_v21 }
  0x1f   :  { %578 = vmatpush3.bf16.msra.mxu0 %v634_v22 }
  0x22   :  { %269 = vmatmul.mubr.bf16.vlgmr.msra.gmra.mxu0 %v635_v23 }
  0x23   :  { %276 = vmatprep.mubr.bf16.mxu0 %v638_v24 }
  0x2a   :  { %277 = vmatmul.mubr.bf16.gmra.mxu0 %v640_v25 }
  0xd4   :  { %v607_v27 = vpop.f32.mrf.mxu1 }
  0xd6   :  { %v319_v28 = vpop.f32.mrf.mxu1 }
  0xd8   :  { %v608_v32 = vpop.f32.mrf.mxu1 }
  0xda   :  { %v322_v37 = vpop.f32.mrf.mxu1 }
  0xe2   :  { %v579_v29 = vpop.f32.mrf.mxu0 }
  0xe4   :  { %v580_v30 = vpop.f32.mrf.mxu0 }
  0xe5   :  { %v581_v31 = vadd.f32 %v580_v30, %v579_v29 }
  0xe6   :  { %v582_v33 = vpop.f32.mrf.mxu0 }
  0xe7   :  { %v772_v34 = vadd.f32 %v581_v31, %v319_v28 }
  0xe8   :  { %v583_v35 = vpop.f32.mrf.mxu0 }
  0xe9   :  { %v584_v36 = vadd.f32 %v583_v35, %v582_v33  ;;  %338 = vadd.xlane.f32.xlu0 %v772_v34  ;;  %v359_v40 = vmul.f32 %v772_v34, %v772_v34 }
  0xea   :  { %v585_v38 = vpop.f32.mrf.mxu0 }
  0xeb   :  { %v775_v39 = vadd.f32 %v584_v36, %v322_v37 }
  0xec   :  { %v586_v41 = vpop.f32.mrf.mxu0 }
  0xed   :  { %v587_v42 = vadd.f32 %v586_v41, %v585_v38  ;;  %363 = vadd.xlane.f32.xlu0 %v359_v40  ;;  %v360_v43 = vmul.f32 %v775_v39, %v775_v39 }
  0xee   :  { %v588_v44 = vpop.f32.mrf.mxu0 }
  0xef   :  { %v781_v45 = vadd.f32 %v607_v27, %v587_v42  ;;  %365 = vadd.xlane.f32.xlu1 %v360_v43 }
  0xf0   :  { %v589_v46 = vpop.f32.mrf.mxu0 }
  0xf1   :  { %v590_v47 = vadd.f32 %v589_v46, %v588_v44  ;;  %340 = vadd.xlane.f32.xlu0 %v775_v39  ;;  %v361_v48 = vmul.f32 %v781_v45, %v781_v45  ;;  %v426_v44 = vld [vmem:[%s842_s2] sm:$0xff] }
  0xf3   :  { %342 = vadd.xlane.f32.xlu1 %v781_v45  ;;  %v787_v49 = vadd.f32 %v608_v32, %v590_v47 }
  0xf5   :  { %367 = vadd.xlane.f32.xlu0 %v361_v48  ;;  %v362_v50 = vmul.f32 %v787_v49, %v787_v49 }
  0xf7   :  { %344 = vadd.xlane.f32.xlu1 %v787_v49 }
  0xfb   :  { %369 = vadd.xlane.f32.xlu1 %v362_v50 }
 0x172   :  { %v339_v53 = vpop.xlane.xlu0 %338 }
 0x173   :  { %v346_v54 = vadd.f32 %v339_v53, %v334_v52 }
 0x175   :  { %351 = vst.msk [vmem:[#allocation2] sm:$0xff] %vm22_vm1, %v346_v54 }
 0x176   :  { %v364_v56 = vpop.xlane.xlu0 %363 }
 0x177   :  { %v371_v58 = vadd.f32 %v364_v56, %v355_v55  ;;  %v434_v55 = vld [vmem:[%s843_s3] sm:$0xff] }
 0x178   :  { %v366_v59 = vpop.xlane.xlu1 %365 }
 0x179   :  { %375 = vst.msk [vmem:[#allocation3] sm:$0xff] %vm22_vm1, %v371_v58  ;;  %v372_v61 = vadd.f32 %v366_v59, %v356_v57  ;;  %v428_v58 = vld [vmem:[%s842_s2 + $0x10] sm:$0xff] }
 0x17a   :  { %v341_v62 = vpop.xlane.xlu0 %340 }
 0x17b   :  { %376 = vst.msk [vmem:[#allocation3 + $0x8] sm:$0xff] %vm22_vm1, %v372_v61  ;;  %v347_v0 = vadd.f32 %v341_v62, %v335_v60  ;;  %v435_v61 = vld [vmem:[%s843_s3 + $0x8] sm:$0xff] }
 0x17c   :  { %v343_v1 = vpop.xlane.xlu1 %342  ;;  %v390_v3 = vld [vmem:[#allocation2] sm:$0xff] }
 0x17d   :  { %352 = vst.msk [vmem:[#allocation2 + $0x8] sm:$0xff] %vm22_vm1, %v347_v0  ;;  %v348_v4 = vadd.f32 %v343_v1, %v336_v63  ;;  %v394_v5 = vmul.f32 0.008928572, %v390_v3  ;;  %v429_v0 = vld [vmem:[%s842_s2 + $0x18] sm:$0xff]  ;;  %v436_v3 = vld [vmem:[%s843_s3 + $0x10] sm:$0xff] }
 0x17e   :  { %v368_v6 = vpop.xlane.xlu0 %367 }
 0x17f   :  { %353 = vst.msk [vmem:[#allocation2 + $0x10] sm:$0xff] %vm22_vm1, %v348_v4  ;;  %v373_v8 = vadd.f32 %v368_v6, %v357_v2  ;;  %v406_v13 = vmul.f32 %v394_v5, %v394_v5  ;;  %v437_v6 = vld [vmem:[%s843_s3 + $0x18] sm:$0xff] }
 0x180   :  { %v345_v9 = vpop.xlane.xlu1 %344  ;;  %v398_v10 = vld [vmem:[#allocation3] sm:$0xff] }
 0x181   :  { %377 = vst.msk [vmem:[#allocation3 + $0x10] sm:$0xff] %vm22_vm1, %v373_v8  ;;  %v349_v11 = vadd.f32 %v345_v9, %v337_v7  ;;  %v402_v12 = vmul.f32 0.008928572, %v398_v10 }
 0x182   :  { %v399_v18 = vld [vmem:[#allocation3 + $0x8] sm:$0xff] }
 0x183   :  { %354 = vst.msk [vmem:[#allocation2 + $0x18] sm:$0xff] %vm22_vm1, %v349_v11  ;;  %v410_v15 = vsub.f32 %v402_v12, %v406_v13  ;;  %v403_v24 = vmul.f32 0.008928572, %v399_v18 }
 0x184   :  { %v370_v16 = vpop.xlane.xlu1 %369  ;;  %v391_v17 = vld [vmem:[#allocation2 + $0x8] sm:$0xff] }
 0x185   :  { %v374_v19 = vadd.f32 %v370_v16, %v358_v14  ;;  %v414_v20 = vmax.f32 %v410_v15, 0.0  ;;  %v395_v21 = vmul.f32 0.008928572, %v391_v17 }
 0x186   :  { %v392_v22 = vld [vmem:[#allocation2 + $0x10] sm:$0xff] }
 0x187   :  { %378 = vst.msk [vmem:[#allocation3 + $0x18] sm:$0xff] %vm22_vm1, %v374_v19  ;;  %v418_v23 = vadd.f32 1e-05, %v414_v20  ;;  %v407_v25 = vmul.f32 %v395_v21, %v395_v21  ;;  %v396_v26 = vmul.f32 0.008928572, %v392_v22 }
 0x188   :  { %v400_v27 = vld [vmem:[#allocation3 + $0x10] sm:$0xff] }
 0x189   :  { %641 = vrsqrt.f32 %v418_v23  ;;  %v411_v28 = vsub.f32 %v403_v24, %v407_v25  ;;  %v404_v29 = vmul.f32 0.008928572, %v400_v27  ;;  %v408_v30 = vmul.f32 %v396_v26, %v396_v26 }
 0x18a   :  { %v393_v31 = vld [vmem:[#allocation2 + $0x18] sm:$0xff] }
 0x18b   :  { %v415_v32 = vmax.f32 %v411_v28, 0.0  ;;  %v412_v33 = vsub.f32 %v404_v29, %v408_v30  ;;  %v397_v35 = vmul.f32 0.008928572, %v393_v31 }
 0x18d   :  { %v419_v36 = vadd.f32 1e-05, %v415_v32  ;;  %v416_v37 = vmax.f32 %v412_v33, 0.0  ;;  %v409_v41 = vmul.f32 %v397_v35, %v397_v35 }
 0x18e   :  { %v401_v38 = vld [vmem:[#allocation3 + $0x18] sm:$0xff] }
 0x18f   :  { %643 = vrsqrt.f32 %v419_v36  ;;  %v405_v40 = vmul.f32 0.008928572, %v401_v38  ;;  %v420_v42 = vadd.f32 1e-05, %v416_v37 }
 0x191   :  { %v413_v43 = vsub.f32 %v405_v40, %v409_v41  ;;  %645 = vrsqrt.f32 %v420_v42 }
 0x193   :  { %v417_v46 = vmax.f32 %v413_v43, 0.0 }
 0x195   :  { %v421_v50 = vadd.f32 1e-05, %v417_v46 }
 0x196   :  { %v642_v47 = vpop.eup %641 }
 0x197   :  { %v430_v48 = vmul.f32 %v642_v47, %v426_v44  ;;  %647 = vrsqrt.f32 %v421_v50 }
 0x199   :  { %452 = vperm.xlu0 %611, %v430_v48   ;;  %v438_v54 = vmul.f32 %v430_v48, %v394_v5 }
 0x19b   :  { %v442_v56 = vsub.f32 %v434_v55, %v438_v54 }
 0x19c   :  { %v644_v52 = vpop.eup %643 }
 0x19d   :  { %v431_v53 = vmul.f32 %v644_v52, %v427_v51 }
 0x19e   :  { %v646_v57 = vpop.eup %645 }
 0x19f   :  { %457 = vperm.xlu1 %612, %v431_v53   ;;  %v432_v59 = vmul.f32 %v646_v57, %v428_v58  ;;  %v439_v60 = vmul.f32 %v431_v53, %v395_v21 }
 0x1a1   :  { %v443_v62 = vsub.f32 %v435_v61, %v439_v60  ;;  %v440_v2 = vmul.f32 %v432_v59, %v396_v26 }
 0x1a3   :  { %476 = vperm.xlu1 %612, %v442_v56   ;;  %v444_v4 = vsub.f32 %v436_v3, %v440_v2 }
 0x1a4   :  { %v648_v63 = vpop.eup %647 }
 0x1a5   :  { %v433_v1 = vmul.f32 %v648_v63, %v429_v0 }
 0x1a7   :  { %462 = vperm.xlu1 %612, %v432_v59   ;;  %v441_v5 = vmul.f32 %v433_v1, %v397_v35 }
 0x1a9   :  { %v445_v7 = vsub.f32 %v437_v6, %v441_v5 }
 0x1ab   :  { %481 = vperm.xlu1 %612, %v443_v62  }
 0x1af   :  { %467 = vperm.xlu1 %612, %v433_v1  }
 0x1b3   :  { %486 = vperm.xlu1 %612, %v444_v4  }
 0x1b7   :  { %491 = vperm.xlu1 %612, %v445_v7  }
 0x214   :  { %v453_v8 = vpop.permute.xlu0 %452 }
 0x215   :  { %v470_v10 = vmul.f32 %v453_v8, %v772_v34 }
 0x21a   :  { %v458_v9 = vpop.permute.xlu1 %457 }
 0x21b   :  { %v471_v16 = vmul.f32 %v458_v9, %v775_v39 }
 0x21e   :  { %v477_v11 = vpop.permute.xlu1 %476 }
 0x21f   :  { %v494_v12 = vadd.f32 %v477_v11, %v470_v10 }
 0x221   :  { %v502_v13 = vmin.f32 %v494_v12, 0.0  ;;  %vm498_vm2 = vcmp.gt.f32.partialorder %v494_v12, 0.0 }
 0x222   :  { %v463_v14 = vpop.permute.xlu1 %462 }
 0x223   :  { %v506_v15 = vmul.f32 1.442695, %v502_v13  ;;  %v472_v22 = vmul.f32 %v463_v14, %v781_v45 }
 0x225   :  { %649 = vpow2.f32 %v506_v15 }
 0x226   :  { %v482_v17 = vpop.permute.xlu1 %481 }
 0x227   :  { %v495_v18 = vadd.f32 %v482_v17, %v471_v16 }
 0x229   :  { %v503_v19 = vmin.f32 %v495_v18, 0.0  ;;  %vm499_vm3 = vcmp.gt.f32.partialorder %v495_v18, 0.0 }
 0x22a   :  { %v468_v20 = vpop.permute.xlu1 %467 }
 0x22b   :  { %v508_v21 = vmul.f32 1.442695, %v503_v19  ;;  %v473_v34 = vmul.f32 %v468_v20, %v787_v49 }
 0x22d   :  { %651 = vpow2.f32 %v508_v21 }
 0x22e   :  { %v487_v23 = vpop.permute.xlu1 %486 }
 0x22f   :  { %v496_v24 = vadd.f32 %v487_v23, %v472_v22 }
 0x231   :  { %v504_v25 = vmin.f32 %v496_v24, 0.0  ;;  %vm500_vm4 = vcmp.gt.f32.partialorder %v496_v24, 0.0 }
 0x232   :  { %v650_v26 = vpop.eup %649  ;;  %v492_v27 = vpop.permute.xlu1 %491 }
 0x233   :  { %v559_v28 = vadd.f32 -1.0, %v650_v26  ;;  %v510_v29 = vmul.f32 1.442695, %v504_v25  ;;  %v497_v30 = vadd.f32 %v492_v27, %v473_v34 }
 0x235   :  { %v518_v39 = vsel %vm498_vm2, %v494_v12, %v559_v28  ;;  %653 = vpow2.f32 %v510_v29  ;;  %v505_v31 = vmin.f32 %v497_v30, 0.0  ;;  %vm501_vm5 = vcmp.gt.f32.partialorder %v497_v30, 0.0 }
 0x236   :  { %522 = vst [vmem:[%s844_s4] sm:$0xff] %v518_v39 }
 0x237   :  { %v512_v45 = vmul.f32 1.442695, %v505_v31 }
 0x239   :  { %655 = vpow2.f32 %v512_v45 }
 0x23a   :  { %v652_v32 = vpop.eup %651 }
 0x23b   :  { %v560_v33 = vadd.f32 -1.0, %v652_v32 }
 0x23d   :  { %v519_v49 = vsel %vm499_vm3, %v495_v18, %v560_v33 }
 0x23e   :  { %523 = vst [vmem:[%s844_s4 + $0x8] sm:$0xff] %v519_v49 }
 0x242   :  { %v654_v35 = vpop.eup %653 }
 0x243   :  { %v561_v36 = vadd.f32 -1.0, %v654_v35 }
 0x245   :  { %v520_v37 = vsel %vm500_vm4, %v496_v24, %v561_v36 }
 0x246   :  { %v656_v38 = vpop.eup %655  ;;  %524 = vst [vmem:[%s844_s4 + $0x10] sm:$0xff] %v520_v37 }
 0x247   :  { %v562_v40 = vadd.f32 -1.0, %v656_v38 }
 0x249   :  { %v521_v41 = vsel %vm501_vm5, %v497_v30, %v562_v40 }
 0x24a   :  { %525 = vst [vmem:[%s844_s4 + $0x18] sm:$0xff] %v521_v41 }

// kernel: aunet_forward.13
= control target key start
LH: loop header
LB: loop body
LE: loop exit
PB: predicated region body
PF: predicated region fallthrough
CT: control target
= control target key end

     0   :  { %vm275_vm0 = vcmask 523264   ;;  %vm22_vm1 = vcmask 7168   ;;  %v979_v32 = vmov 0.0   ;;  %s1298_s0 = inlined_call_operand.vmem [shape: bf16[320,128], index: 0, kind: input, shape index: {}]   ;;  %s1299_s1 = inlined_call_operand.vmem [shape: bf16[64,320], index: 1, kind: input, shape index: {}]   ;;  %s1300_s2 = inlined_call_operand.vmem [shape: f32[64,1], index: 2, kind: input, shape index: {}]   ;;  %s1301_s3 = inlined_call_operand.vmem [shape: f32[64,1], index: 3, kind: input, shape index: {}]   ;;  %s1302_s4 = inlined_call_operand.vmem [shape: f32[64,128], index: 4, kind: output, shape index: {}]  }
   0x1   :  { %v911_v0 = vld [vmem:[%s1298_s0 + $0x78] sm:$0xff]   ;;  %v913_v2 = vld [vmem:[%s1298_s0 + $0x70] sm:$0xff]   ;;  %v915_v4 = vld [vmem:[%s1298_s0 + $0x68] sm:$0xff]   ;;  %23 = vst.msk [vmem:[#allocation2] sm:$0xff] %vm22_vm1, %v979_v32 }
   0x2   :  { %v912_v1 = vld [vmem:[%s1298_s0 + $0x38] sm:$0xff]   ;;  %843 = vmatprep.subr.bf16.mxu0 %v911_v0  ;;  %v914_v3 = vld [vmem:[%s1298_s0 + $0x30] sm:$0xff]   ;;  %v916_v5 = vld [vmem:[%s1298_s0 + $0x28] sm:$0xff]   ;;  %24 = vst.msk [vmem:[#allocation2 + $0x8] sm:$0xff] %vm22_vm1, %v979_v32 }
   0x3   :  { %844 = vmatpush3.bf16.msra.mxu0 %v912_v1  ;;  %v918_v6 = vld [vmem:[%s1298_s0 + $0x98] sm:$0xff]   ;;  %v917_v7 = vld [vmem:[%s1298_s0 + $0x60] sm:$0xff]   ;;  %v921_v8 = vld [vmem:[%s1298_s0 + $0x90] sm:$0xff]   ;;  %25 = vst.msk [vmem:[#allocation2 + $0x10] sm:$0xff] %vm22_vm1, %v979_v32 }
   0x4   :  { %845 = vmatprep.subr.bf16.mxu0 %v913_v2  ;;  %891 = vmatprep.subr.bf16.mxu1 %v918_v6  ;;  %v919_v9 = vld [vmem:[%s1298_s0 + $0x20] sm:$0xff]   ;;  %v920_v10 = vld [vmem:[%s1298_s0 + $0x58] sm:$0xff]   ;;  %v924_v11 = vld [vmem:[%s1298_s0 + $0x88] sm:$0xff]   ;;  %26 = vst.msk [vmem:[#allocation2 + $0x18] sm:$0xff] %vm22_vm1, %v979_v32 }
   0x5   :  { %892 = vmatpush3.bf16.msra.mxu1 %v918_v6  ;;  %v922_v12 = vld [vmem:[%s1298_s0 + $0x18] sm:$0xff]   ;;  %v923_v13 = vld [vmem:[%s1298_s0 + $0x50] sm:$0xff]   ;;  %v927_v14 = vld [vmem:[%s1298_s0 + $0x80] sm:$0xff]   ;;  %27 = vst.msk [vmem:[#allocation2 + $0x20] sm:$0xff] %vm22_vm1, %v979_v32 }
   0x6   :  { %893 = vmatprep.subr.bf16.mxu1 %v921_v8  ;;  %v929_v15 = vld [vmem:[%s1299_s1 + $0x8] ss:$12 sps:$4 sm:$0xff]   ;;  %v931_v18 = vld [vmem:[%s1299_s1 + $0x20] ss:$12 sps:$4 sm:$0xff]   ;;  %v935_v20 = vld [vmem:[%s1299_s1 + $0x4] ss:$12 sps:$4 sm:$0xff]  }
   0x7   :  { %846 = vmatpush3.bf16.msra.mxu0 %v914_v3  ;;  %v925_v16 = vld [vmem:[%s1298_s0 + $0x10] sm:$0xff]   ;;  %v926_v17 = vld [vmem:[%s1298_s0 + $0x48] sm:$0xff]   ;;  %899 = vmatprep.mubr.msk.bf16.mxu1 %vm275_vm0, %v929_v15  ;;  %v930_v21 = vld [vmem:[%s1298_s0 + $0x40] sm:$0xff]   ;;  %28 = vst.msk [vmem:[#allocation2 + $0x28] sm:$0xff] %vm22_vm1, %v979_v32 }
   0x8   :  { %847 = vmatprep.subr.bf16.mxu0 %v915_v4  ;;  %v928_v19 = vld [vmem:[%s1298_s0 + $0x8] sm:$0xff]   ;;  %320 = vmatprep.mubr.bf16.mxu0 %v935_v20  ;;  %v942_v22 = vld [vmem:[%s1299_s1 + $0x38] ss:$12 sps:$4 sm:$0xff]   ;;  %v943_v24 = vld [vmem:[%s1299_s1 + $0x50] ss:$12 sps:$4 sm:$0xff]   ;;  %29 = vst.msk [vmem:[#allocation2 + $0x30] sm:$0xff] %vm22_vm1, %v979_v32 }
   0x9   :  { %894 = vmatpush3.bf16.msra.mxu1 %v921_v8  ;;  %v932_v23 = vld [vmem:[%s1298_s0] sm:$0xff]   ;;  %v936_v26 = vld [vmem:[%s1299_s1 + $0x1c] ss:$12 sps:$4 sm:$0xff]   ;;  %v944_v30 = vld [vmem:[%s1299_s1 + $0x4c] ss:$12 sps:$4 sm:$0xff]   ;;  %30 = vst.msk [vmem:[#allocation2 + $0x38] sm:$0xff] %vm22_vm1, %v979_v32 }
   0xa   :  { %895 = vmatprep.subr.bf16.mxu1 %v924_v11  ;;  %v933_v25 = vld [vmem:[%s1299_s1] ss:$12 sps:$4 sm:$0xff]   ;;  %v938_v27 = vld [vmem:[%s1299_s1 + $0x18] ss:$12 sps:$4 sm:$0xff]   ;;  %v941_v29 = vld [vmem:[%s1299_s1 + $0x30] ss:$12 sps:$4 sm:$0xff]  }
   0xb   :  { %848 = vmatpush3.bf16.msra.mxu0 %v916_v5  ;;  %v939_v28 = vld [vmem:[%s1299_s1 + $0x34] ss:$12 sps:$4 sm:$0xff]   ;;  %31 = vst.msk [vmem:[#allocation3] sm:$0xff] %vm22_vm1, %v979_v32  ;;  %32 = vst.msk [vmem:[#allocation3 + $0x8] sm:$0xff] %vm22_vm1, %v979_v32 }
   0xc   :  { %849 = vmatprep.subr.bf16.mxu0 %v917_v7  ;;  %v946_v31 = vld [vmem:[%s1299_s1 + $0x48] ss:$12 sps:$4 sm:$0xff]   ;;  %33 = vst.msk [vmem:[#allocation3 + $0x10] sm:$0xff] %vm22_vm1, %v979_v32  ;;  %34 = vst.msk [vmem:[#allocation3 + $0x18] sm:$0xff] %vm22_vm1, %v979_v32 }
   0xd   :  { %896 = vmatpush3.bf16.msra.mxu1 %v924_v11  ;;  %35 = vst.msk [vmem:[#allocation3 + $0x20] sm:$0xff] %vm22_vm1, %v979_v32  ;;  %36 = vst.msk [vmem:[#allocation3 + $0x28] sm:$0xff] %vm22_vm1, %v979_v32 }
   0xe   :  { %897 = vmatprep.subr.bf16.mxu1 %v927_v14  ;;  %37 = vst.msk [vmem:[#allocation3 + $0x30] sm:$0xff] %vm22_vm1, %v979_v32  ;;  %38 = vst.msk [vmem:[#allocation3 + $0x38] sm:$0xff] %vm22_vm1, %v979_v32 }
   0xf   :  { %850 = vmatpush3.bf16.msra.mxu0 %v919_v9 }
  0x10   :  { %851 = vmatprep.subr.bf16.mxu0 %v920_v10 }
  0x11   :  { %898 = vmatpush3.bf16.msra.mxu1 %v927_v14 }
  0x13   :  { %852 = vmatpush3.bf16.msra.mxu0 %v922_v12  ;;  %v461_v32 = vld [vmem:[#allocation3 + $0x10] sm:$0xff] }
  0x14   :  { %853 = vmatprep.subr.bf16.mxu0 %v923_v13  ;;  %900 = vmatmul.mubr.msk.bf16.vlgmr.msra.gmra.mxu1 %vm275_vm0, %v931_v18  ;;  %v418_v18 = vld [vmem:[#allocation2] sm:$0xff] }
  0x15   :  { %903 = vmatprep.mubr.msk.bf16.mxu1 %vm275_vm0, %v942_v22 }
  0x17   :  { %854 = vmatpush3.bf16.msra.mxu0 %v925_v16 }
  0x18   :  { %855 = vmatprep.subr.bf16.mxu0 %v926_v17  ;;  %v980_v17 = vmov 0  }
  0x19   :  { %909 = vset.pattern.permute.xlu0 %v980_v17  ;;  %910 = vset.pattern.permute.xlu1 %v980_v17 }
  0x1b   :  { %856 = vmatpush3.bf16.msra.mxu0 %v928_v19 }
  0x1c   :  { %857 = vmatprep.subr.bf16.mxu0 %v930_v21  ;;  %904 = vmatmul.mubr.msk.bf16.gmra.mxu1 %vm275_vm0, %v943_v24  ;;  %v459_v21 = vld [vmem:[#allocation3] sm:$0xff] }
  0x1f   :  { %858 = vmatpush3.bf16.msra.mxu0 %v932_v23  ;;  %v460_v23 = vld [vmem:[#allocation3 + $0x8] sm:$0xff] }
  0x22   :  { %321 = vmatmul.mubr.bf16.vlgmr.msra.gmra.mxu0 %v933_v25 }
  0x23   :  { %328 = vmatprep.mubr.bf16.mxu0 %v936_v26  ;;  %v419_v26 = vld [vmem:[#allocation2 + $0x8] sm:$0xff] }
  0x2a   :  { %329 = vmatmul.mubr.bf16.gmra.mxu0 %v938_v27 }
  0x2b   :  { %336 = vmatprep.mubr.bf16.mxu0 %v939_v28 }
  0x32   :  { %337 = vmatmul.mubr.bf16.gmra.mxu0 %v941_v29  ;;  %v420_v29 = vld [vmem:[#allocation2 + $0x10] sm:$0xff] }
  0x33   :  { %344 = vmatprep.mubr.bf16.mxu0 %v944_v30 }
  0x3a   :  { %345 = vmatmul.mubr.bf16.gmra.mxu0 %v946_v31 }
  0xd4   :  { %v901_v33 = vpop.f32.mrf.mxu1 }
  0xd6   :  { %v387_v34 = vpop.f32.mrf.mxu1 }
  0xd8   :  { %v902_v38 = vpop.f32.mrf.mxu1 }
  0xda   :  { %v390_v43 = vpop.f32.mrf.mxu1 }
  0xdc   :  { %v905_v51 = vpop.f32.mrf.mxu1 }
  0xde   :  { %v403_v56 = vpop.f32.mrf.mxu1 }
  0xe0   :  { %v906_v59 = vpop.f32.mrf.mxu1 }
  0xe2   :  { %v859_v35 = vpop.f32.mrf.mxu0  ;;  %v406_v1 = vpop.f32.mrf.mxu1 }
  0xe4   :  { %v860_v36 = vpop.f32.mrf.mxu0 }
  0xe5   :  { %v861_v37 = vadd.f32 %v860_v36, %v859_v35 }
  0xe6   :  { %v862_v39 = vpop.f32.mrf.mxu0 }
  0xe7   :  { %v1122_v40 = vadd.f32 %v861_v37, %v387_v34  ;;  %v421_v37 = vld [vmem:[#allocation2 + $0x18] sm:$0xff] }
  0xe8   :  { %v863_v41 = vpop.f32.mrf.mxu0 }
  0xe9   :  { %v864_v42 = vadd.f32 %v863_v41, %v862_v39  ;;  %426 = vadd.xlane.f32.xlu0 %v1122_v40  ;;  %v467_v46 = vmul.f32 %v1122_v40, %v1122_v40  ;;  %v422_v41 = vld [vmem:[#allocation2 + $0x20] sm:$0xff] }
  0xea   :  { %v865_v44 = vpop.f32.mrf.mxu0 }
  0xeb   :  { %v1125_v45 = vadd.f32 %v864_v42, %v390_v43 }
  0xec   :  { %v866_v47 = vpop.f32.mrf.mxu0 }
  0xed   :  { %v867_v48 = vadd.f32 %v866_v47, %v865_v44  ;;  %475 = vadd.xlane.f32.xlu0 %v467_v46  ;;  %v468_v49 = vmul.f32 %v1125_v45, %v1125_v45 }
  0xee   :  { %v868_v50 = vpop.f32.mrf.mxu0 }
  0xef   :  { %v1131_v52 = vadd.f32 %v901_v33, %v867_v48  ;;  %477 = vadd.xlane.f32.xlu1 %v468_v49  ;;  %v462_v48 = vld [vmem:[#allocation3 + $0x18] sm:$0xff] }
  0xf0   :  { %v869_v53 = vpop.f32.mrf.mxu0 }
  0xf1   :  { %v870_v54 = vadd.f32 %v869_v53, %v868_v50  ;;  %428 = vadd.xlane.f32.xlu0 %v1125_v45  ;;  %v469_v57 = vmul.f32 %v1131_v52, %v1131_v52 }
  0xf2   :  { %v871_v55 = vpop.f32.mrf.mxu0 }
  0xf3   :  { %430 = vadd.xlane.f32.xlu1 %v1131_v52  ;;  %v1137_v60 = vadd.f32 %v902_v38, %v870_v54  ;;  %v463_v54 = vld [vmem:[#allocation3 + $0x20] sm:$0xff] }
  0xf4   :  { %v872_v58 = vpop.f32.mrf.mxu0 }
  0xf5   :  { %v873_v61 = vadd.f32 %v872_v58, %v871_v55  ;;  %479 = vadd.xlane.f32.xlu0 %v469_v57  ;;  %v470_v3 = vmul.f32 %v1137_v60, %v1137_v60 }
  0xf6   :  { %v874_v62 = vpop.f32.mrf.mxu0 }
  0xf7   :  { %v1139_v63 = vadd.f32 %v873_v61, %v403_v56  ;;  %432 = vadd.xlane.f32.xlu1 %v1137_v60  ;;  %v423_v61 = vld [vmem:[#allocation2 + $0x28] sm:$0xff] }
  0xf8   :  { %v875_v0 = vpop.f32.mrf.mxu0 }
  0xf9   :  { %v876_v2 = vadd.f32 %v875_v0, %v874_v62  ;;  %434 = vadd.xlane.f32.xlu0 %v1139_v63  ;;  %v471_v4 = vmul.f32 %v1139_v63, %v1139_v63 }
  0xfa   :  { %v877_v5 = vpop.f32.mrf.mxu0 }
  0xfb   :  { %481 = vadd.xlane.f32.xlu1 %v470_v3  ;;  %v1147_v6 = vadd.f32 %v876_v2, %v406_v1 }
  0xfc   :  { %v878_v7 = vpop.f32.mrf.mxu0 }
  0xfd   :  { %v879_v8 = vadd.f32 %v878_v7, %v877_v5  ;;  %483 = vadd.xlane.f32.xlu0 %v471_v4  ;;  %v472_v11 = vmul.f32 %v1147_v6, %v1147_v6  ;;  %v424_v7 = vld [vmem:[#allocation2 + $0x30] sm:$0xff] }
  0xfe   :  { %v880_v9 = vpop.f32.mrf.mxu0 }
  0xff   :  { %v1149_v10 = vadd.f32 %v905_v51, %v879_v8  ;;  %436 = vadd.xlane.f32.xlu1 %v1147_v6 }
 0x100   :  { %v881_v12 = vpop.f32.mrf.mxu0 }
 0x101   :  { %v882_v13 = vadd.f32 %v881_v12, %v880_v9  ;;  %438 = vadd.xlane.f32.xlu0 %v1149_v10  ;;  %v473_v14 = vmul.f32 %v1149_v10, %v1149_v10 }
 0x103   :  { %485 = vadd.xlane.f32.xlu1 %v472_v11  ;;  %v1157_v15 = vadd.f32 %v906_v59, %v882_v13 }
 0x105   :  { %487 = vadd.xlane.f32.xlu0 %v473_v14  ;;  %v474_v16 = vmul.f32 %v1157_v15, %v1157_v15  ;;  %v464_v14 = vld [vmem:[#allocation3 + $0x28] sm:$0xff] }
 0x107   :  { %440 = vadd.xlane.f32.xlu1 %v1157_v15 }
 0x10b   :  { %489 = vadd.xlane.f32.xlu1 %v474_v16 }
 0x172   :  { %v427_v19 = vpop.xlane.xlu0 %426 }
 0x173   :  { %v442_v20 = vadd.f32 %v427_v19, %v418_v18 }
 0x175   :  { %451 = vst.msk [vmem:[#allocation2] sm:$0xff] %vm22_vm1, %v442_v20 }
 0x176   :  { %v476_v22 = vpop.xlane.xlu0 %475 }
 0x177   :  { %v491_v24 = vadd.f32 %v476_v22, %v459_v21  ;;  %v465_v22 = vld [vmem:[#allocation3 + $0x30] sm:$0xff] }
 0x178   :  { %v478_v25 = vpop.xlane.xlu1 %477 }
 0x179   :  { %499 = vst.msk [vmem:[#allocation3] sm:$0xff] %vm22_vm1, %v491_v24  ;;  %v492_v27 = vadd.f32 %v478_v25, %v460_v23 }
 0x17a   :  { %v429_v28 = vpop.xlane.xlu0 %428 }
 0x17b   :  { %500 = vst.msk [vmem:[#allocation3 + $0x8] sm:$0xff] %vm22_vm1, %v492_v27  ;;  %v443_v30 = vadd.f32 %v429_v28, %v419_v26 }
 0x17c   :  { %v431_v31 = vpop.xlane.xlu1 %430  ;;  %v522_v33 = vld [vmem:[#allocation2] sm:$0xff] }
 0x17d   :  { %452 = vst.msk [vmem:[#allocation2 + $0x8] sm:$0xff] %vm22_vm1, %v443_v30  ;;  %v444_v34 = vadd.f32 %v431_v31, %v420_v29  ;;  %v1166_v35 = vmul.f32 0.020833334, %v522_v33  ;;  %v425_v29 = vld [vmem:[#allocation2 + $0x38] sm:$0xff] }
 0x17e   :  { %v480_v36 = vpop.xlane.xlu0 %479 }
 0x17f   :  { %453 = vst.msk [vmem:[#allocation2 + $0x10] sm:$0xff] %vm22_vm1, %v444_v34  ;;  %v493_v38 = vadd.f32 %v480_v36, %v461_v32  ;;  %v554_v46 = vmul.f32 %v1166_v35, %v1166_v35 }
 0x180   :  { %v433_v39 = vpop.xlane.xlu1 %432  ;;  %v538_v42 = vld [vmem:[#allocation3] sm:$0xff] }
 0x181   :  { %501 = vst.msk [vmem:[#allocation3 + $0x10] sm:$0xff] %vm22_vm1, %v493_v38  ;;  %v445_v43 = vadd.f32 %v433_v39, %v421_v37  ;;  %v546_v44 = vmul.f32 0.020833334, %v538_v42 }
 0x182   :  { %v435_v47 = vpop.xlane.xlu0 %434  ;;  %v539_v51 = vld [vmem:[#allocation3 + $0x8] sm:$0xff] }
 0x183   :  { %454 = vst.msk [vmem:[#allocation2 + $0x18] sm:$0xff] %vm22_vm1, %v445_v43  ;;  %v446_v49 = vadd.f32 %v435_v47, %v422_v41  ;;  %v562_v50 = vsub.f32 %v546_v44, %v554_v46  ;;  %v547_v62 = vmul.f32 0.020833334, %v539_v51  ;;  %v466_v44 = vld [vmem:[#allocation3 + $0x38] sm:$0xff] }
 0x184   :  { %v482_v53 = vpop.xlane.xlu1 %481  ;;  %v523_v55 = vld [vmem:[#allocation2 + $0x8] sm:$0xff] }
 0x185   :  { %455 = vst.msk [vmem:[#allocation2 + $0x20] sm:$0xff] %vm22_vm1, %v446_v49  ;;  %v494_v56 = vadd.f32 %v482_v53, %v462_v48  ;;  %v570_v57 = vmax.f32 %v562_v50, 0.0  ;;  %v1174_v58 = vmul.f32 0.020833334, %v523_v55  ;;  %v594_v50 = vld [vmem:[%s1300_s2] sm:$0xff] }
 0x186   :  { %v484_v59 = vpop.xlane.xlu0 %483  ;;  %v524_v0 = vld [vmem:[#allocation2 + $0x10] sm:$0xff] }
 0x187   :  { %502 = vst.msk [vmem:[#allocation3 + $0x18] sm:$0xff] %vm22_vm1, %v494_v56  ;;  %v495_v1 = vadd.f32 %v484_v59, %v463_v54  ;;  %v578_v2 = vadd.f32 1e-05, %v570_v57  ;;  %v555_v3 = vmul.f32 %v1174_v58, %v1174_v58  ;;  %v1179_v4 = vmul.f32 0.020833334, %v524_v0 }
 0x188   :  { %v437_v5 = vpop.xlane.xlu1 %436  ;;  %v540_v8 = vld [vmem:[#allocation3 + $0x10] sm:$0xff] }
 0x189   :  { %503 = vst.msk [vmem:[#allocation3 + $0x20] sm:$0xff] %vm22_vm1, %v495_v1  ;;  %v447_v9 = vadd.f32 %v437_v5, %v423_v61  ;;  %947 = vrsqrt.f32 %v578_v2  ;;  %v563_v11 = vsub.f32 %v547_v62, %v555_v3  ;;  %v548_v12 = vmul.f32 0.020833334, %v540_v8  ;;  %v595_v2 = vld [vmem:[%s1300_s2 + $0x8] sm:$0xff] }
 0x18a   :  { %v439_v13 = vpop.xlane.xlu0 %438  ;;  %v556_v16 = vmul.f32 %v1179_v4, %v1179_v4  ;;  %v525_v17 = vld [vmem:[#allocation2 + $0x18] sm:$0xff] }
 0x18b   :  { %456 = vst.msk [vmem:[#allocation2 + $0x28] sm:$0xff] %vm22_vm1, %v447_v9  ;;  %v448_v18 = vadd.f32 %v439_v13, %v424_v7  ;;  %v571_v19 = vmax.f32 %v563_v11, 0.0  ;;  %v1185_v20 = vmul.f32 0.020833334, %v525_v17 }
 0x18c   :  { %v486_v21 = vpop.xlane.xlu1 %485  ;;  %v564_v23 = vsub.f32 %v548_v12, %v556_v16  ;;  %v526_v24 = vld [vmem:[#allocation2 + $0x20] sm:$0xff] }
 0x18d   :  { %457 = vst.msk [vmem:[#allocation2 + $0x30] sm:$0xff] %vm22_vm1, %v448_v18  ;;  %v496_v25 = vadd.f32 %v486_v21, %v464_v14  ;;  %v579_v26 = vadd.f32 1e-05, %v571_v19  ;;  %v1188_v27 = vmul.f32 0.020833334, %v526_v24  ;;  %v557_v34 = vmul.f32 %v1185_v20, %v1185_v20  ;;  %v610_v18 = vld [vmem:[%s1301_s3] sm:$0xff] }
 0x18e   :  { %v488_v28 = vpop.xlane.xlu0 %487  ;;  %v572_v30 = vmax.f32 %v564_v23, 0.0  ;;  %v541_v31 = vld [vmem:[#allocation3 + $0x18] sm:$0xff]  ;;  %v611_v19 = vld [vmem:[%s1301_s3 + $0x8] sm:$0xff] }
 0x18f   :  { %504 = vst.msk [vmem:[#allocation3 + $0x28] sm:$0xff] %vm22_vm1, %v496_v25  ;;  %v497_v32 = vadd.f32 %v488_v28, %v465_v22  ;;  %949 = vrsqrt.f32 %v579_v26  ;;  %v549_v33 = vmul.f32 0.020833334, %v541_v31  ;;  %v558_v38 = vmul.f32 %v1188_v27, %v1188_v27  ;;  %v596_v31 = vld [vmem:[%s1300_s2 + $0x10] sm:$0xff] }
 0x190   :  { %v441_v36 = vpop.xlane.xlu1 %440  ;;  %v542_v37 = vld [vmem:[#allocation3 + $0x20] sm:$0xff]  ;;  %v580_v41 = vadd.f32 1e-05, %v572_v30 }
 0x191   :  { %505 = vst.msk [vmem:[#allocation3 + $0x30] sm:$0xff] %vm22_vm1, %v497_v32  ;;  %v449_v39 = vadd.f32 %v441_v36, %v425_v29  ;;  %v565_v42 = vsub.f32 %v549_v33, %v557_v34  ;;  %v550_v43 = vmul.f32 0.020833334, %v542_v37  ;;  %v597_v32 = vld [vmem:[%s1300_s2 + $0x18] sm:$0xff] }
 0x192   :  { %v527_v46 = vld [vmem:[#allocation2 + $0x28] sm:$0xff]  ;;  %951 = vrsqrt.f32 %v580_v41 }
 0x193   :  { %458 = vst.msk [vmem:[#allocation2 + $0x38] sm:$0xff] %vm22_vm1, %v449_v39  ;;  %v573_v47 = vmax.f32 %v565_v42, 0.0  ;;  %v1197_v48 = vmul.f32 0.020833334, %v527_v46  ;;  %v566_v51 = vsub.f32 %v550_v43, %v558_v38  ;;  %v613_v39 = vld [vmem:[%s1301_s3 + $0x18] sm:$0xff]  ;;  %v612_v46 = vld [vmem:[%s1301_s3 + $0x10] sm:$0xff] }
 0x194   :  { %v490_v49 = vpop.xlane.xlu1 %489  ;;  %v528_v62 = vld [vmem:[#allocation2 + $0x30] sm:$0xff] }
 0x195   :  { %v498_v53 = vadd.f32 %v490_v49, %v466_v44  ;;  %v581_v54 = vadd.f32 1e-05, %v573_v47  ;;  %v559_v55 = vmul.f32 %v1197_v48, %v1197_v48  ;;  %v574_v0 = vmax.f32 %v566_v51, 0.0  ;;  %v599_v47 = vld [vmem:[%s1300_s2 + $0x28] sm:$0xff] }
 0x196   :  { %v948_v56 = vpop.eup %947  ;;  %v543_v57 = vld [vmem:[#allocation3 + $0x28] sm:$0xff]  ;;  %v1208_v5 = vmul.f32 0.020833334, %v528_v62 }
 0x197   :  { %506 = vst.msk [vmem:[#allocation3 + $0x38] sm:$0xff] %vm22_vm1, %v498_v53  ;;  %v602_v59 = vmul.f32 %v948_v56, %v594_v50  ;;  %953 = vrsqrt.f32 %v581_v54  ;;  %v551_v61 = vmul.f32 0.020833334, %v543_v57  ;;  %v582_v12 = vadd.f32 1e-05, %v574_v0  ;;  %v601_v57 = vld [vmem:[%s1300_s2 + $0x38] sm:$0xff] }
 0x198   :  { %v544_v7 = vld [vmem:[#allocation3 + $0x30] sm:$0xff]  ;;  %v560_v22 = vmul.f32 %v1208_v5, %v1208_v5  ;;  %v617_v0 = vld [vmem:[%s1301_s3 + $0x38] sm:$0xff] }
 0x199   :  { %644 = vperm.xlu0 %909, %v602_v59   ;;  %v567_v1 = vsub.f32 %v551_v61, %v559_v55  ;;  %v618_v14 = vmul.f32 %v602_v59, %v1166_v35  ;;  %v552_v17 = vmul.f32 0.020833334, %v544_v7 }
 0x19a   :  { %v529_v3 = vld [vmem:[#allocation2 + $0x38] sm:$0xff] }
 0x19b   :  { %v575_v8 = vmax.f32 %v567_v1, 0.0  ;;  %v1210_v9 = vmul.f32 0.020833334, %v529_v3  ;;  %v626_v25 = vsub.f32 %v610_v18, %v618_v14  ;;  %v568_v29 = vsub.f32 %v552_v17, %v560_v22 }
 0x19c   :  { %v950_v11 = vpop.eup %949 }
 0x19d   :  { %v603_v13 = vmul.f32 %v950_v11, %v595_v2  ;;  %v583_v16 = vadd.f32 1e-05, %v575_v8  ;;  %v561_v35 = vmul.f32 %v1210_v9, %v1210_v9  ;;  %v576_v38 = vmax.f32 %v568_v29, 0.0  ;;  %v600_v8 = vld [vmem:[%s1300_s2 + $0x30] sm:$0xff] }
 0x19e   :  { %v545_v21 = vld [vmem:[#allocation3 + $0x38] sm:$0xff] }
 0x19f   :  { %649 = vperm.xlu1 %910, %v603_v13   ;;  %v619_v23 = vmul.f32 %v603_v13, %v1174_v58  ;;  %955 = vrsqrt.f32 %v583_v16  ;;  %v553_v24 = vmul.f32 0.020833334, %v545_v21  ;;  %v952_v30 = vpop.eup %951  ;;  %v584_v44 = vadd.f32 1e-05, %v576_v38 }
 0x1a0   :  { %957 = vrsqrt.f32 %v582_v12  ;;  %v604_v34 = vmul.f32 %v952_v30, %v596_v31  ;;  %v616_v12 = vld [vmem:[%s1301_s3 + $0x30] sm:$0xff] }
 0x1a1   :  { %v627_v26 = vsub.f32 %v611_v19, %v619_v23  ;;  %v569_v28 = vsub.f32 %v553_v24, %v561_v35 }
 0x1a2   :  { %v620_v43 = vmul.f32 %v604_v34, %v1179_v4  ;;  %v615_v4 = vld [vmem:[%s1301_s3 + $0x28] sm:$0xff] }
 0x1a3   :  { %692 = vperm.xlu1 %910, %v626_v25   ;;  %697 = vperm.xlu0 %909, %v627_v26   ;;  %v577_v58 = vmax.f32 %v569_v28, 0.0 }
 0x1a4   :  { %v954_v33 = vpop.eup %953  ;;  %v628_v51 = vsub.f32 %v612_v46, %v620_v43 }
 0x1a5   :  { %v605_v36 = vmul.f32 %v954_v33, %v597_v32  ;;  %v585_v37 = vadd.f32 1e-05, %v577_v58 }
 0x1a7   :  { %654 = vperm.xlu1 %910, %v604_v34   ;;  %v621_v41 = vmul.f32 %v605_v36, %v1185_v20  ;;  %959 = vrsqrt.f32 %v585_v37  ;;  %v598_v20 = vld [vmem:[%s1300_s2 + $0x20] sm:$0xff] }
 0x1a8   :  { %961 = vrsqrt.f32 %v584_v44 }
 0x1a9   :  { %v629_v42 = vsub.f32 %v613_v39, %v621_v41 }
 0x1ab   :  { %707 = vperm.xlu0 %909, %v629_v42   ;;  %659 = vperm.xlu1 %910, %v605_v36  }
 0x1ac   :  { %v956_v49 = vpop.eup %955 }
 0x1ad   :  { %v958_v50 = vpop.eup %957  ;;  %v607_v53 = vmul.f32 %v956_v49, %v599_v47 }
 0x1ae   :  { %v606_v56 = vmul.f32 %v958_v50, %v598_v20 }
 0x1af   :  { %702 = vperm.xlu1 %910, %v628_v51   ;;  %v623_v54 = vmul.f32 %v607_v53, %v1197_v48  ;;  %v614_v48 = vld [vmem:[%s1301_s3 + $0x20] sm:$0xff] }
 0x1b0   :  { %v622_v62 = vmul.f32 %v606_v56, %v1188_v27 }
 0x1b1   :  { %v631_v55 = vsub.f32 %v615_v4, %v623_v54 }
 0x1b2   :  { %v630_v3 = vsub.f32 %v614_v48, %v622_v62 }
 0x1b3   :  { %717 = vperm.xlu0 %909, %v631_v55   ;;  %664 = vperm.xlu1 %910, %v606_v56  }
 0x1b4   :  { %v960_v59 = vpop.eup %959 }
 0x1b5   :  { %v609_v61 = vmul.f32 %v960_v59, %v601_v57  ;;  %v962_v7 = vpop.eup %961 }
 0x1b6   :  { %v608_v27 = vmul.f32 %v962_v7, %v600_v8 }
 0x1b7   :  { %669 = vperm.xlu1 %910, %v607_v53   ;;  %v625_v1 = vmul.f32 %v609_v61, %v1210_v9 }
 0x1b8   :  { %v624_v11 = vmul.f32 %v608_v27, %v1208_v5 }
 0x1b9   :  { %v633_v2 = vsub.f32 %v617_v0, %v625_v1 }
 0x1ba   :  { %v632_v13 = vsub.f32 %v616_v12, %v624_v11 }
 0x1bb   :  { %727 = vperm.xlu0 %909, %v633_v2   ;;  %712 = vperm.xlu1 %910, %v630_v3  }
 0x1bf   :  { %674 = vperm.xlu1 %910, %v608_v27  }
 0x1c3   :  { %679 = vperm.xlu1 %910, %v609_v61  }
 0x1c7   :  { %722 = vperm.xlu1 %910, %v632_v13  }
 0x214   :  { %v645_v9 = vpop.permute.xlu0 %644 }
 0x215   :  { %v682_v16 = vmul.f32 %v645_v9, %v1122_v40 }
 0x21a   :  { %v650_v14 = vpop.permute.xlu1 %649 }
 0x21b   :  { %v683_v17 = vmul.f32 %v650_v14, %v1125_v45 }
 0x21e   :  { %v693_v18 = vpop.permute.xlu1 %692  ;;  %v698_v19 = vpop.permute.xlu0 %697 }
 0x21f   :  { %v730_v21 = vadd.f32 %v693_v18, %v682_v16  ;;  %v731_v22 = vadd.f32 %v698_v19, %v683_v17 }
 0x221   :  { %v746_v23 = vmin.f32 %v730_v21, 0.0  ;;  %v747_v24 = vmin.f32 %v731_v22, 0.0  ;;  %vm738_vm2 = vcmp.gt.f32.partialorder %v730_v21, 0.0  ;;  %vm739_vm3 = vcmp.gt.f32.partialorder %v731_v22, 0.0 }
 0x222   :  { %v655_v5 = vpop.permute.xlu1 %654 }
 0x223   :  { %v754_v35 = vmul.f32 1.442695, %v746_v23  ;;  %v756_v25 = vmul.f32 1.442695, %v747_v24  ;;  %v684_v30 = vmul.f32 %v655_v5, %v1131_v52 }
 0x225   :  { %963 = vpow2.f32 %v754_v35 }
 0x226   :  { %965 = vpow2.f32 %v756_v25  ;;  %v660_v26 = vpop.permute.xlu1 %659  ;;  %v708_v29 = vpop.permute.xlu0 %707 }
 0x227   :  { %v685_v28 = vmul.f32 %v660_v26, %v1137_v60 }
 0x229   :  { %v733_v40 = vadd.f32 %v708_v29, %v685_v28 }
 0x22a   :  { %v703_v31 = vpop.permute.xlu1 %702 }
 0x22b   :  { %v749_v45 = vmin.f32 %v733_v40, 0.0  ;;  %v732_v32 = vadd.f32 %v703_v31, %v684_v30  ;;  %vm741_vm4 = vcmp.gt.f32.partialorder %v733_v40, 0.0 }
 0x22d   :  { %v760_v58 = vmul.f32 1.442695, %v749_v45  ;;  %v748_v33 = vmin.f32 %v732_v32, 0.0  ;;  %vm740_vm5 = vcmp.gt.f32.partialorder %v732_v32, 0.0 }
 0x22e   :  { %v665_v34 = vpop.permute.xlu1 %664  ;;  %v718_v43 = vpop.permute.xlu0 %717 }
 0x22f   :  { %967 = vpow2.f32 %v760_v58  ;;  %v758_v36 = vmul.f32 1.442695, %v748_v33  ;;  %v686_v44 = vmul.f32 %v665_v34, %v1139_v63 }
 0x231   :  { %969 = vpow2.f32 %v758_v36 }
 0x232   :  { %v964_v37 = vpop.eup %963  ;;  %v670_v38 = vpop.permute.xlu1 %669 }
 0x233   :  { %v966_v39 = vpop.eup %965  ;;  %v835_v41 = vadd.f32 -1.0, %v964_v37  ;;  %v687_v42 = vmul.f32 %v670_v38, %v1147_v6 }
 0x234   :  { %v836_v60 = vadd.f32 -1.0, %v966_v39 }
 0x235   :  { %v778_v52 = vsel %vm738_vm2, %v730_v21, %v835_v41  ;;  %v735_v46 = vadd.f32 %v718_v43, %v687_v42 }
 0x236   :  { %786 = vst [vmem:[%s1302_s4] sm:$0xff] %v778_v52  ;;  %v779_v47 = vsel %vm739_vm3, %v731_v22, %v836_v60  ;;  %v713_v49 = vpop.permute.xlu1 %712  ;;  %v728_v62 = vpop.permute.xlu0 %727 }
 0x237   :  { %787 = vst [vmem:[%s1302_s4 + $0x8] sm:$0xff] %v779_v47  ;;  %v751_v50 = vmin.f32 %v735_v46, 0.0  ;;  %v734_v6 = vadd.f32 %v713_v49, %v686_v44  ;;  %vm743_vm6 = vcmp.gt.f32.partialorder %v735_v46, 0.0 }
 0x239   :  { %v764_v51 = vmul.f32 1.442695, %v751_v50  ;;  %v750_v53 = vmin.f32 %v734_v6, 0.0  ;;  %vm742_vm7 = vcmp.gt.f32.partialorder %v734_v6, 0.0 }
 0x23a   :  { %v675_v4 = vpop.permute.xlu1 %674 }
 0x23b   :  { %971 = vpow2.f32 %v764_v51  ;;  %v762_v20 = vmul.f32 1.442695, %v750_v53  ;;  %v688_v48 = vmul.f32 %v675_v4, %v1149_v10 }
 0x23c   :  { %v968_v54 = vpop.eup %967 }
 0x23d   :  { %v838_v63 = vadd.f32 -1.0, %v968_v54  ;;  %973 = vpow2.f32 %v762_v20 }
 0x23e   :  { %v970_v55 = vpop.eup %969  ;;  %v680_v56 = vpop.permute.xlu1 %679 }
 0x23f   :  { %v781_v57 = vsel %vm741_vm4, %v733_v40, %v838_v63  ;;  %v837_v59 = vadd.f32 -1.0, %v970_v55  ;;  %v689_v61 = vmul.f32 %v680_v56, %v1157_v15 }
 0x240   :  { %789 = vst [vmem:[%s1302_s4 + $0x18] sm:$0xff] %v781_v57 }
 0x241   :  { %v780_v0 = vsel %vm740_vm5, %v732_v32, %v837_v59  ;;  %v737_v1 = vadd.f32 %v728_v62, %v689_v61 }
 0x242   :  { %788 = vst [vmem:[%s1302_s4 + $0x10] sm:$0xff] %v780_v0  ;;  %v723_v2 = vpop.permute.xlu1 %722 }
 0x243   :  { %v753_v3 = vmin.f32 %v737_v1, 0.0  ;;  %v736_v7 = vadd.f32 %v723_v2, %v688_v48  ;;  %vm745_vm8 = vcmp.gt.f32.partialorder %v737_v1, 0.0 }
 0x245   :  { %v768_v8 = vmul.f32 1.442695, %v753_v3  ;;  %v752_v27 = vmin.f32 %v736_v7, 0.0  ;;  %vm744_vm9 = vcmp.gt.f32.partialorder %v736_v7, 0.0 }
 0x247   :  { %975 = vpow2.f32 %v768_v8  ;;  %v766_v15 = vmul.f32 1.442695, %v752_v27 }
 0x248   :  { %v972_v11 = vpop.eup %971 }
 0x249   :  { %v840_v12 = vadd.f32 -1.0, %v972_v11  ;;  %977 = vpow2.f32 %v766_v15 }
 0x24a   :  { %v974_v13 = vpop.eup %973 }
 0x24b   :  { %v783_v9 = vsel %vm743_vm6, %v735_v46, %v840_v12  ;;  %v839_v14 = vadd.f32 -1.0, %v974_v13 }
 0x24c   :  { %791 = vst [vmem:[%s1302_s4 + $0x28] sm:$0xff] %v783_v9 }
 0x24d   :  { %v782_v10 = vsel %vm742_vm7, %v734_v6, %v839_v14 }
 0x24e   :  { %790 = vst [vmem:[%s1302_s4 + $0x20] sm:$0xff] %v782_v10 }
 0x254   :  { %v976_v16 = vpop.eup %975 }
 0x255   :  { %v842_v17 = vadd.f32 -1.0, %v976_v16 }
 0x256   :  { %v978_v18 = vpop.eup %977 }
 0x257   :  { %v785_v19 = vsel %vm745_vm8, %v737_v1, %v842_v17  ;;  %v841_v21 = vadd.f32 -1.0, %v978_v18 }
 0x258   :  { %793 = vst [vmem:[%s1302_s4 + $0x38] sm:$0xff] %v785_v19 }
 0x259   :  { %v784_v22 = vsel %vm744_vm9, %v736_v7, %v841_v21 }
 0x25a   :  { %792 = vst [vmem:[%s1302_s4 + $0x30] sm:$0xff] %v784_v22 }

// kernel: aunet_forward.14
= control target key start
LH: loop header
LB: loop body
LE: loop exit
PB: predicated region body
PF: predicated region fallthrough
CT: control target
= control target key end

     0   :  { %vm22_vm0 = vcmask 7168   ;;  %v1367_v60 = vmov 0.0   ;;  %s1773_s0 = inlined_call_operand.vmem [shape: bf16[640,128], index: 0, kind: input, shape index: {}]   ;;  %s1774_s1 = inlined_call_operand.vmem [shape: bf16[64,640], index: 1, kind: input, shape index: {}]   ;;  %s1775_s2 = inlined_call_operand.vmem [shape: f32[64,1], index: 2, kind: input, shape index: {}]   ;;  %s1776_s3 = inlined_call_operand.vmem [shape: f32[64,1], index: 3, kind: input, shape index: {}]   ;;  %s1777_s4 = inlined_call_operand.vmem [shape: f32[64,128], index: 4, kind: output, shape index: {}]  }
   0x1   :  { %v1267_v0 = vld [vmem:[%s1773_s0 + $0x78] sm:$0xff]   ;;  %v1271_v4 = vld [vmem:[%s1773_s0 + $0x70] sm:$0xff]   ;;  %v1275_v8 = vld [vmem:[%s1773_s0 + $0x68] sm:$0xff]   ;;  %29 = vst.msk [vmem:[#allocation2 + $0x30] sm:$0xff] %vm22_vm0, %v1367_v60 }
   0x2   :  { %v1268_v1 = vld [vmem:[%s1773_s0 + $0xf8] sm:$0xff]   ;;  %1131 = vmatprep.subr.bf16.mxu0 %v1267_v0  ;;  %v1272_v5 = vld [vmem:[%s1773_s0 + $0xf0] sm:$0xff]   ;;  %v1276_v9 = vld [vmem:[%s1773_s0 + $0xe8] sm:$0xff]   ;;  %23 = vst.msk [vmem:[#allocation2] sm:$0xff] %vm22_vm0, %v1367_v60 }
   0x3   :  { %v1269_v2 = vld [vmem:[%s1773_s0 + $0x38] sm:$0xff]   ;;  %1171 = vmatprep.subr.bf16.mxu1 %v1268_v1  ;;  %v1273_v6 = vld [vmem:[%s1773_s0 + $0x30] sm:$0xff]   ;;  %v1277_v10 = vld [vmem:[%s1773_s0 + $0x28] sm:$0xff]   ;;  %24 = vst.msk [vmem:[#allocation2 + $0x8] sm:$0xff] %vm22_vm0, %v1367_v60 }
   0x4   :  { %v1270_v3 = vld [vmem:[%s1773_s0 + $0xb8] sm:$0xff]   ;;  %1132 = vmatpush3.bf16.msra.mxu0 %v1269_v2  ;;  %v1274_v7 = vld [vmem:[%s1773_s0 + $0xb0] sm:$0xff]   ;;  %v1278_v11 = vld [vmem:[%s1773_s0 + $0xa8] sm:$0xff]   ;;  %25 = vst.msk [vmem:[#allocation2 + $0x10] sm:$0xff] %vm22_vm0, %v1367_v60 }
   0x5   :  { %1172 = vmatpush3.bf16.msra.mxu1 %v1270_v3  ;;  %1133 = vmatprep.subr.bf16.mxu0 %v1271_v4  ;;  %v1279_v12 = vld [vmem:[%s1773_s0 + $0x60] sm:$0xff]   ;;  %v1283_v16 = vld [vmem:[%s1773_s0 + $0x58] sm:$0xff]   ;;  %v1287_v20 = vld [vmem:[%s1773_s0 + $0x50] sm:$0xff]   ;;  %26 = vst.msk [vmem:[#allocation2 + $0x18] sm:$0xff] %vm22_vm0, %v1367_v60 }
   0x6   :  { %1173 = vmatprep.subr.bf16.mxu1 %v1272_v5  ;;  %v1280_v13 = vld [vmem:[%s1773_s0 + $0xe0] sm:$0xff]   ;;  %v1284_v17 = vld [vmem:[%s1773_s0 + $0xd8] sm:$0xff]   ;;  %v1288_v21 = vld [vmem:[%s1773_s0 + $0xd0] sm:$0xff]   ;;  %27 = vst.msk [vmem:[#allocation2 + $0x20] sm:$0xff] %vm22_vm0, %v1367_v60 }
   0x7   :  { %v1281_v14 = vld [vmem:[%s1773_s0 + $0x20] sm:$0xff]   ;;  %v1285_v18 = vld [vmem:[%s1773_s0 + $0x18] sm:$0xff]   ;;  %v1289_v22 = vld [vmem:[%s1773_s0 + $0x10] sm:$0xff]   ;;  %28 = vst.msk [vmem:[#allocation2 + $0x28] sm:$0xff] %vm22_vm0, %v1367_v60 }
   0x8   :  { %1134 = vmatpush3.bf16.msra.mxu0 %v1273_v6  ;;  %v1282_v15 = vld [vmem:[%s1773_s0 + $0xa0] sm:$0xff]   ;;  %v1286_v19 = vld [vmem:[%s1773_s0 + $0x98] sm:$0xff]   ;;  %v1290_v23 = vld [vmem:[%s1773_s0 + $0x90] sm:$0xff]   ;;  %30 = vst.msk [vmem:[#allocation2 + $0x38] sm:$0xff] %vm22_vm0, %v1367_v60 }
   0x9   :  { %1174 = vmatpush3.bf16.msra.mxu1 %v1274_v7  ;;  %1135 = vmatprep.subr.bf16.mxu0 %v1275_v8  ;;  %v1291_v24 = vld [vmem:[%s1773_s0 + $0x48] sm:$0xff]   ;;  %v1295_v28 = vld [vmem:[%s1773_s0 + $0x40] sm:$0xff]   ;;  %v1305_v36 = vld [vmem:[%s1773_s0 + $0x138] sm:$0xff]   ;;  %31 = vst.msk [vmem:[#allocation3] sm:$0xff] %vm22_vm0, %v1367_v60 }
   0xa   :  { %1175 = vmatprep.subr.bf16.mxu1 %v1276_v9  ;;  %v1292_v25 = vld [vmem:[%s1773_s0 + $0xc8] sm:$0xff]   ;;  %v1296_v29 = vld [vmem:[%s1773_s0 + $0xc0] sm:$0xff]   ;;  %v1306_v37 = vld [vmem:[%s1773_s0 + $0x130] sm:$0xff]   ;;  %32 = vst.msk [vmem:[#allocation3 + $0x8] sm:$0xff] %vm22_vm0, %v1367_v60 }
   0xb   :  { %v1293_v26 = vld [vmem:[%s1773_s0 + $0x8] sm:$0xff]   ;;  %v1297_v30 = vld [vmem:[%s1773_s0] sm:$0xff]   ;;  %v1317_v45 = vld [vmem:[%s1774_s1 + $0x5c] ss:$20 sps:$4 sm:$0xff]   ;;  %33 = vst.msk [vmem:[#allocation3 + $0x10] sm:$0xff] %vm22_vm0, %v1367_v60 }
   0xc   :  { %1136 = vmatpush3.bf16.msra.mxu0 %v1277_v10  ;;  %v1294_v27 = vld [vmem:[%s1773_s0 + $0x88] sm:$0xff]   ;;  %v1298_v31 = vld [vmem:[%s1773_s0 + $0x80] sm:$0xff]   ;;  %v1321_v46 = vld [vmem:[%s1773_s0 + $0x118] sm:$0xff]   ;;  %34 = vst.msk [vmem:[#allocation3 + $0x18] sm:$0xff] %vm22_vm0, %v1367_v60 }
   0xd   :  { %1176 = vmatpush3.bf16.msra.mxu1 %v1278_v11  ;;  %1137 = vmatprep.subr.bf16.mxu0 %v1279_v12  ;;  %v1299_v32 = vld [vmem:[%s1774_s1] ss:$20 sps:$4 sm:$0xff]   ;;  %v1301_v33 = vld [vmem:[%s1774_s1 + $0x4] ss:$20 sps:$4 sm:$0xff]   ;;  %v1302_v34 = vld [vmem:[%s1774_s1 + $0x8] ss:$20 sps:$4 sm:$0xff]  }
   0xe   :  { %1177 = vmatprep.subr.bf16.mxu1 %v1280_v13  ;;  %v1304_v35 = vld [vmem:[%s1774_s1 + $0xc] ss:$20 sps:$4 sm:$0xff]   ;;  %519 = vmatprep.mubr.bf16.mxu0 %v1301_v33  ;;  %v1309_v39 = vld [vmem:[%s1774_s1 + $0x34] ss:$20 sps:$4 sm:$0xff]   ;;  %v1312_v42 = vld [vmem:[%s1774_s1 + $0x30] ss:$20 sps:$4 sm:$0xff]  }
   0xf   :  { %584 = vmatprep.mubr.bf16.mxu1 %v1304_v35  ;;  %v1307_v38 = vld [vmem:[%s1774_s1 + $0x2c] ss:$20 sps:$4 sm:$0xff]   ;;  %v1311_v40 = vld [vmem:[%s1774_s1 + $0x28] ss:$20 sps:$4 sm:$0xff]   ;;  %v1319_v47 = vld [vmem:[%s1774_s1 + $0x50] ss:$20 sps:$4 sm:$0xff]  }
  0x10   :  { %1138 = vmatpush3.bf16.msra.mxu0 %v1281_v14  ;;  %v1313_v41 = vld [vmem:[%s1773_s0 + $0x128] sm:$0xff]   ;;  %v1314_v44 = vld [vmem:[%s1773_s0 + $0x120] sm:$0xff]   ;;  %v1323_v49 = vld [vmem:[%s1774_s1 + $0x7c] ss:$20 sps:$4 sm:$0xff]   ;;  %35 = vst.msk [vmem:[#allocation3 + $0x20] sm:$0xff] %vm22_vm0, %v1367_v60 }
  0x11   :  { %1178 = vmatpush3.bf16.msra.mxu1 %v1282_v15  ;;  %1139 = vmatprep.subr.bf16.mxu0 %v1283_v16  ;;  %v1315_v43 = vld [vmem:[%s1774_s1 + $0x54] ss:$20 sps:$4 sm:$0xff]   ;;  %v1320_v48 = vld [vmem:[%s1774_s1 + $0x58] ss:$20 sps:$4 sm:$0xff]   ;;  %v1331_v55 = vld [vmem:[%s1774_s1 + $0x10] ss:$20 sps:$4 sm:$0xff]  }
  0x12   :  { %1179 = vmatprep.subr.bf16.mxu1 %v1284_v17  ;;  %v1325_v50 = vld [vmem:[%s1774_s1 + $0x84] ss:$20 sps:$4 sm:$0xff]   ;;  %v1322_v51 = vld [vmem:[%s1773_s0 + $0x110] sm:$0xff]   ;;  %v1329_v52 = vld [vmem:[%s1773_s0 + $0x108] sm:$0xff]   ;;  %36 = vst.msk [vmem:[#allocation3 + $0x28] sm:$0xff] %vm22_vm0, %v1367_v60 }
  0x13   :  { %v1327_v53 = vld [vmem:[%s1774_s1 + $0x78] ss:$20 sps:$4 sm:$0xff]   ;;  %v1328_v54 = vld [vmem:[%s1774_s1 + $0x80] ss:$20 sps:$4 sm:$0xff]   ;;  %v1334_v59 = vld [vmem:[%s1774_s1 + $0x88] ss:$20 sps:$4 sm:$0xff]  }
  0x14   :  { %1140 = vmatpush3.bf16.msra.mxu0 %v1285_v18  ;;  %v1332_v56 = vld [vmem:[%s1774_s1 + $0x60] ss:$20 sps:$4 sm:$0xff]   ;;  %v1333_v58 = vld [vmem:[%s1774_s1 + $0x38] ss:$20 sps:$4 sm:$0xff]   ;;  %37 = vst.msk [vmem:[#allocation3 + $0x30] sm:$0xff] %vm22_vm0, %v1367_v60  ;;  %38 = vst.msk [vmem:[#allocation3 + $0x38] sm:$0xff] %vm22_vm0, %v1367_v60 }
  0x15   :  { %1180 = vmatpush3.bf16.msra.mxu1 %v1286_v19  ;;  %1141 = vmatprep.subr.bf16.mxu0 %v1287_v20  ;;  %v1330_v57 = vld [vmem:[%s1773_s0 + $0x100] sm:$0xff]  }
  0x16   :  { %1181 = vmatprep.subr.bf16.mxu1 %v1288_v21 }
  0x18   :  { %1142 = vmatpush3.bf16.msra.mxu0 %v1289_v22 }
  0x19   :  { %1182 = vmatpush3.bf16.msra.mxu1 %v1290_v23  ;;  %1143 = vmatprep.subr.bf16.mxu0 %v1291_v24 }
  0x1a   :  { %1183 = vmatprep.subr.bf16.mxu1 %v1292_v25 }
  0x1c   :  { %1144 = vmatpush3.bf16.msra.mxu0 %v1293_v26 }
  0x1d   :  { %1184 = vmatpush3.bf16.msra.mxu1 %v1294_v27  ;;  %1145 = vmatprep.subr.bf16.mxu0 %v1295_v28 }
  0x1e   :  { %1185 = vmatprep.subr.bf16.mxu1 %v1296_v29 }
  0x20   :  { %1146 = vmatpush3.bf16.msra.mxu0 %v1297_v30 }
  0x21   :  { %1186 = vmatpush3.bf16.msra.mxu1 %v1298_v31  ;;  %1223 = vmatprep.subr.bf16.mxu0 %v1305_v36 }
  0x22   :  { %1247 = vmatprep.subr.bf16.mxu1 %v1305_v36 }
  0x23   :  { %520 = vmatmul.mubr.bf16.vlgmr.msra.gmra.mxu0 %v1299_v32 }
  0x24   :  { %585 = vmatmul.mubr.bf16.vlgmr.msra.gmra.mxu1 %v1302_v34  ;;  %1224 = vmatpush3.bf16.msra.mxu0 %v1305_v36 }
  0x25   :  { %1255 = vmatpush3.bf16.msra.mxu1 %v1305_v36  ;;  %1225 = vmatprep.subr.bf16.mxu0 %v1306_v37 }
  0x26   :  { %1248 = vmatprep.subr.bf16.mxu1 %v1306_v37  ;;  %527 = vmatprep.mubr.bf16.mxu0 %v1307_v38 }
  0x27   :  { %592 = vmatprep.mubr.bf16.mxu1 %v1309_v39 }
  0x28   :  { %1226 = vmatpush3.bf16.msra.mxu0 %v1306_v37 }
  0x29   :  { %1256 = vmatpush3.bf16.msra.mxu1 %v1306_v37  ;;  %1227 = vmatprep.subr.bf16.mxu0 %v1313_v41 }
  0x2a   :  { %1249 = vmatprep.subr.bf16.mxu1 %v1313_v41 }
  0x2b   :  { %528 = vmatmul.mubr.bf16.gmra.mxu0 %v1311_v40 }
  0x2c   :  { %593 = vmatmul.mubr.bf16.gmra.mxu1 %v1312_v42  ;;  %535 = vmatprep.mubr.bf16.mxu0 %v1315_v43 }
  0x2d   :  { %1228 = vmatpush3.bf16.msra.mxu0 %v1313_v41  ;;  %600 = vmatprep.mubr.bf16.mxu1 %v1317_v45 }
  0x2e   :  { %1257 = vmatpush3.bf16.msra.mxu1 %v1313_v41  ;;  %1229 = vmatprep.subr.bf16.mxu0 %v1314_v44 }
  0x2f   :  { %1250 = vmatprep.subr.bf16.mxu1 %v1314_v44 }
  0x31   :  { %1230 = vmatpush3.bf16.msra.mxu0 %v1314_v44 }
  0x32   :  { %1258 = vmatpush3.bf16.msra.mxu1 %v1314_v44  ;;  %1231 = vmatprep.subr.bf16.mxu0 %v1321_v46 }
  0x33   :  { %536 = vmatmul.mubr.bf16.gmra.mxu0 %v1319_v47  ;;  %1251 = vmatprep.subr.bf16.mxu1 %v1321_v46 }
  0x34   :  { %601 = vmatmul.mubr.bf16.gmra.mxu1 %v1320_v48  ;;  %543 = vmatprep.mubr.bf16.mxu0 %v1323_v49 }
  0x35   :  { %1232 = vmatpush3.bf16.msra.mxu0 %v1321_v46  ;;  %608 = vmatprep.mubr.bf16.mxu1 %v1325_v50 }
  0x36   :  { %1259 = vmatpush3.bf16.msra.mxu1 %v1321_v46  ;;  %1233 = vmatprep.subr.bf16.mxu0 %v1322_v51 }
  0x37   :  { %1252 = vmatprep.subr.bf16.mxu1 %v1322_v51 }
  0x39   :  { %1234 = vmatpush3.bf16.msra.mxu0 %v1322_v51 }
  0x3a   :  { %1260 = vmatpush3.bf16.msra.mxu1 %v1322_v51  ;;  %1235 = vmatprep.subr.bf16.mxu0 %v1329_v52 }
  0x3b   :  { %544 = vmatmul.mubr.bf16.gmra.mxu0 %v1327_v53  ;;  %1253 = vmatprep.subr.bf16.mxu1 %v1329_v52 }
  0x3c   :  { %609 = vmatmul.mubr.bf16.gmra.mxu1 %v1328_v54  ;;  %1239 = vmatprep.mubr.bf16.mxu0 %v1331_v55 }
  0x3d   :  { %1236 = vmatpush3.bf16.msra.mxu0 %v1329_v52  ;;  %1243 = vmatprep.mubr.bf16.mxu1 %v1332_v56 }
  0x3e   :  { %1261 = vmatpush3.bf16.msra.mxu1 %v1329_v52  ;;  %1237 = vmatprep.subr.bf16.mxu0 %v1330_v57 }
  0x3f   :  { %1254 = vmatprep.subr.bf16.mxu1 %v1330_v57 }
  0x41   :  { %1238 = vmatpush3.bf16.msra.mxu0 %v1330_v57 }
  0x42   :  { %1262 = vmatpush3.bf16.msra.mxu1 %v1330_v57 }
  0x44   :  { %1240 = vmatmul.mubr.bf16.vlgmr.msra.gmra.mxu0 %v1333_v58 }
  0x45   :  { %1244 = vmatmul.mubr.bf16.vlgmr.msra.gmra.mxu1 %v1334_v59 }
  0xe3   :  { %v1147_v61 = vpop.f32.mrf.mxu0 }
  0xe4   :  { %v1187_v62 = vpop.f32.mrf.mxu1 }
  0xe5   :  { %v1148_v63 = vpop.f32.mrf.mxu0 }
  0xe6   :  { %v1188_v0 = vpop.f32.mrf.mxu1  ;;  %v1149_v36 = vadd.f32 %v1148_v63, %v1147_v61 }
  0xe7   :  { %v1590_v1 = vpop.f32.mrf.mxu0  ;;  %v1189_v37 = vadd.f32 %v1188_v0, %v1187_v62 }
  0xe8   :  { %v1592_v2 = vpop.f32.mrf.mxu1 }
  0xe9   :  { %v1594_v3 = vpop.f32.mrf.mxu0  ;;  %v587_v50 = vadd.f32 %v1189_v37, %v1149_v36 }
  0xea   :  { %v1596_v4 = vpop.f32.mrf.mxu1  ;;  %v1152_v62 = vadd.f32 %v1594_v3, %v1590_v1 }
  0xeb   :  { %v1153_v5 = vpop.f32.mrf.mxu0  ;;  %v1192_v63 = vadd.f32 %v1596_v4, %v1592_v2 }
  0xec   :  { %v1193_v6 = vpop.f32.mrf.mxu1 }
  0xed   :  { %v1154_v7 = vpop.f32.mrf.mxu0 }
  0xee   :  { %v1194_v8 = vpop.f32.mrf.mxu1  ;;  %v1155_v25 = vadd.f32 %v1154_v7, %v1153_v5 }
  0xef   :  { %v1156_v9 = vpop.f32.mrf.mxu0  ;;  %v1195_v26 = vadd.f32 %v1194_v8, %v1193_v6  ;;  %v590_v8 = vadd.f32 %v1192_v63, %v1152_v62 }
  0xf0   :  { %v1196_v10 = vpop.f32.mrf.mxu1 }
  0xf1   :  { %v1157_v11 = vpop.f32.mrf.mxu0  ;;  %v595_v35 = vadd.f32 %v1195_v26, %v1155_v25  ;;  %v689_v26 = vld [vmem:[#allocation2 + $0x38] sm:$0xff] }
  0xf2   :  { %v1197_v12 = vpop.f32.mrf.mxu1  ;;  %v1158_v33 = vadd.f32 %v1157_v11, %v1156_v9 }
  0xf3   :  { %v1159_v13 = vpop.f32.mrf.mxu0  ;;  %v1198_v34 = vadd.f32 %v1197_v12, %v1196_v10 }
  0xf4   :  { %v1199_v14 = vpop.f32.mrf.mxu1 }
  0xf5   :  { %v1160_v15 = vpop.f32.mrf.mxu0  ;;  %v598_v47 = vadd.f32 %v1198_v34, %v1158_v33  ;;  %v725_v33 = vld [vmem:[#allocation3 + $0x10] sm:$0xff] }
  0xf6   :  { %v1200_v16 = vpop.f32.mrf.mxu1  ;;  %v1161_v48 = vadd.f32 %v1160_v15, %v1159_v13  ;;  %v1368_v13 = vmov 0   ;;  %v688_v15 = vld [vmem:[#allocation2 + $0x30] sm:$0xff] }
  0xf7   :  { %v1162_v17 = vpop.f32.mrf.mxu0  ;;  %v1201_v49 = vadd.f32 %v1200_v16, %v1199_v14  ;;  %1265 = vset.pattern.permute.xlu1 %v1368_v13  ;;  %1266 = vset.pattern.permute.xlu0 %v1368_v13  ;;  %v684_v14 = vld [vmem:[#allocation2 + $0x10] sm:$0xff] }
  0xf8   :  { %v1202_v18 = vpop.f32.mrf.mxu1 }
  0xf9   :  { %v1163_v19 = vpop.f32.mrf.mxu0  ;;  %v603_v58 = vadd.f32 %v1201_v49, %v1161_v48  ;;  %v727_v48 = vld [vmem:[#allocation3 + $0x20] sm:$0xff] }
  0xfa   :  { %v1203_v20 = vpop.f32.mrf.mxu1  ;;  %v1164_v55 = vadd.f32 %v1163_v19, %v1162_v17 }
  0xfb   :  { %v1165_v21 = vpop.f32.mrf.mxu0  ;;  %v1204_v56 = vadd.f32 %v1203_v20, %v1202_v18  ;;  %v685_v20 = vld [vmem:[#allocation2 + $0x18] sm:$0xff] }
  0xfc   :  { %v1205_v22 = vpop.f32.mrf.mxu1 }
  0xfd   :  { %v1166_v23 = vpop.f32.mrf.mxu0  ;;  %v606_v0 = vadd.f32 %v1204_v56, %v1164_v55 }
  0xfe   :  { %v1206_v24 = vpop.f32.mrf.mxu1  ;;  %v1167_v28 = vadd.f32 %v1166_v23, %v1165_v21  ;;  %v682_v21 = vld [vmem:[#allocation2] sm:$0xff] }
  0xff   :  { %v1168_v27 = vpop.f32.mrf.mxu0  ;;  %v1207_v29 = vadd.f32 %v1206_v24, %v1205_v22 }
 0x100   :  { %v1208_v30 = vpop.f32.mrf.mxu1 }
 0x101   :  { %v1169_v31 = vpop.f32.mrf.mxu0  ;;  %v611_v39 = vadd.f32 %v1207_v29, %v1167_v28 }
 0x102   :  { %v1209_v32 = vpop.f32.mrf.mxu1  ;;  %v1170_v44 = vadd.f32 %v1169_v31, %v1168_v27  ;;  %v686_v27 = vld [vmem:[#allocation2 + $0x20] sm:$0xff] }
 0x103   :  { %v1210_v45 = vadd.f32 %v1209_v32, %v1208_v30  ;;  %v687_v32 = vld [vmem:[#allocation2 + $0x28] sm:$0xff] }
 0x104   :  { %v1241_v38 = vpop.f32.mrf.mxu0 }
 0x105   :  { %v1598_v40 = vadd.f32 %v1241_v38, %v595_v35  ;;  %v1245_v41 = vpop.f32.mrf.mxu1  ;;  %v614_v57 = vadd.f32 %v1210_v45, %v1170_v44  ;;  %v726_v38 = vld [vmem:[#allocation3 + $0x18] sm:$0xff] }
 0x106   :  { %v1600_v42 = vadd.f32 %v1245_v41, %v611_v39  ;;  %v651_v43 = vpop.f32.mrf.mxu0  ;;  %v723_v39 = vld [vmem:[#allocation3] sm:$0xff] }
 0x107   :  { %v667_v46 = vpop.f32.mrf.mxu1  ;;  %694 = vadd.xlane.f32.xlu1 %v1598_v40  ;;  %v1606_v53 = vadd.f32 %v651_v43, %v587_v50  ;;  %v733_v7 = vmul.f32 %v1598_v40, %v1598_v40 }
 0x108   :  { %702 = vadd.xlane.f32.xlu0 %v1600_v42  ;;  %v1242_v51 = vpop.f32.mrf.mxu0  ;;  %v1612_v60 = vadd.f32 %v667_v46, %v603_v58  ;;  %v737_v12 = vmul.f32 %v1600_v42, %v1600_v42  ;;  %v728_v58 = vld [vmem:[#allocation3 + $0x28] sm:$0xff] }
 0x109   :  { %v1604_v52 = vadd.f32 %v1242_v51, %v598_v47  ;;  %v1246_v54 = vpop.f32.mrf.mxu1  ;;  %v731_v2 = vmul.f32 %v1606_v53, %v1606_v53  ;;  %v724_v47 = vld [vmem:[#allocation3 + $0x8] sm:$0xff] }
 0x10a   :  { %v1610_v59 = vadd.f32 %v1246_v54, %v614_v57  ;;  %v654_v6 = vpop.f32.mrf.mxu0  ;;  %v735_v4 = vmul.f32 %v1612_v60, %v1612_v60 }
 0x10b   :  { %696 = vadd.xlane.f32.xlu1 %v1604_v52  ;;  %v670_v61 = vpop.f32.mrf.mxu1  ;;  %v1625_v9 = vadd.f32 %v654_v6, %v590_v8  ;;  %v734_v1 = vmul.f32 %v1604_v52, %v1604_v52 }
 0x10c   :  { %690 = vadd.xlane.f32.xlu0 %v1606_v53  ;;  %v1620_v5 = vadd.f32 %v670_v61, %v606_v0  ;;  %v738_v11 = vmul.f32 %v1610_v59, %v1610_v59  ;;  %v683_v61 = vld [vmem:[#allocation2 + $0x8] sm:$0xff] }
 0x10d   :  { %v732_v3 = vmul.f32 %v1625_v9, %v1625_v9 }
 0x10e   :  { %v736_v10 = vmul.f32 %v1620_v5, %v1620_v5 }
 0x10f   :  { %704 = vadd.xlane.f32.xlu1 %v1610_v59 }
 0x110   :  { %698 = vadd.xlane.f32.xlu0 %v1612_v60 }
 0x113   :  { %700 = vadd.xlane.f32.xlu1 %v1620_v5 }
 0x114   :  { %743 = vadd.xlane.f32.xlu0 %v733_v7 }
 0x117   :  { %745 = vadd.xlane.f32.xlu1 %v734_v1 }
 0x118   :  { %739 = vadd.xlane.f32.xlu0 %v731_v2 }
 0x11b   :  { %741 = vadd.xlane.f32.xlu1 %v732_v3 }
 0x11c   :  { %747 = vadd.xlane.f32.xlu0 %v735_v4  ;;  %v730_v4 = vld [vmem:[#allocation3 + $0x38] sm:$0xff] }
 0x11f   :  { %749 = vadd.xlane.f32.xlu1 %v736_v10 }
 0x120   :  { %692 = vadd.xlane.f32.xlu0 %v1625_v9 }
 0x123   :  { %753 = vadd.xlane.f32.xlu1 %v738_v11 }
 0x124   :  { %751 = vadd.xlane.f32.xlu0 %v737_v12  ;;  %v729_v12 = vld [vmem:[#allocation3 + $0x30] sm:$0xff] }
 0x190   :  { %v695_v16 = vpop.xlane.xlu1 %694 }
 0x191   :  { %v703_v17 = vpop.xlane.xlu0 %702  ;;  %v708_v18 = vadd.f32 %v695_v16, %v684_v14 }
 0x192   :  { %v712_v19 = vadd.f32 %v703_v17, %v688_v15 }
 0x193   :  { %717 = vst.msk [vmem:[#allocation2 + $0x10] sm:$0xff] %vm22_vm0, %v708_v18 }
 0x194   :  { %721 = vst.msk [vmem:[#allocation2 + $0x30] sm:$0xff] %vm22_vm0, %v712_v19  ;;  %v697_v22 = vpop.xlane.xlu1 %696 }
 0x195   :  { %v709_v23 = vadd.f32 %v697_v22, %v685_v20  ;;  %v691_v24 = vpop.xlane.xlu0 %690 }
 0x196   :  { %v706_v25 = vadd.f32 %v691_v24, %v682_v21 }
 0x197   :  { %718 = vst.msk [vmem:[#allocation2 + $0x18] sm:$0xff] %vm22_vm0, %v709_v23 }
 0x198   :  { %715 = vst.msk [vmem:[#allocation2] sm:$0xff] %vm22_vm0, %v706_v25  ;;  %v705_v28 = vpop.xlane.xlu1 %704 }
 0x199   :  { %v713_v29 = vadd.f32 %v705_v28, %v689_v26  ;;  %v699_v30 = vpop.xlane.xlu0 %698 }
 0x19a   :  { %v710_v31 = vadd.f32 %v699_v30, %v686_v27  ;;  %v788_v45 = vld [vmem:[#allocation2 + $0x10] sm:$0xff] }
 0x19b   :  { %722 = vst.msk [vmem:[#allocation2 + $0x38] sm:$0xff] %vm22_vm0, %v713_v29  ;;  %v1652_v50 = vmul.f32 0.0625, %v788_v45 }
 0x19c   :  { %719 = vst.msk [vmem:[#allocation2 + $0x20] sm:$0xff] %vm22_vm0, %v710_v31  ;;  %v701_v34 = vpop.xlane.xlu1 %700 }
 0x19d   :  { %v711_v35 = vadd.f32 %v701_v34, %v687_v32  ;;  %v744_v36 = vpop.xlane.xlu0 %743  ;;  %v820_v7 = vmul.f32 %v1652_v50, %v1652_v50 }
 0x19e   :  { %v757_v37 = vadd.f32 %v744_v36, %v725_v33  ;;  %v789_v51 = vld [vmem:[#allocation2 + $0x18] sm:$0xff] }
 0x19f   :  { %720 = vst.msk [vmem:[#allocation2 + $0x28] sm:$0xff] %vm22_vm0, %v711_v35  ;;  %v786_v56 = vld [vmem:[#allocation2] sm:$0xff]  ;;  %v1655_v63 = vmul.f32 0.0625, %v789_v51  ;;  %v792_v35 = vld [vmem:[#allocation2 + $0x30] sm:$0xff] }
 0x1a0   :  { %765 = vst.msk [vmem:[#allocation3 + $0x10] sm:$0xff] %vm22_vm0, %v757_v37  ;;  %v746_v41 = vpop.xlane.xlu1 %745  ;;  %v1660_v8 = vmul.f32 0.0625, %v786_v56 }
 0x1a1   :  { %v758_v43 = vadd.f32 %v746_v41, %v726_v38  ;;  %v740_v44 = vpop.xlane.xlu0 %739  ;;  %v821_v15 = vmul.f32 %v1655_v63, %v1655_v63 }
 0x1a2   :  { %v755_v46 = vadd.f32 %v740_v44, %v723_v39  ;;  %v818_v19 = vmul.f32 %v1660_v8, %v1660_v8  ;;  %v793_v33 = vld [vmem:[#allocation2 + $0x38] sm:$0xff] }
 0x1a3   :  { %766 = vst.msk [vmem:[#allocation3 + $0x18] sm:$0xff] %vm22_vm0, %v758_v43  ;;  %v790_v24 = vld [vmem:[#allocation2 + $0x20] sm:$0xff]  ;;  %v1676_v45 = vmul.f32 0.0625, %v793_v33  ;;  %v863_v33 = vld [vmem:[%s1775_s2 + $0x28] sm:$0xff] }
 0x1a4   :  { %763 = vst.msk [vmem:[#allocation3] sm:$0xff] %vm22_vm0, %v755_v46  ;;  %v742_v49 = vpop.xlane.xlu1 %741  ;;  %v1672_v32 = vmul.f32 0.0625, %v790_v24  ;;  %v1678_v46 = vmul.f32 0.0625, %v792_v35  ;;  %v864_v35 = vld [vmem:[%s1775_s2 + $0x30] sm:$0xff] }
 0x1a5   :  { %v756_v54 = vadd.f32 %v742_v49, %v724_v47  ;;  %v748_v55 = vpop.xlane.xlu0 %747 }
 0x1a6   :  { %v759_v57 = vadd.f32 %v748_v55, %v727_v48  ;;  %v791_v20 = vld [vmem:[#allocation2 + $0x28] sm:$0xff]  ;;  %v822_v48 = vmul.f32 %v1672_v32, %v1672_v32 }
 0x1a7   :  { %764 = vst.msk [vmem:[#allocation3 + $0x8] sm:$0xff] %vm22_vm0, %v756_v54  ;;  %v804_v62 = vld [vmem:[#allocation3 + $0x10] sm:$0xff]  ;;  %v1669_v30 = vmul.f32 0.0625, %v791_v20 }
 0x1a8   :  { %767 = vst.msk [vmem:[#allocation3 + $0x20] sm:$0xff] %vm22_vm0, %v759_v57  ;;  %v750_v0 = vpop.xlane.xlu1 %749  ;;  %v812_v6 = vmul.f32 0.0625, %v804_v62  ;;  %v825_v62 = vmul.f32 %v1676_v45, %v1676_v45 }
 0x1a9   :  { %v760_v1 = vadd.f32 %v750_v0, %v728_v58  ;;  %v693_v2 = vpop.xlane.xlu0 %692  ;;  %v823_v44 = vmul.f32 %v1669_v30, %v1669_v30 }
 0x1aa   :  { %v707_v3 = vadd.f32 %v693_v2, %v683_v61  ;;  %v828_v10 = vsub.f32 %v812_v6, %v820_v7  ;;  %v805_v11 = vld [vmem:[#allocation3 + $0x18] sm:$0xff]  ;;  %v824_v6 = vmul.f32 %v1678_v46, %v1678_v46 }
 0x1ab   :  { %768 = vst.msk [vmem:[#allocation3 + $0x28] sm:$0xff] %vm22_vm0, %v760_v1  ;;  %v802_v13 = vld [vmem:[#allocation3] sm:$0xff]  ;;  %v813_v14 = vmul.f32 0.0625, %v805_v11  ;;  %v860_v11 = vld [vmem:[%s1775_s2 + $0x10] sm:$0xff] }
 0x1ac   :  { %716 = vst.msk [vmem:[#allocation2 + $0x8] sm:$0xff] %vm22_vm0, %v707_v3  ;;  %v754_v16 = vpop.xlane.xlu1 %753  ;;  %v836_v17 = vmax.f32 %v828_v10, 0.0  ;;  %v810_v18 = vmul.f32 0.0625, %v802_v13 }
 0x1ad   :  { %v762_v21 = vadd.f32 %v754_v16, %v730_v4  ;;  %v752_v22 = vpop.xlane.xlu0 %751  ;;  %v829_v23 = vsub.f32 %v813_v14, %v821_v15 }
 0x1ae   :  { %v761_v25 = vadd.f32 %v752_v22, %v729_v12  ;;  %v844_v26 = vadd.f32 1e-05, %v836_v17  ;;  %v826_v27 = vsub.f32 %v810_v18, %v818_v19  ;;  %v803_v41 = vld [vmem:[#allocation3 + $0x8] sm:$0xff]  ;;  %v861_v18 = vld [vmem:[%s1775_s2 + $0x18] sm:$0xff] }
 0x1af   :  { %770 = vst.msk [vmem:[#allocation3 + $0x38] sm:$0xff] %vm22_vm0, %v762_v21  ;;  %v837_v28 = vmax.f32 %v829_v23, 0.0  ;;  %v806_v29 = vld [vmem:[#allocation3 + $0x20] sm:$0xff]  ;;  %v811_v51 = vmul.f32 0.0625, %v803_v41  ;;  %v865_v41 = vld [vmem:[%s1775_s2 + $0x38] sm:$0xff] }
 0x1b0   :  { %769 = vst.msk [vmem:[#allocation3 + $0x30] sm:$0xff] %vm22_vm0, %v761_v25  ;;  %1335 = vrsqrt.f32 %v844_v26  ;;  %v834_v31 = vmax.f32 %v826_v27, 0.0  ;;  %v814_v37 = vmul.f32 0.0625, %v806_v29  ;;  %v858_v21 = vld [vmem:[%s1775_s2] sm:$0xff]  ;;  %v877_v26 = vld [vmem:[%s1776_s3 + $0x18] sm:$0xff] }
 0x1b1   :  { %v845_v34 = vadd.f32 1e-05, %v837_v28 }
 0x1b2   :  { %v842_v36 = vadd.f32 1e-05, %v834_v31  ;;  %v807_v38 = vld [vmem:[#allocation3 + $0x28] sm:$0xff]  ;;  %v830_v55 = vsub.f32 %v814_v37, %v822_v48 }
 0x1b3   :  { %1337 = vrsqrt.f32 %v845_v34  ;;  %v787_v39 = vld [vmem:[#allocation2 + $0x8] sm:$0xff]  ;;  %v815_v43 = vmul.f32 0.0625, %v807_v38 }
 0x1b4   :  { %1339 = vrsqrt.f32 %v842_v36  ;;  %v795_v47 = vmul.f32 0.0625, %v787_v39  ;;  %v838_v10 = vmax.f32 %v830_v55, 0.0  ;;  %v859_v31 = vld [vmem:[%s1775_s2 + $0x8] sm:$0xff] }
 0x1b5   :  { %v831_v49 = vsub.f32 %v815_v43, %v823_v44  ;;  %v875_v39 = vld [vmem:[%s1776_s3 + $0x8] sm:$0xff] }
 0x1b6   :  { %v819_v54 = vmul.f32 %v795_v47, %v795_v47  ;;  %v809_v56 = vld [vmem:[#allocation3 + $0x38] sm:$0xff]  ;;  %v846_v20 = vadd.f32 1e-05, %v838_v10 }
 0x1b7   :  { %v808_v57 = vld [vmem:[#allocation3 + $0x30] sm:$0xff]  ;;  %v839_v58 = vmax.f32 %v831_v49, 0.0  ;;  %v817_v61 = vmul.f32 0.0625, %v809_v56  ;;  %v862_v49 = vld [vmem:[%s1775_s2 + $0x20] sm:$0xff]  ;;  %v879_v56 = vld [vmem:[%s1776_s3 + $0x28] sm:$0xff] }
 0x1b8   :  { %v816_v0 = vmul.f32 0.0625, %v808_v57  ;;  %v827_v7 = vsub.f32 %v811_v51, %v819_v54 }
 0x1b9   :  { %v847_v1 = vadd.f32 1e-05, %v839_v58  ;;  %v833_v2 = vsub.f32 %v817_v61, %v825_v62  ;;  %v881_v61 = vld [vmem:[%s1776_s3 + $0x38] sm:$0xff] }
 0x1ba   :  { %v832_v3 = vsub.f32 %v816_v0, %v824_v6  ;;  %v835_v4 = vmax.f32 %v827_v7, 0.0  ;;  %v876_v0 = vld [vmem:[%s1776_s3 + $0x10] sm:$0xff]  ;;  %v874_v7 = vld [vmem:[%s1776_s3] sm:$0xff] }
 0x1bb   :  { %v841_v12 = vmax.f32 %v833_v2, 0.0  ;;  %1341 = vrsqrt.f32 %v847_v1 }
 0x1bc   :  { %v840_v13 = vmax.f32 %v832_v3, 0.0  ;;  %v843_v14 = vadd.f32 1e-05, %v835_v4 }
 0x1bd   :  { %v1336_v15 = vpop.eup %1335  ;;  %v849_v16 = vadd.f32 1e-05, %v841_v12 }
 0x1be   :  { %v868_v17 = vmul.f32 %v1336_v15, %v860_v11  ;;  %v848_v19 = vadd.f32 1e-05, %v840_v13  ;;  %1343 = vrsqrt.f32 %v843_v14 }
 0x1bf   :  { %1345 = vrsqrt.f32 %v849_v16 }
 0x1c0   :  { %v1338_v22 = vpop.eup %1337  ;;  %918 = vperm.xlu1 %1265, %v868_v17   ;;  %1347 = vrsqrt.f32 %v848_v19 }
 0x1c1   :  { %v1340_v23 = vpop.eup %1339  ;;  %v869_v24 = vmul.f32 %v1338_v22, %v861_v18  ;;  %1349 = vrsqrt.f32 %v846_v20 }
 0x1c2   :  { %v866_v25 = vmul.f32 %v1340_v23, %v858_v21 }
 0x1c3   :  { %v885_v27 = vmul.f32 %v869_v24, %v1655_v63 }
 0x1c4   :  { %908 = vperm.xlu0 %1266, %v866_v25  }
 0x1c5   :  { %v893_v28 = vsub.f32 %v877_v26, %v885_v27 }
 0x1c8   :  { %971 = vperm.xlu0 %1266, %v893_v28   ;;  %v1342_v29 = vpop.eup %1341 }
 0x1c9   :  { %v871_v63 = vmul.f32 %v1342_v29, %v863_v33 }
 0x1cb   :  { %v1344_v34 = vpop.eup %1343  ;;  %v887_v54 = vmul.f32 %v871_v63, %v1669_v30  ;;  %v884_v30 = vmul.f32 %v868_v17, %v1652_v50  ;;  %v878_v50 = vld [vmem:[%s1776_s3 + $0x20] sm:$0xff] }
 0x1cc   :  { %v1346_v36 = vpop.eup %1345  ;;  %v867_v37 = vmul.f32 %v1344_v34, %v859_v31 }
 0x1cd   :  { %v1348_v38 = vpop.eup %1347  ;;  %v873_v55 = vmul.f32 %v1346_v36, %v865_v41  ;;  %v895_v58 = vsub.f32 %v879_v56, %v887_v54  ;;  %v892_v6 = vsub.f32 %v876_v0, %v884_v30 }
 0x1ce   :  { %v872_v43 = vmul.f32 %v1348_v38, %v864_v35  ;;  %v883_v44 = vmul.f32 %v867_v37, %v795_v47  ;;  %v1350_v48 = vpop.eup %1349 }
 0x1cf   :  { %v870_v57 = vmul.f32 %v1350_v48, %v862_v49  ;;  %v889_v47 = vmul.f32 %v873_v55, %v1676_v45  ;;  %v882_v45 = vmul.f32 %v866_v25, %v1660_v8  ;;  %v880_v8 = vld [vmem:[%s1776_s3 + $0x30] sm:$0xff] }
 0x1d0   :  { %938 = vperm.xlu1 %1265, %v872_v43   ;;  %v891_v51 = vsub.f32 %v875_v39, %v883_v44  ;;  %v888_v4 = vmul.f32 %v872_v43, %v1678_v46 }
 0x1d1   :  { %v897_v62 = vsub.f32 %v881_v61, %v889_v47  ;;  %v890_v1 = vsub.f32 %v874_v7, %v882_v45  ;;  %v886_v2 = vmul.f32 %v870_v57, %v1672_v32 }
 0x1d2   :  { %961 = vperm.xlu0 %1266, %v891_v51   ;;  %v896_v10 = vsub.f32 %v880_v8, %v888_v4 }
 0x1d3   :  { %v894_v3 = vsub.f32 %v878_v50, %v886_v2 }
 0x1d4   :  { %928 = vperm.xlu1 %1265, %v870_v57  }
 0x1d6   :  { %981 = vperm.xlu0 %1266, %v895_v58  }
 0x1d8   :  { %923 = vperm.xlu1 %1265, %v869_v24  }
 0x1da   :  { %991 = vperm.xlu0 %1266, %v897_v62  }
 0x1dc   :  { %943 = vperm.xlu1 %1265, %v873_v55  }
 0x1e0   :  { %966 = vperm.xlu1 %1265, %v892_v6  }
 0x1e4   :  { %913 = vperm.xlu1 %1265, %v867_v37  }
 0x1e8   :  { %933 = vperm.xlu1 %1265, %v871_v63  }
 0x1ec   :  { %956 = vperm.xlu1 %1265, %v890_v1  }
 0x1f0   :  { %976 = vperm.xlu1 %1265, %v894_v3  }
 0x1f4   :  { %986 = vperm.xlu1 %1265, %v896_v10  }
 0x23b   :  { %v919_v12 = vpop.permute.xlu1 %918 }
 0x23c   :  { %v948_v23 = vmul.f32 %v919_v12, %v1598_v40 }
 0x23f   :  { %v909_v11 = vpop.permute.xlu0 %908 }
 0x240   :  { %v946_v40 = vmul.f32 %v909_v11, %v1606_v53 }
 0x243   :  { %v972_v13 = vpop.permute.xlu0 %971 }
 0x24b   :  { %v939_v14 = vpop.permute.xlu1 %938 }
 0x24c   :  { %v952_v53 = vmul.f32 %v939_v14, %v1600_v42 }
 0x24d   :  { %v962_v32 = vpop.permute.xlu0 %961 }
 0x24f   :  { %v929_v15 = vpop.permute.xlu1 %928 }
 0x250   :  { %v950_v48 = vmul.f32 %v929_v15, %v1612_v60 }
 0x251   :  { %v982_v16 = vpop.permute.xlu0 %981 }
 0x253   :  { %v924_v17 = vpop.permute.xlu1 %923 }
 0x254   :  { %v949_v18 = vmul.f32 %v924_v17, %v1604_v52 }
 0x255   :  { %v992_v22 = vpop.permute.xlu0 %991 }
 0x256   :  { %v997_v19 = vadd.f32 %v972_v13, %v949_v18 }
 0x257   :  { %v944_v20 = vpop.permute.xlu1 %943 }
 0x258   :  { %v1013_v46 = vmin.f32 %v997_v19, 0.0  ;;  %v953_v21 = vmul.f32 %v944_v20, %v1610_v59  ;;  %vm1005_vm1 = vcmp.gt.f32.partialorder %v997_v19, 0.0 }
 0x25a   :  { %v1024_v24 = vmul.f32 1.442695, %v1013_v46  ;;  %v1001_v25 = vadd.f32 %v992_v22, %v953_v21 }
 0x25b   :  { %v967_v26 = vpop.permute.xlu1 %966 }
 0x25c   :  { %1351 = vpow2.f32 %v1024_v24  ;;  %v1017_v27 = vmin.f32 %v1001_v25, 0.0  ;;  %v996_v28 = vadd.f32 %v967_v26, %v948_v23  ;;  %vm1009_vm2 = vcmp.gt.f32.partialorder %v1001_v25, 0.0 }
 0x25e   :  { %v1032_v29 = vmul.f32 1.442695, %v1017_v27  ;;  %v1012_v31 = vmin.f32 %v996_v28, 0.0  ;;  %vm1004_vm3 = vcmp.gt.f32.partialorder %v996_v28, 0.0 }
 0x25f   :  { %v914_v33 = vpop.permute.xlu1 %913 }
 0x260   :  { %1353 = vpow2.f32 %v1032_v29  ;;  %v1022_v34 = vmul.f32 1.442695, %v1012_v31  ;;  %v947_v52 = vmul.f32 %v914_v33, %v1625_v9 }
 0x262   :  { %1355 = vpow2.f32 %v1022_v34  ;;  %v995_v35 = vadd.f32 %v962_v32, %v947_v52 }
 0x263   :  { %v934_v36 = vpop.permute.xlu1 %933 }
 0x264   :  { %v1011_v59 = vmin.f32 %v995_v35, 0.0  ;;  %v951_v37 = vmul.f32 %v934_v36, %v1620_v5  ;;  %vm1003_vm4 = vcmp.gt.f32.partialorder %v995_v35, 0.0 }
 0x266   :  { %v1020_v63 = vmul.f32 1.442695, %v1011_v59  ;;  %v999_v38 = vadd.f32 %v982_v16, %v951_v37 }
 0x267   :  { %v957_v39 = vpop.permute.xlu1 %956 }
 0x268   :  { %1357 = vpow2.f32 %v1020_v63  ;;  %v1015_v41 = vmin.f32 %v999_v38, 0.0  ;;  %v994_v43 = vadd.f32 %v957_v39, %v946_v40  ;;  %vm1007_vm5 = vcmp.gt.f32.partialorder %v999_v38, 0.0 }
 0x269   :  { %v1352_v44 = vpop.eup %1351 }
 0x26a   :  { %v1126_v49 = vadd.f32 -1.0, %v1352_v44  ;;  %v1028_v51 = vmul.f32 1.442695, %v1015_v41  ;;  %v1010_v9 = vmin.f32 %v994_v43, 0.0  ;;  %vm1002_vm6 = vcmp.gt.f32.partialorder %v994_v43, 0.0 }
 0x26b   :  { %v977_v54 = vpop.permute.xlu1 %976 }
 0x26c   :  { %v1045_v55 = vsel %vm1005_vm1, %v997_v19, %v1126_v49  ;;  %1359 = vpow2.f32 %v1028_v51  ;;  %v1018_v56 = vmul.f32 1.442695, %v1010_v9  ;;  %v998_v5 = vadd.f32 %v977_v54, %v950_v48 }
 0x26d   :  { %v1354_v57 = vpop.eup %1353  ;;  %1053 = vst [vmem:[%s1777_s4 + $0x18] sm:$0xff] %v1045_v55 }
 0x26e   :  { %v1130_v58 = vadd.f32 -1.0, %v1354_v57  ;;  %1361 = vpow2.f32 %v1018_v56  ;;  %v1014_v47 = vmin.f32 %v998_v5, 0.0  ;;  %vm1006_vm7 = vcmp.gt.f32.partialorder %v998_v5, 0.0 }
 0x26f   :  { %v1356_v60 = vpop.eup %1355  ;;  %v987_v61 = vpop.permute.xlu1 %986 }
 0x270   :  { %v1049_v62 = vsel %vm1009_vm2, %v1001_v25, %v1130_v58  ;;  %v1125_v30 = vadd.f32 -1.0, %v1356_v60  ;;  %v1026_v0 = vmul.f32 1.442695, %v1014_v47  ;;  %v1000_v6 = vadd.f32 %v987_v61, %v952_v53 }
 0x271   :  { %1057 = vst [vmem:[%s1777_s4 + $0x38] sm:$0xff] %v1049_v62 }
 0x272   :  { %v1044_v45 = vsel %vm1004_vm3, %v996_v28, %v1125_v30  ;;  %1363 = vpow2.f32 %v1026_v0  ;;  %v1016_v7 = vmin.f32 %v1000_v6, 0.0  ;;  %vm1008_vm8 = vcmp.gt.f32.partialorder %v1000_v6, 0.0 }
 0x273   :  { %1052 = vst [vmem:[%s1777_s4 + $0x10] sm:$0xff] %v1044_v45 }
 0x274   :  { %v1030_v42 = vmul.f32 1.442695, %v1016_v7 }
 0x275   :  { %v1358_v1 = vpop.eup %1357 }
 0x276   :  { %v1124_v2 = vadd.f32 -1.0, %v1358_v1  ;;  %1365 = vpow2.f32 %v1030_v42 }
 0x278   :  { %v1043_v50 = vsel %vm1003_vm4, %v995_v35, %v1124_v2 }
 0x279   :  { %v1360_v3 = vpop.eup %1359  ;;  %1051 = vst [vmem:[%s1777_s4 + $0x8] sm:$0xff] %v1043_v50 }
 0x27a   :  { %v1128_v4 = vadd.f32 -1.0, %v1360_v3 }
 0x27b   :  { %v1362_v8 = vpop.eup %1361 }
 0x27c   :  { %v1047_v10 = vsel %vm1007_vm5, %v999_v38, %v1128_v4  ;;  %v1123_v11 = vadd.f32 -1.0, %v1362_v8 }
 0x27d   :  { %1055 = vst [vmem:[%s1777_s4 + $0x28] sm:$0xff] %v1047_v10 }
 0x27e   :  { %v1042_v12 = vsel %vm1002_vm6, %v994_v43, %v1123_v11 }
 0x27f   :  { %v1364_v13 = vpop.eup %1363  ;;  %1050 = vst [vmem:[%s1777_s4] sm:$0xff] %v1042_v12 }
 0x280   :  { %v1127_v14 = vadd.f32 -1.0, %v1364_v13 }
 0x282   :  { %v1046_v32 = vsel %vm1006_vm7, %v998_v5, %v1127_v14 }
 0x283   :  { %v1366_v15 = vpop.eup %1365  ;;  %1054 = vst [vmem:[%s1777_s4 + $0x20] sm:$0xff] %v1046_v32 }
 0x284   :  { %v1129_v16 = vadd.f32 -1.0, %v1366_v15 }
 0x286   :  { %v1048_v17 = vsel %vm1008_vm8, %v1000_v6, %v1129_v16 }
 0x287   :  { %1056 = vst [vmem:[%s1777_s4 + $0x30] sm:$0xff] %v1048_v17 }

// kernel: aunet_forward.15
= control target key start
LH: loop header
LB: loop body
LE: loop exit
PB: predicated region body
PF: predicated region fallthrough
CT: control target
= control target key end

     0   :  { %vm30_vm0 = vcmask 7168   ;;  %s2053_s0 = inlined_call_operand.vmem [shape: bf16[384,128], index: 0, kind: input, shape index: {}]   ;;  %s2054_s1 = inlined_call_operand.vmem [shape: bf16[256,128], index: 1, kind: input, shape index: {}]   ;;  %s2055_s2 = inlined_call_operand.vmem [shape: bf16[64,384], index: 2, kind: input, shape index: {}]   ;;  %s2056_s3 = inlined_call_operand.vmem [shape: bf16[64,256], index: 3, kind: input, shape index: {}]   ;;  %s2057_s4 = inlined_call_operand.vmem [shape: f32[64,1], index: 4, kind: input, shape index: {}]   ;;  %s2058_s5 = inlined_call_operand.vmem [shape: f32[64,1], index: 5, kind: input, shape index: {}]   ;;  %s2059_s6 = inlined_call_operand.vmem [shape: f32[64,128], index: 6, kind: output, shape index: {0}]   ;;  %s2060_s7 = inlined_call_operand.vmem [shape: f32[64,128], index: 7, kind: output, shape index: {1}]  }
   0x1   :  { %v1417_v0 = vld [vmem:[%s2053_s0 + $0x78] sm:$0xff]   ;;  %v1421_v4 = vld [vmem:[%s2053_s0 + $0x70] sm:$0xff]   ;;  %v1425_v8 = vld [vmem:[%s2053_s0 + $0x68] sm:$0xff]  }
   0x2   :  { %v1418_v1 = vld [vmem:[%s2054_s1 + $0x78] sm:$0xff]   ;;  %1297 = vmatprep.subr.bf16.mxu1 %v1417_v0  ;;  %v1422_v5 = vld [vmem:[%s2054_s1 + $0x70] sm:$0xff]   ;;  %v1426_v9 = vld [vmem:[%s2054_s1 + $0x68] sm:$0xff]  }
   0x3   :  { %v1419_v2 = vld [vmem:[%s2053_s0 + $0x38] sm:$0xff]   ;;  %1349 = vmatprep.subr.bf16.mxu0 %v1418_v1  ;;  %v1423_v6 = vld [vmem:[%s2053_s0 + $0x30] sm:$0xff]   ;;  %v1427_v10 = vld [vmem:[%s2053_s0 + $0x28] sm:$0xff]  }
   0x4   :  { %v1420_v3 = vld [vmem:[%s2054_s1 + $0x38] sm:$0xff]   ;;  %1298 = vmatpush3.bf16.msra.mxu1 %v1419_v2  ;;  %v1424_v7 = vld [vmem:[%s2054_s1 + $0x30] sm:$0xff]   ;;  %v1428_v11 = vld [vmem:[%s2054_s1 + $0x28] sm:$0xff]  }
   0x5   :  { %1350 = vmatpush3.bf16.msra.mxu0 %v1420_v3  ;;  %1299 = vmatprep.subr.bf16.mxu1 %v1421_v4  ;;  %v1429_v12 = vld [vmem:[%s2053_s0 + $0x60] sm:$0xff]   ;;  %v1433_v16 = vld [vmem:[%s2053_s0 + $0x58] sm:$0xff]   ;;  %v1437_v20 = vld [vmem:[%s2053_s0 + $0x50] sm:$0xff]  }
   0x6   :  { %1351 = vmatprep.subr.bf16.mxu0 %v1422_v5  ;;  %v1430_v13 = vld [vmem:[%s2054_s1 + $0x60] sm:$0xff]   ;;  %v1434_v17 = vld [vmem:[%s2054_s1 + $0x58] sm:$0xff]   ;;  %v1438_v21 = vld [vmem:[%s2054_s1 + $0x50] sm:$0xff]  }
   0x7   :  { %v1431_v14 = vld [vmem:[%s2053_s0 + $0x20] sm:$0xff]   ;;  %v1435_v18 = vld [vmem:[%s2053_s0 + $0x18] sm:$0xff]   ;;  %v1439_v22 = vld [vmem:[%s2053_s0 + $0x10] sm:$0xff]  }
   0x8   :  { %1300 = vmatpush3.bf16.msra.mxu1 %v1423_v6  ;;  %v1432_v15 = vld [vmem:[%s2054_s1 + $0x20] sm:$0xff]   ;;  %v1436_v19 = vld [vmem:[%s2054_s1 + $0x18] sm:$0xff]   ;;  %v1440_v23 = vld [vmem:[%s2054_s1 + $0x10] sm:$0xff]  }
   0x9   :  { %1352 = vmatpush3.bf16.msra.mxu0 %v1424_v7  ;;  %1301 = vmatprep.subr.bf16.mxu1 %v1425_v8  ;;  %v1441_v24 = vld [vmem:[%s2053_s0 + $0x48] sm:$0xff]   ;;  %v1445_v28 = vld [vmem:[%s2053_s0 + $0x40] sm:$0xff]   ;;  %v1455_v36 = vld [vmem:[%s2053_s0 + $0xb8] sm:$0xff]  }
   0xa   :  { %1353 = vmatprep.subr.bf16.mxu0 %v1426_v9  ;;  %v1442_v25 = vld [vmem:[%s2054_s1 + $0x48] sm:$0xff]   ;;  %v1446_v29 = vld [vmem:[%s2054_s1 + $0x40] sm:$0xff]   ;;  %v1456_v37 = vld [vmem:[%s2053_s0 + $0xb0] sm:$0xff]  }
   0xb   :  { %v1443_v26 = vld [vmem:[%s2053_s0 + $0x8] sm:$0xff]   ;;  %v1447_v30 = vld [vmem:[%s2053_s0] sm:$0xff]   ;;  %v1459_v39 = vld [vmem:[%s2056_s3 + $0x14] ss:$8 sps:$4 sm:$0xff]  }
   0xc   :  { %1302 = vmatpush3.bf16.msra.mxu1 %v1427_v10  ;;  %v1444_v27 = vld [vmem:[%s2054_s1 + $0x8] sm:$0xff]   ;;  %v1448_v31 = vld [vmem:[%s2054_s1] sm:$0xff]   ;;  %v1463_v42 = vld [vmem:[%s2056_s3 + $0x10] ss:$8 sps:$4 sm:$0xff]  }
   0xd   :  { %1354 = vmatpush3.bf16.msra.mxu0 %v1428_v11  ;;  %1303 = vmatprep.subr.bf16.mxu1 %v1429_v12  ;;  %v1449_v32 = vld [vmem:[%s2055_s2] ss:$12 sps:$4 sm:$0xff]   ;;  %v1451_v33 = vld [vmem:[%s2055_s2 + $0x4] ss:$12 sps:$4 sm:$0xff]   ;;  %v1457_v38 = vld [vmem:[%s2055_s2 + $0x1c] ss:$12 sps:$4 sm:$0xff]  }
   0xe   :  { %1355 = vmatprep.subr.bf16.mxu0 %v1430_v13  ;;  %v1452_v34 = vld [vmem:[%s2056_s3] ss:$8 sps:$4 sm:$0xff]   ;;  %v1454_v35 = vld [vmem:[%s2056_s3 + $0x4] ss:$8 sps:$4 sm:$0xff]   ;;  %351 = vmatprep.mubr.bf16.mxu1 %v1451_v33  ;;  %v1470_v46 = vld [vmem:[%s2053_s0 + $0x98] sm:$0xff]  }
   0xf   :  { %657 = vmatprep.mubr.bf16.mxu0 %v1454_v35  ;;  %v1462_v40 = vld [vmem:[%s2053_s0 + $0xa8] sm:$0xff]   ;;  %v1461_v41 = vld [vmem:[%s2055_s2 + $0x18] ss:$12 sps:$4 sm:$0xff]   ;;  %v1465_v43 = vld [vmem:[%s2055_s2 + $0x34] ss:$12 sps:$4 sm:$0xff]  }
  0x10   :  { %1304 = vmatpush3.bf16.msra.mxu1 %v1431_v14  ;;  %v1464_v44 = vld [vmem:[%s2053_s0 + $0xa0] sm:$0xff]   ;;  %v1469_v47 = vld [vmem:[%s2055_s2 + $0x30] ss:$12 sps:$4 sm:$0xff]   ;;  %v1473_v49 = vld [vmem:[%s2055_s2 + $0x4c] ss:$12 sps:$4 sm:$0xff]  }
  0x11   :  { %1356 = vmatpush3.bf16.msra.mxu0 %v1432_v15  ;;  %1305 = vmatprep.subr.bf16.mxu1 %v1433_v16  ;;  %v1467_v45 = vld [vmem:[%s2056_s3 + $0x24] ss:$8 sps:$4 sm:$0xff]   ;;  %v1471_v48 = vld [vmem:[%s2056_s3 + $0x20] ss:$8 sps:$4 sm:$0xff]   ;;  %v1475_v50 = vld [vmem:[%s2056_s3 + $0x34] ss:$8 sps:$4 sm:$0xff]  }
  0x12   :  { %1357 = vmatprep.subr.bf16.mxu0 %v1434_v17  ;;  %v1472_v51 = vld [vmem:[%s2053_s0 + $0x90] sm:$0xff]   ;;  %v1478_v52 = vld [vmem:[%s2053_s0 + $0x88] sm:$0xff]   ;;  %v1480_v56 = vld [vmem:[%s2053_s0 + $0x80] sm:$0xff]  }
  0x13   :  { %v1477_v53 = vld [vmem:[%s2055_s2 + $0x48] ss:$12 sps:$4 sm:$0xff]   ;;  %v1479_v54 = vld [vmem:[%s2056_s3 + $0x30] ss:$8 sps:$4 sm:$0xff]   ;;  %v1482_v57 = vld [vmem:[%s2055_s2 + $0x20] ss:$12 sps:$4 sm:$0xff]  }
  0x14   :  { %1306 = vmatpush3.bf16.msra.mxu1 %v1435_v18  ;;  %v1481_v55 = vld [vmem:[%s2055_s2 + $0x8] ss:$12 sps:$4 sm:$0xff]   ;;  %v1483_v58 = vld [vmem:[%s2055_s2 + $0x38] ss:$12 sps:$4 sm:$0xff]   ;;  %v1484_v59 = vld [vmem:[%s2055_s2 + $0x50] ss:$12 sps:$4 sm:$0xff]  }
  0x15   :  { %1358 = vmatpush3.bf16.msra.mxu0 %v1436_v19  ;;  %1307 = vmatprep.subr.bf16.mxu1 %v1437_v20 }
  0x16   :  { %1359 = vmatprep.subr.bf16.mxu0 %v1438_v21 }
  0x18   :  { %1308 = vmatpush3.bf16.msra.mxu1 %v1439_v22 }
  0x19   :  { %1360 = vmatpush3.bf16.msra.mxu0 %v1440_v23  ;;  %1309 = vmatprep.subr.bf16.mxu1 %v1441_v24 }
  0x1a   :  { %1361 = vmatprep.subr.bf16.mxu0 %v1442_v25 }
  0x1c   :  { %1310 = vmatpush3.bf16.msra.mxu1 %v1443_v26 }
  0x1d   :  { %1362 = vmatpush3.bf16.msra.mxu0 %v1444_v27  ;;  %1311 = vmatprep.subr.bf16.mxu1 %v1445_v28 }
  0x1e   :  { %1363 = vmatprep.subr.bf16.mxu0 %v1446_v29 }
  0x20   :  { %1312 = vmatpush3.bf16.msra.mxu1 %v1447_v30 }
  0x21   :  { %1364 = vmatpush3.bf16.msra.mxu0 %v1448_v31  ;;  %1389 = vmatprep.subr.bf16.mxu1 %v1455_v36 }
  0x23   :  { %352 = vmatmul.mubr.bf16.vlgmr.msra.gmra.mxu1 %v1449_v32 }
  0x24   :  { %658 = vmatmul.mubr.bf16.vlgmr.msra.gmra.mxu0 %v1452_v34  ;;  %1390 = vmatpush3.bf16.msra.mxu1 %v1455_v36 }
  0x25   :  { %1391 = vmatprep.subr.bf16.mxu1 %v1456_v37  ;;  %359 = vmatprep.mubr.bf16.mxu1 %v1457_v38 }
  0x26   :  { %665 = vmatprep.mubr.bf16.mxu0 %v1459_v39 }
  0x28   :  { %1392 = vmatpush3.bf16.msra.mxu1 %v1456_v37 }
  0x29   :  { %1393 = vmatprep.subr.bf16.mxu1 %v1462_v40 }
  0x2b   :  { %360 = vmatmul.mubr.bf16.gmra.mxu1 %v1461_v41 }
  0x2c   :  { %666 = vmatmul.mubr.bf16.gmra.mxu0 %v1463_v42  ;;  %367 = vmatprep.mubr.bf16.mxu1 %v1465_v43 }
  0x2d   :  { %1394 = vmatpush3.bf16.msra.mxu1 %v1462_v40  ;;  %673 = vmatprep.mubr.bf16.mxu0 %v1467_v45 }
  0x2e   :  { %1395 = vmatprep.subr.bf16.mxu1 %v1464_v44 }
  0x31   :  { %1396 = vmatpush3.bf16.msra.mxu1 %v1464_v44 }
  0x32   :  { %1397 = vmatprep.subr.bf16.mxu1 %v1470_v46 }
  0x33   :  { %368 = vmatmul.mubr.bf16.gmra.mxu1 %v1469_v47 }
  0x34   :  { %674 = vmatmul.mubr.bf16.gmra.mxu0 %v1471_v48  ;;  %375 = vmatprep.mubr.bf16.mxu1 %v1473_v49 }
  0x35   :  { %1398 = vmatpush3.bf16.msra.mxu1 %v1470_v46  ;;  %681 = vmatprep.mubr.bf16.mxu0 %v1475_v50 }
  0x36   :  { %1399 = vmatprep.subr.bf16.mxu1 %v1472_v51 }
  0x39   :  { %1400 = vmatpush3.bf16.msra.mxu1 %v1472_v51 }
  0x3a   :  { %1401 = vmatprep.subr.bf16.mxu1 %v1478_v52 }
  0x3b   :  { %376 = vmatmul.mubr.bf16.gmra.mxu1 %v1477_v53 }
  0x3c   :  { %682 = vmatmul.mubr.bf16.gmra.mxu0 %v1479_v54  ;;  %1405 = vmatprep.mubr.bf16.mxu1 %v1481_v55  ;;  %v1533_v55 = vmov 0.0  }
  0x3d   :  { %1402 = vmatpush3.bf16.msra.mxu1 %v1478_v52  ;;  %33 = vst.msk [vmem:[#allocation2 + $0x10] sm:$0xff] %vm30_vm0, %v1533_v55  ;;  %31 = vst.msk [vmem:[#allocation2] sm:$0xff] %vm30_vm0, %v1533_v55 }
  0x3e   :  { %1403 = vmatprep.subr.bf16.mxu1 %v1480_v56  ;;  %32 = vst.msk [vmem:[#allocation2 + $0x8] sm:$0xff] %vm30_vm0, %v1533_v55  ;;  %34 = vst.msk [vmem:[#allocation2 + $0x18] sm:$0xff] %vm30_vm0, %v1533_v55 }
  0x3f   :  { %35 = vst.msk [vmem:[#allocation2 + $0x20] sm:$0xff] %vm30_vm0, %v1533_v55  ;;  %36 = vst.msk [vmem:[#allocation2 + $0x28] sm:$0xff] %vm30_vm0, %v1533_v55 }
  0x40   :  { %37 = vst.msk [vmem:[#allocation2 + $0x30] sm:$0xff] %vm30_vm0, %v1533_v55  ;;  %38 = vst.msk [vmem:[#allocation2 + $0x38] sm:$0xff] %vm30_vm0, %v1533_v55 }
  0x41   :  { %1404 = vmatpush3.bf16.msra.mxu1 %v1480_v56  ;;  %39 = vst.msk [vmem:[#allocation3] sm:$0xff] %vm30_vm0, %v1533_v55  ;;  %40 = vst.msk [vmem:[#allocation3 + $0x8] sm:$0xff] %vm30_vm0, %v1533_v55 }
  0x42   :  { %41 = vst.msk [vmem:[#allocation3 + $0x10] sm:$0xff] %vm30_vm0, %v1533_v55  ;;  %42 = vst.msk [vmem:[#allocation3 + $0x18] sm:$0xff] %vm30_vm0, %v1533_v55 }
  0x43   :  { %43 = vst.msk [vmem:[#allocation3 + $0x20] sm:$0xff] %vm30_vm0, %v1533_v55  ;;  %44 = vst.msk [vmem:[#allocation3 + $0x28] sm:$0xff] %vm30_vm0, %v1533_v55 }
  0x44   :  { %1406 = vmatmul.mubr.bf16.vlgmr.msra.gmra.mxu1 %v1482_v57  ;;  %45 = vst.msk [vmem:[#allocation3 + $0x30] sm:$0xff] %vm30_vm0, %v1533_v55  ;;  %46 = vst.msk [vmem:[#allocation3 + $0x38] sm:$0xff] %vm30_vm0, %v1533_v55 }
  0x45   :  { %1409 = vmatprep.mubr.bf16.mxu1 %v1483_v58 }
  0x49   :  { %v758_v55 = vld [vmem:[#allocation3 + $0x18] sm:$0xff] }
  0x4c   :  { %1410 = vmatmul.mubr.bf16.gmra.mxu1 %v1484_v59 }
  0xe3   :  { %v1313_v60 = vpop.f32.mrf.mxu1 }
  0xe4   :  { %v1365_v61 = vpop.f32.mrf.mxu0 }
  0xe5   :  { %v1314_v62 = vpop.f32.mrf.mxu1 }
  0xe6   :  { %v1366_v63 = vpop.f32.mrf.mxu0  ;;  %v1315_v43 = vadd.f32 %v1314_v62, %v1313_v60 }
  0xe7   :  { %v1755_v0 = vadd.f32 %v1366_v63, %v1365_v61  ;;  %v1757_v1 = vpop.f32.mrf.mxu1 }
  0xe8   :  { %v1368_v2 = vpop.f32.mrf.mxu0 }
  0xe9   :  { %714 = vadd.xlane.f32.xlu0 %v1755_v0  ;;  %v1760_v3 = vpop.f32.mrf.mxu1  ;;  %v787_v4 = vmul.f32 %v1755_v0, %v1755_v0 }
  0xea   :  { %v1369_v5 = vpop.f32.mrf.mxu0  ;;  %v1318_v54 = vadd.f32 %v1760_v3, %v1757_v1 }
  0xeb   :  { %v1764_v6 = vadd.f32 %v1369_v5, %v1368_v2  ;;  %v1319_v7 = vpop.f32.mrf.mxu1 }
  0xec   :  { %v1371_v8 = vpop.f32.mrf.mxu0 }
  0xed   :  { %716 = vadd.xlane.f32.xlu1 %v1764_v6  ;;  %795 = vadd.xlane.f32.xlu0 %v787_v4  ;;  %v1320_v9 = vpop.f32.mrf.mxu1  ;;  %v788_v13 = vmul.f32 %v1764_v6, %v1764_v6 }
  0xee   :  { %v1372_v10 = vpop.f32.mrf.mxu0  ;;  %v1321_v44 = vadd.f32 %v1320_v9, %v1319_v7 }
  0xef   :  { %v1767_v11 = vadd.f32 %v1372_v10, %v1371_v8  ;;  %v1322_v12 = vpop.f32.mrf.mxu1 }
  0xf0   :  { %v1374_v14 = vpop.f32.mrf.mxu0 }
  0xf1   :  { %797 = vadd.xlane.f32.xlu1 %v788_v13  ;;  %718 = vadd.xlane.f32.xlu0 %v1767_v11  ;;  %v1323_v15 = vpop.f32.mrf.mxu1  ;;  %v789_v16 = vmul.f32 %v1767_v11, %v1767_v11 }
  0xf2   :  { %v1375_v17 = vpop.f32.mrf.mxu0  ;;  %v1324_v49 = vadd.f32 %v1323_v15, %v1322_v12 }
  0xf3   :  { %v1774_v18 = vadd.f32 %v1375_v17, %v1374_v14  ;;  %v1776_v19 = vpop.f32.mrf.mxu1 }
  0xf4   :  { %v1377_v20 = vpop.f32.mrf.mxu0 }
  0xf5   :  { %720 = vadd.xlane.f32.xlu1 %v1774_v18  ;;  %799 = vadd.xlane.f32.xlu0 %v789_v16  ;;  %v1779_v21 = vpop.f32.mrf.mxu1  ;;  %v790_v25 = vmul.f32 %v1774_v18, %v1774_v18  ;;  %v1534_v16 = vmov 0  }
  0xf6   :  { %v1378_v22 = vpop.f32.mrf.mxu0  ;;  %v1327_v4 = vadd.f32 %v1779_v21, %v1776_v19  ;;  %1415 = vset.pattern.permute.xlu1 %v1534_v16  ;;  %1416 = vset.pattern.permute.xlu0 %v1534_v16 }
  0xf7   :  { %v1781_v23 = vadd.f32 %v1378_v22, %v1377_v20  ;;  %v1783_v24 = vpop.f32.mrf.mxu1 }
  0xf8   :  { %v1380_v26 = vpop.f32.mrf.mxu0 }
  0xf9   :  { %801 = vadd.xlane.f32.xlu1 %v790_v25  ;;  %722 = vadd.xlane.f32.xlu0 %v1781_v23  ;;  %v1788_v27 = vpop.f32.mrf.mxu1  ;;  %v791_v28 = vmul.f32 %v1781_v23, %v1781_v23 }
  0xfa   :  { %v1381_v29 = vpop.f32.mrf.mxu0  ;;  %v1330_v5 = vadd.f32 %v1788_v27, %v1783_v24 }
  0xfb   :  { %v1792_v30 = vadd.f32 %v1381_v29, %v1380_v26  ;;  %v1331_v31 = vpop.f32.mrf.mxu1 }
  0xfc   :  { %v1383_v32 = vpop.f32.mrf.mxu0 }
  0xfd   :  { %724 = vadd.xlane.f32.xlu1 %v1792_v30  ;;  %803 = vadd.xlane.f32.xlu0 %v791_v28  ;;  %v1332_v33 = vpop.f32.mrf.mxu1  ;;  %v792_v37 = vmul.f32 %v1792_v30, %v1792_v30 }
  0xfe   :  { %v1384_v34 = vpop.f32.mrf.mxu0  ;;  %v1333_v62 = vadd.f32 %v1332_v33, %v1331_v31 }
  0xff   :  { %v1795_v35 = vadd.f32 %v1384_v34, %v1383_v32  ;;  %v1334_v36 = vpop.f32.mrf.mxu1  ;;  %v692_v34 = vld [vmem:[#allocation2 + $0x10] sm:$0xff] }
 0x100   :  { %v1386_v38 = vpop.f32.mrf.mxu0 }
 0x101   :  { %805 = vadd.xlane.f32.xlu1 %v792_v37  ;;  %v1335_v39 = vpop.f32.mrf.mxu1  ;;  %726 = vadd.xlane.f32.xlu0 %v1795_v35  ;;  %v793_v15 = vmul.f32 %v1795_v35, %v1795_v35  ;;  %v690_v37 = vld [vmem:[#allocation2] sm:$0xff] }
 0x102   :  { %v1387_v40 = vpop.f32.mrf.mxu0  ;;  %v1336_v63 = vadd.f32 %v1335_v39, %v1334_v36 }
 0x103   :  { %v1800_v41 = vadd.f32 %v1387_v40, %v1386_v38 }
 0x104   :  { %v1407_v42 = vpop.f32.mrf.mxu1 }
 0x105   :  { %728 = vadd.xlane.f32.xlu1 %v1800_v41  ;;  %v1803_v46 = vadd.f32 %v1407_v42, %v1321_v44  ;;  %v794_v14 = vmul.f32 %v1800_v41, %v1800_v41  ;;  %v693_v44 = vld [vmem:[#allocation2 + $0x18] sm:$0xff] }
 0x106   :  { %v418_v45 = vpop.f32.mrf.mxu1 }
 0x107   :  { %v1805_v47 = vadd.f32 %v1315_v43, %v418_v45  ;;  %v765_v52 = vmul.f32 %v1803_v46, %v1803_v46 }
 0x108   :  { %v1408_v48 = vpop.f32.mrf.mxu1 }
 0x109   :  { %702 = vadd.xlane.f32.xlu1 %v1803_v46  ;;  %698 = vadd.xlane.f32.xlu0 %v1805_v47  ;;  %v1809_v51 = vadd.f32 %v1408_v48, %v1324_v49  ;;  %v763_v58 = vmul.f32 %v1805_v47, %v1805_v47  ;;  %v757_v48 = vld [vmem:[#allocation3 + $0x10] sm:$0xff] }
 0x10a   :  { %v421_v50 = vpop.f32.mrf.mxu1 }
 0x10b   :  { %v1832_v56 = vadd.f32 %v1318_v54, %v421_v50  ;;  %v766_v57 = vmul.f32 %v1809_v51, %v1809_v51 }
 0x10c   :  { %v1411_v53 = vpop.f32.mrf.mxu1 }
 0x10d   :  { %704 = vadd.xlane.f32.xlu1 %v1809_v51  ;;  %775 = vadd.xlane.f32.xlu0 %v765_v52  ;;  %v764_v60 = vmul.f32 %v1832_v56, %v1832_v56  ;;  %v1841_v1 = vadd.f32 %v1411_v53, %v1333_v62 }
 0x10e   :  { %v434_v59 = vpop.f32.mrf.mxu1 }
 0x10f   :  { %v1851_v7 = vadd.f32 %v1327_v4, %v434_v59  ;;  %v769_v10 = vmul.f32 %v1841_v1, %v1841_v1 }
 0x110   :  { %v1412_v61 = vpop.f32.mrf.mxu1 }
 0x111   :  { %777 = vadd.xlane.f32.xlu1 %v766_v57  ;;  %771 = vadd.xlane.f32.xlu0 %v763_v58  ;;  %v1843_v2 = vadd.f32 %v1412_v61, %v1336_v63  ;;  %v767_v13 = vmul.f32 %v1851_v7, %v1851_v7  ;;  %v755_v58 = vld [vmem:[#allocation3] sm:$0xff] }
 0x112   :  { %v437_v3 = vpop.f32.mrf.mxu1 }
 0x113   :  { %v1853_v8 = vadd.f32 %v1330_v5, %v437_v3  ;;  %v770_v9 = vmul.f32 %v1843_v2, %v1843_v2  ;;  %v756_v3 = vld [vmem:[#allocation3 + $0x8] sm:$0xff] }
 0x114   :  { %v691_v5 = vld [vmem:[#allocation2 + $0x8] sm:$0xff] }
 0x115   :  { %773 = vadd.xlane.f32.xlu1 %v764_v60  ;;  %700 = vadd.xlane.f32.xlu0 %v1832_v56  ;;  %v768_v12 = vmul.f32 %v1853_v8, %v1853_v8 }
 0x119   :  { %712 = vadd.xlane.f32.xlu1 %v1843_v2  ;;  %710 = vadd.xlane.f32.xlu0 %v1841_v1 }
 0x11d   :  { %708 = vadd.xlane.f32.xlu1 %v1853_v8  ;;  %706 = vadd.xlane.f32.xlu0 %v1851_v7 }
 0x121   :  { %785 = vadd.xlane.f32.xlu1 %v770_v9  ;;  %783 = vadd.xlane.f32.xlu0 %v769_v10 }
 0x125   :  { %781 = vadd.xlane.f32.xlu1 %v768_v12  ;;  %779 = vadd.xlane.f32.xlu0 %v767_v13 }
 0x129   :  { %809 = vadd.xlane.f32.xlu1 %v794_v14  ;;  %807 = vadd.xlane.f32.xlu0 %v793_v15 }
 0x172   :  { %v715_v17 = vpop.xlane.xlu0 %714 }
 0x176   :  { %v717_v19 = vpop.xlane.xlu1 %716  ;;  %v796_v20 = vpop.xlane.xlu0 %795 }
 0x17a   :  { %v798_v21 = vpop.xlane.xlu1 %797  ;;  %v719_v22 = vpop.xlane.xlu0 %718 }
 0x17e   :  { %v721_v24 = vpop.xlane.xlu1 %720  ;;  %v800_v25 = vpop.xlane.xlu0 %799 }
 0x182   :  { %v802_v26 = vpop.xlane.xlu1 %801  ;;  %v1869_v27 = vpop.xlane.xlu0 %722 }
 0x186   :  { %v1871_v28 = vpop.xlane.xlu1 %724  ;;  %v1873_v29 = vpop.xlane.xlu0 %803 }
 0x18a   :  { %v1875_v31 = vpop.xlane.xlu1 %805  ;;  %v727_v32 = vpop.xlane.xlu0 %726 }
 0x18e   :  { %v729_v33 = vpop.xlane.xlu1 %728 }
 0x192   :  { %v703_v36 = vpop.xlane.xlu1 %702  ;;  %v699_v38 = vpop.xlane.xlu0 %698 }
 0x193   :  { %v732_v39 = vadd.f32 %v719_v22, %v703_v36  ;;  %v730_v40 = vadd.f32 %v715_v17, %v699_v38  ;;  %v697_v17 = vld [vmem:[#allocation2 + $0x38] sm:$0xff] }
 0x195   :  { %v740_v42 = vadd.f32 %v732_v39, %v692_v34  ;;  %v738_v43 = vadd.f32 %v730_v40, %v690_v37 }
 0x196   :  { %v705_v45 = vpop.xlane.xlu1 %704  ;;  %v776_v49 = vpop.xlane.xlu0 %775 }
 0x197   :  { %749 = vst.msk [vmem:[#allocation2 + $0x10] sm:$0xff] %vm30_vm0, %v740_v42  ;;  %747 = vst.msk [vmem:[#allocation2] sm:$0xff] %vm30_vm0, %v738_v43  ;;  %v733_v50 = vadd.f32 %v721_v24, %v705_v45  ;;  %v813_v52 = vadd.f32 %v800_v25, %v776_v49  ;;  %v696_v24 = vld [vmem:[#allocation2 + $0x30] sm:$0xff]  ;;  %v695_v43 = vld [vmem:[#allocation2 + $0x28] sm:$0xff] }
 0x199   :  { %v741_v53 = vadd.f32 %v733_v50, %v693_v44  ;;  %v821_v54 = vadd.f32 %v813_v52, %v757_v48  ;;  %v694_v48 = vld [vmem:[#allocation2 + $0x20] sm:$0xff] }
 0x19a   :  { %v778_v57 = vpop.xlane.xlu1 %777  ;;  %v772_v59 = vpop.xlane.xlu0 %771 }
 0x19b   :  { %750 = vst.msk [vmem:[#allocation2 + $0x18] sm:$0xff] %vm30_vm0, %v741_v53  ;;  %829 = vst.msk [vmem:[#allocation3 + $0x10] sm:$0xff] %vm30_vm0, %v821_v54  ;;  %v814_v60 = vadd.f32 %v802_v26, %v778_v57  ;;  %v811_v61 = vadd.f32 %v796_v20, %v772_v59 }
 0x19d   :  { %v822_v62 = vadd.f32 %v814_v60, %v758_v55  ;;  %v819_v63 = vadd.f32 %v811_v61, %v755_v58 }
 0x19e   :  { %v774_v4 = vpop.xlane.xlu1 %773  ;;  %v701_v9 = vpop.xlane.xlu0 %700  ;;  %v861_v10 = vld [vmem:[#allocation2 + $0x10] sm:$0xff]  ;;  %v859_v22 = vld [vmem:[#allocation2] sm:$0xff] }
 0x19f   :  { %830 = vst.msk [vmem:[#allocation3 + $0x18] sm:$0xff] %vm30_vm0, %v822_v62  ;;  %827 = vst.msk [vmem:[#allocation3] sm:$0xff] %vm30_vm0, %v819_v63  ;;  %v812_v12 = vadd.f32 %v798_v21, %v774_v4  ;;  %v731_v13 = vadd.f32 %v717_v19, %v701_v9  ;;  %v1883_v14 = vmul.f32 0.020833334, %v861_v10  ;;  %v1891_v39 = vmul.f32 0.020833334, %v859_v22 }
 0x1a0   :  { %v759_v22 = vld [vmem:[#allocation3 + $0x20] sm:$0xff] }
 0x1a1   :  { %v820_v15 = vadd.f32 %v812_v12, %v756_v3  ;;  %v739_v16 = vadd.f32 %v731_v13, %v691_v5  ;;  %v893_v34 = vmul.f32 %v1883_v14, %v1883_v14  ;;  %v891_v58 = vmul.f32 %v1891_v39, %v1891_v39 }
 0x1a2   :  { %v713_v20 = vpop.xlane.xlu1 %712  ;;  %v711_v25 = vpop.xlane.xlu0 %710  ;;  %v877_v26 = vld [vmem:[#allocation3 + $0x10] sm:$0xff]  ;;  %v862_v36 = vld [vmem:[#allocation2 + $0x18] sm:$0xff] }
 0x1a3   :  { %828 = vst.msk [vmem:[#allocation3 + $0x8] sm:$0xff] %vm30_vm0, %v820_v15  ;;  %748 = vst.msk [vmem:[#allocation2 + $0x8] sm:$0xff] %vm30_vm0, %v739_v16  ;;  %v737_v21 = vadd.f32 %v729_v33, %v713_v20  ;;  %v736_v19 = vadd.f32 %v727_v32, %v711_v25  ;;  %v885_v37 = vmul.f32 0.020833334, %v877_v26  ;;  %v1889_v38 = vmul.f32 0.020833334, %v862_v36 }
 0x1a4   :  { %v760_v16 = vld [vmem:[#allocation3 + $0x28] sm:$0xff] }
 0x1a5   :  { %v745_v40 = vadd.f32 %v737_v21, %v697_v17  ;;  %v744_v42 = vadd.f32 %v736_v19, %v696_v24  ;;  %v901_v44 = vsub.f32 %v885_v37, %v893_v34  ;;  %v894_v52 = vmul.f32 %v1889_v38, %v1889_v38  ;;  %v762_v37 = vld [vmem:[#allocation3 + $0x38] sm:$0xff] }
 0x1a6   :  { %v709_v45 = vpop.xlane.xlu1 %708  ;;  %v707_v49 = vpop.xlane.xlu0 %706  ;;  %v878_v50 = vld [vmem:[#allocation3 + $0x18] sm:$0xff]  ;;  %v875_v53 = vld [vmem:[#allocation3] sm:$0xff] }
 0x1a7   :  { %754 = vst.msk [vmem:[#allocation2 + $0x38] sm:$0xff] %vm30_vm0, %v745_v40  ;;  %753 = vst.msk [vmem:[#allocation2 + $0x30] sm:$0xff] %vm30_vm0, %v744_v42  ;;  %v735_v32 = vadd.f32 %v1871_v28, %v709_v45  ;;  %v734_v33 = vadd.f32 %v1869_v27, %v707_v49  ;;  %v909_v54 = vmax.f32 %v901_v44, 0.0  ;;  %v886_v55 = vmul.f32 0.020833334, %v878_v50  ;;  %v761_v42 = vld [vmem:[#allocation3 + $0x30] sm:$0xff] }
 0x1a8   :  { %v883_v57 = vmul.f32 0.020833334, %v875_v53 }
 0x1a9   :  { %v743_v59 = vadd.f32 %v735_v32, %v695_v43  ;;  %v742_v60 = vadd.f32 %v734_v33, %v694_v48  ;;  %v917_v61 = vadd.f32 1e-05, %v909_v54  ;;  %v902_v62 = vsub.f32 %v886_v55, %v894_v52  ;;  %v933_v52 = vld [vmem:[%s2057_s4 + $0x10] sm:$0xff] }
 0x1aa   :  { %v786_v63 = vpop.xlane.xlu1 %785  ;;  %v784_v3 = vpop.xlane.xlu0 %783  ;;  %v899_v4 = vsub.f32 %v883_v57, %v891_v58  ;;  %v860_v5 = vld [vmem:[#allocation2 + $0x8] sm:$0xff]  ;;  %v934_v58 = vld [vmem:[%s2057_s4 + $0x18] sm:$0xff] }
 0x1ab   :  { %v876_v9 = vld [vmem:[#allocation3 + $0x8] sm:$0xff]  ;;  %752 = vst.msk [vmem:[#allocation2 + $0x28] sm:$0xff] %vm30_vm0, %v743_v59  ;;  %751 = vst.msk [vmem:[#allocation2 + $0x20] sm:$0xff] %vm30_vm0, %v742_v60  ;;  %1485 = vrsqrt.f32 %v917_v61  ;;  %v910_v27 = vmax.f32 %v902_v62, 0.0  ;;  %v1903_v28 = vmul.f32 0.020833334, %v860_v5 }
 0x1ac   :  { %v907_v10 = vmax.f32 %v899_v4, 0.0  ;;  %v884_v13 = vmul.f32 0.020833334, %v876_v9 }
 0x1ad   :  { %v918_v12 = vadd.f32 1e-05, %v910_v27  ;;  %v892_v15 = vmul.f32 %v1903_v28, %v1903_v28 }
 0x1ae   :  { %v782_v17 = vpop.xlane.xlu1 %781  ;;  %v780_v20 = vpop.xlane.xlu0 %779  ;;  %v915_v24 = vadd.f32 1e-05, %v907_v10  ;;  %v865_v32 = vld [vmem:[#allocation2 + $0x30] sm:$0xff]  ;;  %v866_v33 = vld [vmem:[#allocation2 + $0x38] sm:$0xff] }
 0x1af   :  { %v816_v25 = vadd.f32 %v1875_v31, %v782_v17  ;;  %v815_v26 = vadd.f32 %v1873_v29, %v780_v20  ;;  %1487 = vrsqrt.f32 %v918_v12  ;;  %v900_v34 = vsub.f32 %v884_v13, %v892_v15  ;;  %v949_v15 = vld [vmem:[%s2058_s5 + $0x10] sm:$0xff]  ;;  %v950_v20 = vld [vmem:[%s2058_s5 + $0x18] sm:$0xff] }
 0x1b0   :  { %1489 = vrsqrt.f32 %v915_v24  ;;  %v1923_v60 = vmul.f32 0.020833334, %v865_v32  ;;  %v1925_v61 = vmul.f32 0.020833334, %v866_v33 }
 0x1b1   :  { %v824_v36 = vadd.f32 %v816_v25, %v760_v16  ;;  %v823_v21 = vadd.f32 %v815_v26, %v759_v22  ;;  %v908_v19 = vmax.f32 %v900_v34, 0.0 }
 0x1b2   :  { %v810_v40 = vpop.xlane.xlu1 %809  ;;  %v808_v43 = vpop.xlane.xlu0 %807  ;;  %v864_v31 = vld [vmem:[#allocation2 + $0x28] sm:$0xff]  ;;  %v863_v49 = vld [vmem:[#allocation2 + $0x20] sm:$0xff]  ;;  %v897_v25 = vmul.f32 %v1923_v60, %v1923_v60 }
 0x1b3   :  { %832 = vst.msk [vmem:[#allocation3 + $0x28] sm:$0xff] %vm30_vm0, %v824_v36  ;;  %831 = vst.msk [vmem:[#allocation3 + $0x20] sm:$0xff] %vm30_vm0, %v823_v21  ;;  %v818_v44 = vadd.f32 %v810_v40, %v786_v63  ;;  %v817_v45 = vadd.f32 %v808_v43, %v784_v3  ;;  %v916_v48 = vadd.f32 1e-05, %v908_v19  ;;  %v1916_v53 = vmul.f32 0.020833334, %v864_v31 }
 0x1b4   :  { %v1918_v54 = vmul.f32 0.020833334, %v863_v49  ;;  %v931_v63 = vld [vmem:[%s2057_s4] sm:$0xff]  ;;  %v932_v40 = vld [vmem:[%s2057_s4 + $0x8] sm:$0xff] }
 0x1b5   :  { %v826_v29 = vadd.f32 %v818_v44, %v762_v37  ;;  %v825_v50 = vadd.f32 %v817_v45, %v761_v42  ;;  %1491 = vrsqrt.f32 %v916_v48  ;;  %v896_v4 = vmul.f32 %v1916_v53, %v1916_v53 }
 0x1b6   :  { %v895_v9 = vmul.f32 %v1918_v54, %v1918_v54 }
 0x1b7   :  { %834 = vst.msk [vmem:[#allocation3 + $0x38] sm:$0xff] %vm30_vm0, %v826_v29  ;;  %833 = vst.msk [vmem:[#allocation3 + $0x30] sm:$0xff] %vm30_vm0, %v825_v50  ;;  %v948_v50 = vld [vmem:[%s2058_s5 + $0x8] sm:$0xff] }
 0x1b8   :  { %v1486_v55 = vpop.eup %1485 }
 0x1b9   :  { %v941_v57 = vmul.f32 %v1486_v55, %v933_v52 }
 0x1ba   :  { %v880_v59 = vld [vmem:[#allocation3 + $0x28] sm:$0xff]  ;;  %v879_v62 = vld [vmem:[#allocation3 + $0x20] sm:$0xff] }
 0x1bb   :  { %991 = vperm.xlu1 %1415, %v941_v57   ;;  %v888_v3 = vmul.f32 0.020833334, %v880_v59  ;;  %v887_v5 = vmul.f32 0.020833334, %v879_v62  ;;  %v957_v10 = vmul.f32 %v941_v57, %v1883_v14  ;;  %v898_v14 = vmul.f32 %v1925_v61, %v1925_v61 }
 0x1bc   :  { %v1488_v27 = vpop.eup %1487 }
 0x1bd   :  { %v1490_v12 = vpop.eup %1489  ;;  %v942_v13 = vmul.f32 %v1488_v27, %v934_v58  ;;  %v904_v16 = vsub.f32 %v888_v3, %v896_v4  ;;  %v903_v17 = vsub.f32 %v887_v5, %v895_v9  ;;  %v965_v37 = vsub.f32 %v949_v15, %v957_v10  ;;  %v947_v58 = vld [vmem:[%s2058_s5] sm:$0xff]  ;;  %v952_v3 = vld [vmem:[%s2058_s5 + $0x28] sm:$0xff]  ;;  %v937_v4 = vld [vmem:[%s2057_s4 + $0x30] sm:$0xff] }
 0x1be   :  { %v939_v22 = vmul.f32 %v1490_v12, %v931_v63  ;;  %v881_v24 = vld [vmem:[#allocation3 + $0x30] sm:$0xff]  ;;  %v882_v26 = vld [vmem:[#allocation3 + $0x38] sm:$0xff] }
 0x1bf   :  { %996 = vperm.xlu1 %1415, %v942_v13   ;;  %v958_v34 = vmul.f32 %v942_v13, %v1889_v38  ;;  %v912_v36 = vmax.f32 %v904_v16, 0.0  ;;  %v889_v21 = vmul.f32 0.020833334, %v881_v24  ;;  %v890_v19 = vmul.f32 0.020833334, %v882_v26  ;;  %v938_v9 = vld [vmem:[%s2057_s4 + $0x38] sm:$0xff] }
 0x1c0   :  { %981 = vperm.xlu0 %1416, %v939_v22   ;;  %v911_v42 = vmax.f32 %v903_v17, 0.0  ;;  %v955_v52 = vmul.f32 %v939_v22, %v1891_v39  ;;  %v936_v39 = vld [vmem:[%s2057_s4 + $0x28] sm:$0xff]  ;;  %v935_v17 = vld [vmem:[%s2057_s4 + $0x20] sm:$0xff] }
 0x1c1   :  { %v966_v43 = vsub.f32 %v950_v20, %v958_v34  ;;  %v920_v44 = vadd.f32 1e-05, %v912_v36  ;;  %v905_v45 = vsub.f32 %v889_v21, %v897_v25  ;;  %v906_v48 = vsub.f32 %v890_v19, %v898_v14  ;;  %v951_v26 = vld [vmem:[%s2058_s5 + $0x20] sm:$0xff]  ;;  %v953_v36 = vld [vmem:[%s2058_s5 + $0x30] sm:$0xff] }
 0x1c2   :  { %v1492_v31 = vpop.eup %1491  ;;  %v919_v57 = vadd.f32 1e-05, %v911_v42  ;;  %v963_v62 = vsub.f32 %v947_v58, %v955_v52 }
 0x1c3   :  { %1039 = vperm.xlu1 %1415, %v965_v37   ;;  %v940_v49 = vmul.f32 %v1492_v31, %v932_v40  ;;  %1493 = vrsqrt.f32 %v920_v44  ;;  %v913_v29 = vmax.f32 %v905_v45, 0.0  ;;  %v914_v38 = vmax.f32 %v906_v48, 0.0 }
 0x1c4   :  { %1044 = vperm.xlu0 %1416, %v966_v43  }
 0x1c5   :  { %v956_v32 = vmul.f32 %v940_v49, %v1903_v28  ;;  %v921_v33 = vadd.f32 1e-05, %v913_v29  ;;  %v922_v55 = vadd.f32 1e-05, %v914_v38 }
 0x1c7   :  { %986 = vperm.xlu1 %1415, %v940_v49   ;;  %v964_v59 = vsub.f32 %v948_v50, %v956_v32  ;;  %1495 = vrsqrt.f32 %v921_v33 }
 0x1c8   :  { %1497 = vrsqrt.f32 %v922_v55 }
 0x1c9   :  { %1034 = vperm.xlu0 %1416, %v964_v59   ;;  %1499 = vrsqrt.f32 %v919_v57 }
 0x1cb   :  { %1029 = vperm.xlu1 %1415, %v963_v62  }
 0x1d0   :  { %v1494_v28 = vpop.eup %1493 }
 0x1d1   :  { %v944_v63 = vmul.f32 %v1494_v28, %v936_v39 }
 0x1d3   :  { %v960_v5 = vmul.f32 %v944_v63, %v1916_v53  ;;  %v954_v53 = vld [vmem:[%s2058_s5 + $0x38] sm:$0xff] }
 0x1d4   :  { %v1496_v27 = vpop.eup %1495 }
 0x1d5   :  { %v1498_v10 = vpop.eup %1497  ;;  %v968_v12 = vsub.f32 %v952_v3, %v960_v5  ;;  %v945_v13 = vmul.f32 %v1496_v27, %v937_v4 }
 0x1d6   :  { %v1500_v15 = vpop.eup %1499  ;;  %v946_v16 = vmul.f32 %v1498_v10, %v938_v9 }
 0x1d7   :  { %1054 = vperm.xlu0 %1416, %v968_v12   ;;  %1011 = vperm.xlu1 %1415, %v945_v13   ;;  %v943_v20 = vmul.f32 %v1500_v15, %v935_v17  ;;  %v961_v34 = vmul.f32 %v945_v13, %v1923_v60 }
 0x1d8   :  { %v962_v22 = vmul.f32 %v946_v16, %v1925_v61 }
 0x1d9   :  { %v959_v25 = vmul.f32 %v943_v20, %v1918_v54  ;;  %v969_v61 = vsub.f32 %v953_v36, %v961_v34 }
 0x1da   :  { %v970_v24 = vsub.f32 %v954_v53, %v962_v22 }
 0x1db   :  { %1001 = vperm.xlu1 %1415, %v943_v20   ;;  %v967_v14 = vsub.f32 %v951_v26, %v959_v25 }
 0x1dc   :  { %1064 = vperm.xlu0 %1416, %v970_v24  }
 0x1df   :  { %1016 = vperm.xlu1 %1415, %v946_v16  }
 0x1e3   :  { %1006 = vperm.xlu1 %1415, %v944_v63  }
 0x1e7   :  { %1049 = vperm.xlu1 %1415, %v967_v14  }
 0x1eb   :  { %1059 = vperm.xlu1 %1415, %v969_v61  }
 0x236   :  { %v992_v21 = vpop.permute.xlu1 %991 }
 0x237   :  { %v1021_v54 = vmul.f32 %v992_v21, %v1803_v46  ;;  %v1141_v40 = vmul.f32 %v1767_v11, %v992_v21 }
 0x23a   :  { %v997_v19 = vpop.permute.xlu1 %996 }
 0x23b   :  { %v982_v37 = vpop.permute.xlu0 %981  ;;  %v1022_v42 = vmul.f32 %v997_v19, %v1809_v51  ;;  %v1142_v43 = vmul.f32 %v1774_v18, %v997_v19 }
 0x23c   :  { %v1019_v62 = vmul.f32 %v982_v37, %v1805_v47  ;;  %v1139_v39 = vmul.f32 %v1755_v0, %v982_v37 }
 0x23e   :  { %v1040_v44 = vpop.permute.xlu1 %1039 }
 0x23f   :  { %v1069_v60 = vadd.f32 %v1040_v44, %v1021_v54  ;;  %v1149_v45 = vadd.f32 %v1141_v40, %v1040_v44  ;;  %v1045_v48 = vpop.permute.xlu0 %1044 }
 0x240   :  { %v1070_v31 = vadd.f32 %v1045_v48, %v1022_v42  ;;  %v1150_v49 = vadd.f32 %v1142_v43, %v1045_v48 }
 0x241   :  { %v1085_v29 = vmin.f32 %v1069_v60, 0.0  ;;  %v1165_v38 = vmin.f32 %v1149_v45, 0.0  ;;  %vm1077_vm1 = vcmp.gt.f32.partialorder %v1069_v60, 0.0  ;;  %vm1157_vm2 = vcmp.gt.f32.partialorder %v1149_v45, 0.0 }
 0x242   :  { %v1086_v50 = vmin.f32 %v1070_v31, 0.0  ;;  %v1166_v52 = vmin.f32 %v1150_v49, 0.0  ;;  %v987_v32 = vpop.permute.xlu1 %986  ;;  %vm1078_vm3 = vcmp.gt.f32.partialorder %v1070_v31, 0.0  ;;  %vm1158_vm4 = vcmp.gt.f32.partialorder %v1150_v49, 0.0 }
 0x243   :  { %v1095_v33 = vmul.f32 1.442695, %v1085_v29  ;;  %v1175_v55 = vmul.f32 1.442695, %v1165_v38  ;;  %v1020_v46 = vmul.f32 %v987_v32, %v1832_v56  ;;  %v1140_v11 = vmul.f32 %v1764_v6, %v987_v32 }
 0x244   :  { %v1097_v51 = vmul.f32 1.442695, %v1086_v50  ;;  %v1177_v57 = vmul.f32 1.442695, %v1166_v52  ;;  %v1035_v18 = vpop.permute.xlu0 %1034 }
 0x245   :  { %1501 = vpow2.f32 %v1095_v33  ;;  %v1068_v58 = vadd.f32 %v1035_v18, %v1020_v46  ;;  %v1148_v59 = vadd.f32 %v1140_v11, %v1035_v18 }
 0x246   :  { %1503 = vpow2.f32 %v1175_v55  ;;  %v1030_v28 = vpop.permute.xlu1 %1029 }
 0x247   :  { %1505 = vpow2.f32 %v1097_v51  ;;  %v1084_v63 = vmin.f32 %v1068_v58, 0.0  ;;  %v1164_v3 = vmin.f32 %v1148_v59, 0.0  ;;  %v1067_v4 = vadd.f32 %v1030_v28, %v1019_v62 }
 0x248   :  { %1507 = vpow2.f32 %v1177_v57  ;;  %v1147_v56 = vadd.f32 %v1139_v39, %v1030_v28  ;;  %vm1076_vm5 = vcmp.gt.f32.partialorder %v1068_v58, 0.0  ;;  %vm1156_vm6 = vcmp.gt.f32.partialorder %v1148_v59, 0.0 }
 0x249   :  { %v1093_v5 = vmul.f32 1.442695, %v1084_v63  ;;  %v1173_v6 = vmul.f32 1.442695, %v1164_v3  ;;  %v1083_v9 = vmin.f32 %v1067_v4, 0.0  ;;  %vm1075_vm7 = vcmp.gt.f32.partialorder %v1067_v4, 0.0 }
 0x24a   :  { %v1163_v27 = vmin.f32 %v1147_v56, 0.0  ;;  %vm1155_vm8 = vcmp.gt.f32.partialorder %v1147_v56, 0.0 }
 0x24b   :  { %1509 = vpow2.f32 %v1093_v5  ;;  %v1091_v10 = vmul.f32 1.442695, %v1083_v9 }
 0x24c   :  { %1511 = vpow2.f32 %v1173_v6  ;;  %v1171_v12 = vmul.f32 1.442695, %v1163_v27 }
 0x24d   :  { %1513 = vpow2.f32 %v1091_v10 }
 0x24e   :  { %1515 = vpow2.f32 %v1171_v12 }
 0x252   :  { %v1502_v47 = vpop.eup %1501  ;;  %v1993_v0 = vpop.permute.xlu1 %1011 }
 0x253   :  { %v1504_v13 = vpop.eup %1503  ;;  %v1283_v15 = vadd.f32 -1.0, %v1502_v47  ;;  %v1055_v26 = vpop.permute.xlu0 %1054  ;;  %v1025_v63 = vmul.f32 %v1993_v0, %v1841_v1 }
 0x254   :  { %v1506_v16 = vpop.eup %1505  ;;  %v1291_v17 = vadd.f32 -1.0, %v1504_v13 }
 0x255   :  { %v1508_v53 = vpop.eup %1507  ;;  %v1117_v22 = vsel %vm1077_vm1, %v1069_v60, %v1283_v15  ;;  %v1284_v20 = vadd.f32 -1.0, %v1506_v16 }
 0x256   :  { %1125 = vst [vmem:[%s2059_s6 + $0x10] sm:$0xff] %v1117_v22  ;;  %v1197_v24 = vsel %vm1157_vm2, %v1149_v45, %v1291_v17  ;;  %v1292_v25 = vadd.f32 -1.0, %v1508_v53  ;;  %v1002_v14 = vpop.permute.xlu1 %1001 }
 0x257   :  { %1205 = vst [vmem:[%s2060_s7 + $0x10] sm:$0xff] %v1197_v24  ;;  %v1118_v34 = vsel %vm1078_vm3, %v1070_v31, %v1284_v20  ;;  %v1065_v31 = vpop.permute.xlu0 %1064  ;;  %v1023_v46 = vmul.f32 %v1002_v14, %v1851_v7  ;;  %v1143_v11 = vmul.f32 %v1781_v23, %v1002_v14 }
 0x258   :  { %v1510_v36 = vpop.eup %1509  ;;  %1126 = vst [vmem:[%s2059_s6 + $0x18] sm:$0xff] %v1118_v34  ;;  %v1198_v61 = vsel %vm1158_vm4, %v1150_v49, %v1292_v25 }
 0x259   :  { %v1512_v21 = vpop.eup %1511  ;;  %1206 = vst [vmem:[%s2060_s7 + $0x18] sm:$0xff] %v1198_v61  ;;  %v1282_v19 = vadd.f32 -1.0, %v1510_v36 }
 0x25a   :  { %v1290_v37 = vadd.f32 -1.0, %v1512_v21  ;;  %v1017_v54 = vpop.permute.xlu1 %1016  ;;  %v1514_v40 = vpop.eup %1513 }
 0x25b   :  { %v1116_v42 = vsel %vm1076_vm5, %v1068_v58, %v1282_v19  ;;  %v1026_v43 = vmul.f32 %v1017_v54, %v1843_v2  ;;  %v1146_v44 = vmul.f32 %v1800_v41, %v1017_v54  ;;  %v1516_v60 = vpop.eup %1515  ;;  %v1281_v48 = vadd.f32 -1.0, %v1514_v40 }
 0x25c   :  { %1124 = vst [vmem:[%s2059_s6 + $0x8] sm:$0xff] %v1116_v42  ;;  %v1196_v45 = vsel %vm1156_vm6, %v1148_v59, %v1290_v37  ;;  %v1289_v49 = vadd.f32 -1.0, %v1516_v60 }
 0x25d   :  { %1204 = vst [vmem:[%s2060_s7 + $0x8] sm:$0xff] %v1196_v45  ;;  %v1074_v29 = vadd.f32 %v1065_v31, %v1026_v43  ;;  %v1154_v38 = vadd.f32 %v1146_v44, %v1065_v31  ;;  %v1115_v50 = vsel %vm1075_vm7, %v1067_v4, %v1281_v48 }
 0x25e   :  { %v1007_v2 = vpop.permute.xlu1 %1006  ;;  %1123 = vst [vmem:[%s2059_s6] sm:$0xff] %v1115_v50  ;;  %v1195_v41 = vsel %vm1155_vm8, %v1147_v56, %v1289_v49 }
 0x25f   :  { %v1090_v52 = vmin.f32 %v1074_v29, 0.0  ;;  %1203 = vst [vmem:[%s2060_s7] sm:$0xff] %v1195_v41  ;;  %v1170_v32 = vmin.f32 %v1154_v38, 0.0  ;;  %v1024_v33 = vmul.f32 %v1007_v2, %v1853_v8  ;;  %v1144_v55 = vmul.f32 %v1792_v30, %v1007_v2 }
 0x260   :  { %v1145_v30 = vmul.f32 %v1795_v35, %v1993_v0  ;;  %vm1082_vm9 = vcmp.gt.f32.partialorder %v1074_v29, 0.0  ;;  %vm1162_vm10 = vcmp.gt.f32.partialorder %v1154_v38, 0.0 }
 0x261   :  { %v1105_v51 = vmul.f32 1.442695, %v1090_v52  ;;  %v1185_v57 = vmul.f32 1.442695, %v1170_v32  ;;  %v1072_v18 = vadd.f32 %v1055_v26, %v1024_v33  ;;  %v1152_v58 = vadd.f32 %v1144_v55, %v1055_v26 }
 0x262   :  { %v1050_v59 = vpop.permute.xlu1 %1049 }
 0x263   :  { %1517 = vpow2.f32 %v1105_v51  ;;  %v1071_v62 = vadd.f32 %v1050_v59, %v1023_v46  ;;  %v1151_v39 = vadd.f32 %v1143_v11, %v1050_v59  ;;  %v1088_v28 = vmin.f32 %v1072_v18, 0.0 }
 0x264   :  { %1519 = vpow2.f32 %v1185_v57  ;;  %v1168_v8 = vmin.f32 %v1152_v58, 0.0  ;;  %vm1080_vm11 = vcmp.gt.f32.partialorder %v1072_v18, 0.0  ;;  %vm1160_vm12 = vcmp.gt.f32.partialorder %v1152_v58, 0.0 }
 0x265   :  { %v1087_v7 = vmin.f32 %v1071_v62, 0.0  ;;  %v1101_v3 = vmul.f32 1.442695, %v1088_v28  ;;  %v1167_v23 = vmin.f32 %v1151_v39, 0.0  ;;  %vm1079_vm13 = vcmp.gt.f32.partialorder %v1071_v62, 0.0 }
 0x266   :  { %v1060_v4 = vpop.permute.xlu1 %1059  ;;  %v1181_v56 = vmul.f32 1.442695, %v1168_v8  ;;  %vm1159_vm14 = vcmp.gt.f32.partialorder %v1151_v39, 0.0 }
 0x267   :  { %v1099_v5 = vmul.f32 1.442695, %v1087_v7  ;;  %v1073_v6 = vadd.f32 %v1060_v4, %v1025_v63  ;;  %v1153_v9 = vadd.f32 %v1145_v30, %v1060_v4  ;;  %1521 = vpow2.f32 %v1101_v3 }
 0x268   :  { %v1179_v27 = vmul.f32 1.442695, %v1167_v23  ;;  %1523 = vpow2.f32 %v1181_v56 }
 0x269   :  { %v1089_v10 = vmin.f32 %v1073_v6, 0.0  ;;  %1525 = vpow2.f32 %v1099_v5  ;;  %v1169_v12 = vmin.f32 %v1153_v9, 0.0  ;;  %vm1081_vm15 = vcmp.gt.f32.partialorder %v1073_v6, 0.0 }
 0x26a   :  { %1527 = vpow2.f32 %v1179_v27  ;;  %vm1161_vm0 = vcmp.gt.f32.partialorder %v1153_v9, 0.0 }
 0x26b   :  { %v1103_v1 = vmul.f32 1.442695, %v1089_v10  ;;  %v1183_v47 = vmul.f32 1.442695, %v1169_v12 }
 0x26d   :  { %1529 = vpow2.f32 %v1103_v1 }
 0x26e   :  { %1531 = vpow2.f32 %v1183_v47 }
 0x270   :  { %v1518_v35 = vpop.eup %1517 }
 0x271   :  { %v1520_v0 = vpop.eup %1519  ;;  %v1288_v13 = vadd.f32 -1.0, %v1518_v35 }
 0x272   :  { %v1296_v15 = vadd.f32 -1.0, %v1520_v0 }
 0x273   :  { %v1122_v16 = vsel %vm1082_vm9, %v1074_v29, %v1288_v13 }
 0x274   :  { %1130 = vst [vmem:[%s2059_s6 + $0x38] sm:$0xff] %v1122_v16  ;;  %v1202_v17 = vsel %vm1162_vm10, %v1154_v38, %v1296_v15  ;;  %v1522_v53 = vpop.eup %1521 }
 0x275   :  { %1210 = vst [vmem:[%s2060_s7 + $0x38] sm:$0xff] %v1202_v17  ;;  %v1524_v22 = vpop.eup %1523  ;;  %v1286_v20 = vadd.f32 -1.0, %v1522_v53 }
 0x276   :  { %v1526_v24 = vpop.eup %1525  ;;  %v1294_v25 = vadd.f32 -1.0, %v1524_v22 }
 0x277   :  { %v1528_v26 = vpop.eup %1527  ;;  %v1120_v14 = vsel %vm1080_vm11, %v1072_v18, %v1286_v20  ;;  %v1285_v34 = vadd.f32 -1.0, %v1526_v24 }
 0x278   :  { %1128 = vst [vmem:[%s2059_s6 + $0x28] sm:$0xff] %v1120_v14  ;;  %v1200_v36 = vsel %vm1160_vm12, %v1152_v58, %v1294_v25  ;;  %v1293_v61 = vadd.f32 -1.0, %v1528_v26 }
 0x279   :  { %1208 = vst [vmem:[%s2060_s7 + $0x28] sm:$0xff] %v1200_v36  ;;  %v1119_v19 = vsel %vm1079_vm13, %v1071_v62, %v1285_v34 }
 0x27a   :  { %v1530_v21 = vpop.eup %1529  ;;  %1127 = vst [vmem:[%s2059_s6 + $0x20] sm:$0xff] %v1119_v19  ;;  %v1199_v54 = vsel %vm1159_vm14, %v1151_v39, %v1293_v61 }
 0x27b   :  { %v1532_v37 = vpop.eup %1531  ;;  %v1287_v40 = vadd.f32 -1.0, %v1530_v21  ;;  %1207 = vst [vmem:[%s2060_s7 + $0x20] sm:$0xff] %v1199_v54 }
 0x27c   :  { %v1295_v42 = vadd.f32 -1.0, %v1532_v37 }
 0x27d   :  { %v1121_v43 = vsel %vm1081_vm15, %v1073_v6, %v1287_v40 }
 0x27e   :  { %1129 = vst [vmem:[%s2059_s6 + $0x30] sm:$0xff] %v1121_v43  ;;  %v1201_v44 = vsel %vm1161_vm0, %v1153_v9, %v1295_v42 }
 0x27f   :  { %1209 = vst [vmem:[%s2060_s7 + $0x30] sm:$0xff] %v1201_v44 }

// kernel: aunet_forward.16
= control target key start
LH: loop header
LB: loop body
LE: loop exit
PB: predicated region body
PF: predicated region fallthrough
CT: control target
= control target key end

     0   :  { %vm30_vm0 = vcmask 7168   ;;  %s2175_s0 = inlined_call_operand.vmem [shape: bf16[768,128], index: 0, kind: input, shape index: {}]   ;;  %s2176_s2 = inlined_call_operand.vmem [shape: bf16[32,768], index: 2, kind: input, shape index: {}]   ;;  %s2177_s1 = inlined_call_operand.vmem [shape: bf16[512,128], index: 1, kind: input, shape index: {}]   ;;  %s2178_s3 = inlined_call_operand.vmem [shape: bf16[32,512], index: 3, kind: input, shape index: {}]   ;;  %s2179_s4 = inlined_call_operand.vmem [shape: f32[32,1], index: 4, kind: input, shape index: {}]   ;;  %s2180_s5 = inlined_call_operand.vmem [shape: f32[32,1], index: 5, kind: input, shape index: {}]   ;;  %s2181_s6 = inlined_call_operand.vmem [shape: f32[32,128], index: 6, kind: output, shape index: {0}]   ;;  %s2182_s7 = inlined_call_operand.vmem [shape: f32[32,128], index: 7, kind: output, shape index: {1}]  }
   0x1   :  { %v1587_v0 = vld [vmem:[%s2175_s0 + $0x78] sm:$0xff]   ;;  %v1591_v4 = vld [vmem:[%s2175_s0 + $0x70] sm:$0xff]   ;;  %v1595_v8 = vld [vmem:[%s2175_s0 + $0x68] sm:$0xff]  }
   0x2   :  { %v1588_v1 = vld [vmem:[%s2175_s0 + $0xf8] sm:$0xff]   ;;  %1427 = vmatprep.subr.bf16.mxu0 %v1587_v0  ;;  %v1592_v5 = vld [vmem:[%s2175_s0 + $0xf0] sm:$0xff]   ;;  %v1596_v9 = vld [vmem:[%s2175_s0 + $0xe8] sm:$0xff]  }
   0x3   :  { %v1589_v2 = vld [vmem:[%s2175_s0 + $0x38] sm:$0xff]   ;;  %1455 = vmatprep.subr.bf16.mxu1 %v1588_v1  ;;  %v1593_v6 = vld [vmem:[%s2175_s0 + $0x30] sm:$0xff]   ;;  %v1597_v10 = vld [vmem:[%s2175_s0 + $0x28] sm:$0xff]  }
   0x4   :  { %v1590_v3 = vld [vmem:[%s2175_s0 + $0xb8] sm:$0xff]   ;;  %1428 = vmatpush3.bf16.msra.mxu0 %v1589_v2  ;;  %v1594_v7 = vld [vmem:[%s2175_s0 + $0xb0] sm:$0xff]   ;;  %v1598_v11 = vld [vmem:[%s2175_s0 + $0xa8] sm:$0xff]  }
   0x5   :  { %1456 = vmatpush3.bf16.msra.mxu1 %v1590_v3  ;;  %1429 = vmatprep.subr.bf16.mxu0 %v1591_v4  ;;  %v1599_v12 = vld [vmem:[%s2175_s0 + $0x60] sm:$0xff]   ;;  %v1603_v16 = vld [vmem:[%s2175_s0 + $0x58] sm:$0xff]   ;;  %v1607_v20 = vld [vmem:[%s2175_s0 + $0x50] sm:$0xff]  }
   0x6   :  { %1457 = vmatprep.subr.bf16.mxu1 %v1592_v5  ;;  %v1600_v13 = vld [vmem:[%s2175_s0 + $0xe0] sm:$0xff]   ;;  %v1604_v17 = vld [vmem:[%s2175_s0 + $0xd8] sm:$0xff]   ;;  %v1608_v21 = vld [vmem:[%s2175_s0 + $0xd0] sm:$0xff]  }
   0x7   :  { %v1601_v14 = vld [vmem:[%s2175_s0 + $0x20] sm:$0xff]   ;;  %v1605_v18 = vld [vmem:[%s2175_s0 + $0x18] sm:$0xff]   ;;  %v1609_v22 = vld [vmem:[%s2175_s0 + $0x10] sm:$0xff]  }
   0x8   :  { %1430 = vmatpush3.bf16.msra.mxu0 %v1593_v6  ;;  %v1602_v15 = vld [vmem:[%s2175_s0 + $0xa0] sm:$0xff]   ;;  %v1606_v19 = vld [vmem:[%s2175_s0 + $0x98] sm:$0xff]   ;;  %v1610_v23 = vld [vmem:[%s2175_s0 + $0x90] sm:$0xff]  }
   0x9   :  { %1458 = vmatpush3.bf16.msra.mxu1 %v1594_v7  ;;  %1431 = vmatprep.subr.bf16.mxu0 %v1595_v8  ;;  %v1611_v24 = vld [vmem:[%s2175_s0 + $0x48] sm:$0xff]   ;;  %v1615_v28 = vld [vmem:[%s2175_s0 + $0x40] sm:$0xff]   ;;  %v1625_v36 = vld [vmem:[%s2175_s0 + $0x178] sm:$0xff]  }
   0xa   :  { %1459 = vmatprep.subr.bf16.mxu1 %v1596_v9  ;;  %v1612_v25 = vld [vmem:[%s2175_s0 + $0xc8] sm:$0xff]   ;;  %v1616_v29 = vld [vmem:[%s2175_s0 + $0xc0] sm:$0xff]   ;;  %v1626_v37 = vld [vmem:[%s2177_s1 + $0x78] sm:$0xff]  }
   0xb   :  { %v1613_v26 = vld [vmem:[%s2175_s0 + $0x8] sm:$0xff]   ;;  %v1617_v30 = vld [vmem:[%s2175_s0] sm:$0xff]   ;;  %v1627_v38 = vld [vmem:[%s2175_s0 + $0x138] sm:$0xff]  }
   0xc   :  { %1432 = vmatpush3.bf16.msra.mxu0 %v1597_v10  ;;  %v1614_v27 = vld [vmem:[%s2175_s0 + $0x88] sm:$0xff]   ;;  %v1618_v31 = vld [vmem:[%s2175_s0 + $0x80] sm:$0xff]   ;;  %v1628_v39 = vld [vmem:[%s2177_s1 + $0x38] sm:$0xff]  }
   0xd   :  { %1460 = vmatpush3.bf16.msra.mxu1 %v1598_v11  ;;  %1433 = vmatprep.subr.bf16.mxu0 %v1599_v12  ;;  %v1619_v32 = vld [vmem:[%s2176_s2] ss:$24 sps:$4 sm:$0xff]   ;;  %v1621_v33 = vld [vmem:[%s2176_s2 + $0x4] ss:$24 sps:$4 sm:$0xff]   ;;  %v1629_v40 = vld [vmem:[%s2175_s0 + $0x170] sm:$0xff]  }
   0xe   :  { %1461 = vmatprep.subr.bf16.mxu1 %v1600_v13  ;;  %v1622_v34 = vld [vmem:[%s2176_s2 + $0x8] ss:$24 sps:$4 sm:$0xff]   ;;  %v1624_v35 = vld [vmem:[%s2176_s2 + $0xc] ss:$24 sps:$4 sm:$0xff]   ;;  %527 = vmatprep.mubr.bf16.mxu0 %v1621_v33  ;;  %v1630_v41 = vld [vmem:[%s2177_s1 + $0x70] sm:$0xff]  }
   0xf   :  { %576 = vmatprep.mubr.bf16.mxu1 %v1624_v35  ;;  %v1631_v42 = vld [vmem:[%s2175_s0 + $0x130] sm:$0xff]   ;;  %v1633_v44 = vld [vmem:[%s2175_s0 + $0x168] sm:$0xff]   ;;  %v1637_v48 = vld [vmem:[%s2175_s0 + $0x160] sm:$0xff]  }
  0x10   :  { %1434 = vmatpush3.bf16.msra.mxu0 %v1601_v14  ;;  %v1632_v43 = vld [vmem:[%s2177_s1 + $0x30] sm:$0xff]   ;;  %v1634_v45 = vld [vmem:[%s2177_s1 + $0x68] sm:$0xff]   ;;  %v1638_v49 = vld [vmem:[%s2177_s1 + $0x60] sm:$0xff]  }
  0x11   :  { %1462 = vmatpush3.bf16.msra.mxu1 %v1602_v15  ;;  %1435 = vmatprep.subr.bf16.mxu0 %v1603_v16  ;;  %v1635_v46 = vld [vmem:[%s2175_s0 + $0x128] sm:$0xff]   ;;  %v1639_v50 = vld [vmem:[%s2175_s0 + $0x120] sm:$0xff]   ;;  %v1641_v52 = vld [vmem:[%s2175_s0 + $0x158] sm:$0xff]  }
  0x12   :  { %1463 = vmatprep.subr.bf16.mxu1 %v1604_v17  ;;  %v1636_v47 = vld [vmem:[%s2177_s1 + $0x28] sm:$0xff]   ;;  %v1640_v51 = vld [vmem:[%s2177_s1 + $0x20] sm:$0xff]   ;;  %v1642_v53 = vld [vmem:[%s2177_s1 + $0x58] sm:$0xff]  }
  0x13   :  { %v1643_v54 = vld [vmem:[%s2175_s0 + $0x118] sm:$0xff]   ;;  %v1645_v56 = vld [vmem:[%s2176_s2 + $0x34] ss:$24 sps:$4 sm:$0xff]   ;;  %v1649_v58 = vld [vmem:[%s2176_s2 + $0x30] ss:$24 sps:$4 sm:$0xff]  }
  0x14   :  { %1436 = vmatpush3.bf16.msra.mxu0 %v1605_v18  ;;  %v1644_v55 = vld [vmem:[%s2177_s1 + $0x18] sm:$0xff]   ;;  %v1651_v60 = vld [vmem:[%s2175_s0 + $0x150] sm:$0xff]   ;;  %v1655_v0 = vld [vmem:[%s2175_s0 + $0x148] sm:$0xff]  }
  0x15   :  { %1464 = vmatpush3.bf16.msra.mxu1 %v1606_v19  ;;  %1437 = vmatprep.subr.bf16.mxu0 %v1607_v20  ;;  %v1647_v57 = vld [vmem:[%s2176_s2 + $0x3c] ss:$24 sps:$4 sm:$0xff]   ;;  %v1650_v59 = vld [vmem:[%s2176_s2 + $0x38] ss:$24 sps:$4 sm:$0xff]   ;;  %v1656_v1 = vld [vmem:[%s2177_s1 + $0x48] sm:$0xff]  }
  0x16   :  { %1465 = vmatprep.subr.bf16.mxu1 %v1608_v21  ;;  %v1652_v61 = vld [vmem:[%s2177_s1 + $0x50] sm:$0xff]   ;;  %v1657_v2 = vld [vmem:[%s2175_s0 + $0x108] sm:$0xff]   ;;  %v1659_v4 = vld [vmem:[%s2175_s0 + $0x140] sm:$0xff]  }
  0x17   :  { %v1653_v62 = vld [vmem:[%s2175_s0 + $0x110] sm:$0xff]   ;;  %v1658_v3 = vld [vmem:[%s2177_s1 + $0x8] sm:$0xff]   ;;  %v1660_v5 = vld [vmem:[%s2177_s1 + $0x40] sm:$0xff]  }
  0x18   :  { %1438 = vmatpush3.bf16.msra.mxu0 %v1609_v22  ;;  %v1654_v63 = vld [vmem:[%s2177_s1 + $0x10] sm:$0xff]   ;;  %v1661_v6 = vld [vmem:[%s2175_s0 + $0x100] sm:$0xff]   ;;  %v1669_v12 = vld [vmem:[%s2177_s1 + $0xf8] sm:$0xff]  }
  0x19   :  { %1466 = vmatpush3.bf16.msra.mxu1 %v1610_v23  ;;  %1439 = vmatprep.subr.bf16.mxu0 %v1611_v24  ;;  %v1662_v7 = vld [vmem:[%s2177_s1] sm:$0xff]   ;;  %v1663_v8 = vld [vmem:[%s2176_s2 + $0x10] ss:$24 sps:$4 sm:$0xff]   ;;  %v1665_v9 = vld [vmem:[%s2176_s2 + $0x14] ss:$24 sps:$4 sm:$0xff]  }
  0x1a   :  { %1467 = vmatprep.subr.bf16.mxu1 %v1612_v25  ;;  %v1666_v10 = vld [vmem:[%s2178_s3] ss:$16 sps:$4 sm:$0xff]   ;;  %v1668_v11 = vld [vmem:[%s2178_s3 + $0x4] ss:$16 sps:$4 sm:$0xff]   ;;  %v1670_v13 = vld [vmem:[%s2177_s1 + $0xb8] sm:$0xff]  }
  0x1b   :  { %v1671_v14 = vld [vmem:[%s2177_s1 + $0xf0] sm:$0xff]   ;;  %v1673_v16 = vld [vmem:[%s2176_s2 + $0x44] ss:$24 sps:$4 sm:$0xff]   ;;  %v1675_v17 = vld [vmem:[%s2176_s2 + $0x40] ss:$24 sps:$4 sm:$0xff]  }
  0x1c   :  { %1440 = vmatpush3.bf16.msra.mxu0 %v1613_v26  ;;  %v1672_v15 = vld [vmem:[%s2177_s1 + $0xb0] sm:$0xff]   ;;  %v1676_v18 = vld [vmem:[%s2177_s1 + $0xe8] sm:$0xff]   ;;  %v1678_v20 = vld [vmem:[%s2177_s1 + $0xe0] sm:$0xff]  }
  0x1d   :  { %1468 = vmatpush3.bf16.msra.mxu1 %v1614_v27  ;;  %1441 = vmatprep.subr.bf16.mxu0 %v1615_v28  ;;  %v1677_v19 = vld [vmem:[%s2177_s1 + $0xa8] sm:$0xff]   ;;  %v1679_v21 = vld [vmem:[%s2177_s1 + $0xa0] sm:$0xff]   ;;  %v1680_v22 = vld [vmem:[%s2177_s1 + $0xd8] sm:$0xff]  }
  0x1e   :  { %1469 = vmatprep.subr.bf16.mxu1 %v1616_v29  ;;  %v1683_v23 = vld [vmem:[%s2178_s3 + $0x24] ss:$16 sps:$4 sm:$0xff]   ;;  %v1686_v24 = vld [vmem:[%s2178_s3 + $0x20] ss:$16 sps:$4 sm:$0xff]   ;;  %v1681_v25 = vld [vmem:[%s2177_s1 + $0x98] sm:$0xff]  }
  0x1f   :  { %v1682_v26 = vld [vmem:[%s2177_s1 + $0xd0] sm:$0xff]   ;;  %v1693_v28 = vld [vmem:[%s2178_s3 + $0xc] ss:$16 sps:$4 sm:$0xff]   ;;  %v1690_v33 = vld [vmem:[%s2177_s1 + $0x80] sm:$0xff]  }
  0x20   :  { %1442 = vmatpush3.bf16.msra.mxu0 %v1617_v30  ;;  %v1685_v27 = vld [vmem:[%s2177_s1 + $0x90] sm:$0xff]   ;;  %v1687_v29 = vld [vmem:[%s2177_s1 + $0xc8] sm:$0xff]  }
  0x21   :  { %1470 = vmatpush3.bf16.msra.mxu1 %v1618_v31  ;;  %1483 = vmatprep.subr.bf16.mxu0 %v1625_v36  ;;  %v1696_v30 = vld [vmem:[%s2178_s3 + $0x2c] ss:$16 sps:$4 sm:$0xff]   ;;  %v1694_v35 = vld [vmem:[%s2178_s3 + $0x28] ss:$16 sps:$4 sm:$0xff]  }
  0x22   :  { %1511 = vmatprep.subr.bf16.mxu1 %v1626_v37  ;;  %v1688_v31 = vld [vmem:[%s2177_s1 + $0x88] sm:$0xff]  }
  0x23   :  { %528 = vmatmul.mubr.bf16.vlgmr.msra.gmra.mxu0 %v1619_v32  ;;  %v1689_v32 = vld [vmem:[%s2177_s1 + $0xc0] sm:$0xff]  }
  0x24   :  { %577 = vmatmul.mubr.bf16.vlgmr.msra.gmra.mxu1 %v1622_v34  ;;  %1484 = vmatpush3.bf16.msra.mxu0 %v1627_v38  ;;  %v1691_v34 = vld [vmem:[%s2178_s3 + $0x8] ss:$16 sps:$4 sm:$0xff]  }
  0x25   :  { %1512 = vmatpush3.bf16.msra.mxu1 %v1628_v39  ;;  %1485 = vmatprep.subr.bf16.mxu0 %v1629_v40 }
  0x26   :  { %1513 = vmatprep.subr.bf16.mxu1 %v1630_v41  ;;  %535 = vmatprep.mubr.bf16.mxu0 %v1645_v56 }
  0x27   :  { %584 = vmatprep.mubr.bf16.mxu1 %v1647_v57 }
  0x28   :  { %1486 = vmatpush3.bf16.msra.mxu0 %v1631_v42 }
  0x29   :  { %1514 = vmatpush3.bf16.msra.mxu1 %v1632_v43  ;;  %1487 = vmatprep.subr.bf16.mxu0 %v1633_v44 }
  0x2a   :  { %1515 = vmatprep.subr.bf16.mxu1 %v1634_v45 }
  0x2b   :  { %536 = vmatmul.mubr.bf16.gmra.mxu0 %v1649_v58 }
  0x2c   :  { %1488 = vmatpush3.bf16.msra.mxu0 %v1635_v46  ;;  %585 = vmatmul.mubr.bf16.gmra.mxu1 %v1650_v59 }
  0x2d   :  { %1516 = vmatpush3.bf16.msra.mxu1 %v1636_v47  ;;  %1489 = vmatprep.subr.bf16.mxu0 %v1637_v48 }
  0x2e   :  { %1517 = vmatprep.subr.bf16.mxu1 %v1638_v49  ;;  %625 = vmatprep.mubr.bf16.mxu0 %v1665_v9 }
  0x2f   :  { %978 = vmatprep.mubr.bf16.mxu1 %v1668_v11 }
  0x30   :  { %1490 = vmatpush3.bf16.msra.mxu0 %v1639_v50 }
  0x31   :  { %1518 = vmatpush3.bf16.msra.mxu1 %v1640_v51  ;;  %1491 = vmatprep.subr.bf16.mxu0 %v1641_v52 }
  0x32   :  { %1519 = vmatprep.subr.bf16.mxu1 %v1642_v53 }
  0x34   :  { %1492 = vmatpush3.bf16.msra.mxu0 %v1643_v54 }
  0x35   :  { %1520 = vmatpush3.bf16.msra.mxu1 %v1644_v55  ;;  %1493 = vmatprep.subr.bf16.mxu0 %v1651_v60 }
  0x36   :  { %1521 = vmatprep.subr.bf16.mxu1 %v1652_v61 }
  0x38   :  { %1494 = vmatpush3.bf16.msra.mxu0 %v1653_v62 }
  0x39   :  { %1522 = vmatpush3.bf16.msra.mxu1 %v1654_v63  ;;  %1495 = vmatprep.subr.bf16.mxu0 %v1655_v0 }
  0x3a   :  { %1523 = vmatprep.subr.bf16.mxu1 %v1656_v1 }
  0x3c   :  { %1496 = vmatpush3.bf16.msra.mxu0 %v1657_v2 }
  0x3d   :  { %1524 = vmatpush3.bf16.msra.mxu1 %v1658_v3  ;;  %1497 = vmatprep.subr.bf16.mxu0 %v1659_v4 }
  0x3e   :  { %1525 = vmatprep.subr.bf16.mxu1 %v1660_v5 }
  0x40   :  { %1498 = vmatpush3.bf16.msra.mxu0 %v1661_v6 }
  0x41   :  { %1526 = vmatpush3.bf16.msra.mxu1 %v1662_v7  ;;  %1539 = vmatprep.subr.bf16.mxu0 %v1669_v12 }
  0x42   :  { %1567 = vmatprep.subr.bf16.mxu1 %v1669_v12 }
  0x43   :  { %626 = vmatmul.mubr.bf16.vlgmr.msra.gmra.mxu0 %v1663_v8 }
  0x44   :  { %979 = vmatmul.mubr.bf16.vlgmr.msra.gmra.mxu1 %v1666_v10  ;;  %1540 = vmatpush3.bf16.msra.mxu0 %v1670_v13 }
  0x45   :  { %1575 = vmatpush3.bf16.msra.mxu1 %v1670_v13  ;;  %1541 = vmatprep.subr.bf16.mxu0 %v1671_v14 }
  0x46   :  { %1568 = vmatprep.subr.bf16.mxu1 %v1671_v14  ;;  %633 = vmatprep.mubr.bf16.mxu0 %v1673_v16 }
  0x47   :  { %986 = vmatprep.mubr.bf16.mxu1 %v1683_v23 }
  0x48   :  { %1542 = vmatpush3.bf16.msra.mxu0 %v1672_v15 }
  0x49   :  { %1576 = vmatpush3.bf16.msra.mxu1 %v1672_v15  ;;  %1543 = vmatprep.subr.bf16.mxu0 %v1676_v18 }
  0x4a   :  { %1569 = vmatprep.subr.bf16.mxu1 %v1676_v18 }
  0x4b   :  { %634 = vmatmul.mubr.bf16.gmra.mxu0 %v1675_v17 }
  0x4c   :  { %1544 = vmatpush3.bf16.msra.mxu0 %v1677_v19  ;;  %987 = vmatmul.mubr.bf16.gmra.mxu1 %v1686_v24 }
  0x4d   :  { %1577 = vmatpush3.bf16.msra.mxu1 %v1677_v19  ;;  %1545 = vmatprep.subr.bf16.mxu0 %v1678_v20 }
  0x4e   :  { %1570 = vmatprep.subr.bf16.mxu1 %v1678_v20  ;;  %1027 = vmatprep.mubr.bf16.mxu0 %v1693_v28 }
  0x4f   :  { %1035 = vmatprep.mubr.bf16.mxu1 %v1696_v30 }
  0x50   :  { %1546 = vmatpush3.bf16.msra.mxu0 %v1679_v21 }
  0x51   :  { %1578 = vmatpush3.bf16.msra.mxu1 %v1679_v21  ;;  %1547 = vmatprep.subr.bf16.mxu0 %v1680_v22 }
  0x52   :  { %1571 = vmatprep.subr.bf16.mxu1 %v1680_v22 }
  0x54   :  { %1548 = vmatpush3.bf16.msra.mxu0 %v1681_v25 }
  0x55   :  { %1579 = vmatpush3.bf16.msra.mxu1 %v1681_v25  ;;  %1549 = vmatprep.subr.bf16.mxu0 %v1682_v26 }
  0x56   :  { %1572 = vmatprep.subr.bf16.mxu1 %v1682_v26 }
  0x58   :  { %1550 = vmatpush3.bf16.msra.mxu0 %v1685_v27 }
  0x59   :  { %1580 = vmatpush3.bf16.msra.mxu1 %v1685_v27  ;;  %1551 = vmatprep.subr.bf16.mxu0 %v1687_v29 }
  0x5a   :  { %1573 = vmatprep.subr.bf16.mxu1 %v1687_v29 }
  0x5c   :  { %1552 = vmatpush3.bf16.msra.mxu0 %v1688_v31 }
  0x5d   :  { %1581 = vmatpush3.bf16.msra.mxu1 %v1688_v31  ;;  %1553 = vmatprep.subr.bf16.mxu0 %v1689_v32  ;;  %v1721_v31 = vmov 0.0  }
  0x5e   :  { %1574 = vmatprep.subr.bf16.mxu1 %v1689_v32  ;;  %31 = vst.msk [vmem:[#allocation2] sm:$0xff] %vm30_vm0, %v1721_v31  ;;  %32 = vst.msk [vmem:[#allocation2 + $0x8] sm:$0xff] %vm30_vm0, %v1721_v31 }
  0x5f   :  { %33 = vst.msk [vmem:[#allocation2 + $0x10] sm:$0xff] %vm30_vm0, %v1721_v31  ;;  %34 = vst.msk [vmem:[#allocation2 + $0x18] sm:$0xff] %vm30_vm0, %v1721_v31 }
  0x60   :  { %1554 = vmatpush3.bf16.msra.mxu0 %v1690_v33  ;;  %35 = vst.msk [vmem:[#allocation3] sm:$0xff] %vm30_vm0, %v1721_v31  ;;  %36 = vst.msk [vmem:[#allocation3 + $0x8] sm:$0xff] %vm30_vm0, %v1721_v31 }
  0x61   :  { %1582 = vmatpush3.bf16.msra.mxu1 %v1690_v33  ;;  %37 = vst.msk [vmem:[#allocation3 + $0x10] sm:$0xff] %vm30_vm0, %v1721_v31  ;;  %38 = vst.msk [vmem:[#allocation3 + $0x18] sm:$0xff] %vm30_vm0, %v1721_v31 }
  0x63   :  { %1028 = vmatmul.mubr.bf16.vlgmr.msra.gmra.mxu0 %v1691_v34 }
  0x64   :  { %1036 = vmatmul.mubr.bf16.vlgmr.msra.gmra.mxu1 %v1694_v35 }
  0x68   :  { %v1080_v31 = vld [vmem:[#allocation3 + $0x18] sm:$0xff] }
  0xe3   :  { %v1443_v36 = vpop.f32.mrf.mxu0 }
  0xe4   :  { %v1471_v38 = vpop.f32.mrf.mxu1 }
  0xe5   :  { %v1444_v37 = vpop.f32.mrf.mxu0 }
  0xe6   :  { %v1472_v40 = vpop.f32.mrf.mxu1  ;;  %v1445_v50 = vadd.f32 %v1444_v37, %v1443_v36 }
  0xe7   :  { %v1446_v39 = vpop.f32.mrf.mxu0  ;;  %v1473_v51 = vadd.f32 %v1472_v40, %v1471_v38 }
  0xe8   :  { %v1474_v42 = vpop.f32.mrf.mxu1 }
  0xe9   :  { %v1447_v41 = vpop.f32.mrf.mxu0  ;;  %v579_v55 = vadd.f32 %v1473_v51, %v1445_v50 }
  0xea   :  { %v1475_v44 = vpop.f32.mrf.mxu1  ;;  %v1448_v56 = vadd.f32 %v1447_v41, %v1446_v39 }
  0xeb   :  { %v1449_v43 = vpop.f32.mrf.mxu0  ;;  %v1476_v57 = vadd.f32 %v1475_v44, %v1474_v42 }
  0xec   :  { %v1477_v46 = vpop.f32.mrf.mxu1 }
  0xed   :  { %v1450_v45 = vpop.f32.mrf.mxu0  ;;  %v582_v0 = vadd.f32 %v1476_v57, %v1448_v56 }
  0xee   :  { %v1478_v48 = vpop.f32.mrf.mxu1  ;;  %v1451_v1 = vadd.f32 %v1450_v45, %v1449_v43 }
  0xef   :  { %v1452_v47 = vpop.f32.mrf.mxu0  ;;  %v1479_v2 = vadd.f32 %v1478_v48, %v1477_v46 }
  0xf0   :  { %v1480_v52 = vpop.f32.mrf.mxu1 }
  0xf1   :  { %v1453_v49 = vpop.f32.mrf.mxu0  ;;  %v587_v9 = vadd.f32 %v1479_v2, %v1451_v1 }
  0xf2   :  { %v1481_v59 = vpop.f32.mrf.mxu1  ;;  %v1454_v13 = vadd.f32 %v1453_v49, %v1452_v47 }
  0xf3   :  { %v1482_v14 = vadd.f32 %v1481_v59, %v1480_v52 }
  0xf5   :  { %v590_v19 = vadd.f32 %v1482_v14, %v1454_v13  ;;  %v1077_v14 = vld [vmem:[#allocation3] sm:$0xff] }
 0x103   :  { %v1499_v53 = vpop.f32.mrf.mxu0 }
 0x104   :  { %v1527_v62 = vpop.f32.mrf.mxu1 }
 0x105   :  { %v1500_v54 = vpop.f32.mrf.mxu0 }
 0x106   :  { %v1501_v58 = vadd.f32 %v1500_v54, %v1499_v53  ;;  %v1528_v7 = vpop.f32.mrf.mxu1  ;;  %v1722_v53 = vmov 0  }
 0x107   :  { %v1502_v60 = vpop.f32.mrf.mxu0  ;;  %v1529_v32 = vadd.f32 %v1528_v7, %v1527_v62  ;;  %1585 = vset.pattern.permute.xlu0 %v1722_v53  ;;  %1586 = vset.pattern.permute.xlu1 %v1722_v53 }
 0x108   :  { %v2063_v61 = vadd.f32 %v1501_v58, %v579_v55  ;;  %v1530_v16 = vpop.f32.mrf.mxu1 }
 0x109   :  { %v1503_v63 = vpop.f32.mrf.mxu0 }
 0x10a   :  { %v1504_v3 = vadd.f32 %v1503_v63, %v1502_v60  ;;  %1048 = vadd.xlane.f32.xlu0 %v2063_v61  ;;  %v1081_v6 = vmul.f32 %v2063_v61, %v2063_v61  ;;  %v1531_v21 = vpop.f32.mrf.mxu1  ;;  %v1044_v63 = vld [vmem:[#allocation2] sm:$0xff] }
 0x10b   :  { %v1505_v4 = vpop.f32.mrf.mxu0  ;;  %v1532_v40 = vadd.f32 %v1531_v21, %v1530_v16  ;;  %v1078_v21 = vld [vmem:[#allocation3 + $0x8] sm:$0xff] }
 0x10c   :  { %v2066_v5 = vadd.f32 %v1504_v3, %v582_v0  ;;  %v1533_v23 = vpop.f32.mrf.mxu1  ;;  %v1045_v3 = vld [vmem:[#allocation2 + $0x8] sm:$0xff] }
 0x10d   :  { %v1506_v8 = vpop.f32.mrf.mxu0 }
 0x10e   :  { %v1507_v10 = vadd.f32 %v1506_v8, %v1505_v4  ;;  %1085 = vadd.xlane.f32.xlu0 %v1081_v6  ;;  %v1082_v11 = vmul.f32 %v2066_v5, %v2066_v5  ;;  %v1534_v25 = vpop.f32.mrf.mxu1  ;;  %v1046_v6 = vld [vmem:[#allocation2 + $0x10] sm:$0xff] }
 0x10f   :  { %v1508_v12 = vpop.f32.mrf.mxu0  ;;  %v1535_v41 = vadd.f32 %v1534_v25, %v1533_v23 }
 0x110   :  { %v2072_v15 = vadd.f32 %v1507_v10, %v587_v9  ;;  %1087 = vadd.xlane.f32.xlu1 %v1082_v11  ;;  %v1536_v26 = vpop.f32.mrf.mxu1 }
 0x111   :  { %v1509_v17 = vpop.f32.mrf.mxu0 }
 0x112   :  { %v1510_v18 = vadd.f32 %v1509_v17, %v1508_v12  ;;  %1050 = vadd.xlane.f32.xlu0 %v2066_v5  ;;  %v1083_v20 = vmul.f32 %v2072_v15, %v2072_v15  ;;  %v1537_v27 = vpop.f32.mrf.mxu1  ;;  %v1047_v12 = vld [vmem:[#allocation2 + $0x18] sm:$0xff] }
 0x113   :  { %v1538_v47 = vadd.f32 %v1537_v27, %v1536_v26 }
 0x114   :  { %1052 = vadd.xlane.f32.xlu1 %v2072_v15  ;;  %v2078_v22 = vadd.f32 %v1510_v18, %v590_v19 }
 0x116   :  { %1089 = vadd.xlane.f32.xlu0 %v1083_v20  ;;  %v1084_v24 = vmul.f32 %v2078_v22, %v2078_v22 }
 0x118   :  { %1054 = vadd.xlane.f32.xlu1 %v2078_v22 }
 0x11c   :  { %1091 = vadd.xlane.f32.xlu1 %v1084_v24  ;;  %v1079_v24 = vld [vmem:[#allocation3 + $0x10] sm:$0xff] }
 0x123   :  { %v1555_v28 = vpop.f32.mrf.mxu0 }
 0x124   :  { %v1561_v29 = vpop.f32.mrf.mxu1 }
 0x125   :  { %v1556_v30 = vpop.f32.mrf.mxu0 }
 0x126   :  { %v1557_v33 = vadd.f32 %v1556_v30, %v1555_v28  ;;  %v1562_v34 = vpop.f32.mrf.mxu1 }
 0x127   :  { %v1558_v35 = vpop.f32.mrf.mxu0  ;;  %v1563_v37 = vadd.f32 %v1562_v34, %v1561_v29 }
 0x128   :  { %v2091_v36 = vadd.f32 %v1557_v33, %v1529_v32  ;;  %v1564_v38 = vpop.f32.mrf.mxu1 }
 0x129   :  { %v1559_v39 = vpop.f32.mrf.mxu0  ;;  %v2094_v44 = vadd.f32 %v1563_v37, %v1535_v41 }
 0x12a   :  { %v1560_v42 = vadd.f32 %v1559_v39, %v1558_v35  ;;  %v1565_v43 = vpop.f32.mrf.mxu1  ;;  %1056 = vadd.xlane.f32.xlu0 %v2091_v36  ;;  %v1093_v49 = vmul.f32 %v2091_v36, %v2091_v36 }
 0x12b   :  { %v1566_v46 = vadd.f32 %v1565_v43, %v1564_v38  ;;  %v1095_v51 = vmul.f32 %v2094_v44, %v2094_v44 }
 0x12c   :  { %v2096_v45 = vadd.f32 %v1560_v42, %v1532_v40 }
 0x12d   :  { %v2100_v48 = vadd.f32 %v1566_v46, %v1538_v47 }
 0x12e   :  { %1058 = vadd.xlane.f32.xlu1 %v2096_v45  ;;  %1060 = vadd.xlane.f32.xlu0 %v2094_v44  ;;  %v1094_v50 = vmul.f32 %v2096_v45, %v2096_v45 }
 0x12f   :  { %v1096_v52 = vmul.f32 %v2100_v48, %v2100_v48 }
 0x132   :  { %1062 = vadd.xlane.f32.xlu1 %v2100_v48  ;;  %1097 = vadd.xlane.f32.xlu0 %v1093_v49 }
 0x136   :  { %1099 = vadd.xlane.f32.xlu1 %v1094_v50  ;;  %1101 = vadd.xlane.f32.xlu0 %v1095_v51 }
 0x13a   :  { %1103 = vadd.xlane.f32.xlu1 %v1096_v52 }
 0x193   :  { %v1049_v54 = vpop.xlane.xlu0 %1048 }
 0x197   :  { %v1086_v56 = vpop.xlane.xlu0 %1085 }
 0x199   :  { %v1088_v55 = vpop.xlane.xlu1 %1087 }
 0x19b   :  { %v1051_v58 = vpop.xlane.xlu0 %1050 }
 0x19d   :  { %v1053_v57 = vpop.xlane.xlu1 %1052 }
 0x19f   :  { %v1090_v60 = vpop.xlane.xlu0 %1089 }
 0x1a1   :  { %v1055_v59 = vpop.xlane.xlu1 %1054 }
 0x1a5   :  { %v1092_v62 = vpop.xlane.xlu1 %1091 }
 0x1b3   :  { %v1057_v0 = vpop.xlane.xlu0 %1056 }
 0x1b4   :  { %v1064_v1 = vadd.f32 %v1057_v0, %v1049_v54 }
 0x1b6   :  { %v1068_v2 = vadd.f32 %v1064_v1, %v1044_v63 }
 0x1b7   :  { %v1059_v4 = vpop.xlane.xlu1 %1058  ;;  %v1061_v7 = vpop.xlane.xlu0 %1060 }
 0x1b8   :  { %1073 = vst.msk [vmem:[#allocation2] sm:$0xff] %vm30_vm0, %v1068_v2  ;;  %v1065_v8 = vadd.f32 %v1059_v4, %v1051_v58  ;;  %v1066_v9 = vadd.f32 %v1061_v7, %v1053_v57 }
 0x1ba   :  { %v1069_v10 = vadd.f32 %v1065_v8, %v1045_v3  ;;  %v1070_v11 = vadd.f32 %v1066_v9, %v1046_v6  ;;  %v1169_v8 = vld [vmem:[%s2179_s4] sm:$0xff] }
 0x1bb   :  { %v1063_v13 = vpop.xlane.xlu1 %1062  ;;  %v1098_v16 = vpop.xlane.xlu0 %1097 }
 0x1bc   :  { %1074 = vst.msk [vmem:[#allocation2 + $0x8] sm:$0xff] %vm30_vm0, %v1069_v10  ;;  %1075 = vst.msk [vmem:[#allocation2 + $0x10] sm:$0xff] %vm30_vm0, %v1070_v11  ;;  %v1067_v17 = vadd.f32 %v1063_v13, %v1055_v59  ;;  %v1105_v18 = vadd.f32 %v1098_v16, %v1086_v56  ;;  %v1171_v11 = vld [vmem:[%s2179_s4 + $0x10] sm:$0xff]  ;;  %v1170_v16 = vld [vmem:[%s2179_s4 + $0x8] sm:$0xff] }
 0x1be   :  { %v1071_v19 = vadd.f32 %v1067_v17, %v1047_v12  ;;  %v1109_v20 = vadd.f32 %v1105_v18, %v1077_v14 }
 0x1bf   :  { %v1100_v23 = vpop.xlane.xlu1 %1099  ;;  %v1102_v25 = vpop.xlane.xlu0 %1101  ;;  %v1133_v28 = vld [vmem:[#allocation2] sm:$0xff] }
 0x1c0   :  { %1076 = vst.msk [vmem:[#allocation2 + $0x18] sm:$0xff] %vm30_vm0, %v1071_v19  ;;  %1113 = vst.msk [vmem:[#allocation3] sm:$0xff] %vm30_vm0, %v1109_v20  ;;  %v1106_v26 = vadd.f32 %v1100_v23, %v1088_v55  ;;  %v1107_v27 = vadd.f32 %v1102_v25, %v1090_v60  ;;  %v1137_v34 = vmul.f32 0.008928572, %v1133_v28  ;;  %v1172_v19 = vld [vmem:[%s2179_s4 + $0x18] sm:$0xff]  ;;  %v1177_v23 = vld [vmem:[%s2180_s5] sm:$0xff] }
 0x1c2   :  { %v1110_v29 = vadd.f32 %v1106_v26, %v1078_v21  ;;  %v1111_v30 = vadd.f32 %v1107_v27, %v1079_v24  ;;  %v1149_v42 = vmul.f32 %v1137_v34, %v1137_v34  ;;  %v1179_v26 = vld [vmem:[%s2180_s5 + $0x10] sm:$0xff] }
 0x1c3   :  { %v1104_v32 = vpop.xlane.xlu1 %1103  ;;  %v1135_v35 = vld [vmem:[#allocation2 + $0x10] sm:$0xff]  ;;  %v1134_v37 = vld [vmem:[#allocation2 + $0x8] sm:$0xff] }
 0x1c4   :  { %1114 = vst.msk [vmem:[#allocation3 + $0x8] sm:$0xff] %vm30_vm0, %v1110_v29  ;;  %1115 = vst.msk [vmem:[#allocation3 + $0x10] sm:$0xff] %vm30_vm0, %v1111_v30  ;;  %v1108_v33 = vadd.f32 %v1104_v32, %v1092_v62  ;;  %v1139_v40 = vmul.f32 0.008928572, %v1135_v35  ;;  %v1138_v43 = vmul.f32 0.008928572, %v1134_v37 }
 0x1c5   :  { %v1178_v29 = vld [vmem:[%s2180_s5 + $0x8] sm:$0xff]  ;;  %v1180_v32 = vld [vmem:[%s2180_s5 + $0x18] sm:$0xff] }
 0x1c6   :  { %v1112_v38 = vadd.f32 %v1108_v33, %v1080_v31  ;;  %v1151_v50 = vmul.f32 %v1139_v40, %v1139_v40  ;;  %v1150_v56 = vmul.f32 %v1138_v43, %v1138_v43 }
 0x1c7   :  { %v1141_v39 = vld [vmem:[#allocation3] sm:$0xff]  ;;  %v1136_v46 = vld [vmem:[#allocation2 + $0x18] sm:$0xff] }
 0x1c8   :  { %1116 = vst.msk [vmem:[#allocation3 + $0x18] sm:$0xff] %vm30_vm0, %v1112_v38  ;;  %v1145_v41 = vmul.f32 0.008928572, %v1141_v39  ;;  %v1140_v52 = vmul.f32 0.008928572, %v1136_v46 }
 0x1ca   :  { %v1153_v47 = vsub.f32 %v1145_v41, %v1149_v42  ;;  %v1152_v62 = vmul.f32 %v1140_v52, %v1140_v52 }
 0x1cb   :  { %v1143_v49 = vld [vmem:[#allocation3 + $0x10] sm:$0xff]  ;;  %v1142_v51 = vld [vmem:[#allocation3 + $0x8] sm:$0xff] }
 0x1cc   :  { %v1157_v53 = vmax.f32 %v1153_v47, 0.0  ;;  %v1147_v54 = vmul.f32 0.008928572, %v1143_v49  ;;  %v1146_v55 = vmul.f32 0.008928572, %v1142_v51 }
 0x1ce   :  { %v1161_v57 = vadd.f32 1e-05, %v1157_v53  ;;  %v1155_v58 = vsub.f32 %v1147_v54, %v1151_v50  ;;  %v1154_v59 = vsub.f32 %v1146_v55, %v1150_v56 }
 0x1cf   :  { %v1144_v60 = vld [vmem:[#allocation3 + $0x18] sm:$0xff] }
 0x1d0   :  { %1697 = vrsqrt.f32 %v1161_v57  ;;  %v1159_v63 = vmax.f32 %v1155_v58, 0.0  ;;  %v1158_v0 = vmax.f32 %v1154_v59, 0.0  ;;  %v1148_v1 = vmul.f32 0.008928572, %v1144_v60 }
 0x1d2   :  { %v1163_v2 = vadd.f32 1e-05, %v1159_v63  ;;  %v1162_v3 = vadd.f32 1e-05, %v1158_v0  ;;  %v1156_v4 = vsub.f32 %v1148_v1, %v1152_v62 }
 0x1d4   :  { %1699 = vrsqrt.f32 %v1163_v2  ;;  %v1160_v6 = vmax.f32 %v1156_v4, 0.0 }
 0x1d5   :  { %1701 = vrsqrt.f32 %v1162_v3 }
 0x1d6   :  { %v1164_v7 = vadd.f32 1e-05, %v1160_v6 }
 0x1d8   :  { %1703 = vrsqrt.f32 %v1164_v7 }
 0x1dd   :  { %v1698_v9 = vpop.eup %1697 }
 0x1de   :  { %v1173_v10 = vmul.f32 %v1698_v9, %v1169_v8 }
 0x1e0   :  { %1195 = vperm.xlu0 %1585, %v1173_v10   ;;  %v1181_v21 = vmul.f32 %v1173_v10, %v1137_v34 }
 0x1e1   :  { %v1700_v12 = vpop.eup %1699 }
 0x1e2   :  { %v1175_v13 = vmul.f32 %v1700_v12, %v1171_v11  ;;  %v1702_v14 = vpop.eup %1701  ;;  %v1185_v24 = vsub.f32 %v1177_v23, %v1181_v21 }
 0x1e3   :  { %v1174_v17 = vmul.f32 %v1702_v14, %v1170_v16 }
 0x1e4   :  { %1205 = vperm.xlu1 %1586, %v1175_v13   ;;  %v1183_v25 = vmul.f32 %v1175_v13, %v1139_v40 }
 0x1e5   :  { %v1704_v18 = vpop.eup %1703  ;;  %v1182_v28 = vmul.f32 %v1174_v17, %v1138_v43 }
 0x1e6   :  { %v1176_v20 = vmul.f32 %v1704_v18, %v1172_v19  ;;  %v1187_v27 = vsub.f32 %v1179_v26, %v1183_v25 }
 0x1e7   :  { %v1186_v30 = vsub.f32 %v1178_v29, %v1182_v28 }
 0x1e8   :  { %1200 = vperm.xlu1 %1586, %v1174_v17   ;;  %v1184_v31 = vmul.f32 %v1176_v20, %v1140_v52 }
 0x1ea   :  { %v1188_v33 = vsub.f32 %v1180_v32, %v1184_v31 }
 0x1ec   :  { %1210 = vperm.xlu1 %1586, %v1176_v20  }
 0x1f0   :  { %1219 = vperm.xlu1 %1586, %v1185_v24  }
 0x1f4   :  { %1229 = vperm.xlu1 %1586, %v1187_v27  }
 0x1f8   :  { %1224 = vperm.xlu1 %1586, %v1186_v30  }
 0x1fc   :  { %1234 = vperm.xlu1 %1586, %v1188_v33  }
 0x25b   :  { %v1196_v37 = vpop.permute.xlu0 %1195 }
 0x25c   :  { %v1213_v39 = vmul.f32 %v1196_v37, %v2063_v61  ;;  %v1273_v40 = vmul.f32 %v1196_v37, %v2091_v36 }
 0x25f   :  { %v1206_v34 = vpop.permute.xlu1 %1205 }
 0x260   :  { %v1215_v46 = vmul.f32 %v1206_v34, %v2072_v15  ;;  %v1275_v47 = vmul.f32 %v1206_v34, %v2094_v44 }
 0x263   :  { %v1201_v35 = vpop.permute.xlu1 %1200 }
 0x264   :  { %v1214_v56 = vmul.f32 %v1201_v35, %v2066_v5  ;;  %v1274_v61 = vmul.f32 %v1201_v35, %v2096_v45 }
 0x267   :  { %v1211_v38 = vpop.permute.xlu1 %1210 }
 0x268   :  { %v1216_v62 = vmul.f32 %v1211_v38, %v2078_v22  ;;  %v1276_v63 = vmul.f32 %v1211_v38, %v2100_v48 }
 0x26b   :  { %v1220_v41 = vpop.permute.xlu1 %1219 }
 0x26c   :  { %v1237_v42 = vadd.f32 %v1220_v41, %v1213_v39  ;;  %v1277_v43 = vadd.f32 %v1273_v40, %v1220_v41 }
 0x26e   :  { %v1245_v49 = vmin.f32 %v1237_v42, 0.0  ;;  %v1285_v50 = vmin.f32 %v1277_v43, 0.0  ;;  %vm1241_vm1 = vcmp.gt.f32.partialorder %v1237_v42, 0.0  ;;  %vm1281_vm2 = vcmp.gt.f32.partialorder %v1277_v43, 0.0 }
 0x26f   :  { %v1230_v51 = vpop.permute.xlu1 %1229 }
 0x270   :  { %v1249_v52 = vmul.f32 1.442695, %v1245_v49  ;;  %v1289_v53 = vmul.f32 1.442695, %v1285_v50  ;;  %v1239_v54 = vadd.f32 %v1230_v51, %v1215_v46  ;;  %v1279_v55 = vadd.f32 %v1275_v47, %v1230_v51 }
 0x272   :  { %1705 = vpow2.f32 %v1249_v52  ;;  %v1247_v36 = vmin.f32 %v1239_v54, 0.0  ;;  %v1287_v57 = vmin.f32 %v1279_v55, 0.0  ;;  %vm1243_vm3 = vcmp.gt.f32.partialorder %v1239_v54, 0.0 }
 0x273   :  { %1707 = vpow2.f32 %v1289_v53  ;;  %v1225_v58 = vpop.permute.xlu1 %1224  ;;  %vm1283_vm4 = vcmp.gt.f32.partialorder %v1279_v55, 0.0 }
 0x274   :  { %v1253_v59 = vmul.f32 1.442695, %v1247_v36  ;;  %v1238_v15 = vadd.f32 %v1225_v58, %v1214_v56  ;;  %v1278_v60 = vadd.f32 %v1274_v61, %v1225_v58  ;;  %v1293_v44 = vmul.f32 1.442695, %v1287_v57 }
 0x276   :  { %1709 = vpow2.f32 %v1253_v59  ;;  %v1246_v0 = vmin.f32 %v1238_v15, 0.0  ;;  %v1286_v1 = vmin.f32 %v1278_v60, 0.0  ;;  %vm1242_vm5 = vcmp.gt.f32.partialorder %v1238_v15, 0.0 }
 0x277   :  { %1711 = vpow2.f32 %v1293_v44  ;;  %v1235_v5 = vpop.permute.xlu1 %1234  ;;  %vm1282_vm6 = vcmp.gt.f32.partialorder %v1278_v60, 0.0 }
 0x278   :  { %v1251_v2 = vmul.f32 1.442695, %v1246_v0  ;;  %v1240_v45 = vadd.f32 %v1235_v5, %v1216_v62  ;;  %v1280_v3 = vadd.f32 %v1276_v63, %v1235_v5  ;;  %v1291_v4 = vmul.f32 1.442695, %v1286_v1 }
 0x27a   :  { %1713 = vpow2.f32 %v1251_v2  ;;  %v1248_v6 = vmin.f32 %v1240_v45, 0.0  ;;  %v1288_v7 = vmin.f32 %v1280_v3, 0.0  ;;  %vm1244_vm7 = vcmp.gt.f32.partialorder %v1240_v45, 0.0 }
 0x27b   :  { %1715 = vpow2.f32 %v1291_v4  ;;  %vm1284_vm8 = vcmp.gt.f32.partialorder %v1280_v3, 0.0 }
 0x27c   :  { %v1255_v8 = vmul.f32 1.442695, %v1248_v6  ;;  %v1295_v9 = vmul.f32 1.442695, %v1288_v7 }
 0x27e   :  { %1717 = vpow2.f32 %v1255_v8 }
 0x27f   :  { %v1706_v10 = vpop.eup %1705  ;;  %1719 = vpow2.f32 %v1295_v9 }
 0x280   :  { %v1708_v22 = vpop.eup %1707  ;;  %v1419_v48 = vadd.f32 -1.0, %v1706_v10 }
 0x281   :  { %v1423_v11 = vadd.f32 -1.0, %v1708_v22 }
 0x282   :  { %v1261_v12 = vsel %vm1241_vm1, %v1237_v42, %v1419_v48 }
 0x283   :  { %v1710_v13 = vpop.eup %1709  ;;  %1265 = vst [vmem:[%s2181_s6] sm:$0xff] %v1261_v12  ;;  %v1301_v14 = vsel %vm1281_vm2, %v1277_v43, %v1423_v11 }
 0x284   :  { %v1712_v16 = vpop.eup %1711  ;;  %1305 = vst [vmem:[%s2182_s7] sm:$0xff] %v1301_v14  ;;  %v1421_v17 = vadd.f32 -1.0, %v1710_v13 }
 0x285   :  { %v1425_v18 = vadd.f32 -1.0, %v1712_v16 }
 0x286   :  { %v1263_v19 = vsel %vm1243_vm3, %v1239_v54, %v1421_v17 }
 0x287   :  { %v1714_v20 = vpop.eup %1713  ;;  %1267 = vst [vmem:[%s2181_s6 + $0x10] sm:$0xff] %v1263_v19  ;;  %v1303_v21 = vsel %vm1283_vm4, %v1279_v55, %v1425_v18 }
 0x288   :  { %v1716_v23 = vpop.eup %1715  ;;  %1307 = vst [vmem:[%s2182_s7 + $0x10] sm:$0xff] %v1303_v21  ;;  %v1420_v24 = vadd.f32 -1.0, %v1714_v20 }
 0x289   :  { %v1424_v25 = vadd.f32 -1.0, %v1716_v23 }
 0x28a   :  { %v1262_v26 = vsel %vm1242_vm5, %v1238_v15, %v1420_v24 }
 0x28b   :  { %v1718_v27 = vpop.eup %1717  ;;  %1266 = vst [vmem:[%s2181_s6 + $0x8] sm:$0xff] %v1262_v26  ;;  %v1302_v28 = vsel %vm1282_vm6, %v1278_v60, %v1424_v25 }
 0x28c   :  { %v1720_v29 = vpop.eup %1719  ;;  %1306 = vst [vmem:[%s2182_s7 + $0x8] sm:$0xff] %v1302_v28  ;;  %v1422_v30 = vadd.f32 -1.0, %v1718_v27 }
 0x28d   :  { %v1426_v31 = vadd.f32 -1.0, %v1720_v29 }
 0x28e   :  { %v1264_v32 = vsel %vm1244_vm7, %v1240_v45, %v1422_v30 }
 0x28f   :  { %1268 = vst [vmem:[%s2181_s6 + $0x18] sm:$0xff] %v1264_v32  ;;  %v1304_v33 = vsel %vm1284_vm8, %v1280_v3, %v1426_v31 }
 0x290   :  { %1308 = vst [vmem:[%s2182_s7 + $0x18] sm:$0xff] %v1304_v33 }

// kernel: aunet_forward.17
= control target key start
LH: loop header
LB: loop body
LE: loop exit
PB: predicated region body
PF: predicated region fallthrough
CT: control target
= control target key end

     0   :  { %vm30_vm0 = vcmask 7168   ;;  %s1375_s0 = inlined_call_operand.vmem [shape: bf16[384,128], index: 0, kind: input, shape index: {}]   ;;  %s1376_s1 = inlined_call_operand.vmem [shape: bf16[256,128], index: 1, kind: input, shape index: {}]   ;;  %s1377_s2 = inlined_call_operand.vmem [shape: bf16[32,384], index: 2, kind: input, shape index: {}]   ;;  %s1378_s3 = inlined_call_operand.vmem [shape: bf16[32,256], index: 3, kind: input, shape index: {}]   ;;  %s1379_s4 = inlined_call_operand.vmem [shape: f32[32,1], index: 4, kind: input, shape index: {}]   ;;  %s1380_s5 = inlined_call_operand.vmem [shape: f32[32,1], index: 5, kind: input, shape index: {}]   ;;  %s1381_s6 = inlined_call_operand.vmem [shape: f32[32,128], index: 6, kind: output, shape index: {0}]   ;;  %s1382_s7 = inlined_call_operand.vmem [shape: f32[32,128], index: 7, kind: output, shape index: {1}]  }
   0x1   :  { %v993_v0 = vld [vmem:[%s1375_s0 + $0x78] sm:$0xff]   ;;  %v995_v2 = vld [vmem:[%s1375_s0 + $0x70] sm:$0xff]   ;;  %v997_v4 = vld [vmem:[%s1375_s0 + $0x68] sm:$0xff]  }
   0x2   :  { %v994_v1 = vld [vmem:[%s1375_s0 + $0x38] sm:$0xff]   ;;  %903 = vmatprep.subr.bf16.mxu1 %v993_v0  ;;  %v996_v3 = vld [vmem:[%s1375_s0 + $0x30] sm:$0xff]   ;;  %v998_v5 = vld [vmem:[%s1375_s0 + $0x28] sm:$0xff]  }
   0x3   :  { %904 = vmatpush3.bf16.msra.mxu1 %v994_v1  ;;  %v1000_v6 = vld [vmem:[%s1376_s1 + $0x78] sm:$0xff]   ;;  %v999_v7 = vld [vmem:[%s1375_s0 + $0x60] sm:$0xff]   ;;  %v1004_v10 = vld [vmem:[%s1376_s1 + $0x70] sm:$0xff]  }
   0x4   :  { %905 = vmatprep.subr.bf16.mxu1 %v995_v2  ;;  %941 = vmatprep.subr.bf16.mxu0 %v1000_v6  ;;  %v1002_v8 = vld [vmem:[%s1376_s1 + $0x38] sm:$0xff]   ;;  %v1001_v9 = vld [vmem:[%s1375_s0 + $0x20] sm:$0xff]   ;;  %v1006_v12 = vld [vmem:[%s1376_s1 + $0x30] sm:$0xff]  }
   0x5   :  { %942 = vmatpush3.bf16.msra.mxu0 %v1002_v8  ;;  %v1003_v11 = vld [vmem:[%s1375_s0 + $0x58] sm:$0xff]   ;;  %v1008_v14 = vld [vmem:[%s1376_s1 + $0x68] sm:$0xff]   ;;  %v1007_v15 = vld [vmem:[%s1375_s0 + $0x50] sm:$0xff]  }
   0x6   :  { %943 = vmatprep.subr.bf16.mxu0 %v1004_v10  ;;  %v1005_v13 = vld [vmem:[%s1375_s0 + $0x18] sm:$0xff]   ;;  %v1010_v16 = vld [vmem:[%s1376_s1 + $0x28] sm:$0xff]   ;;  %v1009_v17 = vld [vmem:[%s1375_s0 + $0x10] sm:$0xff]  }
   0x7   :  { %906 = vmatpush3.bf16.msra.mxu1 %v996_v3  ;;  %v1012_v18 = vld [vmem:[%s1376_s1 + $0x60] sm:$0xff]   ;;  %v1011_v19 = vld [vmem:[%s1375_s0 + $0x48] sm:$0xff]   ;;  %v1016_v22 = vld [vmem:[%s1376_s1 + $0x58] sm:$0xff]  }
   0x8   :  { %907 = vmatprep.subr.bf16.mxu1 %v997_v4  ;;  %v1014_v20 = vld [vmem:[%s1376_s1 + $0x20] sm:$0xff]   ;;  %v1013_v21 = vld [vmem:[%s1375_s0 + $0x8] sm:$0xff]   ;;  %v1018_v24 = vld [vmem:[%s1376_s1 + $0x18] sm:$0xff]  }
   0x9   :  { %944 = vmatpush3.bf16.msra.mxu0 %v1006_v12  ;;  %v1015_v23 = vld [vmem:[%s1375_s0 + $0x40] sm:$0xff]   ;;  %v1022_v28 = vld [vmem:[%s1375_s0 + $0xb8] sm:$0xff]   ;;  %v1023_v29 = vld [vmem:[%s1376_s1 + $0x50] sm:$0xff]  }
   0xa   :  { %945 = vmatprep.subr.bf16.mxu0 %v1008_v14  ;;  %v1017_v25 = vld [vmem:[%s1375_s0] sm:$0xff]   ;;  %v1024_v30 = vld [vmem:[%s1376_s1 + $0x10] sm:$0xff]   ;;  %v1026_v32 = vld [vmem:[%s1376_s1 + $0x48] sm:$0xff]  }
   0xb   :  { %908 = vmatpush3.bf16.msra.mxu1 %v998_v5  ;;  %v1021_v26 = vld [vmem:[%s1377_s2 + $0x4] ss:$12 sps:$4 sm:$0xff]   ;;  %v1019_v27 = vld [vmem:[%s1377_s2] ss:$12 sps:$4 sm:$0xff]   ;;  %v1036_v40 = vld [vmem:[%s1377_s2 + $0x1c] ss:$12 sps:$4 sm:$0xff]  }
   0xc   :  { %909 = vmatprep.subr.bf16.mxu1 %v999_v7  ;;  %303 = vmatprep.mubr.bf16.mxu1 %v1021_v26  ;;  %v1025_v31 = vld [vmem:[%s1375_s0 + $0xb0] sm:$0xff]   ;;  %v1027_v33 = vld [vmem:[%s1376_s1 + $0x8] sm:$0xff]   ;;  %v1029_v35 = vld [vmem:[%s1376_s1 + $0x40] sm:$0xff]  }
   0xd   :  { %946 = vmatpush3.bf16.msra.mxu0 %v1010_v16  ;;  %v1028_v34 = vld [vmem:[%s1375_s0 + $0xa8] sm:$0xff]   ;;  %v1030_v36 = vld [vmem:[%s1376_s1] sm:$0xff]   ;;  %v1040_v42 = vld [vmem:[%s1378_s3 + $0x14] ss:$8 sps:$4 sm:$0xff]   ;;  %v1071_v16 = vmov 0.0  }
   0xe   :  { %947 = vmatprep.subr.bf16.mxu0 %v1012_v18  ;;  %v1033_v37 = vld [vmem:[%s1378_s3 + $0x4] ss:$8 sps:$4 sm:$0xff]   ;;  %v1031_v38 = vld [vmem:[%s1378_s3] ss:$8 sps:$4 sm:$0xff]   ;;  %v1035_v43 = vld [vmem:[%s1375_s0 + $0x98] sm:$0xff]   ;;  %33 = vst.msk [vmem:[#allocation2 + $0x10] sm:$0xff] %vm30_vm0, %v1071_v16 }
   0xf   :  { %910 = vmatpush3.bf16.msra.mxu1 %v1001_v9  ;;  %553 = vmatprep.mubr.bf16.mxu0 %v1033_v37  ;;  %v1034_v39 = vld [vmem:[%s1375_s0 + $0xa0] sm:$0xff]   ;;  %v1045_v44 = vld [vmem:[%s1377_s2 + $0x8] ss:$12 sps:$4 sm:$0xff]   ;;  %v1042_v45 = vld [vmem:[%s1378_s3 + $0x10] ss:$8 sps:$4 sm:$0xff]   ;;  %31 = vst.msk [vmem:[#allocation2] sm:$0xff] %vm30_vm0, %v1071_v16 }
  0x10   :  { %911 = vmatprep.subr.bf16.mxu1 %v1003_v11  ;;  %v1038_v41 = vld [vmem:[%s1377_s2 + $0x18] ss:$12 sps:$4 sm:$0xff]   ;;  %v1039_v46 = vld [vmem:[%s1375_s0 + $0x90] sm:$0xff]   ;;  %v1043_v47 = vld [vmem:[%s1375_s0 + $0x88] sm:$0xff]   ;;  %32 = vst.msk [vmem:[#allocation2 + $0x8] sm:$0xff] %vm30_vm0, %v1071_v16 }
  0x11   :  { %948 = vmatpush3.bf16.msra.mxu0 %v1014_v20  ;;  %v1044_v48 = vld [vmem:[%s1375_s0 + $0x80] sm:$0xff]   ;;  %34 = vst.msk [vmem:[#allocation2 + $0x18] sm:$0xff] %vm30_vm0, %v1071_v16  ;;  %35 = vst.msk [vmem:[#allocation3] sm:$0xff] %vm30_vm0, %v1071_v16 }
  0x12   :  { %949 = vmatprep.subr.bf16.mxu0 %v1016_v22  ;;  %v1046_v49 = vld [vmem:[%s1377_s2 + $0x20] ss:$12 sps:$4 sm:$0xff]   ;;  %36 = vst.msk [vmem:[#allocation3 + $0x8] sm:$0xff] %vm30_vm0, %v1071_v16  ;;  %37 = vst.msk [vmem:[#allocation3 + $0x10] sm:$0xff] %vm30_vm0, %v1071_v16 }
  0x13   :  { %912 = vmatpush3.bf16.msra.mxu1 %v1005_v13  ;;  %38 = vst.msk [vmem:[#allocation3 + $0x18] sm:$0xff] %vm30_vm0, %v1071_v16 }
  0x14   :  { %913 = vmatprep.subr.bf16.mxu1 %v1007_v15 }
  0x15   :  { %950 = vmatpush3.bf16.msra.mxu0 %v1018_v24 }
  0x16   :  { %951 = vmatprep.subr.bf16.mxu0 %v1023_v29  ;;  %v570_v37 = vld [vmem:[#allocation2] sm:$0xff] }
  0x17   :  { %914 = vmatpush3.bf16.msra.mxu1 %v1009_v17 }
  0x18   :  { %915 = vmatprep.subr.bf16.mxu1 %v1011_v19 }
  0x19   :  { %952 = vmatpush3.bf16.msra.mxu0 %v1024_v30 }
  0x1a   :  { %953 = vmatprep.subr.bf16.mxu0 %v1026_v32 }
  0x1b   :  { %916 = vmatpush3.bf16.msra.mxu1 %v1013_v21 }
  0x1c   :  { %917 = vmatprep.subr.bf16.mxu1 %v1015_v23 }
  0x1d   :  { %954 = vmatpush3.bf16.msra.mxu0 %v1027_v33 }
  0x1e   :  { %955 = vmatprep.subr.bf16.mxu0 %v1029_v35 }
  0x1f   :  { %918 = vmatpush3.bf16.msra.mxu1 %v1017_v25 }
  0x20   :  { %969 = vmatprep.subr.bf16.mxu1 %v1022_v28 }
  0x21   :  { %956 = vmatpush3.bf16.msra.mxu0 %v1030_v36 }
  0x22   :  { %304 = vmatmul.mubr.bf16.vlgmr.msra.gmra.mxu1 %v1019_v27  ;;  %v1072_v27 = vmov 0  }
  0x23   :  { %970 = vmatpush3.bf16.msra.mxu1 %v1022_v28  ;;  %311 = vmatprep.mubr.bf16.mxu1 %v1036_v40 }
  0x24   :  { %971 = vmatprep.subr.bf16.mxu1 %v1025_v31  ;;  %554 = vmatmul.mubr.bf16.vlgmr.msra.gmra.mxu0 %v1031_v38 }
  0x25   :  { %561 = vmatprep.mubr.bf16.mxu0 %v1040_v42  ;;  %991 = vset.pattern.permute.xlu0 %v1072_v27 }
  0x26   :  { %992 = vset.pattern.permute.xlu1 %v1072_v27 }
  0x27   :  { %972 = vmatpush3.bf16.msra.mxu1 %v1025_v31 }
  0x28   :  { %973 = vmatprep.subr.bf16.mxu1 %v1028_v34 }
  0x2a   :  { %312 = vmatmul.mubr.bf16.gmra.mxu1 %v1038_v41  ;;  %v573_v41 = vld [vmem:[#allocation2 + $0x18] sm:$0xff] }
  0x2b   :  { %974 = vmatpush3.bf16.msra.mxu1 %v1028_v34  ;;  %985 = vmatprep.mubr.bf16.mxu1 %v1045_v44  ;;  %v572_v34 = vld [vmem:[#allocation2 + $0x10] sm:$0xff] }
  0x2c   :  { %975 = vmatprep.subr.bf16.mxu1 %v1034_v39  ;;  %562 = vmatmul.mubr.bf16.gmra.mxu0 %v1042_v45 }
  0x2f   :  { %976 = vmatpush3.bf16.msra.mxu1 %v1034_v39 }
  0x30   :  { %977 = vmatprep.subr.bf16.mxu1 %v1035_v43 }
  0x33   :  { %978 = vmatpush3.bf16.msra.mxu1 %v1035_v43 }
  0x34   :  { %979 = vmatprep.subr.bf16.mxu1 %v1039_v46 }
  0x37   :  { %980 = vmatpush3.bf16.msra.mxu1 %v1039_v46 }
  0x38   :  { %981 = vmatprep.subr.bf16.mxu1 %v1043_v47 }
  0x3b   :  { %982 = vmatpush3.bf16.msra.mxu1 %v1043_v47 }
  0x3c   :  { %983 = vmatprep.subr.bf16.mxu1 %v1044_v48 }
  0x3f   :  { %984 = vmatpush3.bf16.msra.mxu1 %v1044_v48  ;;  %v603_v48 = vld [vmem:[#allocation3] sm:$0xff] }
  0x42   :  { %986 = vmatmul.mubr.bf16.vlgmr.msra.gmra.mxu1 %v1046_v49 }
  0xe2   :  { %v919_v50 = vpop.f32.mrf.mxu1 }
  0xe4   :  { %v920_v51 = vpop.f32.mrf.mxu1  ;;  %v957_v52 = vpop.f32.mrf.mxu0 }
  0xe5   :  { %v921_v10 = vadd.f32 %v920_v51, %v919_v50  ;;  %v604_v51 = vld [vmem:[#allocation3 + $0x8] sm:$0xff] }
  0xe6   :  { %v958_v53 = vpop.f32.mrf.mxu0  ;;  %v922_v54 = vpop.f32.mrf.mxu1 }
  0xe7   :  { %v1263_v55 = vadd.f32 %v958_v53, %v957_v52 }
  0xe8   :  { %v960_v56 = vpop.f32.mrf.mxu0  ;;  %v923_v59 = vpop.f32.mrf.mxu1 }
  0xe9   :  { %582 = vadd.xlane.f32.xlu0 %v1263_v55  ;;  %v619_v57 = vmul.f32 %v1263_v55, %v1263_v55  ;;  %v924_v19 = vadd.f32 %v923_v59, %v922_v54 }
  0xea   :  { %v961_v58 = vpop.f32.mrf.mxu0  ;;  %v925_v62 = vpop.f32.mrf.mxu1 }
  0xeb   :  { %v1268_v60 = vadd.f32 %v961_v58, %v960_v56  ;;  %v571_v56 = vld [vmem:[#allocation2 + $0x8] sm:$0xff] }
  0xec   :  { %v963_v61 = vpop.f32.mrf.mxu0  ;;  %v926_v3 = vpop.f32.mrf.mxu1 }
  0xed   :  { %584 = vadd.xlane.f32.xlu1 %v1268_v60  ;;  %v620_v63 = vmul.f32 %v1268_v60, %v1268_v60  ;;  %623 = vadd.xlane.f32.xlu0 %v619_v57  ;;  %v927_v8 = vadd.f32 %v926_v3, %v925_v62  ;;  %v605_v3 = vld [vmem:[#allocation3 + $0x10] sm:$0xff] }
  0xee   :  { %v964_v0 = vpop.f32.mrf.mxu0  ;;  %v928_v6 = vpop.f32.mrf.mxu1 }
  0xef   :  { %v1273_v1 = vadd.f32 %v964_v0, %v963_v61  ;;  %v606_v61 = vld [vmem:[#allocation3 + $0x18] sm:$0xff] }
  0xf0   :  { %v966_v2 = vpop.f32.mrf.mxu0  ;;  %v929_v7 = vpop.f32.mrf.mxu1 }
  0xf1   :  { %625 = vadd.xlane.f32.xlu1 %v620_v63  ;;  %586 = vadd.xlane.f32.xlu0 %v1273_v1  ;;  %v930_v13 = vadd.f32 %v929_v7, %v928_v6  ;;  %v621_v26 = vmul.f32 %v1273_v1, %v1273_v1 }
  0xf2   :  { %v967_v4 = vpop.f32.mrf.mxu0 }
  0xf3   :  { %v1276_v5 = vadd.f32 %v967_v4, %v966_v2 }
  0xf5   :  { %588 = vadd.xlane.f32.xlu1 %v1276_v5  ;;  %v622_v25 = vmul.f32 %v1276_v5, %v1276_v5 }
 0x102   :  { %v987_v9 = vpop.f32.mrf.mxu1 }
 0x103   :  { %v1279_v11 = vadd.f32 %v987_v9, %v927_v8 }
 0x104   :  { %v354_v12 = vpop.f32.mrf.mxu1 }
 0x105   :  { %v1281_v14 = vadd.f32 %v921_v10, %v354_v12  ;;  %578 = vadd.xlane.f32.xlu1 %v1279_v11  ;;  %v609_v20 = vmul.f32 %v1279_v11, %v1279_v11 }
 0x106   :  { %v988_v15 = vpop.f32.mrf.mxu1 }
 0x107   :  { %v1292_v17 = vadd.f32 %v988_v15, %v930_v13  ;;  %574 = vadd.xlane.f32.xlu0 %v1281_v14  ;;  %v607_v23 = vmul.f32 %v1281_v14, %v1281_v14 }
 0x108   :  { %v357_v18 = vpop.f32.mrf.mxu1 }
 0x109   :  { %580 = vadd.xlane.f32.xlu1 %v1292_v17  ;;  %v1298_v21 = vadd.f32 %v924_v19, %v357_v18  ;;  %v610_v22 = vmul.f32 %v1292_v17, %v1292_v17 }
 0x10b   :  { %615 = vadd.xlane.f32.xlu0 %v609_v20  ;;  %v608_v24 = vmul.f32 %v1298_v21, %v1298_v21 }
 0x10d   :  { %617 = vadd.xlane.f32.xlu1 %v610_v22 }
 0x10f   :  { %611 = vadd.xlane.f32.xlu0 %v607_v23 }
 0x111   :  { %613 = vadd.xlane.f32.xlu1 %v608_v24 }
 0x113   :  { %576 = vadd.xlane.f32.xlu0 %v1298_v21 }
 0x115   :  { %629 = vadd.xlane.f32.xlu1 %v622_v25 }
 0x117   :  { %627 = vadd.xlane.f32.xlu0 %v621_v26 }
 0x172   :  { %v583_v29 = vpop.xlane.xlu0 %582 }
 0x176   :  { %v585_v28 = vpop.xlane.xlu1 %584  ;;  %v624_v31 = vpop.xlane.xlu0 %623 }
 0x17a   :  { %v626_v30 = vpop.xlane.xlu1 %625  ;;  %v587_v33 = vpop.xlane.xlu0 %586 }
 0x17e   :  { %v589_v32 = vpop.xlane.xlu1 %588 }
 0x18e   :  { %v579_v35 = vpop.xlane.xlu1 %578 }
 0x18f   :  { %v592_v36 = vadd.f32 %v587_v33, %v579_v35 }
 0x190   :  { %v575_v38 = vpop.xlane.xlu0 %574 }
 0x191   :  { %v596_v39 = vadd.f32 %v592_v36, %v572_v34  ;;  %v590_v40 = vadd.f32 %v583_v29, %v575_v38 }
 0x192   :  { %v581_v42 = vpop.xlane.xlu1 %580 }
 0x193   :  { %601 = vst.msk [vmem:[#allocation2 + $0x10] sm:$0xff] %vm30_vm0, %v596_v39  ;;  %v594_v43 = vadd.f32 %v590_v40, %v570_v37  ;;  %v593_v44 = vadd.f32 %v589_v32, %v581_v42 }
 0x194   :  { %v616_v45 = vpop.xlane.xlu0 %615 }
 0x195   :  { %599 = vst.msk [vmem:[#allocation2] sm:$0xff] %vm30_vm0, %v594_v43  ;;  %v597_v46 = vadd.f32 %v593_v44, %v573_v41  ;;  %v695_v43 = vld [vmem:[%s1379_s4] sm:$0xff] }
 0x196   :  { %v618_v47 = vpop.xlane.xlu1 %617 }
 0x197   :  { %602 = vst.msk [vmem:[#allocation2 + $0x18] sm:$0xff] %vm30_vm0, %v597_v46 }
 0x198   :  { %v612_v49 = vpop.xlane.xlu0 %611 }
 0x199   :  { %v631_v50 = vadd.f32 %v624_v31, %v612_v49 }
 0x19a   :  { %v614_v52 = vpop.xlane.xlu1 %613  ;;  %v661_v16 = vld [vmem:[#allocation2 + $0x10] sm:$0xff] }
 0x19b   :  { %v635_v53 = vadd.f32 %v631_v50, %v603_v48  ;;  %v632_v54 = vadd.f32 %v626_v30, %v614_v52  ;;  %v665_v23 = vmul.f32 0.004166667, %v661_v16 }
 0x19c   :  { %v577_v57 = vpop.xlane.xlu0 %576  ;;  %v659_v63 = vld [vmem:[#allocation2] sm:$0xff] }
 0x19d   :  { %639 = vst.msk [vmem:[#allocation3] sm:$0xff] %vm30_vm0, %v635_v53  ;;  %v636_v58 = vadd.f32 %v632_v54, %v604_v51  ;;  %v591_v59 = vadd.f32 %v585_v28, %v577_v57  ;;  %v663_v8 = vmul.f32 0.004166667, %v659_v63  ;;  %v677_v31 = vmul.f32 %v665_v23, %v665_v23  ;;  %v698_v51 = vld [vmem:[%s1379_s4 + $0x18] sm:$0xff]  ;;  %v705_v54 = vld [vmem:[%s1380_s5 + $0x10] sm:$0xff] }
 0x19e   :  { %v630_v62 = vpop.xlane.xlu1 %629  ;;  %v662_v12 = vld [vmem:[#allocation2 + $0x18] sm:$0xff] }
 0x19f   :  { %640 = vst.msk [vmem:[#allocation3 + $0x8] sm:$0xff] %vm30_vm0, %v636_v58  ;;  %v595_v0 = vadd.f32 %v591_v59, %v571_v56  ;;  %v634_v2 = vadd.f32 %v630_v62, %v618_v47  ;;  %v675_v15 = vmul.f32 %v663_v8, %v663_v8  ;;  %v666_v19 = vmul.f32 0.004166667, %v662_v12  ;;  %v697_v47 = vld [vmem:[%s1379_s4 + $0x10] sm:$0xff]  ;;  %v696_v58 = vld [vmem:[%s1379_s4 + $0x8] sm:$0xff]  ;;  %v703_v62 = vld [vmem:[%s1380_s5] sm:$0xff] }
 0x1a0   :  { %v628_v4 = vpop.xlane.xlu0 %627 }
 0x1a1   :  { %600 = vst.msk [vmem:[#allocation2 + $0x8] sm:$0xff] %vm30_vm0, %v595_v0  ;;  %v638_v6 = vadd.f32 %v634_v2, %v606_v61  ;;  %v633_v7 = vadd.f32 %v628_v4, %v616_v45  ;;  %v678_v27 = vmul.f32 %v666_v19, %v666_v19  ;;  %v704_v2 = vld [vmem:[%s1380_s5 + $0x8] sm:$0xff] }
 0x1a3   :  { %642 = vst.msk [vmem:[#allocation3 + $0x18] sm:$0xff] %vm30_vm0, %v638_v6  ;;  %v637_v9 = vadd.f32 %v633_v7, %v605_v3  ;;  %v706_v6 = vld [vmem:[%s1380_s5 + $0x18] sm:$0xff] }
 0x1a4   :  { %v667_v10 = vld [vmem:[#allocation3] sm:$0xff] }
 0x1a5   :  { %641 = vst.msk [vmem:[#allocation3 + $0x10] sm:$0xff] %vm30_vm0, %v637_v9  ;;  %v671_v13 = vmul.f32 0.004166667, %v667_v10 }
 0x1a6   :  { %v668_v33 = vld [vmem:[#allocation3 + $0x8] sm:$0xff] }
 0x1a7   :  { %v679_v18 = vsub.f32 %v671_v13, %v675_v15  ;;  %v672_v38 = vmul.f32 0.004166667, %v668_v33 }
 0x1a8   :  { %v660_v20 = vld [vmem:[#allocation2 + $0x8] sm:$0xff] }
 0x1a9   :  { %v683_v22 = vmax.f32 %v679_v18, 0.0  ;;  %v664_v28 = vmul.f32 0.004166667, %v660_v20 }
 0x1aa   :  { %v670_v24 = vld [vmem:[#allocation3 + $0x18] sm:$0xff] }
 0x1ab   :  { %v687_v25 = vadd.f32 1e-05, %v683_v22  ;;  %v674_v26 = vmul.f32 0.004166667, %v670_v24  ;;  %v676_v36 = vmul.f32 %v664_v28, %v664_v28 }
 0x1ac   :  { %v669_v29 = vld [vmem:[#allocation3 + $0x10] sm:$0xff] }
 0x1ad   :  { %1047 = vrsqrt.f32 %v687_v25  ;;  %v673_v30 = vmul.f32 0.004166667, %v669_v29  ;;  %v682_v32 = vsub.f32 %v674_v26, %v678_v27  ;;  %v680_v41 = vsub.f32 %v672_v38, %v676_v36 }
 0x1af   :  { %v681_v34 = vsub.f32 %v673_v30, %v677_v31  ;;  %v686_v35 = vmax.f32 %v682_v32, 0.0  ;;  %v684_v42 = vmax.f32 %v680_v41, 0.0 }
 0x1b1   :  { %v685_v37 = vmax.f32 %v681_v34, 0.0  ;;  %v690_v40 = vadd.f32 1e-05, %v686_v35  ;;  %v688_v46 = vadd.f32 1e-05, %v684_v42 }
 0x1b3   :  { %v689_v39 = vadd.f32 1e-05, %v685_v37 }
 0x1b5   :  { %1049 = vrsqrt.f32 %v689_v39 }
 0x1b6   :  { %1051 = vrsqrt.f32 %v690_v40 }
 0x1b7   :  { %1053 = vrsqrt.f32 %v688_v46 }
 0x1ba   :  { %v1048_v44 = vpop.eup %1047 }
 0x1bb   :  { %v699_v45 = vmul.f32 %v1048_v44, %v695_v43 }
 0x1bd   :  { %721 = vperm.xlu0 %991, %v699_v45   ;;  %v707_v61 = vmul.f32 %v699_v45, %v663_v8 }
 0x1bf   :  { %v711_v63 = vsub.f32 %v703_v62, %v707_v61 }
 0x1c2   :  { %v1050_v48 = vpop.eup %1049 }
 0x1c3   :  { %v701_v49 = vmul.f32 %v1050_v48, %v697_v47  ;;  %v1052_v50 = vpop.eup %1051 }
 0x1c4   :  { %v702_v52 = vmul.f32 %v1052_v50, %v698_v51  ;;  %v1054_v57 = vpop.eup %1053 }
 0x1c5   :  { %731 = vperm.xlu1 %992, %v701_v49   ;;  %v709_v53 = vmul.f32 %v701_v49, %v665_v23  ;;  %v700_v59 = vmul.f32 %v1054_v57, %v696_v58 }
 0x1c6   :  { %v710_v4 = vmul.f32 %v702_v52, %v666_v19 }
 0x1c7   :  { %v713_v56 = vsub.f32 %v705_v54, %v709_v53  ;;  %v708_v0 = vmul.f32 %v700_v59, %v664_v28 }
 0x1c8   :  { %v714_v7 = vsub.f32 %v706_v6, %v710_v4 }
 0x1c9   :  { %736 = vperm.xlu1 %992, %v702_v52   ;;  %v712_v3 = vsub.f32 %v704_v2, %v708_v0 }
 0x1cd   :  { %755 = vperm.xlu1 %992, %v713_v56  }
 0x1d1   :  { %726 = vperm.xlu1 %992, %v700_v59  }
 0x1d5   :  { %745 = vperm.xlu1 %992, %v711_v63  }
 0x1d9   :  { %750 = vperm.xlu1 %992, %v712_v3  }
 0x1dd   :  { %760 = vperm.xlu1 %992, %v714_v7  }
 0x238   :  { %v722_v22 = vpop.permute.xlu0 %721 }
 0x239   :  { %v739_v25 = vmul.f32 %v722_v22, %v1281_v14  ;;  %v799_v26 = vmul.f32 %v1263_v55, %v722_v22 }
 0x240   :  { %v732_v8 = vpop.permute.xlu1 %731 }
 0x241   :  { %v741_v10 = vmul.f32 %v732_v8, %v1279_v11  ;;  %v801_v12 = vmul.f32 %v1273_v1, %v732_v8 }
 0x244   :  { %v737_v9 = vpop.permute.xlu1 %736 }
 0x245   :  { %v742_v14 = vmul.f32 %v737_v9, %v1292_v17  ;;  %v802_v55 = vmul.f32 %v1276_v5, %v737_v9 }
 0x248   :  { %v756_v13 = vpop.permute.xlu1 %755 }
 0x249   :  { %v765_v15 = vadd.f32 %v756_v13, %v741_v10  ;;  %v805_v16 = vadd.f32 %v801_v12, %v756_v13 }
 0x24b   :  { %v773_v18 = vmin.f32 %v765_v15, 0.0  ;;  %v813_v20 = vmin.f32 %v805_v16, 0.0  ;;  %vm769_vm1 = vcmp.gt.f32.partialorder %v765_v15, 0.0  ;;  %vm809_vm2 = vcmp.gt.f32.partialorder %v805_v16, 0.0 }
 0x24c   :  { %v727_v19 = vpop.permute.xlu1 %726 }
 0x24d   :  { %v779_v23 = vmul.f32 1.442695, %v773_v18  ;;  %v819_v24 = vmul.f32 1.442695, %v813_v20  ;;  %v740_v1 = vmul.f32 %v727_v19, %v1298_v21  ;;  %v800_v29 = vmul.f32 %v1268_v60, %v727_v19 }
 0x24f   :  { %1055 = vpow2.f32 %v779_v23 }
 0x250   :  { %1057 = vpow2.f32 %v819_v24  ;;  %v746_v27 = vpop.permute.xlu1 %745 }
 0x251   :  { %v763_v28 = vadd.f32 %v746_v27, %v739_v25  ;;  %v803_v11 = vadd.f32 %v799_v26, %v746_v27 }
 0x253   :  { %v771_v30 = vmin.f32 %v763_v28, 0.0  ;;  %v811_v31 = vmin.f32 %v803_v11, 0.0  ;;  %vm767_vm3 = vcmp.gt.f32.partialorder %v763_v28, 0.0  ;;  %vm807_vm4 = vcmp.gt.f32.partialorder %v803_v11, 0.0 }
 0x254   :  { %v751_v32 = vpop.permute.xlu1 %750 }
 0x255   :  { %v775_v33 = vmul.f32 1.442695, %v771_v30  ;;  %v815_v34 = vmul.f32 1.442695, %v811_v31  ;;  %v764_v35 = vadd.f32 %v751_v32, %v740_v1  ;;  %v804_v36 = vadd.f32 %v800_v29, %v751_v32 }
 0x257   :  { %1059 = vpow2.f32 %v775_v33  ;;  %v772_v37 = vmin.f32 %v764_v35, 0.0  ;;  %v812_v38 = vmin.f32 %v804_v36, 0.0  ;;  %vm768_vm5 = vcmp.gt.f32.partialorder %v764_v35, 0.0 }
 0x258   :  { %1061 = vpow2.f32 %v815_v34  ;;  %v761_v39 = vpop.permute.xlu1 %760  ;;  %vm808_vm6 = vcmp.gt.f32.partialorder %v804_v36, 0.0 }
 0x259   :  { %v777_v40 = vmul.f32 1.442695, %v772_v37  ;;  %v766_v21 = vadd.f32 %v761_v39, %v742_v14  ;;  %v806_v41 = vadd.f32 %v802_v55, %v761_v39  ;;  %v817_v60 = vmul.f32 1.442695, %v812_v38 }
 0x25b   :  { %1063 = vpow2.f32 %v777_v40  ;;  %v774_v42 = vmin.f32 %v766_v21, 0.0  ;;  %v814_v44 = vmin.f32 %v806_v41, 0.0  ;;  %vm770_vm7 = vcmp.gt.f32.partialorder %v766_v21, 0.0 }
 0x25c   :  { %v1056_v43 = vpop.eup %1055  ;;  %1065 = vpow2.f32 %v817_v60  ;;  %vm810_vm8 = vcmp.gt.f32.partialorder %v806_v41, 0.0 }
 0x25d   :  { %v1058_v45 = vpop.eup %1057  ;;  %v897_v46 = vadd.f32 -1.0, %v1056_v43  ;;  %v781_v47 = vmul.f32 1.442695, %v774_v42  ;;  %v821_v5 = vmul.f32 1.442695, %v814_v44 }
 0x25e   :  { %v901_v17 = vadd.f32 -1.0, %v1058_v45 }
 0x25f   :  { %v789_v48 = vsel %vm769_vm1, %v765_v15, %v897_v46  ;;  %1067 = vpow2.f32 %v781_v47 }
 0x260   :  { %793 = vst [vmem:[%s1381_s6 + $0x10] sm:$0xff] %v789_v48  ;;  %v829_v49 = vsel %vm809_vm2, %v805_v16, %v901_v17  ;;  %1069 = vpow2.f32 %v821_v5 }
 0x261   :  { %833 = vst [vmem:[%s1382_s7 + $0x10] sm:$0xff] %v829_v49 }
 0x264   :  { %v1060_v50 = vpop.eup %1059 }
 0x265   :  { %v1062_v51 = vpop.eup %1061  ;;  %v895_v52 = vadd.f32 -1.0, %v1060_v50 }
 0x266   :  { %v899_v53 = vadd.f32 -1.0, %v1062_v51 }
 0x267   :  { %v787_v54 = vsel %vm767_vm3, %v763_v28, %v895_v52 }
 0x268   :  { %v1064_v56 = vpop.eup %1063  ;;  %791 = vst [vmem:[%s1381_s6] sm:$0xff] %v787_v54  ;;  %v827_v57 = vsel %vm807_vm4, %v803_v11, %v899_v53 }
 0x269   :  { %v1066_v58 = vpop.eup %1065  ;;  %831 = vst [vmem:[%s1382_s7] sm:$0xff] %v827_v57  ;;  %v896_v59 = vadd.f32 -1.0, %v1064_v56 }
 0x26a   :  { %v900_v61 = vadd.f32 -1.0, %v1066_v58 }
 0x26b   :  { %v788_v62 = vsel %vm768_vm5, %v764_v35, %v896_v59 }
 0x26c   :  { %v1068_v63 = vpop.eup %1067  ;;  %792 = vst [vmem:[%s1381_s6 + $0x8] sm:$0xff] %v788_v62  ;;  %v828_v0 = vsel %vm808_vm6, %v804_v36, %v900_v61 }
 0x26d   :  { %v1070_v2 = vpop.eup %1069  ;;  %832 = vst [vmem:[%s1382_s7 + $0x8] sm:$0xff] %v828_v0  ;;  %v898_v3 = vadd.f32 -1.0, %v1068_v63 }
 0x26e   :  { %v902_v4 = vadd.f32 -1.0, %v1070_v2 }
 0x26f   :  { %v790_v6 = vsel %vm770_vm7, %v766_v21, %v898_v3 }
 0x270   :  { %794 = vst [vmem:[%s1381_s6 + $0x18] sm:$0xff] %v790_v6  ;;  %v830_v7 = vsel %vm810_vm8, %v806_v41, %v902_v4 }
 0x271   :  { %834 = vst [vmem:[%s1382_s7 + $0x18] sm:$0xff] %v830_v7 }

// kernel: aunet_forward.18
= control target key start
LH: loop header
LB: loop body
LE: loop exit
PB: predicated region body
PF: predicated region fallthrough
CT: control target
= control target key end

     0   :  { %v1127_v1 = vmov 0   ;;  %vm30_vm0 = vcmask 7168   ;;  %s1516_s0 = inlined_call_operand.vmem [shape: bf16[384,256], index: 0, kind: input, shape index: {}]   ;;  %s1517_s2 = inlined_call_operand.vmem [shape: bf16[16,384], index: 2, kind: input, shape index: {}]   ;;  %s1518_s1 = inlined_call_operand.vmem [shape: bf16[256,256], index: 1, kind: input, shape index: {}]   ;;  %s1519_s3 = inlined_call_operand.vmem [shape: bf16[16,256], index: 3, kind: input, shape index: {}]   ;;  %s1520_s4 = inlined_call_operand.vmem [shape: f32[16,1], index: 4, kind: input, shape index: {}]   ;;  %s1521_s5 = inlined_call_operand.vmem [shape: f32[16,1], index: 5, kind: input, shape index: {}]   ;;  %s1522_s6 = inlined_call_operand.vmem [shape: f32[16,256], index: 6, kind: output, shape index: {0}]   ;;  %s1523_s7 = inlined_call_operand.vmem [shape: f32[16,256], index: 7, kind: output, shape index: {1}]  }
   0x1   :  { %v980_v0 = vld [vmem:[%s1516_s0 + $0x74] ss:$8 sps:$4 sm:$0xff]   ;;  %418 = vmatprep.mubr.bf16.mxu1 %v1127_v1  ;;  %978 = vset.pattern.permute.xlu0 %v1127_v1  ;;  %v984_v3 = vld [vmem:[%s1516_s0 + $0x70] ss:$8 sps:$4 sm:$0xff]   ;;  %v986_v5 = vld [vmem:[%s1516_s0 + $0x64] ss:$8 sps:$4 sm:$0xff]  }
   0x2   :  { %v982_v2 = vld [vmem:[%s1516_s0 + $0x174] ss:$8 sps:$4 sm:$0xff]   ;;  %979 = vset.pattern.permute.xlu1 %v1127_v1  ;;  %343 = vmatprep.subr.bf16.mxu0 %v980_v0  ;;  %v985_v4 = vld [vmem:[%s1516_s0 + $0x170] ss:$8 sps:$4 sm:$0xff]   ;;  %v988_v6 = vld [vmem:[%s1516_s0 + $0x164] ss:$8 sps:$4 sm:$0xff]  }
   0x3   :  { %386 = vmatprep.subr.bf16.mxu1 %v982_v2  ;;  %344 = vmatpush1.bf16.msra.mxu0 %v984_v3  ;;  %v990_v7 = vld [vmem:[%s1516_s0 + $0x60] ss:$8 sps:$4 sm:$0xff]   ;;  %v992_v9 = vld [vmem:[%s1516_s0 + $0x54] ss:$8 sps:$4 sm:$0xff]   ;;  %v996_v11 = vld [vmem:[%s1516_s0 + $0x50] ss:$8 sps:$4 sm:$0xff]  }
   0x4   :  { %387 = vmatpush1.bf16.msra.mxu1 %v985_v4  ;;  %345 = vmatprep.subr.bf16.mxu0 %v986_v5  ;;  %v991_v8 = vld [vmem:[%s1516_s0 + $0x160] ss:$8 sps:$4 sm:$0xff]   ;;  %v994_v10 = vld [vmem:[%s1516_s0 + $0x154] ss:$8 sps:$4 sm:$0xff]   ;;  %v997_v12 = vld [vmem:[%s1516_s0 + $0x150] ss:$8 sps:$4 sm:$0xff]  }
   0x5   :  { %388 = vmatprep.subr.bf16.mxu1 %v988_v6  ;;  %v998_v13 = vld [vmem:[%s1516_s0 + $0x44] ss:$8 sps:$4 sm:$0xff]   ;;  %v1002_v15 = vld [vmem:[%s1516_s0 + $0x40] ss:$8 sps:$4 sm:$0xff]   ;;  %v1004_v17 = vld [vmem:[%s1516_s0 + $0x34] ss:$8 sps:$4 sm:$0xff]  }
   0x6   :  { %v1000_v14 = vld [vmem:[%s1516_s0 + $0x144] ss:$8 sps:$4 sm:$0xff]   ;;  %v1003_v16 = vld [vmem:[%s1516_s0 + $0x140] ss:$8 sps:$4 sm:$0xff]   ;;  %v1006_v18 = vld [vmem:[%s1516_s0 + $0x134] ss:$8 sps:$4 sm:$0xff]  }
   0x7   :  { %346 = vmatpush1.bf16.msra.mxu0 %v990_v7  ;;  %v1008_v19 = vld [vmem:[%s1516_s0 + $0x30] ss:$8 sps:$4 sm:$0xff]   ;;  %v1010_v21 = vld [vmem:[%s1516_s0 + $0x24] ss:$8 sps:$4 sm:$0xff]   ;;  %v1014_v23 = vld [vmem:[%s1516_s0 + $0x20] ss:$8 sps:$4 sm:$0xff]  }
   0x8   :  { %389 = vmatpush1.bf16.msra.mxu1 %v991_v8  ;;  %347 = vmatprep.subr.bf16.mxu0 %v992_v9  ;;  %v1009_v20 = vld [vmem:[%s1516_s0 + $0x130] ss:$8 sps:$4 sm:$0xff]   ;;  %v1012_v22 = vld [vmem:[%s1516_s0 + $0x124] ss:$8 sps:$4 sm:$0xff]   ;;  %v1015_v24 = vld [vmem:[%s1516_s0 + $0x120] ss:$8 sps:$4 sm:$0xff]  }
   0x9   :  { %390 = vmatprep.subr.bf16.mxu1 %v994_v10  ;;  %v1016_v25 = vld [vmem:[%s1516_s0 + $0x14] ss:$8 sps:$4 sm:$0xff]   ;;  %v1020_v27 = vld [vmem:[%s1516_s0 + $0x10] ss:$8 sps:$4 sm:$0xff]   ;;  %v1022_v29 = vld [vmem:[%s1516_s0 + $0x4] ss:$8 sps:$4 sm:$0xff]  }
   0xa   :  { %v1018_v26 = vld [vmem:[%s1516_s0 + $0x114] ss:$8 sps:$4 sm:$0xff]   ;;  %v1021_v28 = vld [vmem:[%s1516_s0 + $0x110] ss:$8 sps:$4 sm:$0xff]   ;;  %v1024_v30 = vld [vmem:[%s1516_s0 + $0x104] ss:$8 sps:$4 sm:$0xff]  }
   0xb   :  { %348 = vmatpush1.bf16.msra.mxu0 %v996_v11  ;;  %v1026_v31 = vld [vmem:[%s1516_s0] ss:$8 sps:$4 sm:$0xff]   ;;  %v1028_v33 = vld [vmem:[%s1516_s0 + $0xf4] ss:$8 sps:$4 sm:$0xff]   ;;  %v1031_v36 = vld [vmem:[%s1518_s1 + $0x70] ss:$8 sps:$4 sm:$0xff]  }
   0xc   :  { %391 = vmatpush1.bf16.msra.mxu1 %v997_v12  ;;  %349 = vmatprep.subr.bf16.mxu0 %v998_v13  ;;  %v1027_v32 = vld [vmem:[%s1516_s0 + $0x100] ss:$8 sps:$4 sm:$0xff]   ;;  %v1033_v34 = vld [vmem:[%s1518_s1 + $0x74] ss:$8 sps:$4 sm:$0xff]   ;;  %v1034_v37 = vld [vmem:[%s1516_s0 + $0xf0] ss:$8 sps:$4 sm:$0xff]  }
   0xd   :  { %392 = vmatprep.subr.bf16.mxu1 %v1000_v14  ;;  %v1030_v35 = vld [vmem:[%s1517_s2 + $0x8] ss:$12 sps:$4 sm:$0xff]   ;;  %v1035_v38 = vld [vmem:[%s1516_s0 + $0xe4] ss:$8 sps:$4 sm:$0xff]   ;;  %v1043_v44 = vld [vmem:[%s1518_s1 + $0x50] ss:$8 sps:$4 sm:$0xff]  }
   0xe   :  { %v1039_v39 = vld [vmem:[%s1518_s1 + $0x64] ss:$8 sps:$4 sm:$0xff]   ;;  %v1037_v40 = vld [vmem:[%s1518_s1 + $0x60] ss:$8 sps:$4 sm:$0xff]   ;;  %v1041_v42 = vld [vmem:[%s1516_s0 + $0xd4] ss:$8 sps:$4 sm:$0xff]  }
   0xf   :  { %350 = vmatpush1.bf16.msra.mxu0 %v1002_v15  ;;  %v1040_v41 = vld [vmem:[%s1516_s0 + $0xe0] ss:$8 sps:$4 sm:$0xff]   ;;  %v1045_v43 = vld [vmem:[%s1518_s1 + $0x54] ss:$8 sps:$4 sm:$0xff]   ;;  %v1046_v45 = vld [vmem:[%s1516_s0 + $0xd0] ss:$8 sps:$4 sm:$0xff]  }
  0x10   :  { %393 = vmatpush1.bf16.msra.mxu1 %v1003_v16  ;;  %351 = vmatprep.subr.bf16.mxu0 %v1004_v17  ;;  %v1047_v46 = vld [vmem:[%s1516_s0 + $0xc4] ss:$8 sps:$4 sm:$0xff]   ;;  %v1049_v48 = vld [vmem:[%s1518_s1 + $0x40] ss:$8 sps:$4 sm:$0xff]   ;;  %v1053_v50 = vld [vmem:[%s1516_s0 + $0xb4] ss:$8 sps:$4 sm:$0xff]  }
  0x11   :  { %394 = vmatprep.subr.bf16.mxu1 %v1006_v18  ;;  %v1051_v47 = vld [vmem:[%s1518_s1 + $0x44] ss:$8 sps:$4 sm:$0xff]   ;;  %v1052_v49 = vld [vmem:[%s1516_s0 + $0xc0] ss:$8 sps:$4 sm:$0xff]   ;;  %v1057_v52 = vld [vmem:[%s1518_s1 + $0x34] ss:$8 sps:$4 sm:$0xff]  }
  0x12   :  { %v1079_v51 = vld [vmem:[%s1517_s2 + $0x4] ss:$12 sps:$4 sm:$0xff]   ;;  %v1061_v57 = vld [vmem:[%s1518_s1 + $0x20] ss:$8 sps:$4 sm:$0xff]   ;;  %v1065_v59 = vld [vmem:[%s1516_s0 + $0x94] ss:$8 sps:$4 sm:$0xff]  }
  0x13   :  { %352 = vmatpush1.bf16.msra.mxu0 %v1008_v19  ;;  %375 = vmatprep.mubr.bf16.mxu0 %v1079_v51  ;;  %v1055_v53 = vld [vmem:[%s1518_s1 + $0x30] ss:$8 sps:$4 sm:$0xff]   ;;  %v1059_v55 = vld [vmem:[%s1516_s0 + $0xa4] ss:$8 sps:$4 sm:$0xff]   ;;  %v1064_v58 = vld [vmem:[%s1516_s0 + $0xa0] ss:$8 sps:$4 sm:$0xff]  }
  0x14   :  { %395 = vmatpush1.bf16.msra.mxu1 %v1009_v20  ;;  %353 = vmatprep.subr.bf16.mxu0 %v1010_v21  ;;  %v1058_v54 = vld [vmem:[%s1516_s0 + $0xb0] ss:$8 sps:$4 sm:$0xff]   ;;  %v1063_v56 = vld [vmem:[%s1518_s1 + $0x24] ss:$8 sps:$4 sm:$0xff]   ;;  %v1069_v60 = vld [vmem:[%s1518_s1 + $0x14] ss:$8 sps:$4 sm:$0xff]  }
  0x15   :  { %396 = vmatprep.subr.bf16.mxu1 %v1012_v22  ;;  %v1067_v61 = vld [vmem:[%s1518_s1 + $0x10] ss:$8 sps:$4 sm:$0xff]   ;;  %v1106_v63 = vld [vmem:[%s1519_s3 + $0x4] ss:$8 sps:$4 sm:$0xff]   ;;  %v1073_v2 = vld [vmem:[%s1518_s1] ss:$8 sps:$4 sm:$0xff]  }
  0x16   :  { %v1070_v62 = vld [vmem:[%s1516_s0 + $0x90] ss:$8 sps:$4 sm:$0xff]   ;;  %v1071_v0 = vld [vmem:[%s1516_s0 + $0x84] ss:$8 sps:$4 sm:$0xff]   ;;  %v1076_v3 = vld [vmem:[%s1516_s0 + $0x80] ss:$8 sps:$4 sm:$0xff]  }
  0x17   :  { %354 = vmatpush1.bf16.msra.mxu0 %v1014_v23  ;;  %v1075_v1 = vld [vmem:[%s1518_s1 + $0x4] ss:$8 sps:$4 sm:$0xff]   ;;  %v1082_v4 = vld [vmem:[%s1518_s1 + $0xf4] ss:$8 sps:$4 sm:$0xff]   ;;  %v1080_v6 = vld [vmem:[%s1518_s1 + $0xf0] ss:$8 sps:$4 sm:$0xff]  }
  0x18   :  { %397 = vmatpush1.bf16.msra.mxu1 %v1015_v24  ;;  %355 = vmatprep.subr.bf16.mxu0 %v1016_v25  ;;  %v1077_v5 = vld [vmem:[%s1517_s2] ss:$12 sps:$4 sm:$0xff]   ;;  %v1088_v9 = vld [vmem:[%s1518_s1 + $0xd4] ss:$8 sps:$4 sm:$0xff]   ;;  %v1086_v10 = vld [vmem:[%s1518_s1 + $0xd0] ss:$8 sps:$4 sm:$0xff]  }
  0x19   :  { %398 = vmatprep.subr.bf16.mxu1 %v1018_v26  ;;  %v1085_v7 = vld [vmem:[%s1518_s1 + $0xe4] ss:$8 sps:$4 sm:$0xff]   ;;  %v1083_v8 = vld [vmem:[%s1518_s1 + $0xe0] ss:$8 sps:$4 sm:$0xff]   ;;  %v1094_v13 = vld [vmem:[%s1518_s1 + $0xb4] ss:$8 sps:$4 sm:$0xff]  }
  0x1a   :  { %v1091_v11 = vld [vmem:[%s1518_s1 + $0xc4] ss:$8 sps:$4 sm:$0xff]   ;;  %v1089_v12 = vld [vmem:[%s1518_s1 + $0xc0] ss:$8 sps:$4 sm:$0xff]   ;;  %v1092_v14 = vld [vmem:[%s1518_s1 + $0xb0] ss:$8 sps:$4 sm:$0xff]  }
  0x1b   :  { %356 = vmatpush1.bf16.msra.mxu0 %v1020_v27  ;;  %v1097_v15 = vld [vmem:[%s1518_s1 + $0xa4] ss:$8 sps:$4 sm:$0xff]   ;;  %v1095_v16 = vld [vmem:[%s1518_s1 + $0xa0] ss:$8 sps:$4 sm:$0xff]   ;;  %v1100_v17 = vld [vmem:[%s1518_s1 + $0x94] ss:$8 sps:$4 sm:$0xff]  }
  0x1c   :  { %399 = vmatpush1.bf16.msra.mxu1 %v1021_v28  ;;  %357 = vmatprep.subr.bf16.mxu0 %v1022_v29  ;;  %v1098_v18 = vld [vmem:[%s1518_s1 + $0x90] ss:$8 sps:$4 sm:$0xff]   ;;  %v1103_v19 = vld [vmem:[%s1518_s1 + $0x84] ss:$8 sps:$4 sm:$0xff]   ;;  %v1101_v20 = vld [vmem:[%s1518_s1 + $0x80] ss:$8 sps:$4 sm:$0xff]  }
  0x1d   :  { %400 = vmatprep.subr.bf16.mxu1 %v1024_v30  ;;  %v1104_v21 = vld [vmem:[%s1519_s3] ss:$8 sps:$4 sm:$0xff]  }
  0x1f   :  { %358 = vmatpush1.bf16.msra.mxu0 %v1026_v31 }
  0x20   :  { %401 = vmatpush1.bf16.msra.mxu1 %v1027_v32  ;;  %359 = vmatprep.subr.bf16.mxu0 %v1028_v33 }
  0x21   :  { %633 = vmatprep.subr.bf16.mxu1 %v1033_v34 }
  0x23   :  { %419 = vmatmul.mubr.bf16.vlgmr.msra.gmra.mxu1 %v1030_v35  ;;  %360 = vmatpush2.bf16.msra.mxu0 %v1034_v37 }
  0x24   :  { %634 = vmatpush1.bf16.msra.mxu1 %v1031_v36  ;;  %361 = vmatprep.subr.bf16.mxu0 %v1035_v38 }
  0x25   :  { %635 = vmatprep.subr.bf16.mxu1 %v1039_v39  ;;  %665 = vmatprep.mubr.bf16.mxu1 %v1106_v63 }
  0x27   :  { %362 = vmatpush2.bf16.msra.mxu0 %v1040_v41 }
  0x28   :  { %636 = vmatpush1.bf16.msra.mxu1 %v1037_v40  ;;  %363 = vmatprep.subr.bf16.mxu0 %v1041_v42  ;;  %v1128_v42 = vmov 0.0  }
  0x29   :  { %637 = vmatprep.subr.bf16.mxu1 %v1045_v43  ;;  %31 = vst.msk [vmem:[#allocation2] sm:$0xff] %vm30_vm0, %v1128_v42  ;;  %32 = vst.msk [vmem:[#allocation2 + $0x8] sm:$0xff] %vm30_vm0, %v1128_v42 }
  0x2a   :  { %33 = vst.msk [vmem:[#allocation3] sm:$0xff] %vm30_vm0, %v1128_v42  ;;  %34 = vst.msk [vmem:[#allocation3 + $0x8] sm:$0xff] %vm30_vm0, %v1128_v42 }
  0x2b   :  { %364 = vmatpush2.bf16.msra.mxu0 %v1046_v45 }
  0x2c   :  { %638 = vmatpush1.bf16.msra.mxu1 %v1043_v44  ;;  %365 = vmatprep.subr.bf16.mxu0 %v1047_v46 }
  0x2d   :  { %639 = vmatprep.subr.bf16.mxu1 %v1051_v47 }
  0x2f   :  { %366 = vmatpush2.bf16.msra.mxu0 %v1052_v49 }
  0x30   :  { %640 = vmatpush1.bf16.msra.mxu1 %v1049_v48  ;;  %367 = vmatprep.subr.bf16.mxu0 %v1053_v50 }
  0x31   :  { %641 = vmatprep.subr.bf16.mxu1 %v1057_v52 }
  0x33   :  { %368 = vmatpush2.bf16.msra.mxu0 %v1058_v54 }
  0x34   :  { %642 = vmatpush1.bf16.msra.mxu1 %v1055_v53  ;;  %369 = vmatprep.subr.bf16.mxu0 %v1059_v55 }
  0x35   :  { %643 = vmatprep.subr.bf16.mxu1 %v1063_v56 }
  0x37   :  { %370 = vmatpush2.bf16.msra.mxu0 %v1064_v58 }
  0x38   :  { %644 = vmatpush1.bf16.msra.mxu1 %v1061_v57  ;;  %371 = vmatprep.subr.bf16.mxu0 %v1065_v59  ;;  %v676_v59 = vld [vmem:[#allocation2] sm:$0xff] }
  0x39   :  { %645 = vmatprep.subr.bf16.mxu1 %v1069_v60 }
  0x3b   :  { %372 = vmatpush2.bf16.msra.mxu0 %v1070_v62  ;;  %v697_v62 = vld [vmem:[#allocation3] sm:$0xff] }
  0x3c   :  { %646 = vmatpush1.bf16.msra.mxu1 %v1067_v61  ;;  %373 = vmatprep.subr.bf16.mxu0 %v1071_v0 }
  0x3d   :  { %647 = vmatprep.subr.bf16.mxu1 %v1075_v1 }
  0x3f   :  { %374 = vmatpush2.bf16.msra.mxu0 %v1076_v3 }
  0x40   :  { %648 = vmatpush1.bf16.msra.mxu1 %v1073_v2  ;;  %v677_v2 = vld [vmem:[#allocation2 + $0x8] sm:$0xff] }
  0x41   :  { %649 = vmatprep.subr.bf16.mxu1 %v1082_v4 }
  0x42   :  { %376 = vmatmul.mubr.bf16.vlgmr.msra.gmra.mxu0 %v1077_v5 }
  0x44   :  { %650 = vmatpush2.bf16.msra.mxu1 %v1080_v6 }
  0x45   :  { %651 = vmatprep.subr.bf16.mxu1 %v1085_v7  ;;  %v698_v7 = vld [vmem:[#allocation3 + $0x8] sm:$0xff] }
  0x48   :  { %652 = vmatpush2.bf16.msra.mxu1 %v1083_v8 }
  0x49   :  { %653 = vmatprep.subr.bf16.mxu1 %v1088_v9 }
  0x4c   :  { %654 = vmatpush2.bf16.msra.mxu1 %v1086_v10 }
  0x4d   :  { %655 = vmatprep.subr.bf16.mxu1 %v1091_v11 }
  0x50   :  { %656 = vmatpush2.bf16.msra.mxu1 %v1089_v12 }
  0x51   :  { %657 = vmatprep.subr.bf16.mxu1 %v1094_v13 }
  0x54   :  { %658 = vmatpush2.bf16.msra.mxu1 %v1092_v14 }
  0x55   :  { %659 = vmatprep.subr.bf16.mxu1 %v1097_v15 }
  0x58   :  { %660 = vmatpush2.bf16.msra.mxu1 %v1095_v16 }
  0x59   :  { %661 = vmatprep.subr.bf16.mxu1 %v1100_v17 }
  0x5c   :  { %662 = vmatpush2.bf16.msra.mxu1 %v1098_v18 }
  0x5d   :  { %663 = vmatprep.subr.bf16.mxu1 %v1103_v19 }
  0x60   :  { %664 = vmatpush2.bf16.msra.mxu1 %v1101_v20 }
  0x63   :  { %666 = vmatmul.mubr.bf16.vlgmr.msra.gmra.mxu1 %v1104_v21 }
  0xe3   :  { %v420_v22 = vpop.f32.mrf.mxu1 }
  0xe5   :  { %v422_v23 = vpop.f32.mrf.mxu1 }
  0xe7   :  { %v424_v25 = vpop.f32.mrf.mxu1 }
  0xe9   :  { %v426_v33 = vpop.f32.mrf.mxu1 }
 0x102   :  { %v377_v24 = vpop.f32.mrf.mxu0 }
 0x103   :  { %v1424_v27 = vadd.f32 %v420_v22, %v377_v24 }
 0x104   :  { %v379_v26 = vpop.f32.mrf.mxu0 }
 0x105   :  { %v1426_v28 = vadd.f32 %v422_v23, %v379_v26  ;;  %v699_v36 = vmul.f32 %v1424_v27, %v1424_v27 }
 0x106   :  { %v381_v29 = vpop.f32.mrf.mxu0 }
 0x107   :  { %v1428_v30 = vadd.f32 %v424_v25, %v381_v29  ;;  %v678_v31 = vadd.f32 %v1426_v28, %v1424_v27  ;;  %v700_v32 = vmul.f32 %v1426_v28, %v1426_v28  ;;  %v761_v29 = vld [vmem:[%s1520_s4] sm:$0xff] }
 0x108   :  { %v383_v34 = vpop.f32.mrf.mxu0 }
 0x109   :  { %v1434_v35 = vadd.f32 %v426_v33, %v383_v34  ;;  %679 = vadd.xlane.f32.xlu0 %v678_v31  ;;  %v703_v37 = vadd.f32 %v700_v32, %v699_v36  ;;  %v701_v38 = vmul.f32 %v1428_v30, %v1428_v30  ;;  %v762_v33 = vld [vmem:[%s1520_s4 + $0x8] sm:$0xff] }
 0x10b   :  { %v702_v39 = vmul.f32 %v1434_v35, %v1434_v35  ;;  %v681_v41 = vadd.f32 %v1434_v35, %v1428_v30 }
 0x10d   :  { %704 = vadd.xlane.f32.xlu0 %v703_v37  ;;  %v706_v40 = vadd.f32 %v702_v39, %v701_v38  ;;  %v765_v38 = vld [vmem:[%s1521_s5] sm:$0xff] }
 0x10f   :  { %707 = vadd.xlane.f32.xlu1 %v706_v40 }
 0x111   :  { %682 = vadd.xlane.f32.xlu0 %v681_v41  ;;  %v766_v41 = vld [vmem:[%s1521_s5 + $0x8] sm:$0xff] }
 0x123   :  { %v1448_v43 = vpop.f32.mrf.mxu1 }
 0x124   :  { %v709_v46 = vmul.f32 %v1448_v43, %v1448_v43 }
 0x125   :  { %v1450_v44 = vpop.f32.mrf.mxu1 }
 0x126   :  { %v684_v45 = vadd.f32 %v1450_v44, %v1448_v43  ;;  %v710_v47 = vmul.f32 %v1450_v44, %v1450_v44 }
 0x127   :  { %v1458_v48 = vpop.f32.mrf.mxu1 }
 0x128   :  { %685 = vadd.xlane.f32.xlu1 %v684_v45  ;;  %v713_v49 = vadd.f32 %v710_v47, %v709_v46  ;;  %v711_v53 = vmul.f32 %v1458_v48, %v1458_v48 }
 0x129   :  { %v1460_v50 = vpop.f32.mrf.mxu1 }
 0x12a   :  { %v712_v51 = vmul.f32 %v1460_v50, %v1460_v50  ;;  %714 = vadd.xlane.f32.xlu0 %v713_v49  ;;  %v687_v52 = vadd.f32 %v1460_v50, %v1458_v48 }
 0x12c   :  { %688 = vadd.xlane.f32.xlu1 %v687_v52  ;;  %v716_v54 = vadd.f32 %v712_v51, %v711_v53 }
 0x130   :  { %717 = vadd.xlane.f32.xlu1 %v716_v54 }
 0x192   :  { %v680_v55 = vpop.xlane.xlu0 %679 }
 0x196   :  { %v705_v56 = vpop.xlane.xlu0 %704 }
 0x198   :  { %v708_v57 = vpop.xlane.xlu1 %707 }
 0x19a   :  { %v683_v58 = vpop.xlane.xlu0 %682 }
 0x1b1   :  { %v686_v60 = vpop.xlane.xlu1 %685 }
 0x1b2   :  { %v690_v61 = vadd.f32 %v686_v60, %v680_v55 }
 0x1b3   :  { %v715_v63 = vpop.xlane.xlu0 %714 }
 0x1b4   :  { %v692_v0 = vadd.f32 %v690_v61, %v676_v59  ;;  %v719_v1 = vadd.f32 %v715_v63, %v705_v56 }
 0x1b5   :  { %v689_v3 = vpop.xlane.xlu1 %688 }
 0x1b6   :  { %695 = vst.msk [vmem:[#allocation2] sm:$0xff] %vm30_vm0, %v692_v0  ;;  %v721_v4 = vadd.f32 %v719_v1, %v697_v62  ;;  %v691_v5 = vadd.f32 %v689_v3, %v683_v58 }
 0x1b8   :  { %723 = vst.msk [vmem:[#allocation3] sm:$0xff] %vm30_vm0, %v721_v4  ;;  %v693_v6 = vadd.f32 %v691_v5, %v677_v2 }
 0x1b9   :  { %v718_v8 = vpop.xlane.xlu1 %717 }
 0x1ba   :  { %696 = vst.msk [vmem:[#allocation2 + $0x8] sm:$0xff] %vm30_vm0, %v693_v6  ;;  %v720_v9 = vadd.f32 %v718_v8, %v708_v57 }
 0x1bc   :  { %v722_v10 = vadd.f32 %v720_v9, %v698_v7 }
 0x1bd   :  { %v743_v11 = vld [vmem:[#allocation2] sm:$0xff] }
 0x1be   :  { %724 = vst.msk [vmem:[#allocation3 + $0x8] sm:$0xff] %vm30_vm0, %v722_v10  ;;  %v745_v12 = vmul.f32 0.002016129, %v743_v11 }
 0x1bf   :  { %v747_v13 = vld [vmem:[#allocation3] sm:$0xff] }
 0x1c0   :  { %v749_v14 = vmul.f32 0.002016129, %v747_v13  ;;  %v751_v15 = vmul.f32 %v745_v12, %v745_v12 }
 0x1c1   :  { %v744_v16 = vld [vmem:[#allocation2 + $0x8] sm:$0xff] }
 0x1c2   :  { %v753_v17 = vsub.f32 %v749_v14, %v751_v15  ;;  %v746_v18 = vmul.f32 0.002016129, %v744_v16 }
 0x1c4   :  { %v755_v19 = vmax.f32 %v753_v17, 0.0  ;;  %v752_v23 = vmul.f32 %v746_v18, %v746_v18 }
 0x1c5   :  { %v748_v20 = vld [vmem:[#allocation3 + $0x8] sm:$0xff] }
 0x1c6   :  { %v757_v21 = vadd.f32 1e-05, %v755_v19  ;;  %v750_v22 = vmul.f32 0.002016129, %v748_v20 }
 0x1c8   :  { %1107 = vrsqrt.f32 %v757_v21  ;;  %v754_v24 = vsub.f32 %v750_v22, %v752_v23 }
 0x1ca   :  { %v756_v25 = vmax.f32 %v754_v24, 0.0 }
 0x1cc   :  { %v758_v26 = vadd.f32 1e-05, %v756_v25 }
 0x1ce   :  { %1109 = vrsqrt.f32 %v758_v26 }
 0x1d5   :  { %v1108_v31 = vpop.eup %1107 }
 0x1d6   :  { %v763_v32 = vmul.f32 %v1108_v31, %v761_v29 }
 0x1d8   :  { %777 = vperm.xlu0 %978, %v763_v32   ;;  %v767_v37 = vmul.f32 %v763_v32, %v745_v12 }
 0x1da   :  { %v769_v39 = vsub.f32 %v765_v38, %v767_v37 }
 0x1db   :  { %v1110_v34 = vpop.eup %1109 }
 0x1dc   :  { %v764_v36 = vmul.f32 %v1110_v34, %v762_v33 }
 0x1de   :  { %782 = vperm.xlu1 %979, %v764_v36   ;;  %v768_v40 = vmul.f32 %v764_v36, %v746_v18 }
 0x1e0   :  { %v770_v42 = vsub.f32 %v766_v41, %v768_v40 }
 0x1e2   :  { %791 = vperm.xlu1 %979, %v769_v39  }
 0x1e6   :  { %796 = vperm.xlu1 %979, %v770_v42  }
 0x253   :  { %v778_v45 = vpop.permute.xlu0 %777 }
 0x254   :  { %v785_v47 = vmul.f32 %v778_v45, %v1424_v27  ;;  %v786_v49 = vmul.f32 %v778_v45, %v1426_v28  ;;  %v835_v51 = vmul.f32 %v778_v45, %v1448_v43  ;;  %v836_v52 = vmul.f32 %v778_v45, %v1450_v44 }
 0x259   :  { %v783_v46 = vpop.permute.xlu1 %782 }
 0x25a   :  { %v787_v60 = vmul.f32 %v783_v46, %v1428_v30  ;;  %v788_v61 = vmul.f32 %v783_v46, %v1434_v35  ;;  %v837_v27 = vmul.f32 %v783_v46, %v1458_v48  ;;  %v838_v28 = vmul.f32 %v783_v46, %v1460_v50 }
 0x25d   :  { %v792_v53 = vpop.permute.xlu1 %791 }
 0x25e   :  { %v799_v54 = vadd.f32 %v792_v53, %v785_v47  ;;  %v800_v55 = vadd.f32 %v792_v53, %v786_v49  ;;  %v839_v56 = vadd.f32 %v835_v51, %v792_v53  ;;  %v840_v57 = vadd.f32 %v836_v52, %v792_v53 }
 0x260   :  { %v807_v58 = vmin.f32 %v799_v54, 0.0  ;;  %v808_v59 = vmin.f32 %v800_v55, 0.0  ;;  %v847_v62 = vmin.f32 %v839_v56, 0.0  ;;  %v848_v63 = vmin.f32 %v840_v57, 0.0 }
 0x261   :  { %v797_v43 = vpop.permute.xlu1 %796  ;;  %vm803_vm1 = vcmp.gt.f32.partialorder %v799_v54, 0.0  ;;  %vm804_vm2 = vcmp.gt.f32.partialorder %v800_v55, 0.0  ;;  %vm843_vm3 = vcmp.gt.f32.partialorder %v839_v56, 0.0  ;;  %vm844_vm4 = vcmp.gt.f32.partialorder %v840_v57, 0.0 }
 0x262   :  { %v811_v0 = vmul.f32 1.442695, %v807_v58  ;;  %v813_v44 = vmul.f32 1.442695, %v808_v59  ;;  %v801_v1 = vadd.f32 %v797_v43, %v787_v60  ;;  %v802_v2 = vadd.f32 %v797_v43, %v788_v61 }
 0x263   :  { %v851_v3 = vmul.f32 1.442695, %v847_v62  ;;  %v853_v4 = vmul.f32 1.442695, %v848_v63  ;;  %v841_v5 = vadd.f32 %v837_v27, %v797_v43  ;;  %v842_v6 = vadd.f32 %v838_v28, %v797_v43 }
 0x264   :  { %1111 = vpow2.f32 %v811_v0  ;;  %v809_v7 = vmin.f32 %v801_v1, 0.0  ;;  %v810_v30 = vmin.f32 %v802_v2, 0.0  ;;  %vm805_vm5 = vcmp.gt.f32.partialorder %v801_v1, 0.0 }
 0x265   :  { %1113 = vpow2.f32 %v813_v44  ;;  %v849_v8 = vmin.f32 %v841_v5, 0.0  ;;  %v850_v9 = vmin.f32 %v842_v6, 0.0  ;;  %vm806_vm6 = vcmp.gt.f32.partialorder %v802_v2, 0.0 }
 0x266   :  { %1115 = vpow2.f32 %v851_v3  ;;  %v815_v35 = vmul.f32 1.442695, %v809_v7  ;;  %v817_v48 = vmul.f32 1.442695, %v810_v30  ;;  %vm845_vm7 = vcmp.gt.f32.partialorder %v841_v5, 0.0 }
 0x267   :  { %1117 = vpow2.f32 %v853_v4  ;;  %v855_v50 = vmul.f32 1.442695, %v849_v8  ;;  %v857_v10 = vmul.f32 1.442695, %v850_v9  ;;  %vm846_vm8 = vcmp.gt.f32.partialorder %v842_v6, 0.0 }
 0x268   :  { %1119 = vpow2.f32 %v815_v35 }
 0x269   :  { %1121 = vpow2.f32 %v817_v48 }
 0x26a   :  { %1123 = vpow2.f32 %v855_v50 }
 0x26b   :  { %1125 = vpow2.f32 %v857_v10 }
 0x271   :  { %v1112_v11 = vpop.eup %1111 }
 0x272   :  { %v1114_v12 = vpop.eup %1113  ;;  %v968_v13 = vadd.f32 -1.0, %v1112_v11 }
 0x273   :  { %v1116_v14 = vpop.eup %1115  ;;  %v969_v15 = vadd.f32 -1.0, %v1114_v12 }
 0x274   :  { %v1118_v16 = vpop.eup %1117  ;;  %v823_v17 = vsel %vm803_vm1, %v799_v54, %v968_v13  ;;  %v972_v18 = vadd.f32 -1.0, %v1116_v14 }
 0x275   :  { %v1120_v19 = vpop.eup %1119  ;;  %v824_v20 = vsel %vm804_vm2, %v800_v55, %v969_v15  ;;  %827 = vst [vmem:[%s1522_s6] sm:$0xff] %v823_v17  ;;  %v973_v21 = vadd.f32 -1.0, %v1118_v16 }
 0x276   :  { %v1122_v22 = vpop.eup %1121  ;;  %828 = vst [vmem:[%s1522_s6 + $0x8] sm:$0xff] %v824_v20  ;;  %v863_v23 = vsel %vm843_vm3, %v839_v56, %v972_v18  ;;  %v970_v24 = vadd.f32 -1.0, %v1120_v19 }
 0x277   :  { %v1124_v25 = vpop.eup %1123  ;;  %v864_v26 = vsel %vm844_vm4, %v840_v57, %v973_v21  ;;  %867 = vst [vmem:[%s1523_s7] sm:$0xff] %v863_v23  ;;  %v971_v29 = vadd.f32 -1.0, %v1122_v22 }
 0x278   :  { %v1126_v31 = vpop.eup %1125  ;;  %868 = vst [vmem:[%s1523_s7 + $0x8] sm:$0xff] %v864_v26  ;;  %v825_v32 = vsel %vm805_vm5, %v801_v1, %v970_v24  ;;  %v974_v33 = vadd.f32 -1.0, %v1124_v25 }
 0x279   :  { %v826_v34 = vsel %vm806_vm6, %v802_v2, %v971_v29  ;;  %829 = vst [vmem:[%s1522_s6 + $0x10] sm:$0xff] %v825_v32  ;;  %v975_v36 = vadd.f32 -1.0, %v1126_v31 }
 0x27a   :  { %830 = vst [vmem:[%s1522_s6 + $0x18] sm:$0xff] %v826_v34  ;;  %v865_v37 = vsel %vm845_vm7, %v841_v5, %v974_v33 }
 0x27b   :  { %v866_v38 = vsel %vm846_vm8, %v842_v6, %v975_v36  ;;  %869 = vst [vmem:[%s1523_s7 + $0x10] sm:$0xff] %v865_v37 }
 0x27c   :  { %870 = vst [vmem:[%s1523_s7 + $0x18] sm:$0xff] %v866_v38 }

// kernel: aunet_forward.19
= control target key start
LH: loop header
LB: loop body
LE: loop exit
PB: predicated region body
PF: predicated region fallthrough
CT: control target
= control target key end

     0   :  { %s1995_s24 = smov 0   ;;  %s1997_s25 = smov 0   ;;  %s2666_s0 = inlined_call_operand.vmem [shape: bf16[192,768], index: 0, kind: input, shape index: {}]   ;;  %s2667_s1 = inlined_call_operand.vmem [shape: bf16[128,768], index: 1, kind: input, shape index: {}]   ;;  %s2668_s2 = inlined_call_operand.vmem [shape: bf16[16,192], index: 2, kind: input, shape index: {}]   ;;  %s2669_s3 = inlined_call_operand.vmem [shape: bf16[16,128], index: 3, kind: input, shape index: {}]   ;;  %s2670_s4 = inlined_call_operand.vmem [shape: f32[16,1], index: 4, kind: input, shape index: {}]   ;;  %s2671_s5 = inlined_call_operand.vmem [shape: f32[16,1], index: 5, kind: input, shape index: {}]   ;;  %s2672_s6 = inlined_call_operand.vmem [shape: f32[16,768], index: 6, kind: output, shape index: {0}]   ;;  %s2673_s7 = inlined_call_operand.vmem [shape: f32[16,768], index: 7, kind: output, shape index: {1}]  }
   0x1   :  { %s1999_s26 = smov 0  }
   0x2 LB: > { %s2011_s27 = sadd.s32 4294967295, %s1948_s26   ;;  %s2014_s28 = sadd.s32 1, %s1948_s26   ;;  %s1948_s26 = sphi %s1999_s26, %s2677_s26   ;;  %s1944_s25 = sphi %s1997_s25, %s2676_s25   ;;  %s1940_s24 = sphi %s1995_s24, %s2675_s24  }
   0x3   : > { %s22_s29 = ssub.s32 %s1948_s26, %s2014_s28  ;;  %s25_s30 = sadd.s32 1, %s1944_s25 }
   0x4   : > { %p23_p0 = scmp.eq.s32.totalorder %s22_s29, 0  ;;  %p32_p1 = scmp.ne.s32.totalorder %s1944_s25, %s1940_s24 }
   0x5   : > { %p33_p2 = scmp.eq.s32.totalorder %s1948_s26, 0  ;;  %p1545_p4 = scmp.ge.s32.totalorder %s1948_s26, 2 }
   0x6   : > { %s2023_s8 = scalar_select %p23_p0, %s1944_s25, %s25_s30  }
   0x7   : > { %p2025_p3 = por %p33_p2, %p32_p1  ;;  %222 = sbr.rel (%p1545_p4) target bundleno = 68 (0x44), region = 32 }
   0xc   : > { %225 = sbr.rel (!%p2025_p3) target bundleno = 45 (0x2d), region = 36  ;;  %s227_s10 = sand.u32 (%p2025_p3), 1, %s1944_s25  }
   0xd   : > { %s1724_s11 = smul.u32 (%p2025_p3), 12, %s1948_s26 }
   0xe   : > { %s1755_s12 = smul.u32 (%p2025_p3), 288, %s227_s10 }
   0xf   : > { %s2037_s15 = scalar_lea.vmem (%p2025_p3), %s2666_s0, %s1724_s11 }
  0x10   : > { %v247_v0 = vld [vmem:[%s2037_s15] sm:$0xff] (%p2025_p3)  ;;  %v249_v1 = vld [vmem:[%s2037_s15 + $0x18] sm:$0xff] (%p2025_p3)  ;;  %v251_v2 = vld [vmem:[%s2037_s15 + $0x30] sm:$0xff] (%p2025_p3)  ;;  %s2042_s16 = scalar_lea.vmem (%p2025_p3), [#allocation4], %s1755_s12 }
  0x11   : > { %248 = vst [vmem:[%s2042_s16] sm:$0xff] %v247_v0  ;;  %250 = vst [vmem:[%s2042_s16 + $0xc] sm:$0xff] %v249_v1  ;;  %v253_v3 = vld [vmem:[%s2037_s15 + $0x48] sm:$0xff]  ;;  %v255_v4 = vld [vmem:[%s2037_s15 + $0x60] sm:$0xff] }
  0x12   : > { %252 = vst [vmem:[%s2042_s16 + $0x18] sm:$0xff] %v251_v2  ;;  %v257_v5 = vld [vmem:[%s2037_s15 + $0x78] sm:$0xff]  ;;  %254 = vst [vmem:[%s2042_s16 + $0x24] sm:$0xff] %v253_v3  ;;  %v259_v6 = vld [vmem:[%s2037_s15 + $0x90] sm:$0xff] }
  0x13   : > { %256 = vst [vmem:[%s2042_s16 + $0x30] sm:$0xff] %v255_v4  ;;  %258 = vst [vmem:[%s2042_s16 + $0x3c] sm:$0xff] %v257_v5  ;;  %v261_v7 = vld [vmem:[%s2037_s15 + $0xa8] sm:$0xff]  ;;  %v263_v8 = vld [vmem:[%s2037_s15 + $0xc0] sm:$0xff] }
  0x14   : > { %260 = vst [vmem:[%s2042_s16 + $0x48] sm:$0xff] %v259_v6  ;;  %262 = vst [vmem:[%s2042_s16 + $0x54] sm:$0xff] %v261_v7  ;;  %v265_v9 = vld [vmem:[%s2037_s15 + $0xd8] sm:$0xff]  ;;  %v267_v10 = vld [vmem:[%s2037_s15 + $0xf0] sm:$0xff] }
  0x15   : > { %264 = vst [vmem:[%s2042_s16 + $0x60] sm:$0xff] %v263_v8  ;;  %v269_v11 = vld [vmem:[%s2037_s15 + $0x108] sm:$0xff]  ;;  %266 = vst [vmem:[%s2042_s16 + $0x6c] sm:$0xff] %v265_v9  ;;  %v271_v12 = vld [vmem:[%s2037_s15 + $0x120] sm:$0xff] }
  0x16   : > { %268 = vst [vmem:[%s2042_s16 + $0x78] sm:$0xff] %v267_v10  ;;  %270 = vst [vmem:[%s2042_s16 + $0x84] sm:$0xff] %v269_v11  ;;  %v273_v13 = vld [vmem:[%s2037_s15 + $0x138] sm:$0xff]  ;;  %v275_v14 = vld [vmem:[%s2037_s15 + $0x150] sm:$0xff] }
  0x17   : > { %272 = vst [vmem:[%s2042_s16 + $0x90] sm:$0xff] %v271_v12  ;;  %274 = vst [vmem:[%s2042_s16 + $0x9c] sm:$0xff] %v273_v13  ;;  %v277_v15 = vld [vmem:[%s2037_s15 + $0x168] sm:$0xff]  ;;  %v279_v16 = vld [vmem:[%s2037_s15 + $0x180] sm:$0xff] }
  0x18   : > { %276 = vst [vmem:[%s2042_s16 + $0xa8] sm:$0xff] %v275_v14  ;;  %v281_v17 = vld [vmem:[%s2037_s15 + $0x198] sm:$0xff]  ;;  %278 = vst [vmem:[%s2042_s16 + $0xb4] sm:$0xff] %v277_v15  ;;  %v283_v18 = vld [vmem:[%s2037_s15 + $0x1b0] sm:$0xff] }
  0x19   : > { %280 = vst [vmem:[%s2042_s16 + $0xc0] sm:$0xff] %v279_v16  ;;  %282 = vst [vmem:[%s2042_s16 + $0xcc] sm:$0xff] %v281_v17  ;;  %v285_v19 = vld [vmem:[%s2037_s15 + $0x1c8] sm:$0xff]  ;;  %v287_v20 = vld [vmem:[%s2037_s15 + $0x1e0] sm:$0xff] }
  0x1a   : > { %284 = vst [vmem:[%s2042_s16 + $0xd8] sm:$0xff] %v283_v18  ;;  %286 = vst [vmem:[%s2042_s16 + $0xe4] sm:$0xff] %v285_v19  ;;  %v289_v21 = vld [vmem:[%s2037_s15 + $0x1f8] sm:$0xff]  ;;  %v291_v22 = vld [vmem:[%s2037_s15 + $0x210] sm:$0xff] }
  0x1b   : > { %288 = vst [vmem:[%s2042_s16 + $0xf0] sm:$0xff] %v287_v20  ;;  %v293_v23 = vld [vmem:[%s2037_s15 + $0x228] sm:$0xff]  ;;  %290 = vst [vmem:[%s2042_s16 + $0xfc] sm:$0xff] %v289_v21  ;;  %v1549_v25 = vld [vmem:[%s2037_s15 + $0x20] sm:$0xf] }
  0x1c   : > { %292 = vst [vmem:[%s2042_s16 + $0x108] sm:$0xff] %v291_v22  ;;  %294 = vst [vmem:[%s2042_s16 + $0x114] sm:$0xff] %v293_v23  ;;  %v1547_v24 = vld [vmem:[%s2037_s15 + $0x8] sm:$0xf]  ;;  %v1551_v26 = vld [vmem:[%s2037_s15 + $0x38] sm:$0xf] }
  0x1d   : > { %1548 = vst [vmem:[%s2042_s16 + $0x8] sm:$0xf] %v1547_v24  ;;  %1550 = vst [vmem:[%s2042_s16 + $0x14] sm:$0xf] %v1549_v25  ;;  %v1553_v27 = vld [vmem:[%s2037_s15 + $0x50] sm:$0xf] }
  0x1e   : > { %1552 = vst [vmem:[%s2042_s16 + $0x20] sm:$0xf] %v1551_v26  ;;  %v1555_v28 = vld [vmem:[%s2037_s15 + $0x68] sm:$0xf]  ;;  %v1557_v29 = vld [vmem:[%s2037_s15 + $0x80] sm:$0xf] }
  0x1f   : > { %1554 = vst [vmem:[%s2042_s16 + $0x2c] sm:$0xf] %v1553_v27  ;;  %1556 = vst [vmem:[%s2042_s16 + $0x38] sm:$0xf] %v1555_v28  ;;  %v1559_v30 = vld [vmem:[%s2037_s15 + $0x98] sm:$0xf] }
  0x20   : > { %1558 = vst [vmem:[%s2042_s16 + $0x44] sm:$0xf] %v1557_v29  ;;  %v1561_v31 = vld [vmem:[%s2037_s15 + $0xb0] sm:$0xf]  ;;  %v1563_v32 = vld [vmem:[%s2037_s15 + $0xc8] sm:$0xf] }
  0x21   : > { %1560 = vst [vmem:[%s2042_s16 + $0x50] sm:$0xf] %v1559_v30  ;;  %1562 = vst [vmem:[%s2042_s16 + $0x5c] sm:$0xf] %v1561_v31  ;;  %v1565_v33 = vld [vmem:[%s2037_s15 + $0xe0] sm:$0xf] }
  0x22   : > { %1564 = vst [vmem:[%s2042_s16 + $0x68] sm:$0xf] %v1563_v32  ;;  %v1567_v34 = vld [vmem:[%s2037_s15 + $0xf8] sm:$0xf]  ;;  %v1569_v35 = vld [vmem:[%s2037_s15 + $0x110] sm:$0xf] }
  0x23   : > { %1566 = vst [vmem:[%s2042_s16 + $0x74] sm:$0xf] %v1565_v33  ;;  %1568 = vst [vmem:[%s2042_s16 + $0x80] sm:$0xf] %v1567_v34  ;;  %v1571_v36 = vld [vmem:[%s2037_s15 + $0x128] sm:$0xf] }
  0x24   : > { %1570 = vst [vmem:[%s2042_s16 + $0x8c] sm:$0xf] %v1569_v35  ;;  %v1573_v37 = vld [vmem:[%s2037_s15 + $0x140] sm:$0xf]  ;;  %v1575_v38 = vld [vmem:[%s2037_s15 + $0x158] sm:$0xf] }
  0x25   : > { %1572 = vst [vmem:[%s2042_s16 + $0x98] sm:$0xf] %v1571_v36  ;;  %1574 = vst [vmem:[%s2042_s16 + $0xa4] sm:$0xf] %v1573_v37  ;;  %v1577_v39 = vld [vmem:[%s2037_s15 + $0x170] sm:$0xf] }
  0x26   : > { %1576 = vst [vmem:[%s2042_s16 + $0xb0] sm:$0xf] %v1575_v38  ;;  %v1579_v40 = vld [vmem:[%s2037_s15 + $0x188] sm:$0xf]  ;;  %v1581_v41 = vld [vmem:[%s2037_s15 + $0x1a0] sm:$0xf] }
  0x27   : > { %1578 = vst [vmem:[%s2042_s16 + $0xbc] sm:$0xf] %v1577_v39  ;;  %1580 = vst [vmem:[%s2042_s16 + $0xc8] sm:$0xf] %v1579_v40  ;;  %v1583_v42 = vld [vmem:[%s2037_s15 + $0x1b8] sm:$0xf] }
  0x28   : > { %1582 = vst [vmem:[%s2042_s16 + $0xd4] sm:$0xf] %v1581_v41  ;;  %v1585_v43 = vld [vmem:[%s2037_s15 + $0x1d0] sm:$0xf]  ;;  %v1587_v44 = vld [vmem:[%s2037_s15 + $0x1e8] sm:$0xf] }
  0x29   : > { %1584 = vst [vmem:[%s2042_s16 + $0xe0] sm:$0xf] %v1583_v42  ;;  %1586 = vst [vmem:[%s2042_s16 + $0xec] sm:$0xf] %v1585_v43  ;;  %v1589_v45 = vld [vmem:[%s2037_s15 + $0x200] sm:$0xf] }
  0x2a   : > { %1588 = vst [vmem:[%s2042_s16 + $0xf8] sm:$0xf] %v1587_v44  ;;  %v1591_v46 = vld [vmem:[%s2037_s15 + $0x218] sm:$0xf]  ;;  %v1593_v47 = vld [vmem:[%s2037_s15 + $0x230] sm:$0xf] }
  0x2b   : > { %1590 = vst [vmem:[%s2042_s16 + $0x104] sm:$0xf] %v1589_v45  ;;  %1592 = vst [vmem:[%s2042_s16 + $0x110] sm:$0xf] %v1591_v46 }
  0x2c   : > { %1594 = vst [vmem:[%s2042_s16 + $0x11c] sm:$0xf] %v1593_v47 }
  0x2d PF: > { %356 = sbr.rel (!%p2025_p3) target bundleno = 68 (0x44), region = 62  ;;  %s358_s17 = sand.u32 (%p2025_p3), 1, %s1944_s25  }
  0x2e   : > { %s1725_s18 = smul.u32 (%p2025_p3), 12, %s1948_s26 }
  0x2f   : > { %s1756_s19 = smul.u32 (%p2025_p3), 192, %s358_s17 }
  0x30   : > { %s2144_s22 = scalar_lea.vmem (%p2025_p3), %s2667_s1, %s1725_s18 }
  0x31   : > { %v378_v48 = vld [vmem:[%s2144_s22] sm:$0xff] (%p2025_p3)  ;;  %v380_v49 = vld [vmem:[%s2144_s22 + $0x18] sm:$0xff] (%p2025_p3)  ;;  %v382_v50 = vld [vmem:[%s2144_s22 + $0x30] sm:$0xff] (%p2025_p3)  ;;  %s2149_s23 = scalar_lea.vmem (%p2025_p3), [#allocation5], %s1756_s19 }
  0x32   : > { %379 = vst [vmem:[%s2149_s23] sm:$0xff] %v378_v48  ;;  %381 = vst [vmem:[%s2149_s23 + $0xc] sm:$0xff] %v380_v49  ;;  %v384_v51 = vld [vmem:[%s2144_s22 + $0x48] sm:$0xff]  ;;  %v386_v52 = vld [vmem:[%s2144_s22 + $0x60] sm:$0xff] }
  0x33   : > { %383 = vst [vmem:[%s2149_s23 + $0x18] sm:$0xff] %v382_v50  ;;  %v388_v53 = vld [vmem:[%s2144_s22 + $0x78] sm:$0xff]  ;;  %385 = vst [vmem:[%s2149_s23 + $0x24] sm:$0xff] %v384_v51  ;;  %v390_v54 = vld [vmem:[%s2144_s22 + $0x90] sm:$0xff] }
  0x34   : > { %387 = vst [vmem:[%s2149_s23 + $0x30] sm:$0xff] %v386_v52  ;;  %389 = vst [vmem:[%s2149_s23 + $0x3c] sm:$0xff] %v388_v53  ;;  %v392_v55 = vld [vmem:[%s2144_s22 + $0xa8] sm:$0xff]  ;;  %v394_v56 = vld [vmem:[%s2144_s22 + $0xc0] sm:$0xff] }
  0x35   : > { %391 = vst [vmem:[%s2149_s23 + $0x48] sm:$0xff] %v390_v54  ;;  %393 = vst [vmem:[%s2149_s23 + $0x54] sm:$0xff] %v392_v55  ;;  %v396_v57 = vld [vmem:[%s2144_s22 + $0xd8] sm:$0xff]  ;;  %v398_v58 = vld [vmem:[%s2144_s22 + $0xf0] sm:$0xff] }
  0x36   : > { %395 = vst [vmem:[%s2149_s23 + $0x60] sm:$0xff] %v394_v56  ;;  %v400_v59 = vld [vmem:[%s2144_s22 + $0x108] sm:$0xff]  ;;  %397 = vst [vmem:[%s2149_s23 + $0x6c] sm:$0xff] %v396_v57  ;;  %v402_v60 = vld [vmem:[%s2144_s22 + $0x120] sm:$0xff] }
  0x37   : > { %399 = vst [vmem:[%s2149_s23 + $0x78] sm:$0xff] %v398_v58  ;;  %401 = vst [vmem:[%s2149_s23 + $0x84] sm:$0xff] %v400_v59  ;;  %v404_v61 = vld [vmem:[%s2144_s22 + $0x138] sm:$0xff]  ;;  %v406_v62 = vld [vmem:[%s2144_s22 + $0x150] sm:$0xff] }
  0x38   : > { %403 = vst [vmem:[%s2149_s23 + $0x90] sm:$0xff] %v402_v60  ;;  %405 = vst [vmem:[%s2149_s23 + $0x9c] sm:$0xff] %v404_v61  ;;  %v408_v63 = vld [vmem:[%s2144_s22 + $0x168] sm:$0xff]  ;;  %v1598_v1 = vld [vmem:[%s2144_s22 + $0x20] sm:$0xf] }
  0x39   : > { %407 = vst [vmem:[%s2149_s23 + $0xa8] sm:$0xff] %v406_v62  ;;  %v1596_v0 = vld [vmem:[%s2144_s22 + $0x8] sm:$0xf]  ;;  %409 = vst [vmem:[%s2149_s23 + $0xb4] sm:$0xff] %v408_v63  ;;  %v1600_v2 = vld [vmem:[%s2144_s22 + $0x38] sm:$0xf] }
  0x3a   : > { %1597 = vst [vmem:[%s2149_s23 + $0x8] sm:$0xf] %v1596_v0  ;;  %1599 = vst [vmem:[%s2149_s23 + $0x14] sm:$0xf] %v1598_v1  ;;  %v1602_v3 = vld [vmem:[%s2144_s22 + $0x50] sm:$0xf] }
  0x3b   : > { %v1604_v4 = vld [vmem:[%s2144_s22 + $0x68] sm:$0xf]  ;;  %1601 = vst [vmem:[%s2149_s23 + $0x20] sm:$0xf] %v1600_v2  ;;  %1603 = vst [vmem:[%s2149_s23 + $0x2c] sm:$0xf] %v1602_v3 }
  0x3c   : > { %1605 = vst [vmem:[%s2149_s23 + $0x38] sm:$0xf] %v1604_v4  ;;  %v1606_v5 = vld [vmem:[%s2144_s22 + $0x80] sm:$0xf]  ;;  %v1608_v6 = vld [vmem:[%s2144_s22 + $0x98] sm:$0xf] }
  0x3d   : > { %v1610_v7 = vld [vmem:[%s2144_s22 + $0xb0] sm:$0xf]  ;;  %1607 = vst [vmem:[%s2149_s23 + $0x44] sm:$0xf] %v1606_v5  ;;  %1609 = vst [vmem:[%s2149_s23 + $0x50] sm:$0xf] %v1608_v6 }
  0x3e   : > { %1611 = vst [vmem:[%s2149_s23 + $0x5c] sm:$0xf] %v1610_v7  ;;  %v1612_v8 = vld [vmem:[%s2144_s22 + $0xc8] sm:$0xf]  ;;  %v1614_v9 = vld [vmem:[%s2144_s22 + $0xe0] sm:$0xf] }
  0x3f   : > { %v1616_v10 = vld [vmem:[%s2144_s22 + $0xf8] sm:$0xf]  ;;  %1613 = vst [vmem:[%s2149_s23 + $0x68] sm:$0xf] %v1612_v8  ;;  %1615 = vst [vmem:[%s2149_s23 + $0x74] sm:$0xf] %v1614_v9 }
  0x40   : > { %1617 = vst [vmem:[%s2149_s23 + $0x80] sm:$0xf] %v1616_v10  ;;  %v1618_v11 = vld [vmem:[%s2144_s22 + $0x110] sm:$0xf]  ;;  %v1620_v12 = vld [vmem:[%s2144_s22 + $0x128] sm:$0xf] }
  0x41   : > { %v1622_v13 = vld [vmem:[%s2144_s22 + $0x140] sm:$0xf]  ;;  %1619 = vst [vmem:[%s2149_s23 + $0x8c] sm:$0xf] %v1618_v11  ;;  %1621 = vst [vmem:[%s2149_s23 + $0x98] sm:$0xf] %v1620_v12 }
  0x42   : > { %1623 = vst [vmem:[%s2149_s23 + $0xa4] sm:$0xf] %v1622_v13  ;;  %v1624_v14 = vld [vmem:[%s2144_s22 + $0x158] sm:$0xf]  ;;  %v1626_v15 = vld [vmem:[%s2144_s22 + $0x170] sm:$0xf] }
  0x43   : > { %1625 = vst [vmem:[%s2149_s23 + $0xb0] sm:$0xf] %v1624_v14  ;;  %1627 = vst [vmem:[%s2149_s23 + $0xbc] sm:$0xf] %v1626_v15 }
  0x44 PF: > { %p1628_p5 = scmp.ge.s32.totalorder %s1948_s26, 1  ;;  %p454_p6 = scmp.lt.s32.totalorder %s1948_s26, 3 }
  0x46   : > { %p455_p7 = pnand %p1628_p5, %p454_p6 }
  0x47   : > { %s461_s29 = sand.u32 (!%p455_p7), 1, %s1940_s24   ;;  %p1629_p8 = scmp.ne.s32.totalorder (!%p455_p7), %s2011_s27, 0 }
  0x48   : > { %458 = sbr.rel (%p455_p7) target bundleno = 727 (0x2d7), region = 88 }
  0x49   : > { %s1757_s30 = smul.u32 (!%p455_p7), 288, %s461_s29 }
  0x4a   : > { %s1758_s9 = smul.u32 (!%p455_p7), 192, %s461_s29 }
  0x4b   : > { %s2215_s10 = scalar_lea.vmem (!%p455_p7), [#allocation4], %s1757_s30 }
  0x4c   : > { %s2217_s11 = scalar_lea.vmem (!%p455_p7), [#allocation5], %s1758_s9 }
  0x4d   : > { %504 = sbr.rel (%p1629_p8) target bundleno = 85 (0x55), region = 100 }
  0x52   : > { %vm505_vm0 = vcmask 7168   ;;  %v1950_v16 = vmov 0.0  }
  0x53   : > { %506 = vst.msk [vmem:[#allocation2] sm:$0xff] %vm505_vm0, %v1950_v16  ;;  %507 = vst.msk [vmem:[#allocation2 + $0x8] sm:$0xff] %vm505_vm0, %v1950_v16 }
  0x54   : > { %508 = vst.msk [vmem:[#allocation3] sm:$0xff] %vm505_vm0, %v1950_v16  ;;  %509 = vst.msk [vmem:[#allocation3 + $0x8] sm:$0xff] %vm505_vm0, %v1950_v16 }
  0x55 PF: > { %v1788_v17 = vld [vmem:[%s2215_s10 + $0xac] ss:$12 sps:$4 sm:$0xff]   ;;  %v1951_v18 = vmov 0   ;;  %v1790_v19 = vld [vmem:[%s2215_s10 + $0xb0] ss:$12 sps:$4 sm:$0xff]   ;;  %vm761_vm1 = vcmask 523264  }
  0x56   : > { %808 = vmatprep.subr.bf16.mxu1 %v1951_v18  ;;  %765 = vmatprep.subr.bf16.mxu0 %v1788_v17  ;;  %v1791_v20 = vld [vmem:[%s2215_s10 + $0xa8] ss:$12 sps:$4 sm:$0xff]   ;;  %v1794_v22 = vld [vmem:[%s2215_s10 + $0x98] ss:$12 sps:$4 sm:$0xff]   ;;  %v1795_v23 = vld [vmem:[%s2215_s10 + $0x90] ss:$12 sps:$4 sm:$0xff]  }
  0x57   : > { %809 = vmatpush1.bf16.msra.mxu1 %v1790_v19  ;;  %v1792_v21 = vld [vmem:[%s2215_s10 + $0x94] ss:$12 sps:$4 sm:$0xff]   ;;  %766 = vmatpush1.bf16.msra.mxu0 %v1791_v20  ;;  %v1796_v24 = vld [vmem:[%s2215_s10 + $0x7c] ss:$12 sps:$4 sm:$0xff]   ;;  %v1799_v26 = vld [vmem:[%s2215_s10 + $0x78] ss:$12 sps:$4 sm:$0xff]  }
  0x58   : > { %810 = vmatprep.subr.bf16.mxu1 %v1951_v18  ;;  %767 = vmatprep.subr.bf16.mxu0 %v1792_v21  ;;  %v1798_v25 = vld [vmem:[%s2215_s10 + $0x80] ss:$12 sps:$4 sm:$0xff]   ;;  %v1800_v27 = vld [vmem:[%s2215_s10 + $0x64] ss:$12 sps:$4 sm:$0xff]   ;;  %v1802_v28 = vld [vmem:[%s2215_s10 + $0x68] ss:$12 sps:$4 sm:$0xff]  }
  0x59   : > { %v1803_v29 = vld [vmem:[%s2215_s10 + $0x60] ss:$12 sps:$4 sm:$0xff]   ;;  %v1806_v31 = vld [vmem:[%s2215_s10 + $0x50] ss:$12 sps:$4 sm:$0xff]   ;;  %v1807_v32 = vld [vmem:[%s2215_s10 + $0x48] ss:$12 sps:$4 sm:$0xff]  }
  0x5a   : > { %v1804_v30 = vld [vmem:[%s2215_s10 + $0x4c] ss:$12 sps:$4 sm:$0xff]   ;;  %v1808_v33 = vld [vmem:[%s2215_s10 + $0x34] ss:$12 sps:$4 sm:$0xff]   ;;  %v1811_v35 = vld [vmem:[%s2215_s10 + $0x30] ss:$12 sps:$4 sm:$0xff]  }
  0x5b   : > { %811 = vmatpush1.bf16.msra.mxu1 %v1794_v22  ;;  %768 = vmatpush1.bf16.msra.mxu0 %v1795_v23  ;;  %v1810_v34 = vld [vmem:[%s2215_s10 + $0x38] ss:$12 sps:$4 sm:$0xff]   ;;  %v1812_v36 = vld [vmem:[%s2215_s10 + $0x1c] ss:$12 sps:$4 sm:$0xff]   ;;  %v1814_v37 = vld [vmem:[%s2215_s10 + $0x20] ss:$12 sps:$4 sm:$0xff]  }
  0x5c   : > { %812 = vmatprep.subr.bf16.mxu1 %v1951_v18  ;;  %769 = vmatprep.subr.bf16.mxu0 %v1796_v24  ;;  %v1815_v38 = vld [vmem:[%s2215_s10 + $0x18] ss:$12 sps:$4 sm:$0xff]   ;;  %v1818_v40 = vld [vmem:[%s2215_s10 + $0x8] ss:$12 sps:$4 sm:$0xff]   ;;  %v1819_v41 = vld [vmem:[%s2215_s10] ss:$12 sps:$4 sm:$0xff]  }
  0x5d   : > { %v1816_v39 = vld [vmem:[%s2215_s10 + $0x4] ss:$12 sps:$4 sm:$0xff]   ;;  %v1820_v42 = vld [vmem:[%s2215_s10 + $0x10c] ss:$12 sps:$4 sm:$0xff]   ;;  %v1823_v45 = vld [vmem:[%s2215_s10 + $0x108] ss:$12 sps:$4 sm:$0xff]  }
  0x5e   : > { %v1838_v43 = vld [vmem:[%s2668_s2 + $0x4] ss:$8 sps:$4 sm:$0xff]   ;;  %v1822_v44 = vld [vmem:[%s2215_s10 + $0x110] ss:$12 sps:$4 sm:$0xff]   ;;  %v1824_v46 = vld [vmem:[%s2215_s10 + $0xf4] ss:$12 sps:$4 sm:$0xff]  }
  0x5f   : > { %813 = vmatpush1.bf16.msra.mxu1 %v1798_v25  ;;  %770 = vmatpush1.bf16.msra.mxu0 %v1799_v26  ;;  %v1826_v47 = vld [vmem:[%s2215_s10 + $0xf8] ss:$12 sps:$4 sm:$0xff]   ;;  %v1827_v48 = vld [vmem:[%s2215_s10 + $0xf0] ss:$12 sps:$4 sm:$0xff]   ;;  %v1830_v50 = vld [vmem:[%s2215_s10 + $0xe0] ss:$12 sps:$4 sm:$0xff]  }
  0x60   : > { %814 = vmatprep.subr.bf16.mxu1 %v1951_v18  ;;  %771 = vmatprep.subr.bf16.mxu0 %v1800_v27  ;;  %v1828_v49 = vld [vmem:[%s2215_s10 + $0xdc] ss:$12 sps:$4 sm:$0xff]   ;;  %v1831_v51 = vld [vmem:[%s2215_s10 + $0xd8] ss:$12 sps:$4 sm:$0xff]   ;;  %v1835_v54 = vld [vmem:[%s2215_s10 + $0xc0] ss:$12 sps:$4 sm:$0xff]  }
  0x61   : > { %1669 = vmatprep.mubr.msk.bf16.mxu1 %vm761_vm1, %v1838_v43  ;;  %1668 = vmatprep.mubr.msk.bf16.mxu0 %vm761_vm1, %v1838_v43  ;;  %v1832_v52 = vld [vmem:[%s2215_s10 + $0xc4] ss:$12 sps:$4 sm:$0xff]   ;;  %v1834_v53 = vld [vmem:[%s2215_s10 + $0xc8] ss:$12 sps:$4 sm:$0xff]   ;;  %v1841_v55 = vld [vmem:[%s2217_s11 + $0xac] ss:$12 sps:$4 sm:$0xff]  }
  0x62   : > { %v1836_v56 = vld [vmem:[%s2668_s2] ss:$8 sps:$4 sm:$0xff]   ;;  %v1842_v57 = vld [vmem:[%s2217_s11 + $0xb0] ss:$12 sps:$4 sm:$0xff]   ;;  %v1952_v58 = vmov 0.0   ;;  %vm1953_vm2 = vmmov 0  }
  0x63   : > { %815 = vmatpush1.bf16.msra.mxu1 %v1802_v28  ;;  %772 = vmatpush1.bf16.msra.mxu0 %v1803_v29  ;;  %v1839_v59 = vld [vmem:[%s2217_s11 + $0xa8] ss:$12 sps:$4 sm:$0xff]   ;;  %v1846_v61 = vld [vmem:[%s2217_s11 + $0x98] ss:$12 sps:$4 sm:$0xff]   ;;  %v1843_v62 = vld [vmem:[%s2217_s11 + $0x90] ss:$12 sps:$4 sm:$0xff]  }
  0x64   : > { %816 = vmatprep.subr.bf16.mxu1 %v1951_v18  ;;  %773 = vmatprep.subr.bf16.mxu0 %v1804_v30  ;;  %v1845_v60 = vld [vmem:[%s2217_s11 + $0x94] ss:$12 sps:$4 sm:$0xff]   ;;  %v1849_v63 = vld [vmem:[%s2217_s11 + $0x7c] ss:$12 sps:$4 sm:$0xff]   ;;  %v1847_v1 = vld [vmem:[%s2217_s11 + $0x78] ss:$12 sps:$4 sm:$0xff]  }
  0x65   : > { %v1850_v0 = vld [vmem:[%s2217_s11 + $0x80] ss:$12 sps:$4 sm:$0xff]   ;;  %v1853_v2 = vld [vmem:[%s2217_s11 + $0x64] ss:$12 sps:$4 sm:$0xff]   ;;  %v1854_v3 = vld [vmem:[%s2217_s11 + $0x68] ss:$12 sps:$4 sm:$0xff]  }
  0x66   : > { %v1851_v4 = vld [vmem:[%s2217_s11 + $0x60] ss:$12 sps:$4 sm:$0xff]   ;;  %v1858_v6 = vld [vmem:[%s2217_s11 + $0x50] ss:$12 sps:$4 sm:$0xff]   ;;  %v1855_v7 = vld [vmem:[%s2217_s11 + $0x48] ss:$12 sps:$4 sm:$0xff]  }
  0x67   : > { %817 = vmatpush1.bf16.msra.mxu1 %v1806_v31  ;;  %774 = vmatpush1.bf16.msra.mxu0 %v1807_v32  ;;  %v1857_v5 = vld [vmem:[%s2217_s11 + $0x4c] ss:$12 sps:$4 sm:$0xff]   ;;  %v1861_v8 = vld [vmem:[%s2217_s11 + $0x34] ss:$12 sps:$4 sm:$0xff]   ;;  %v1859_v10 = vld [vmem:[%s2217_s11 + $0x30] ss:$12 sps:$4 sm:$0xff]  }
  0x68   : > { %818 = vmatprep.subr.bf16.mxu1 %v1951_v18  ;;  %775 = vmatprep.subr.bf16.mxu0 %v1808_v33  ;;  %v1862_v9 = vld [vmem:[%s2217_s11 + $0x38] ss:$12 sps:$4 sm:$0xff]   ;;  %v1865_v11 = vld [vmem:[%s2217_s11 + $0x1c] ss:$12 sps:$4 sm:$0xff]   ;;  %v1866_v12 = vld [vmem:[%s2217_s11 + $0x20] ss:$12 sps:$4 sm:$0xff]  }
  0x69   : > { %v1863_v13 = vld [vmem:[%s2217_s11 + $0x18] ss:$12 sps:$4 sm:$0xff]   ;;  %v1870_v15 = vld [vmem:[%s2217_s11 + $0x8] ss:$12 sps:$4 sm:$0xff]   ;;  %v1867_v16 = vld [vmem:[%s2217_s11] ss:$12 sps:$4 sm:$0xff]  }
  0x6a   : > { %v1869_v14 = vld [vmem:[%s2217_s11 + $0x4] ss:$12 sps:$4 sm:$0xff]   ;;  %s1162_s16 = smul.u32 384, %s2011_s27  ;;  %vm1123_vm3 = vcmask 7168   ;;  %p1697_p9 = scmp.ne.s32.totalorder %s2011_s27, 1 }
  0x6b   : > { %819 = vmatpush1.bf16.msra.mxu1 %v1810_v34  ;;  %776 = vmatpush1.bf16.msra.mxu0 %v1811_v35  ;;  %v1871_v17 = vld [vmem:[%s2669_s3] sm:$0xff]  }
  0x6c   : > { %820 = vmatprep.subr.bf16.mxu1 %v1951_v18  ;;  %777 = vmatprep.subr.bf16.mxu0 %v1812_v36  ;;  %s2303_s17 = sshra.s32 %s1162_s16, 7 }
  0x6d   : > { %s1695_s18 = sshll.u32 %s2303_s17, 3 }
  0x6e   : > { %s1166_s21 = scalar_lea.vmem %s2672_s6, %s1695_s18  ;;  %s1174_s29 = scalar_lea.vmem %s2673_s7, %s1695_s18 }
  0x6f   : > { %821 = vmatpush1.bf16.msra.mxu1 %v1814_v37  ;;  %778 = vmatpush1.bf16.msra.mxu0 %v1815_v38 }
  0x70   : > { %822 = vmatprep.subr.bf16.mxu1 %v1951_v18  ;;  %779 = vmatprep.subr.bf16.mxu0 %v1816_v39 }
  0x73   : > { %823 = vmatpush1.bf16.msra.mxu1 %v1818_v40  ;;  %780 = vmatpush1.bf16.msra.mxu0 %v1819_v41 }
  0x74   : > { %832 = vmatprep.subr.bf16.mxu1 %v1951_v18  ;;  %789 = vmatprep.subr.bf16.mxu0 %v1820_v42 }
  0x77   : > { %833 = vmatpush2.bf16.msra.mxu1 %v1822_v44  ;;  %790 = vmatpush2.bf16.msra.mxu0 %v1823_v45 }
  0x78   : > { %834 = vmatprep.subr.bf16.mxu1 %v1951_v18  ;;  %791 = vmatprep.subr.bf16.mxu0 %v1824_v46 }
  0x7b   : > { %835 = vmatpush2.bf16.msra.mxu1 %v1826_v47  ;;  %792 = vmatpush2.bf16.msra.mxu0 %v1827_v48 }
  0x7c   : > { %836 = vmatprep.subr.bf16.mxu1 %v1951_v18  ;;  %793 = vmatprep.subr.bf16.mxu0 %v1828_v49 }
  0x7f   : > { %837 = vmatpush2.bf16.msra.mxu1 %v1830_v50  ;;  %794 = vmatpush2.bf16.msra.mxu0 %v1831_v51 }
  0x80   : > { %838 = vmatprep.subr.bf16.mxu1 %v1951_v18  ;;  %795 = vmatprep.subr.bf16.mxu0 %v1832_v52 }
  0x83   : > { %839 = vmatpush2.bf16.msra.mxu1 %v1834_v53  ;;  %796 = vmatpush2.bf16.msra.mxu0 %v1835_v54 }
  0x84   : > { %1735 = vmatprep.subr.bf16.mxu1 %v1952_v58  ;;  %1017 = vmatprep.subr.bf16.mxu0 %v1841_v55 }
  0x86   : > { %841 = vmatmul.mubr.bf16.vlgmr.msra.gmra.mxu1 %v1836_v56  ;;  %798 = vmatmul.mubr.bf16.vlgmr.msra.gmra.mxu0 %v1836_v56 }
  0x87   : > { %1736 = vmatpush3.bf16.msra.mxu1 %v1842_v57  ;;  %1018 = vmatpush1.bf16.msra.mxu0 %v1839_v59 }
  0x88   : > { %1737 = vmatprep.subr.bf16.mxu1 %v1952_v58  ;;  %1019 = vmatprep.subr.bf16.mxu0 %v1845_v60 }
  0x89   : > { %1751 = vmatprep.mubr.msk.bf16.mxu1 %vm1953_vm2, %v1952_v58  ;;  %1049 = vmatprep.mubr.bf16.mxu0 %v1951_v18 }
  0x8b   : > { %1738 = vmatpush3.bf16.msra.mxu1 %v1846_v61  ;;  %1020 = vmatpush1.bf16.msra.mxu0 %v1843_v62 }
  0x8c   : > { %1739 = vmatprep.subr.bf16.mxu1 %v1952_v58  ;;  %1021 = vmatprep.subr.bf16.mxu0 %v1849_v63 }
  0x8f   : > { %1740 = vmatpush3.bf16.msra.mxu1 %v1850_v0  ;;  %1022 = vmatpush1.bf16.msra.mxu0 %v1847_v1 }
  0x90   : > { %1741 = vmatprep.subr.bf16.mxu1 %v1952_v58  ;;  %1023 = vmatprep.subr.bf16.mxu0 %v1853_v2  ;;  %v1101_v2 = vld [vmem:[#allocation2] sm:$0xff] }
  0x93   : > { %1742 = vmatpush3.bf16.msra.mxu1 %v1854_v3  ;;  %1024 = vmatpush1.bf16.msra.mxu0 %v1851_v4 }
  0x94   : > { %1743 = vmatprep.subr.bf16.mxu1 %v1952_v58  ;;  %1025 = vmatprep.subr.bf16.mxu0 %v1857_v5  ;;  %v1126_v5 = vld [vmem:[#allocation3] sm:$0xff] }
  0x97   : > { %1744 = vmatpush3.bf16.msra.mxu1 %v1858_v6  ;;  %1026 = vmatpush1.bf16.msra.mxu0 %v1855_v7 }
  0x98   : > { %1745 = vmatprep.subr.bf16.mxu1 %v1952_v58  ;;  %1027 = vmatprep.subr.bf16.mxu0 %v1861_v8 }
  0x9b   : > { %1746 = vmatpush3.bf16.msra.mxu1 %v1862_v9  ;;  %1028 = vmatpush1.bf16.msra.mxu0 %v1859_v10  ;;  %v1102_v9 = vld [vmem:[#allocation2 + $0x8] sm:$0xff] }
  0x9c   : > { %1747 = vmatprep.subr.bf16.mxu1 %v1952_v58  ;;  %1029 = vmatprep.subr.bf16.mxu0 %v1865_v11 }
  0x9f   : > { %1748 = vmatpush3.bf16.msra.mxu1 %v1866_v12  ;;  %1030 = vmatpush1.bf16.msra.mxu0 %v1863_v13 }
  0xa0   : > { %1749 = vmatprep.subr.bf16.mxu1 %v1952_v58  ;;  %1031 = vmatprep.subr.bf16.mxu0 %v1869_v14  ;;  %v1127_v14 = vld [vmem:[#allocation3 + $0x8] sm:$0xff] }
  0xa3   : > { %1750 = vmatpush3.bf16.msra.mxu1 %v1870_v15  ;;  %1032 = vmatpush1.bf16.msra.mxu0 %v1867_v16 }
  0xa6   : > { %1752 = vmatmul.mubr.bf16.vlgmr.msra.gmra.mxu1 %v1871_v17  ;;  %1050 = vmatmul.mubr.bf16.vlgmr.msra.gmra.mxu0 %v1871_v17 }
 0x146   : > { %v842_v18 = vpop.f32.mrf.mxu1  ;;  %v799_v19 = vpop.f32.mrf.mxu0 }
 0x147   : > { %1169 = vst [vmem:[%s1166_s21 + $0x10] sm:$0xff] %v842_v18  ;;  %v1128_v20 = vmul.f32 %v799_v19, %v799_v19  ;;  %1167 = vst [vmem:[%s1166_s21] sm:$0xff] %v799_v19  ;;  %v1130_v29 = vmul.f32 %v842_v18, %v842_v18 }
 0x148   : > { %v844_v21 = vpop.f32.mrf.mxu1  ;;  %v801_v22 = vpop.f32.mrf.mxu0 }
 0x149   : > { %v1129_v23 = vmul.f32 %v801_v22, %v801_v22  ;;  %1168 = vst [vmem:[%s1166_s21 + $0x8] sm:$0xff] %v801_v22  ;;  %v1103_v25 = vadd.f32 %v801_v22, %v799_v19 }
 0x14a   : > { %v845_v24 = vpop.f32.mrf.mxu1  ;;  %v803_v26 = vpop.f32.mrf.mxu0 }
 0x14b   : > { %1172 = vst [vmem:[%s1166_s21 + $0x40] sm:$0xff] %v845_v24  ;;  %1170 = vst [vmem:[%s1166_s21 + $0x30] sm:$0xff] %v803_v26  ;;  %v1104_v28 = vadd.f32 %v1103_v25, %v842_v18  ;;  %v1134_v30 = vadd.f32 %v1129_v23, %v1128_v20  ;;  %v1131_v32 = vmul.f32 %v803_v26, %v803_v26 }
 0x14c   : > { %v847_v27 = vpop.f32.mrf.mxu1  ;;  %v805_v31 = vpop.f32.mrf.mxu0  ;;  %v1133_v35 = vmul.f32 %v845_v24, %v845_v24 }
 0x14d   : > { %v1132_v33 = vmul.f32 %v805_v31, %v805_v31  ;;  %1171 = vst [vmem:[%s1166_s21 + $0x38] sm:$0xff] %v805_v31  ;;  %1105 = vadd.xlane.f32.xlu0 %v1104_v28  ;;  %v1135_v34 = vadd.f32 %v1134_v30, %v1130_v29  ;;  %v1107_v37 = vadd.f32 %v805_v31, %v803_v26 }
 0x14f   : > { %v1138_v36 = vadd.f32 %v1132_v33, %v1131_v32  ;;  %v1108_v39 = vadd.f32 %v1107_v37, %v845_v24 }
 0x151   : > { %1136 = vadd.xlane.f32.xlu0 %v1135_v34  ;;  %v1139_v38 = vadd.f32 %v1138_v36, %v1133_v35 }
 0x153   : > { %1140 = vadd.xlane.f32.xlu1 %v1139_v38 }
 0x155   : > { %1109 = vadd.xlane.f32.xlu0 %v1108_v39 }
 0x166   : > { %v1094_v40 = vpop.f32.mrf.mxu1  ;;  %v1051_v41 = vpop.f32.mrf.mxu0 }
 0x167   : > { %1177 = vst [vmem:[%s1174_s29 + $0x10] sm:$0xff] %v1094_v40  ;;  %1175 = vst [vmem:[%s1174_s29] sm:$0xff] %v1051_v41  ;;  %v1142_v44 = vmul.f32 %v1051_v41, %v1051_v41  ;;  %v1144_v48 = vmul.f32 %v1094_v40, %v1094_v40 }
 0x168   : > { %v1753_v42 = vpop.f32.mrf.mxu1  ;;  %v1053_v43 = vpop.f32.mrf.mxu0 }
 0x169   : > { %v1143_v45 = vmul.f32 %v1053_v43, %v1053_v43  ;;  %1176 = vst [vmem:[%s1174_s29 + $0x8] sm:$0xff] %v1053_v43  ;;  %v1111_v47 = vadd.f32 %v1053_v43, %v1051_v41 }
 0x16a   : > { %v1097_v46 = vpop.f32.mrf.mxu1  ;;  %v1055_v49 = vpop.f32.mrf.mxu0 }
 0x16b   : > { %1180 = vst [vmem:[%s1174_s29 + $0x40] sm:$0xff] %v1097_v46  ;;  %1178 = vst [vmem:[%s1174_s29 + $0x30] sm:$0xff] %v1055_v49  ;;  %v1112_v51 = vadd.f32 %v1111_v47, %v1094_v40  ;;  %v1148_v52 = vadd.f32 %v1143_v45, %v1142_v44  ;;  %v1145_v54 = vmul.f32 %v1055_v49, %v1055_v49 }
 0x16c   : > { %v1754_v50 = vpop.f32.mrf.mxu1  ;;  %v1057_v53 = vpop.f32.mrf.mxu0  ;;  %v1147_v60 = vmul.f32 %v1097_v46, %v1097_v46 }
 0x16d   : > { %v1115_v55 = vadd.f32 %v1057_v53, %v1055_v49  ;;  %v1146_v56 = vmul.f32 %v1057_v53, %v1057_v53  ;;  %1179 = vst [vmem:[%s1174_s29 + $0x38] sm:$0xff] %v1057_v53  ;;  %1113 = vadd.xlane.f32.xlu1 %v1112_v51  ;;  %v1149_v57 = vadd.f32 %v1148_v52, %v1144_v48 }
 0x16f   : > { %1150 = vadd.xlane.f32.xlu0 %v1149_v57  ;;  %v1116_v58 = vadd.f32 %v1115_v55, %v1097_v46  ;;  %v1152_v59 = vadd.f32 %v1146_v56, %v1145_v54 }
 0x171   : > { %1117 = vadd.xlane.f32.xlu1 %v1116_v58  ;;  %v1153_v61 = vadd.f32 %v1152_v59, %v1147_v60 }
 0x175   : > { %1154 = vadd.xlane.f32.xlu1 %v1153_v61 }
 0x1d6   : > { %v1106_v62 = vpop.xlane.xlu0 %1105 }
 0x1da   : > { %v1137_v63 = vpop.xlane.xlu0 %1136 }
 0x1dc   : > { %v1141_v0 = vpop.xlane.xlu1 %1140 }
 0x1de   : > { %v1110_v1 = vpop.xlane.xlu0 %1109 }
 0x1f6   : > { %v1114_v3 = vpop.xlane.xlu1 %1113 }
 0x1f7   : > { %v1119_v4 = vadd.f32 %v1114_v3, %v1106_v62 }
 0x1f8   : > { %v1151_v6 = vpop.xlane.xlu0 %1150 }
 0x1f9   : > { %v1121_v7 = vadd.f32 %v1119_v4, %v1101_v2  ;;  %v1156_v8 = vadd.f32 %v1151_v6, %v1137_v63 }
 0x1fa   : > { %v1118_v10 = vpop.xlane.xlu1 %1117 }
 0x1fb   : > { %1124 = vst.msk [vmem:[#allocation2] sm:$0xff] %vm1123_vm3, %v1121_v7  ;;  %v1158_v11 = vadd.f32 %v1156_v8, %v1126_v5  ;;  %v1120_v12 = vadd.f32 %v1118_v10, %v1110_v1 }
 0x1fd   : > { %1160 = vst.msk [vmem:[#allocation3] sm:$0xff] %vm1123_vm3, %v1158_v11  ;;  %v1122_v13 = vadd.f32 %v1120_v12, %v1102_v9 }
 0x1fe   : > { %v1155_v15 = vpop.xlane.xlu1 %1154 }
 0x1ff   : > { %1125 = vst.msk [vmem:[#allocation2 + $0x8] sm:$0xff] %vm1123_vm3, %v1122_v13  ;;  %v1157_v16 = vadd.f32 %v1155_v15, %v1141_v0  ;;  %1184 = sbr.rel (%p1697_p9) target bundleno = 727 (0x2d7), region = 104 }
 0x201   : > { %v1159_v17 = vadd.f32 %v1157_v16, %v1127_v14 }
 0x203   : > { %1161 = vst.msk [vmem:[#allocation3 + $0x8] sm:$0xff] %vm1123_vm3, %v1159_v17 }
 0x204   : > { %v1185_v18 = vld [vmem:[#allocation2] sm:$0xff]  ;;  %v1189_v19 = vld [vmem:[#allocation3] sm:$0xff]  ;;  %v1954_v20 = vmov 0   ;;  %v1204_v36 = vld [vmem:[%s2670_s4 + $0x8] sm:$0xff] }
 0x205   : > { %1872 = vset.pattern.permute.xlu0 %v1954_v20  ;;  %v1187_v21 = vmul.f32 0.00096153846, %v1185_v18  ;;  %v1191_v22 = vmul.f32 0.00096153846, %v1189_v19  ;;  %1873 = vset.pattern.permute.xlu1 %v1954_v20  ;;  %v1203_v35 = vld [vmem:[%s2670_s4] sm:$0xff]  ;;  %v1208_v43 = vld [vmem:[%s2671_s5 + $0x8] sm:$0xff] }
 0x206   : > { %v1186_v23 = vld [vmem:[#allocation2 + $0x8] sm:$0xff]  ;;  %v1207_v41 = vld [vmem:[%s2671_s5] sm:$0xff]  ;;  %v1215_v49 = vld [vmem:[%s2672_s6 + $0x10] sm:$0xff] }
 0x207   : > { %v1188_v25 = vmul.f32 0.00096153846, %v1186_v23  ;;  %v1193_v27 = vmul.f32 %v1187_v21, %v1187_v21  ;;  %v1213_v47 = vld [vmem:[%s2672_s6] sm:$0xff]  ;;  %v1214_v48 = vld [vmem:[%s2672_s6 + $0x8] sm:$0xff]  ;;  %v1216_v50 = vld [vmem:[%s2672_s6 + $0x18] sm:$0xff] }
 0x208   : > { %v1217_v52 = vld [vmem:[%s2672_s6 + $0x20] sm:$0xff]  ;;  %v1218_v53 = vld [vmem:[%s2672_s6 + $0x28] sm:$0xff]  ;;  %v1355_v56 = vld [vmem:[%s2673_s7 + $0x10] sm:$0xff] }
 0x209   : > { %v1194_v28 = vmul.f32 %v1188_v25, %v1188_v25  ;;  %v1195_v29 = vsub.f32 %v1191_v22, %v1193_v27  ;;  %v1353_v54 = vld [vmem:[%s2673_s7] sm:$0xff]  ;;  %v1354_v55 = vld [vmem:[%s2673_s7 + $0x8] sm:$0xff]  ;;  %v1356_v0 = vld [vmem:[%s2673_s7 + $0x18] sm:$0xff] }
 0x20a   : > { %v1190_v24 = vld [vmem:[#allocation3 + $0x8] sm:$0xff]  ;;  %v1357_v1 = vld [vmem:[%s2673_s7 + $0x20] sm:$0xff]  ;;  %v1358_v2 = vld [vmem:[%s2673_s7 + $0x28] sm:$0xff] }
 0x20b   : > { %v1192_v26 = vmul.f32 0.00096153846, %v1190_v24  ;;  %v1197_v31 = vmax.f32 %v1195_v29, 0.0  ;;  %v1219_v6 = vld [vmem:[%s2672_s6 + $0x30] sm:$0xff]  ;;  %v1220_v7 = vld [vmem:[%s2672_s6 + $0x38] sm:$0xff]  ;;  %v1221_v8 = vld [vmem:[%s2672_s6 + $0x40] sm:$0xff] }
 0x20c   : > { %v1222_v10 = vld [vmem:[%s2672_s6 + $0x48] sm:$0xff]  ;;  %v1223_v11 = vld [vmem:[%s2672_s6 + $0x50] sm:$0xff] }
 0x20d   : > { %v1196_v30 = vsub.f32 %v1192_v26, %v1194_v28  ;;  %v1199_v33 = vadd.f32 1e-05, %v1197_v31 }
 0x20f   : > { %v1198_v32 = vmax.f32 %v1196_v30, 0.0  ;;  %1874 = vrsqrt.f32 %v1199_v33  ;;  %v1359_v33 = vld [vmem:[%s2673_s7 + $0x30] sm:$0xff] }
 0x211   : > { %v1200_v34 = vadd.f32 1e-05, %v1198_v32  ;;  %v1224_v32 = vld [vmem:[%s2672_s6 + $0x58] sm:$0xff] }
 0x213   : > { %1876 = vrsqrt.f32 %v1200_v34 }
 0x21c   : > { %v1875_v37 = vpop.eup %1874 }
 0x21d   : > { %v1205_v39 = vmul.f32 %v1875_v37, %v1203_v35 }
 0x21f   : > { %1227 = vperm.xlu0 %1872, %v1205_v39   ;;  %v1209_v42 = vmul.f32 %v1205_v39, %v1187_v21  ;;  %v1361_v39 = vld [vmem:[%s2673_s7 + $0x40] sm:$0xff] }
 0x220   : > { %v1877_v38 = vpop.eup %1876 }
 0x221   : > { %v1206_v40 = vmul.f32 %v1877_v38, %v1204_v36  ;;  %v1211_v45 = vsub.f32 %v1207_v41, %v1209_v42  ;;  %v1360_v38 = vld [vmem:[%s2673_s7 + $0x38] sm:$0xff] }
 0x223   : > { %v1210_v44 = vmul.f32 %v1206_v40, %v1188_v25  ;;  %1232 = vperm.xlu0 %1872, %v1206_v40   ;;  %1249 = vperm.xlu1 %1873, %v1211_v45  }
 0x225   : > { %v1212_v46 = vsub.f32 %v1208_v43, %v1210_v44 }
 0x227   : > { %1254 = vperm.xlu1 %1873, %v1212_v46  }
 0x29a   : > { %v1228_v51 = vpop.permute.xlu0 %1227 }
 0x29b   : > { %v1235_v57 = vmul.f32 %v1228_v51, %v1213_v47  ;;  %v1236_v58 = vmul.f32 %v1228_v51, %v1214_v48  ;;  %v1237_v59 = vmul.f32 %v1228_v51, %v1215_v49  ;;  %v1238_v60 = vmul.f32 %v1228_v51, %v1216_v50 }
 0x29c   : > { %v1239_v61 = vmul.f32 %v1228_v51, %v1217_v52  ;;  %v1240_v62 = vmul.f32 %v1228_v51, %v1218_v53  ;;  %v1365_v3 = vmul.f32 %v1353_v54, %v1228_v51  ;;  %v1366_v4 = vmul.f32 %v1354_v55, %v1228_v51 }
 0x29d   : > { %v1367_v5 = vmul.f32 %v1355_v56, %v1228_v51  ;;  %v1368_v16 = vmul.f32 %v1356_v0, %v1228_v51  ;;  %v1369_v17 = vmul.f32 %v1357_v1, %v1228_v51  ;;  %v1370_v20 = vmul.f32 %v1358_v2, %v1228_v51  ;;  %v1363_v0 = vld [vmem:[%s2673_s7 + $0x50] sm:$0xff] }
 0x29e   : > { %v1250_v63 = vpop.permute.xlu1 %1249  ;;  %v2378_v9 = vpop.permute.xlu0 %1232 }
 0x29f   : > { %v2386_v12 = vadd.f32 %v1250_v63, %v1235_v57  ;;  %v2388_v13 = vadd.f32 %v1250_v63, %v1236_v58  ;;  %v2390_v14 = vadd.f32 %v1250_v63, %v1237_v59  ;;  %v2392_v15 = vadd.f32 %v1250_v63, %v1238_v60  ;;  %v1362_v57 = vld [vmem:[%s2673_s7 + $0x48] sm:$0xff] }
 0x2a0   : > { %v2394_v18 = vadd.f32 %v1250_v63, %v1239_v61  ;;  %v2396_v19 = vadd.f32 %v1250_v63, %v1240_v62  ;;  %v1241_v21 = vmul.f32 %v2378_v9, %v1219_v6  ;;  %v1242_v22 = vmul.f32 %v2378_v9, %v1220_v7 }
 0x2a1   : > { %v1243_v23 = vmul.f32 %v2378_v9, %v1221_v8  ;;  %v1244_v24 = vmul.f32 %v2378_v9, %v1222_v10  ;;  %v1245_v25 = vmul.f32 %v2378_v9, %v1223_v11  ;;  %v1281_v26 = vmin.f32 %v2386_v12, 0.0 }
 0x2a2   : > { %v1282_v27 = vmin.f32 %v2388_v13, 0.0  ;;  %v1283_v28 = vmin.f32 %v2390_v14, 0.0  ;;  %v1284_v29 = vmin.f32 %v2392_v15, 0.0  ;;  %v1285_v30 = vmin.f32 %v2394_v18, 0.0  ;;  %v2447_v56 = vpop.permute.xlu1 %1254 }
 0x2a3   : > { %v1286_v31 = vmin.f32 %v2396_v19, 0.0  ;;  %v1293_v34 = vmul.f32 1.442695, %v1281_v26  ;;  %v2415_v36 = vadd.f32 %v1365_v3, %v1250_v63  ;;  %v2417_v37 = vadd.f32 %v1366_v4, %v1250_v63 }
 0x2a4   : > { %v1295_v35 = vmul.f32 1.442695, %v1282_v27  ;;  %v1297_v40 = vmul.f32 1.442695, %v1283_v28  ;;  %v1299_v41 = vmul.f32 1.442695, %v1284_v29  ;;  %v2425_v42 = vadd.f32 %v1367_v5, %v1250_v63 }
 0x2a5   : > { %v2427_v43 = vadd.f32 %v1368_v16, %v1250_v63  ;;  %1878 = vpow2.f32 %v1293_v34  ;;  %v1301_v44 = vmul.f32 1.442695, %v1285_v30  ;;  %v2429_v45 = vadd.f32 %v1369_v17, %v1250_v63  ;;  %v1364_v16 = vld [vmem:[%s2673_s7 + $0x58] sm:$0xff] }
 0x2a6   : > { %v2431_v46 = vadd.f32 %v1370_v20, %v1250_v63  ;;  %v1246_v47 = vmul.f32 %v2378_v9, %v1224_v32  ;;  %v2435_v48 = vmul.f32 %v1359_v33, %v2378_v9  ;;  %1880 = vpow2.f32 %v1295_v35 }
 0x2a7   : > { %v1303_v49 = vmul.f32 1.442695, %v1286_v31  ;;  %v2438_v50 = vmul.f32 %v1360_v38, %v2378_v9  ;;  %v2441_v51 = vmul.f32 %v1361_v39, %v2378_v9  ;;  %1882 = vpow2.f32 %v1297_v40 }
 0x2a8   : > { %v1401_v52 = vmin.f32 %v2415_v36, 0.0  ;;  %1884 = vpow2.f32 %v1299_v41  ;;  %v1402_v53 = vmin.f32 %v2417_v37, 0.0  ;;  %v1403_v54 = vmin.f32 %v2425_v42, 0.0 }
 0x2a9   : > { %v1404_v55 = vmin.f32 %v2427_v43, 0.0  ;;  %1886 = vpow2.f32 %v1301_v44  ;;  %v1405_v58 = vmin.f32 %v2429_v45, 0.0  ;;  %v1406_v59 = vmin.f32 %v2431_v46, 0.0 }
 0x2aa   : > { %v1413_v60 = vmul.f32 1.442695, %v1401_v52  ;;  %1888 = vpow2.f32 %v1303_v49  ;;  %v1415_v61 = vmul.f32 1.442695, %v1402_v53  ;;  %v1417_v62 = vmul.f32 1.442695, %v1403_v54 }
 0x2ab   : > { %v1419_v63 = vmul.f32 1.442695, %v1404_v55  ;;  %v1421_v1 = vmul.f32 1.442695, %v1405_v58  ;;  %v1423_v2 = vmul.f32 1.442695, %v1406_v59  ;;  %v2458_v3 = vadd.f32 %v2447_v56, %v1241_v21 }
 0x2ac   : > { %1890 = vpow2.f32 %v1413_v60  ;;  %v2461_v4 = vadd.f32 %v2447_v56, %v1242_v22  ;;  %v2464_v5 = vadd.f32 %v2447_v56, %v1243_v23  ;;  %v2467_v6 = vadd.f32 %v2447_v56, %v1244_v24 }
 0x2ad   : > { %1892 = vpow2.f32 %v1415_v61  ;;  %v1374_v7 = vmul.f32 %v1362_v57, %v2378_v9  ;;  %v2471_v8 = vadd.f32 %v2447_v56, %v1245_v25  ;;  %v2474_v10 = vadd.f32 %v2447_v56, %v1246_v47 }
 0x2ae   : > { %1894 = vpow2.f32 %v1417_v62  ;;  %v1375_v11 = vmul.f32 %v1363_v0, %v2378_v9  ;;  %vm1269_vm4 = vcmp.gt.f32.partialorder %v2386_v12, 0.0  ;;  %vm1270_vm5 = vcmp.gt.f32.partialorder %v2388_v13, 0.0 }
 0x2af   : > { %1896 = vpow2.f32 %v1419_v63  ;;  %vm1271_vm6 = vcmp.gt.f32.partialorder %v2390_v14, 0.0  ;;  %vm1272_vm7 = vcmp.gt.f32.partialorder %v2392_v15, 0.0  ;;  %v1287_v17 = vmin.f32 %v2458_v3, 0.0 }
 0x2b0   : > { %1898 = vpow2.f32 %v1421_v1  ;;  %vm1273_vm8 = vcmp.gt.f32.partialorder %v2394_v18, 0.0  ;;  %v1288_v20 = vmin.f32 %v2461_v4, 0.0  ;;  %v1289_v21 = vmin.f32 %v2464_v5, 0.0 }
 0x2b1   : > { %1900 = vpow2.f32 %v1423_v2  ;;  %v1290_v22 = vmin.f32 %v2467_v6, 0.0  ;;  %vm1274_vm9 = vcmp.gt.f32.partialorder %v2396_v19, 0.0  ;;  %v1291_v23 = vmin.f32 %v2471_v8, 0.0 }
 0x2b2   : > { %v1292_v24 = vmin.f32 %v2474_v10, 0.0  ;;  %v1305_v25 = vmul.f32 1.442695, %v1287_v17  ;;  %v1879_v26 = vpop.eup %1878  ;;  %v1376_v27 = vmul.f32 %v1364_v16, %v2378_v9  ;;  %vm1389_vm10 = vcmp.gt.f32.partialorder %v2415_v36, 0.0 }
 0x2b3   : > { %v1307_v28 = vmul.f32 1.442695, %v1288_v20  ;;  %v1309_v29 = vmul.f32 1.442695, %v1289_v21  ;;  %v1311_v30 = vmul.f32 1.442695, %v1290_v22  ;;  %v1881_v31 = vpop.eup %1880  ;;  %v2501_v41 = vadd.f32 %v2435_v48, %v2447_v56 }
 0x2b4   : > { %v1698_v32 = vadd.f32 -1.0, %v1879_v26  ;;  %vm1390_vm11 = vcmp.gt.f32.partialorder %v2417_v37, 0.0  ;;  %1902 = vpow2.f32 %v1305_v25  ;;  %v1313_v33 = vmul.f32 1.442695, %v1291_v23  ;;  %v1883_v34 = vpop.eup %1882 }
 0x2b5   : > { %v1699_v35 = vadd.f32 -1.0, %v1881_v31  ;;  %vm1391_vm12 = vcmp.gt.f32.partialorder %v2425_v42, 0.0  ;;  %1904 = vpow2.f32 %v1307_v28  ;;  %v1315_v38 = vmul.f32 1.442695, %v1292_v24  ;;  %v1885_v39 = vpop.eup %1884 }
 0x2b6   : > { %v1700_v40 = vadd.f32 -1.0, %v1883_v34  ;;  %v1329_v9 = vsel %vm1269_vm4, %v2386_v12, %v1698_v32  ;;  %1906 = vpow2.f32 %v1309_v29  ;;  %v1887_v44 = vpop.eup %1886  ;;  %v1701_v47 = vadd.f32 -1.0, %v1885_v39 }
 0x2b7   : > { %v1330_v49 = vsel %vm1270_vm5, %v2388_v13, %v1699_v35  ;;  %1341 = vst [vmem:[%s2672_s6] sm:$0xff] %v1329_v9  ;;  %1908 = vpow2.f32 %v1311_v30  ;;  %v2511_v52 = vadd.f32 %v2438_v50, %v2447_v56  ;;  %v1889_v12 = vpop.eup %1888  ;;  %v1702_v53 = vadd.f32 -1.0, %v1887_v44 }
 0x2b8   : > { %v1331_v48 = vsel %vm1271_vm6, %v2390_v14, %v1700_v40  ;;  %1342 = vst [vmem:[%s2672_s6 + $0x8] sm:$0xff] %v1330_v49  ;;  %1910 = vpow2.f32 %v1313_v33  ;;  %v2521_v13 = vadd.f32 %v2441_v51, %v2447_v56  ;;  %v1703_v55 = vadd.f32 -1.0, %v1889_v12 }
 0x2b9   : > { %v1891_v54 = vpop.eup %1890  ;;  %v1332_v50 = vsel %vm1272_vm7, %v2392_v15, %v1701_v47  ;;  %1343 = vst [vmem:[%s2672_s6 + $0x10] sm:$0xff] %v1331_v48  ;;  %1912 = vpow2.f32 %v1315_v38  ;;  %v2530_v14 = vadd.f32 %v1374_v7, %v2447_v56  ;;  %v1333_v51 = vsel %vm1273_vm8, %v2394_v18, %v1702_v53 }
 0x2ba   : > { %v1893_v57 = vpop.eup %1892  ;;  %1344 = vst [vmem:[%s2672_s6 + $0x18] sm:$0xff] %v1332_v50  ;;  %v1710_v58 = vadd.f32 -1.0, %v1891_v54  ;;  %v2539_v15 = vadd.f32 %v1375_v11, %v2447_v56  ;;  %v2542_v59 = vadd.f32 %v1376_v27, %v2447_v56  ;;  %v1334_v61 = vsel %vm1274_vm9, %v2396_v19, %v1703_v55  ;;  %1345 = vst [vmem:[%s2672_s6 + $0x20] sm:$0xff] %v1333_v51 }
 0x2bb   : > { %v1895_v60 = vpop.eup %1894  ;;  %vm1392_vm13 = vcmp.gt.f32.partialorder %v2427_v43, 0.0  ;;  %vm1393_vm14 = vcmp.gt.f32.partialorder %v2429_v45, 0.0  ;;  %v1711_v18 = vadd.f32 -1.0, %v1893_v57  ;;  %1346 = vst [vmem:[%s2672_s6 + $0x28] sm:$0xff] %v1334_v61  ;;  %v1407_v19 = vmin.f32 %v2501_v41, 0.0 }
 0x2bc   : > { %v1897_v62 = vpop.eup %1896  ;;  %v1712_v56 = vadd.f32 -1.0, %v1895_v60  ;;  %v1449_v63 = vsel %vm1389_vm10, %v2415_v36, %v1710_v58  ;;  %v1408_v0 = vmin.f32 %v2511_v52, 0.0  ;;  %v1409_v11 = vmin.f32 %v2521_v13, 0.0 }
 0x2bd   : > { %v1899_v1 = vpop.eup %1898  ;;  %v1713_v2 = vadd.f32 -1.0, %v1897_v62  ;;  %v1450_v7 = vsel %vm1390_vm11, %v2417_v37, %v1711_v18  ;;  %1461 = vst [vmem:[%s2673_s7] sm:$0xff] %v1449_v63  ;;  %v1410_v16 = vmin.f32 %v2530_v14, 0.0  ;;  %v1411_v37 = vmin.f32 %v2539_v15, 0.0 }
 0x2be   : > { %v1901_v17 = vpop.eup %1900  ;;  %v1714_v36 = vadd.f32 -1.0, %v1899_v1  ;;  %v1451_v20 = vsel %vm1391_vm12, %v2425_v42, %v1712_v56  ;;  %1462 = vst [vmem:[%s2673_s7 + $0x8] sm:$0xff] %v1450_v7  ;;  %v1412_v21 = vmin.f32 %v2542_v59, 0.0  ;;  %v1425_v24 = vmul.f32 1.442695, %v1407_v19 }
 0x2bf   : > { %v1715_v22 = vadd.f32 -1.0, %v1901_v17  ;;  %v1452_v23 = vsel %vm1392_vm13, %v2427_v43, %v1713_v2  ;;  %1463 = vst [vmem:[%s2673_s7 + $0x10] sm:$0xff] %v1451_v20  ;;  %v1427_v25 = vmul.f32 1.442695, %v1408_v0  ;;  %vm1394_vm15 = vcmp.gt.f32.partialorder %v2431_v46, 0.0 }
 0x2c0   : > { %v1453_v42 = vsel %vm1393_vm14, %v2429_v45, %v1714_v36  ;;  %1464 = vst [vmem:[%s2673_s7 + $0x18] sm:$0xff] %v1452_v23  ;;  %v1429_v26 = vmul.f32 1.442695, %v1409_v11  ;;  %v1431_v27 = vmul.f32 1.442695, %v1410_v16  ;;  %1914 = vpow2.f32 %v1425_v24 }
 0x2c1   : > { %v1903_v28 = vpop.eup %1902  ;;  %v1454_v43 = vsel %vm1394_vm15, %v2431_v46, %v1715_v22  ;;  %1465 = vst [vmem:[%s2673_s7 + $0x20] sm:$0xff] %v1453_v42  ;;  %v1433_v29 = vmul.f32 1.442695, %v1411_v37  ;;  %1916 = vpow2.f32 %v1427_v25  ;;  %v1435_v31 = vmul.f32 1.442695, %v1412_v21 }
 0x2c2   : > { %v1905_v30 = vpop.eup %1904  ;;  %1466 = vst [vmem:[%s2673_s7 + $0x28] sm:$0xff] %v1454_v43  ;;  %v1704_v45 = vadd.f32 -1.0, %v1903_v28  ;;  %vm1275_vm0 = vcmp.gt.f32.partialorder %v2458_v3, 0.0  ;;  %1918 = vpow2.f32 %v1429_v26  ;;  %vm1276_vm1 = vcmp.gt.f32.partialorder %v2461_v4, 0.0 }
 0x2c3   : > { %v1907_v32 = vpop.eup %1906  ;;  %v1705_v33 = vadd.f32 -1.0, %v1905_v30  ;;  %1920 = vpow2.f32 %v1431_v27  ;;  %vm1277_vm2 = vcmp.gt.f32.partialorder %v2464_v5, 0.0  ;;  %vm1278_vm3 = vcmp.gt.f32.partialorder %v2467_v6, 0.0 }
 0x2c4   : > { %v1909_v46 = vpop.eup %1908  ;;  %v1706_v34 = vadd.f32 -1.0, %v1907_v32  ;;  %v1335_v35 = vsel %vm1275_vm0, %v2458_v3, %v1704_v45  ;;  %1922 = vpow2.f32 %v1433_v29  ;;  %vm1279_vm4 = vcmp.gt.f32.partialorder %v2471_v8, 0.0 }
 0x2c5   : > { %v1911_v38 = vpop.eup %1910  ;;  %v1707_v39 = vadd.f32 -1.0, %v1909_v46  ;;  %v1336_v40 = vsel %vm1276_vm1, %v2461_v4, %v1705_v33  ;;  %1347 = vst [vmem:[%s2672_s6 + $0x30] sm:$0xff] %v1335_v35  ;;  %1924 = vpow2.f32 %v1435_v31  ;;  %vm1280_vm5 = vcmp.gt.f32.partialorder %v2474_v10, 0.0 }
 0x2c6   : > { %v1913_v9 = vpop.eup %1912  ;;  %v1708_v44 = vadd.f32 -1.0, %v1911_v38  ;;  %v1337_v47 = vsel %vm1277_vm2, %v2464_v5, %v1706_v34  ;;  %1348 = vst [vmem:[%s2672_s6 + $0x38] sm:$0xff] %v1336_v40  ;;  %vm1395_vm6 = vcmp.gt.f32.partialorder %v2501_v41, 0.0  ;;  %vm1396_vm7 = vcmp.gt.f32.partialorder %v2511_v52, 0.0 }
 0x2c7   : > { %v1709_v3 = vadd.f32 -1.0, %v1913_v9  ;;  %v1338_v4 = vsel %vm1278_vm3, %v2467_v6, %v1707_v39  ;;  %1349 = vst [vmem:[%s2672_s6 + $0x40] sm:$0xff] %v1337_v47  ;;  %vm1397_vm8 = vcmp.gt.f32.partialorder %v2521_v13, 0.0  ;;  %vm1398_vm9 = vcmp.gt.f32.partialorder %v2530_v14, 0.0 }
 0x2c8   : > { %v1339_v49 = vsel %vm1279_vm4, %v2471_v8, %v1708_v44  ;;  %1350 = vst [vmem:[%s2672_s6 + $0x48] sm:$0xff] %v1338_v4  ;;  %vm1399_vm10 = vcmp.gt.f32.partialorder %v2539_v15, 0.0  ;;  %vm1400_vm11 = vcmp.gt.f32.partialorder %v2542_v59, 0.0 }
 0x2c9   : > { %v1340_v5 = vsel %vm1280_vm5, %v2474_v10, %v1709_v3  ;;  %1351 = vst [vmem:[%s2672_s6 + $0x50] sm:$0xff] %v1339_v49 }
 0x2ca   : > { %1352 = vst [vmem:[%s2672_s6 + $0x58] sm:$0xff] %v1340_v5 }
 0x2cd   : > { %v1915_v6 = vpop.eup %1914 }
 0x2ce   : > { %v1917_v12 = vpop.eup %1916  ;;  %v1716_v53 = vadd.f32 -1.0, %v1915_v6 }
 0x2cf   : > { %v1919_v48 = vpop.eup %1918  ;;  %v1717_v8 = vadd.f32 -1.0, %v1917_v12 }
 0x2d0   : > { %v1921_v54 = vpop.eup %1920  ;;  %v1718_v55 = vadd.f32 -1.0, %v1919_v48  ;;  %v1455_v10 = vsel %vm1395_vm6, %v2501_v41, %v1716_v53 }
 0x2d1   : > { %v1923_v50 = vpop.eup %1922  ;;  %v1719_v57 = vadd.f32 -1.0, %v1921_v54  ;;  %v1456_v51 = vsel %vm1396_vm7, %v2511_v52, %v1717_v8  ;;  %1467 = vst [vmem:[%s2673_s7 + $0x30] sm:$0xff] %v1455_v10 }
 0x2d2   : > { %v1925_v58 = vpop.eup %1924  ;;  %v1720_v60 = vadd.f32 -1.0, %v1923_v50  ;;  %v1457_v61 = vsel %vm1397_vm8, %v2521_v13, %v1718_v55  ;;  %1468 = vst [vmem:[%s2673_s7 + $0x38] sm:$0xff] %v1456_v51 }
 0x2d3   : > { %v1721_v41 = vadd.f32 -1.0, %v1925_v58  ;;  %v1458_v18 = vsel %vm1398_vm9, %v2530_v14, %v1719_v57  ;;  %1469 = vst [vmem:[%s2673_s7 + $0x40] sm:$0xff] %v1457_v61 }
 0x2d4   : > { %v1459_v52 = vsel %vm1399_vm10, %v2539_v15, %v1720_v60  ;;  %1470 = vst [vmem:[%s2673_s7 + $0x48] sm:$0xff] %v1458_v18 }
 0x2d5   : > { %v1460_v13 = vsel %vm1400_vm11, %v2542_v59, %v1721_v41  ;;  %1471 = vst [vmem:[%s2673_s7 + $0x50] sm:$0xff] %v1459_v52 }
 0x2d6   : > { %1472 = vst [vmem:[%s2673_s7 + $0x58] sm:$0xff] %v1460_v13 }
 0x2d7 PF: > { %p15_p10 = scmp.ge.s32.totalorder %s2014_s28, 4   ;;  %s2675_s24 = smov %s1944_s25 }
 0x2d8   : > { %s2676_s25 = smov %s2023_s8  ;;  %s2677_s26 = smov %s2014_s28 }
 0x2d9   :  { %17 = sbr.rel (!%p15_p10) target bundleno = 2 (0x2), region = 165 }

</bundles_post_ra>
